<compile_context>
chip_gen: v5e
topology: v5e:2x2
jax: 0.10.0
libtpu: 0.0.40
codegen_flags: <defaults>
</compile_context>

<pallas_src>
import numpy as np
import jax
import jax.numpy as jnp
from jax.experimental import pallas as pl
from jax.experimental.pallas import tpu as pltpu


def _round_up(v, m):
    return -(-v // m) * m


# ---------------------------------------------------------------------------
# Host-side constant matrices.
# ---------------------------------------------------------------------------
def _fourier_basis(H, W):
    """Dense linear maps for rfft2 / irfft2 (norm='ortho') on an (H, W) image."""
    Wh = W // 2 + 1
    HW, HWh = H * W, H * Wh
    eye_sp = np.eye(HW, dtype=np.float64).reshape(HW, H, W)
    fwd = np.fft.rfft2(eye_sp, norm="ortho").reshape(HW, HWh)
    GR = np.real(fwd).astype(np.float32)
    GI = np.imag(fwd).astype(np.float32)
    eye_fr = np.eye(HWh, dtype=np.complex128).reshape(HWh, H, Wh)
    HRm = np.fft.irfft2(eye_fr, s=(H, W), norm="ortho").reshape(HWh, HW).astype(np.float32)
    HIm = np.fft.irfft2(1j * eye_fr, s=(H, W), norm="ortho").reshape(HWh, HW).astype(np.float32)
    return GR, GI, HRm, HIm


def _lfu_rearrange(H, W):
    """Selection matrices for the LFU 2x2 quadrant split and the tile-back map."""
    H2, W2 = H // 2, W // 2
    HW, HW2 = H * W, H2 * W2
    sel = np.zeros((4, HW, HW2), np.float32)   # quadrant order: TL, BL, TR, BR
    tile = np.zeros((HW2, HW), np.float32)     # repeat(1,1,2,2) as a matmul
    offs = [(0, 0), (H2, 0), (0, W2), (H2, W2)]
    for q, (dh, dw) in enumerate(offs):
        for h2 in range(H2):
            for w2 in range(W2):
                sel[q, (h2 + dh) * W + (w2 + dw), h2 * W2 + w2] = 1.0
                tile[h2 * W2 + w2, (h2 + dh) * W + (w2 + dw)] = 1.0
    return sel, tile


# ---------------------------------------------------------------------------
# Pallas kernel (NB images per grid step, stacked along sublanes).
# ---------------------------------------------------------------------------
def spectral_transform_kernel(x_ref, w1_ref, b1_ref,
                              gcat_ref, wfu_ref, bfu_ref, hcat_ref,
                              sg_ref, wlfu_ref, blfu_ref, h2cat_ref,
                              w2_ref, out_ref):
    f32, bf16 = jnp.float32, jnp.bfloat16
    NB = x_ref.shape[0]
    Ch = w1_ref.shape[0]
    c4 = Ch // 4
    P = hcat_ref.shape[0] // 2      # padded global spectral dim
    P2 = h2cat_ref.shape[0] // 2    # padded LFU spectral dim

    # hoist weight / bias loads out of the per-image loops
    w1 = w1_ref[...]
    wfu = wfu_ref[...]
    wlfu = wlfu_ref[...]
    w2 = w2_ref[...]
    b1 = b1_ref[...]
    bfu = bfu_ref[...]
    blfu = blfu_ref[...]

    # ---- conv1 (1x1, BN scale folded) + bias + ReLU, per image -------------
    # stack results along sublanes -> (NB*Ch, HW) so the DFT matmuls get M=NB*Ch
    x1_blocks = []
    for n in range(NB):
        v = jnp.dot(w1, x_ref[n].astype(bf16), preferred_element_type=f32)
        x1_blocks.append(jnp.maximum(v + b1, 0.0))
    x1 = jnp.concatenate(x1_blocks, axis=0)                           # (NB*Ch, HW) f32
    x1b = x1.astype(bf16)

    # ---- global FourierUnit -------------------------------------------------
    # fused rfft2: single dot, columns = [re | im] (each zero-padded to P lanes)
    z = jnp.dot(x1b, gcat_ref[...], preferred_element_type=f32)       # (NB*Ch, 2P)
    t_blocks = []
    for n in range(NB):                                               # tiny per-image conv
        zn = z[n * Ch:(n + 1) * Ch]                                   # (Ch, 2P)
        zs = jnp.concatenate([zn[:, :P], zn[:, P:]], axis=0).astype(bf16)   # (2Ch, P)
        tn = jnp.dot(wfu, zs, preferred_element_type=f32)             # (2Ch, P)
        tn = jnp.maximum(tn + bfu, 0.0)
        t_blocks.append(jnp.concatenate([tn[:Ch], tn[Ch:]], axis=1))  # (Ch, 2P) = [re|im]
    t_wide = jnp.concatenate(t_blocks, axis=0).astype(bf16)           # (NB*Ch, 2P)
    # fused irfft2: rows of hcat = [HR ; HI], padded rows are zero
    fu = jnp.dot(t_wide, hcat_ref[...], preferred_element_type=f32)   # (NB*Ch, HW)

    # ---- local FourierUnit (LFU) -------------------------------------------
    # quadrant selection folded host-side into the forward DFT (sg_ref)
    xq = jnp.concatenate([x1[n * Ch:n * Ch + c4] for n in range(NB)],
                         axis=0).astype(bf16)                         # (NB*c4, HW)
    z2 = jnp.dot(xq, sg_ref[...], preferred_element_type=f32)         # (NB*c4, 8*P2)
    t2_blocks = []
    for n in range(NB):
        zn = z2[n * c4:(n + 1) * c4]                                  # (c4, 8*P2)
        res = [zn[:, (2 * q) * P2:(2 * q + 1) * P2] for q in range(4)]
        ims = [zn[:, (2 * q + 1) * P2:(2 * q + 2) * P2] for q in range(4)]
        zs = jnp.concatenate(res + ims, axis=0).astype(bf16)          # (2Ch, P2)
        tn = jnp.dot(wlfu, zs, preferred_element_type=f32)            # (2Ch, P2)
        tn = jnp.maximum(tn + blfu, 0.0)
        t2_blocks.append(jnp.concatenate([tn[:Ch], tn[Ch:]], axis=1))  # (Ch, 2*P2)
    t2_wide = jnp.concatenate(t2_blocks, axis=0).astype(bf16)         # (NB*Ch, 2*P2)
    # fused irfft2 + 2x2 spatial tiling (repeat) -> directly (NB*Ch, HW)
    xs = jnp.dot(t2_wide, h2cat_ref[...], preferred_element_type=f32)

    # ---- conv2 (1x1) on (x1 + fu + xs), per image ---------------------------
    y = (x1 + fu + xs).astype(bf16)                                   # (NB*Ch, HW)
    for n in range(NB):
        out_ref[n] = jnp.dot(w2, y[n * Ch:(n + 1) * Ch],
                             preferred_element_type=f32).astype(out_ref.dtype)


# ---------------------------------------------------------------------------
# Wrapper.
# ---------------------------------------------------------------------------
def spectral_transform(x, params, nb=8):
    """x: (N, Cin, H, W) NCHW, like the PyTorch module.  Returns (N, Cout, H, W)."""
    N, cin, H, W = x.shape
    w1, w2 = params["w1"], params["w2"]
    ch, cout = w1.shape[0], w2.shape[0]
    assert ch % 4 == 0 and H % 2 == 0 and W % 2 == 0
    HW = H * W
    H2, W2 = H // 2, W // 2
    HWh = H * (W // 2 + 1)
    HW2 = H2 * W2
    HWh2 = H2 * (W2 // 2 + 1)
    P = _round_up(HWh, 128)     # lane-padded global spectral dim
    P2 = _round_up(HWh2, 128)   # lane-padded LFU spectral dim

    # ---- host-side constants (bf16 for the MXU; padded columns/rows are zero)
    GR, GI, HR, HI = _fourier_basis(H, W)
    Gcat = np.zeros((HW, 2 * P), np.float32)
    Gcat[:, :HWh], Gcat[:, P:P + HWh] = GR, GI
    Hcat = np.zeros((2 * P, HW), np.float32)
    Hcat[:HWh], Hcat[P:P + HWh] = HR, HI

    GR2, GI2, HR2, HI2 = _fourier_basis(H2, W2)
    sel, tile = _lfu_rearrange(H, W)
    G2cat = np.zeros((HW2, 2 * P2), np.float32)
    G2cat[:, :HWh2], G2cat[:, P2:P2 + HWh2] = GR2, GI2
    SG = np.concatenate([sel[q] @ G2cat for q in range(4)], axis=1)   # (HW, 8*P2)
    H2cat = np.zeros((2 * P2, HW), np.float32)                        # inverse + 2x2 tiling
    H2cat[:HWh2] = HR2 @ tile
    H2cat[P2:P2 + HWh2] = HI2 @ tile

    # ---- fold BN scales into conv weights; reorder FU convs to [re ; im] ----
    perm = jnp.concatenate([jnp.arange(0, 2 * ch, 2), jnp.arange(1, 2 * ch, 2)])

    def fold_fu(wc, scale, bias):
        wp = (wc * scale[:, None])[perm][:, perm]
        return wp.astype(jnp.bfloat16), bias[perm][:, None].astype(jnp.float32)

    wfu_b, bfu_b = fold_fu(params["wfu"], params["sfu"], params["bfu"])
    wlfu_b, blfu_b = fold_fu(params["wlfu"], params["slfu"], params["blfu"])
    w1_b = (w1 * params["s1"][:, None]).astype(jnp.bfloat16)
    b1_b = params["b1"][:, None].astype(jnp.float32)
    w2_b = w2.astype(jnp.bfloat16)

    gcat_b = jnp.asarray(Gcat, jnp.bfloat16)
    hcat_b = jnp.asarray(Hcat, jnp.bfloat16)
    sg_b = jnp.asarray(SG, jnp.bfloat16)
    h2cat_b = jnp.asarray(H2cat, jnp.bfloat16)

    # ---- batch blocking: NB images per grid step ----
    NB = max(1, min(nb, N))
    N_pad = _round_up(N, NB)
    xf = x.reshape(N, cin, HW)
    if N_pad != N:
        xf = jnp.concatenate([xf, jnp.zeros((N_pad - N, cin, HW), x.dtype)], axis=0)

    def rep(*shape):  # weight / constant block, resident in VMEM across the grid
        return pl.BlockSpec(shape, lambda n: (0,) * len(shape))

    grid_spec = pltpu.PrefetchScalarGridSpec(
        num_scalar_prefetch=0,
        grid=(N_pad // NB,),
        in_specs=[
            pl.BlockSpec((NB, cin, HW), lambda n: (n, 0, 0)),
            rep(ch, cin), rep(ch, 1),
            rep(HW, 2 * P), rep(2 * ch, 2 * ch), rep(2 * ch, 1), rep(2 * P, HW),
            rep(HW, 8 * P2), rep(2 * ch, 2 * ch), rep(2 * ch, 1), rep(2 * P2, HW),
            rep(cout, ch),
        ],
        out_specs=pl.BlockSpec((NB, cout, HW), lambda n: (n, 0, 0)),
    )

    flops = N_pad * (
        2 * ch * cin * HW                    # conv1
        + 2 * ch * HW * (2 * P)              # global forward DFT
        + 2 * (2 * ch) * (2 * ch) * P        # global FU conv
        + 2 * ch * (2 * P) * HW              # global inverse DFT
        + 2 * (ch // 4) * HW * (8 * P2)      # LFU forward DFT (sel folded)
        + 2 * (2 * ch) * (2 * ch) * P2       # LFU conv
        + 2 * ch * (2 * P2) * HW             # LFU inverse DFT + tiling
        + 2 * cout * ch * HW)                # conv2
    const_bytes = 2 * (gcat_b.size + hcat_b.size + sg_b.size + h2cat_b.size
                       + wfu_b.size + wlfu_b.size + w1_b.size + w2_b.size)
    bytes_accessed = 4 * (N_pad * cin * HW + N_pad * cout * HW) + const_bytes

    out = pl.pallas_call(
        spectral_transform_kernel,
        out_shape=jax.ShapeDtypeStruct((N_pad, cout, HW), x.dtype),
        grid_spec=grid_spec,
        compiler_params=pltpu.CompilerParams(
            dimension_semantics=("parallel",),
            # actual usage ~7-8 MiB (bf16 constants + NB-blocked activations);
            # 24 MiB leaves ample headroom while staying inside v7x's scoped budget.
            vmem_limit_bytes=24 * 1024 * 1024),
        cost_estimate=pl.CostEstimate(flops=flops, transcendentals=0,
                                      bytes_accessed=bytes_accessed),
    )(xf, w1_b, b1_b, gcat_b, wfu_b, bfu_b, hcat_b,
      sg_b, wlfu_b, blfu_b, h2cat_b, w2_b)
    return out[:N].reshape(N, cout, H, W)


# ---------------------------------------------------------------------------
# Synthetic deterministic parameters (BN folded to inference-mode affine).
# ---------------------------------------------------------------------------
def make_params(key, in_channels, out_channels):
    ch = out_channels // 2
    ks = jax.random.split(key, 7)

    def bn_affine(k, c):
        k1, k2, k3, k4 = jax.random.split(k, 4)
        gamma = 1.0 + 0.1 * jax.random.normal(k1, (c,), jnp.float32)
        beta = 0.1 * jax.random.normal(k2, (c,), jnp.float32)
        mean = 0.1 * jax.random.normal(k3, (c,), jnp.float32)
        var = 1.0 + 0.1 * jnp.abs(jax.random.normal(k4, (c,), jnp.float32))
        scale = gamma * jax.lax.rsqrt(var + 1e-5)
        return scale, beta - mean * scale

    w1 = 0.1 * jax.random.normal(ks[0], (ch, in_channels), jnp.float32)
    s1, b1 = bn_affine(ks[1], ch)
    wfu = 0.1 * jax.random.normal(ks[2], (2 * ch, 2 * ch), jnp.float32)
    sfu, bfu = bn_affine(ks[3], 2 * ch)
    wlfu = 0.1 * jax.random.normal(ks[4], (2 * ch, 2 * ch), jnp.float32)
    slfu, blfu = bn_affine(ks[5], 2 * ch)
    w2 = 0.1 * jax.random.normal(ks[6], (out_channels, ch), jnp.float32)
    return dict(w1=w1, s1=s1, b1=b1, wfu=wfu, sfu=sfu, bfu=bfu,
                wlfu=wlfu, slfu=slfu, blfu=blfu, w2=w2)


# ---------------------------------------------------------------------------
# Pure-JAX reference of the PyTorch forward (stride=1, groups=1, enable_lfu=True).
# ---------------------------------------------------------------------------
def _fourier_unit_ref(x, wconv, scale, bias):
    N, C, H, W = x.shape
    f = jnp.fft.rfft2(x, norm="ortho")
    f = jnp.stack([jnp.real(f), jnp.imag(f)], axis=2)
    f = f.reshape(N, 2 * C, H, f.shape[-1])
    f = jnp.einsum("oc,nchw->nohw", wconv, f, precision="highest")
    f = jnp.maximum(f * scale[None, :, None, None] + bias[None, :, None, None], 0.0)
    f = f.reshape(N, C, 2, H, f.shape[-1])
    z = f[:, :, 0] + 1j * f[:, :, 1]
    return jnp.fft.irfft2(z, s=(H, W), norm="ortho")


def spectral_transform_ref(x, p):
    x1 = jnp.einsum("oc,nchw->nohw", p["w1"], x, precision="highest")
    x1 = jnp.maximum(x1 * p["s1"][None, :, None, None] + p["b1"][None, :, None, None], 0.0)
    fu = _fourier_unit_ref(x1, p["wfu"], p["sfu"], p["bfu"])
    c = x1.shape[1]
    xs = jnp.concatenate(jnp.split(x1[:, :c // 4], 2, axis=-2), axis=1)
    xs = jnp.concatenate(jnp.split(xs, 2, axis=-1), axis=1)
    xs = _fourier_unit_ref(xs, p["wlfu"], p["slfu"], p["blfu"])
    xs = jnp.tile(xs, (1, 1, 2, 2))
    return jnp.einsum("oc,nchw->nohw", p["w2"], x1 + fu + xs, precision="highest")


if __name__ == "__main__":
    # Module defaults: stride=1, groups=1, enable_lfu=True, fft_norm='ortho'.
    in_channels, out_channels = 32, 64
    N, H, W = 16, 16, 16   # N=16 with NB=8 -> grid of 2 steps (keeps both v7x TCs busy)

    key = jax.random.PRNGKey(0)
    kx, kp = jax.random.split(key)
    x = jax.random.normal(kx, (N, in_channels, H, W), jnp.float32)
    params = make_params(kp, in_channels, out_channels)

    out = jax.block_until_ready(spectral_transform(x, params))
    ref = spectral_transform_ref(x, params)

    assert out.shape == (N, out_channels, H, W)
    err = float(jnp.max(jnp.abs(out - ref)))
    # bf16 MXU operands with f32 accumulation -> a slightly looser tolerance than pure f32
    assert jnp.allclose(out, ref, atol=3e-2, rtol=3e-2), err

    print("KERNEL_OK")
</pallas_src>

<mosaic_0001>
module attributes {stable_mosaic.version = 11 : i64} {
  func.func @spectral_transform_kernel(%arg0: i32, %arg1: memref<8x32x256xf32, #tpu.memory_space<vmem>>, %arg2: memref<32x32xbf16, #tpu.memory_space<vmem>>, %arg3: memref<32x1xf32, #tpu.memory_space<vmem>>, %arg4: memref<256x512xbf16, #tpu.memory_space<vmem>>, %arg5: memref<64x64xbf16, #tpu.memory_space<vmem>>, %arg6: memref<64x1xf32, #tpu.memory_space<vmem>>, %arg7: memref<512x256xbf16, #tpu.memory_space<vmem>>, %arg8: memref<256x1024xbf16, #tpu.memory_space<vmem>>, %arg9: memref<64x64xbf16, #tpu.memory_space<vmem>>, %arg10: memref<64x1xf32, #tpu.memory_space<vmem>>, %arg11: memref<256x256xbf16, #tpu.memory_space<vmem>>, %arg12: memref<64x32xbf16, #tpu.memory_space<vmem>>, %arg13: memref<8x64x256xf32, #tpu.memory_space<vmem>>) attributes {dimension_semantics = [#tpu.dimension_semantics<parallel>], iteration_bounds = array<i64: 2>, scalar_prefetch = 0 : i64, scratch_operands = 0 : i64, tpu.core_type = #tpu.core_type<tc>, window_params = [{transform_indices = @transform_0, window_bounds = array<i64: 8, 32, 256>}, {pipeline_mode = #tpu.pipeline_mode<synchronous>, transform_indices = @transform_1, window_bounds = array<i64: 32, 32>}, {pipeline_mode = #tpu.pipeline_mode<synchronous>, transform_indices = @transform_2, window_bounds = array<i64: 32, 1>}, {pipeline_mode = #tpu.pipeline_mode<synchronous>, transform_indices = @transform_3, window_bounds = array<i64: 256, 512>}, {pipeline_mode = #tpu.pipeline_mode<synchronous>, transform_indices = @transform_4, window_bounds = array<i64: 64, 64>}, {pipeline_mode = #tpu.pipeline_mode<synchronous>, transform_indices = @transform_5, window_bounds = array<i64: 64, 1>}, {pipeline_mode = #tpu.pipeline_mode<synchronous>, transform_indices = @transform_6, window_bounds = array<i64: 512, 256>}, {pipeline_mode = #tpu.pipeline_mode<synchronous>, transform_indices = @transform_7, window_bounds = array<i64: 256, 1024>}, {pipeline_mode = #tpu.pipeline_mode<synchronous>, transform_indices = @transform_8, window_bounds = array<i64: 64, 64>}, {pipeline_mode = #tpu.pipeline_mode<synchronous>, transform_indices = @transform_9, window_bounds = array<i64: 64, 1>}, {pipeline_mode = #tpu.pipeline_mode<synchronous>, transform_indices = @transform_10, window_bounds = array<i64: 256, 256>}, {pipeline_mode = #tpu.pipeline_mode<synchronous>, transform_indices = @transform_11, window_bounds = array<i64: 64, 32>}, {transform_indices = @transform_12, window_bounds = array<i64: 8, 64, 256>}]} {
    %c0 = arith.constant 0 : index
    %c0_0 = arith.constant 0 : index
    %0 = vector.load %arg2[%c0, %c0_0] : memref<32x32xbf16, #tpu.memory_space<vmem>>, vector<32x32xbf16>
    %c0_1 = arith.constant 0 : index
    %c0_2 = arith.constant 0 : index
    %1 = vector.load %arg5[%c0_1, %c0_2] : memref<64x64xbf16, #tpu.memory_space<vmem>>, vector<64x64xbf16>
    %c0_3 = arith.constant 0 : index
    %c0_4 = arith.constant 0 : index
    %2 = vector.load %arg9[%c0_3, %c0_4] : memref<64x64xbf16, #tpu.memory_space<vmem>>, vector<64x64xbf16>
    %c0_5 = arith.constant 0 : index
    %c0_6 = arith.constant 0 : index
    %3 = vector.load %arg12[%c0_5, %c0_6] : memref<64x32xbf16, #tpu.memory_space<vmem>>, vector<64x32xbf16>
    %c0_7 = arith.constant 0 : index
    %c0_8 = arith.constant 0 : index
    %4 = vector.load %arg3[%c0_7, %c0_8] : memref<32x1xf32, #tpu.memory_space<vmem>>, vector<32x1xf32>
    %c0_9 = arith.constant 0 : index
    %c0_10 = arith.constant 0 : index
    %5 = vector.load %arg6[%c0_9, %c0_10] : memref<64x1xf32, #tpu.memory_space<vmem>>, vector<64x1xf32>
    %c0_11 = arith.constant 0 : index
    %c0_12 = arith.constant 0 : index
    %6 = vector.load %arg10[%c0_11, %c0_12] : memref<64x1xf32, #tpu.memory_space<vmem>>, vector<64x1xf32>
    %c0_13 = arith.constant 0 : index
    %c0_14 = arith.constant 0 : index
    %c0_15 = arith.constant 0 : index
    %7 = vector.load %arg1[%c0_13, %c0_14, %c0_15] : memref<8x32x256xf32, #tpu.memory_space<vmem>>, vector<1x32x256xf32>
    %8 = vector.shape_cast %7 : vector<1x32x256xf32> to vector<32x256xf32>
    %9 = arith.truncf %8 : vector<32x256xf32> to vector<32x256xbf16>
    %cst = arith.constant dense<0.000000e+00> : vector<32x256xf32>
    %10 = tpu.matmul %0, %9, %cst {dimension_numbers = #tpu.dot_dimension_numbers<[1], [0], [0], [1], [0, 0, 1, 1], [], []>} : vector<32x32xbf16>, vector<32x256xbf16>, vector<32x256xf32> -> vector<32x256xf32>
    %11 = vector.broadcast %4 : vector<32x1xf32> to vector<32x256xf32>
    %12 = arith.addf %10, %11 : vector<32x256xf32>
    %cst_16 = arith.constant 0.000000e+00 : f32
    %13 = vector.broadcast %cst_16 : f32 to vector<32x256xf32>
    %14 = arith.maximumf %12, %13 : vector<32x256xf32>
    %c1 = arith.constant 1 : index
    %c0_17 = arith.constant 0 : index
    %c0_18 = arith.constant 0 : index
    %15 = vector.load %arg1[%c1, %c0_17, %c0_18] : memref<8x32x256xf32, #tpu.memory_space<vmem>>, vector<1x32x256xf32>
    %16 = vector.shape_cast %15 : vector<1x32x256xf32> to vector<32x256xf32>
    %17 = arith.truncf %16 : vector<32x256xf32> to vector<32x256xbf16>
    %cst_19 = arith.constant dense<0.000000e+00> : vector<32x256xf32>
    %18 = tpu.matmul %0, %17, %cst_19 {dimension_numbers = #tpu.dot_dimension_numbers<[1], [0], [0], [1], [0, 0, 1, 1], [], []>} : vector<32x32xbf16>, vector<32x256xbf16>, vector<32x256xf32> -> vector<32x256xf32>
    %19 = vector.broadcast %4 : vector<32x1xf32> to vector<32x256xf32>
    %20 = arith.addf %18, %19 : vector<32x256xf32>
    %cst_20 = arith.constant 0.000000e+00 : f32
    %21 = vector.broadcast %cst_20 : f32 to vector<32x256xf32>
    %22 = arith.maximumf %20, %21 : vector<32x256xf32>
    %c2 = arith.constant 2 : index
    %c0_21 = arith.constant 0 : index
    %c0_22 = arith.constant 0 : index
    %23 = vector.load %arg1[%c2, %c0_21, %c0_22] : memref<8x32x256xf32, #tpu.memory_space<vmem>>, vector<1x32x256xf32>
    %24 = vector.shape_cast %23 : vector<1x32x256xf32> to vector<32x256xf32>
    %25 = arith.truncf %24 : vector<32x256xf32> to vector<32x256xbf16>
    %cst_23 = arith.constant dense<0.000000e+00> : vector<32x256xf32>
    %26 = tpu.matmul %0, %25, %cst_23 {dimension_numbers = #tpu.dot_dimension_numbers<[1], [0], [0], [1], [0, 0, 1, 1], [], []>} : vector<32x32xbf16>, vector<32x256xbf16>, vector<32x256xf32> -> vector<32x256xf32>
    %27 = vector.broadcast %4 : vector<32x1xf32> to vector<32x256xf32>
    %28 = arith.addf %26, %27 : vector<32x256xf32>
    %cst_24 = arith.constant 0.000000e+00 : f32
    %29 = vector.broadcast %cst_24 : f32 to vector<32x256xf32>
    %30 = arith.maximumf %28, %29 : vector<32x256xf32>
    %c3 = arith.constant 3 : index
    %c0_25 = arith.constant 0 : index
    %c0_26 = arith.constant 0 : index
    %31 = vector.load %arg1[%c3, %c0_25, %c0_26] : memref<8x32x256xf32, #tpu.memory_space<vmem>>, vector<1x32x256xf32>
    %32 = vector.shape_cast %31 : vector<1x32x256xf32> to vector<32x256xf32>
    %33 = arith.truncf %32 : vector<32x256xf32> to vector<32x256xbf16>
    %cst_27 = arith.constant dense<0.000000e+00> : vector<32x256xf32>
    %34 = tpu.matmul %0, %33, %cst_27 {dimension_numbers = #tpu.dot_dimension_numbers<[1], [0], [0], [1], [0, 0, 1, 1], [], []>} : vector<32x32xbf16>, vector<32x256xbf16>, vector<32x256xf32> -> vector<32x256xf32>
    %35 = vector.broadcast %4 : vector<32x1xf32> to vector<32x256xf32>
    %36 = arith.addf %34, %35 : vector<32x256xf32>
    %cst_28 = arith.constant 0.000000e+00 : f32
    %37 = vector.broadcast %cst_28 : f32 to vector<32x256xf32>
    %38 = arith.maximumf %36, %37 : vector<32x256xf32>
    %c4 = arith.constant 4 : index
    %c0_29 = arith.constant 0 : index
    %c0_30 = arith.constant 0 : index
    %39 = vector.load %arg1[%c4, %c0_29, %c0_30] : memref<8x32x256xf32, #tpu.memory_space<vmem>>, vector<1x32x256xf32>
    %40 = vector.shape_cast %39 : vector<1x32x256xf32> to vector<32x256xf32>
    %41 = arith.truncf %40 : vector<32x256xf32> to vector<32x256xbf16>
    %cst_31 = arith.constant dense<0.000000e+00> : vector<32x256xf32>
    %42 = tpu.matmul %0, %41, %cst_31 {dimension_numbers = #tpu.dot_dimension_numbers<[1], [0], [0], [1], [0, 0, 1, 1], [], []>} : vector<32x32xbf16>, vector<32x256xbf16>, vector<32x256xf32> -> vector<32x256xf32>
    %43 = vector.broadcast %4 : vector<32x1xf32> to vector<32x256xf32>
    %44 = arith.addf %42, %43 : vector<32x256xf32>
    %cst_32 = arith.constant 0.000000e+00 : f32
    %45 = vector.broadcast %cst_32 : f32 to vector<32x256xf32>
    %46 = arith.maximumf %44, %45 : vector<32x256xf32>
    %c5 = arith.constant 5 : index
    %c0_33 = arith.constant 0 : index
    %c0_34 = arith.constant 0 : index
    %47 = vector.load %arg1[%c5, %c0_33, %c0_34] : memref<8x32x256xf32, #tpu.memory_space<vmem>>, vector<1x32x256xf32>
    %48 = vector.shape_cast %47 : vector<1x32x256xf32> to vector<32x256xf32>
    %49 = arith.truncf %48 : vector<32x256xf32> to vector<32x256xbf16>
    %cst_35 = arith.constant dense<0.000000e+00> : vector<32x256xf32>
    %50 = tpu.matmul %0, %49, %cst_35 {dimension_numbers = #tpu.dot_dimension_numbers<[1], [0], [0], [1], [0, 0, 1, 1], [], []>} : vector<32x32xbf16>, vector<32x256xbf16>, vector<32x256xf32> -> vector<32x256xf32>
    %51 = vector.broadcast %4 : vector<32x1xf32> to vector<32x256xf32>
    %52 = arith.addf %50, %51 : vector<32x256xf32>
    %cst_36 = arith.constant 0.000000e+00 : f32
    %53 = vector.broadcast %cst_36 : f32 to vector<32x256xf32>
    %54 = arith.maximumf %52, %53 : vector<32x256xf32>
    %c6 = arith.constant 6 : index
    %c0_37 = arith.constant 0 : index
    %c0_38 = arith.constant 0 : index
    %55 = vector.load %arg1[%c6, %c0_37, %c0_38] : memref<8x32x256xf32, #tpu.memory_space<vmem>>, vector<1x32x256xf32>
    %56 = vector.shape_cast %55 : vector<1x32x256xf32> to vector<32x256xf32>
    %57 = arith.truncf %56 : vector<32x256xf32> to vector<32x256xbf16>
    %cst_39 = arith.constant dense<0.000000e+00> : vector<32x256xf32>
    %58 = tpu.matmul %0, %57, %cst_39 {dimension_numbers = #tpu.dot_dimension_numbers<[1], [0], [0], [1], [0, 0, 1, 1], [], []>} : vector<32x32xbf16>, vector<32x256xbf16>, vector<32x256xf32> -> vector<32x256xf32>
    %59 = vector.broadcast %4 : vector<32x1xf32> to vector<32x256xf32>
    %60 = arith.addf %58, %59 : vector<32x256xf32>
    %cst_40 = arith.constant 0.000000e+00 : f32
    %61 = vector.broadcast %cst_40 : f32 to vector<32x256xf32>
    %62 = arith.maximumf %60, %61 : vector<32x256xf32>
    %c7 = arith.constant 7 : index
    %c0_41 = arith.constant 0 : index
    %c0_42 = arith.constant 0 : index
    %63 = vector.load %arg1[%c7, %c0_41, %c0_42] : memref<8x32x256xf32, #tpu.memory_space<vmem>>, vector<1x32x256xf32>
    %64 = vector.shape_cast %63 : vector<1x32x256xf32> to vector<32x256xf32>
    %65 = arith.truncf %64 : vector<32x256xf32> to vector<32x256xbf16>
    %cst_43 = arith.constant dense<0.000000e+00> : vector<32x256xf32>
    %66 = tpu.matmul %0, %65, %cst_43 {dimension_numbers = #tpu.dot_dimension_numbers<[1], [0], [0], [1], [0, 0, 1, 1], [], []>} : vector<32x32xbf16>, vector<32x256xbf16>, vector<32x256xf32> -> vector<32x256xf32>
    %67 = vector.broadcast %4 : vector<32x1xf32> to vector<32x256xf32>
    %68 = arith.addf %66, %67 : vector<32x256xf32>
    %cst_44 = arith.constant 0.000000e+00 : f32
    %69 = vector.broadcast %cst_44 : f32 to vector<32x256xf32>
    %70 = arith.maximumf %68, %69 : vector<32x256xf32>
    %71 = tpu.concatenate %14, %22, %30, %38, %46, %54, %62, %70 in 0 : vector<32x256xf32>, vector<32x256xf32>, vector<32x256xf32>, vector<32x256xf32>, vector<32x256xf32>, vector<32x256xf32>, vector<32x256xf32>, vector<32x256xf32> -> vector<256x256xf32>
    %72 = arith.truncf %71 : vector<256x256xf32> to vector<256x256xbf16>
    %c0_45 = arith.constant 0 : index
    %c0_46 = arith.constant 0 : index
    %73 = vector.load %arg4[%c0_45, %c0_46] : memref<256x512xbf16, #tpu.memory_space<vmem>>, vector<256x512xbf16>
    %cst_47 = arith.constant dense<0.000000e+00> : vector<256x512xf32>
    %74 = tpu.matmul %72, %73, %cst_47 {dimension_numbers = #tpu.dot_dimension_numbers<[1], [0], [0], [1], [0, 0, 1, 1], [], []>} : vector<256x256xbf16>, vector<256x512xbf16>, vector<256x512xf32> -> vector<256x512xf32>
    %75 = vector.extract_strided_slice %74 {offsets = [0, 0], sizes = [32, 512], strides = [1, 1]} : vector<256x512xf32> to vector<32x512xf32>
    %76 = vector.extract_strided_slice %75 {offsets = [0, 0], sizes = [32, 256], strides = [1, 1]} : vector<32x512xf32> to vector<32x256xf32>
    %77 = vector.extract_strided_slice %75 {offsets = [0, 256], sizes = [32, 256], strides = [1, 1]} : vector<32x512xf32> to vector<32x256xf32>
    %78 = tpu.concatenate %76, %77 in 0 : vector<32x256xf32>, vector<32x256xf32> -> vector<64x256xf32>
    %79 = arith.truncf %78 : vector<64x256xf32> to vector<64x256xbf16>
    %cst_48 = arith.constant dense<0.000000e+00> : vector<64x256xf32>
    %80 = tpu.matmul %1, %79, %cst_48 {dimension_numbers = #tpu.dot_dimension_numbers<[1], [0], [0], [1], [0, 0, 1, 1], [], []>} : vector<64x64xbf16>, vector<64x256xbf16>, vector<64x256xf32> -> vector<64x256xf32>
    %81 = vector.broadcast %5 : vector<64x1xf32> to vector<64x256xf32>
    %82 = arith.addf %80, %81 : vector<64x256xf32>
    %cst_49 = arith.constant 0.000000e+00 : f32
    %83 = vector.broadcast %cst_49 : f32 to vector<64x256xf32>
    %84 = arith.maximumf %82, %83 : vector<64x256xf32>
    %85 = vector.extract_strided_slice %84 {offsets = [0, 0], sizes = [32, 256], strides = [1, 1]} : vector<64x256xf32> to vector<32x256xf32>
    %86 = vector.extract_strided_slice %84 {offsets = [32, 0], sizes = [32, 256], strides = [1, 1]} : vector<64x256xf32> to vector<32x256xf32>
    %87 = tpu.concatenate %85, %86 in 1 : vector<32x256xf32>, vector<32x256xf32> -> vector<32x512xf32>
    %88 = vector.extract_strided_slice %74 {offsets = [32, 0], sizes = [32, 512], strides = [1, 1]} : vector<256x512xf32> to vector<32x512xf32>
    %89 = vector.extract_strided_slice %88 {offsets = [0, 0], sizes = [32, 256], strides = [1, 1]} : vector<32x512xf32> to vector<32x256xf32>
    %90 = vector.extract_strided_slice %88 {offsets = [0, 256], sizes = [32, 256], strides = [1, 1]} : vector<32x512xf32> to vector<32x256xf32>
    %91 = tpu.concatenate %89, %90 in 0 : vector<32x256xf32>, vector<32x256xf32> -> vector<64x256xf32>
    %92 = arith.truncf %91 : vector<64x256xf32> to vector<64x256xbf16>
    %cst_50 = arith.constant dense<0.000000e+00> : vector<64x256xf32>
    %93 = tpu.matmul %1, %92, %cst_50 {dimension_numbers = #tpu.dot_dimension_numbers<[1], [0], [0], [1], [0, 0, 1, 1], [], []>} : vector<64x64xbf16>, vector<64x256xbf16>, vector<64x256xf32> -> vector<64x256xf32>
    %94 = vector.broadcast %5 : vector<64x1xf32> to vector<64x256xf32>
    %95 = arith.addf %93, %94 : vector<64x256xf32>
    %cst_51 = arith.constant 0.000000e+00 : f32
    %96 = vector.broadcast %cst_51 : f32 to vector<64x256xf32>
    %97 = arith.maximumf %95, %96 : vector<64x256xf32>
    %98 = vector.extract_strided_slice %97 {offsets = [0, 0], sizes = [32, 256], strides = [1, 1]} : vector<64x256xf32> to vector<32x256xf32>
    %99 = vector.extract_strided_slice %97 {offsets = [32, 0], sizes = [32, 256], strides = [1, 1]} : vector<64x256xf32> to vector<32x256xf32>
    %100 = tpu.concatenate %98, %99 in 1 : vector<32x256xf32>, vector<32x256xf32> -> vector<32x512xf32>
    %101 = vector.extract_strided_slice %74 {offsets = [64, 0], sizes = [32, 512], strides = [1, 1]} : vector<256x512xf32> to vector<32x512xf32>
    %102 = vector.extract_strided_slice %101 {offsets = [0, 0], sizes = [32, 256], strides = [1, 1]} : vector<32x512xf32> to vector<32x256xf32>
    %103 = vector.extract_strided_slice %101 {offsets = [0, 256], sizes = [32, 256], strides = [1, 1]} : vector<32x512xf32> to vector<32x256xf32>
    %104 = tpu.concatenate %102, %103 in 0 : vector<32x256xf32>, vector<32x256xf32> -> vector<64x256xf32>
    %105 = arith.truncf %104 : vector<64x256xf32> to vector<64x256xbf16>
    %cst_52 = arith.constant dense<0.000000e+00> : vector<64x256xf32>
    %106 = tpu.matmul %1, %105, %cst_52 {dimension_numbers = #tpu.dot_dimension_numbers<[1], [0], [0], [1], [0, 0, 1, 1], [], []>} : vector<64x64xbf16>, vector<64x256xbf16>, vector<64x256xf32> -> vector<64x256xf32>
    %107 = vector.broadcast %5 : vector<64x1xf32> to vector<64x256xf32>
    %108 = arith.addf %106, %107 : vector<64x256xf32>
    %cst_53 = arith.constant 0.000000e+00 : f32
    %109 = vector.broadcast %cst_53 : f32 to vector<64x256xf32>
    %110 = arith.maximumf %108, %109 : vector<64x256xf32>
    %111 = vector.extract_strided_slice %110 {offsets = [0, 0], sizes = [32, 256], strides = [1, 1]} : vector<64x256xf32> to vector<32x256xf32>
    %112 = vector.extract_strided_slice %110 {offsets = [32, 0], sizes = [32, 256], strides = [1, 1]} : vector<64x256xf32> to vector<32x256xf32>
    %113 = tpu.concatenate %111, %112 in 1 : vector<32x256xf32>, vector<32x256xf32> -> vector<32x512xf32>
    %114 = vector.extract_strided_slice %74 {offsets = [96, 0], sizes = [32, 512], strides = [1, 1]} : vector<256x512xf32> to vector<32x512xf32>
    %115 = vector.extract_strided_slice %114 {offsets = [0, 0], sizes = [32, 256], strides = [1, 1]} : vector<32x512xf32> to vector<32x256xf32>
    %116 = vector.extract_strided_slice %114 {offsets = [0, 256], sizes = [32, 256], strides = [1, 1]} : vector<32x512xf32> to vector<32x256xf32>
    %117 = tpu.concatenate %115, %116 in 0 : vector<32x256xf32>, vector<32x256xf32> -> vector<64x256xf32>
    %118 = arith.truncf %117 : vector<64x256xf32> to vector<64x256xbf16>
    %cst_54 = arith.constant dense<0.000000e+00> : vector<64x256xf32>
    %119 = tpu.matmul %1, %118, %cst_54 {dimension_numbers = #tpu.dot_dimension_numbers<[1], [0], [0], [1], [0, 0, 1, 1], [], []>} : vector<64x64xbf16>, vector<64x256xbf16>, vector<64x256xf32> -> vector<64x256xf32>
    %120 = vector.broadcast %5 : vector<64x1xf32> to vector<64x256xf32>
    %121 = arith.addf %119, %120 : vector<64x256xf32>
    %cst_55 = arith.constant 0.000000e+00 : f32
    %122 = vector.broadcast %cst_55 : f32 to vector<64x256xf32>
    %123 = arith.maximumf %121, %122 : vector<64x256xf32>
    %124 = vector.extract_strided_slice %123 {offsets = [0, 0], sizes = [32, 256], strides = [1, 1]} : vector<64x256xf32> to vector<32x256xf32>
    %125 = vector.extract_strided_slice %123 {offsets = [32, 0], sizes = [32, 256], strides = [1, 1]} : vector<64x256xf32> to vector<32x256xf32>
    %126 = tpu.concatenate %124, %125 in 1 : vector<32x256xf32>, vector<32x256xf32> -> vector<32x512xf32>
    %127 = vector.extract_strided_slice %74 {offsets = [128, 0], sizes = [32, 512], strides = [1, 1]} : vector<256x512xf32> to vector<32x512xf32>
    %128 = vector.extract_strided_slice %127 {offsets = [0, 0], sizes = [32, 256], strides = [1, 1]} : vector<32x512xf32> to vector<32x256xf32>
    %129 = vector.extract_strided_slice %127 {offsets = [0, 256], sizes = [32, 256], strides = [1, 1]} : vector<32x512xf32> to vector<32x256xf32>
    %130 = tpu.concatenate %128, %129 in 0 : vector<32x256xf32>, vector<32x256xf32> -> vector<64x256xf32>
    %131 = arith.truncf %130 : vector<64x256xf32> to vector<64x256xbf16>
    %cst_56 = arith.constant dense<0.000000e+00> : vector<64x256xf32>
    %132 = tpu.matmul %1, %131, %cst_56 {dimension_numbers = #tpu.dot_dimension_numbers<[1], [0], [0], [1], [0, 0, 1, 1], [], []>} : vector<64x64xbf16>, vector<64x256xbf16>, vector<64x256xf32> -> vector<64x256xf32>
    %133 = vector.broadcast %5 : vector<64x1xf32> to vector<64x256xf32>
    %134 = arith.addf %132, %133 : vector<64x256xf32>
    %cst_57 = arith.constant 0.000000e+00 : f32
    %135 = vector.broadcast %cst_57 : f32 to vector<64x256xf32>
    %136 = arith.maximumf %134, %135 : vector<64x256xf32>
    %137 = vector.extract_strided_slice %136 {offsets = [0, 0], sizes = [32, 256], strides = [1, 1]} : vector<64x256xf32> to vector<32x256xf32>
    %138 = vector.extract_strided_slice %136 {offsets = [32, 0], sizes = [32, 256], strides = [1, 1]} : vector<64x256xf32> to vector<32x256xf32>
    %139 = tpu.concatenate %137, %138 in 1 : vector<32x256xf32>, vector<32x256xf32> -> vector<32x512xf32>
    %140 = vector.extract_strided_slice %74 {offsets = [160, 0], sizes = [32, 512], strides = [1, 1]} : vector<256x512xf32> to vector<32x512xf32>
    %141 = vector.extract_strided_slice %140 {offsets = [0, 0], sizes = [32, 256], strides = [1, 1]} : vector<32x512xf32> to vector<32x256xf32>
    %142 = vector.extract_strided_slice %140 {offsets = [0, 256], sizes = [32, 256], strides = [1, 1]} : vector<32x512xf32> to vector<32x256xf32>
    %143 = tpu.concatenate %141, %142 in 0 : vector<32x256xf32>, vector<32x256xf32> -> vector<64x256xf32>
    %144 = arith.truncf %143 : vector<64x256xf32> to vector<64x256xbf16>
    %cst_58 = arith.constant dense<0.000000e+00> : vector<64x256xf32>
    %145 = tpu.matmul %1, %144, %cst_58 {dimension_numbers = #tpu.dot_dimension_numbers<[1], [0], [0], [1], [0, 0, 1, 1], [], []>} : vector<64x64xbf16>, vector<64x256xbf16>, vector<64x256xf32> -> vector<64x256xf32>
    %146 = vector.broadcast %5 : vector<64x1xf32> to vector<64x256xf32>
    %147 = arith.addf %145, %146 : vector<64x256xf32>
    %cst_59 = arith.constant 0.000000e+00 : f32
    %148 = vector.broadcast %cst_59 : f32 to vector<64x256xf32>
    %149 = arith.maximumf %147, %148 : vector<64x256xf32>
    %150 = vector.extract_strided_slice %149 {offsets = [0, 0], sizes = [32, 256], strides = [1, 1]} : vector<64x256xf32> to vector<32x256xf32>
    %151 = vector.extract_strided_slice %149 {offsets = [32, 0], sizes = [32, 256], strides = [1, 1]} : vector<64x256xf32> to vector<32x256xf32>
    %152 = tpu.concatenate %150, %151 in 1 : vector<32x256xf32>, vector<32x256xf32> -> vector<32x512xf32>
    %153 = vector.extract_strided_slice %74 {offsets = [192, 0], sizes = [32, 512], strides = [1, 1]} : vector<256x512xf32> to vector<32x512xf32>
    %154 = vector.extract_strided_slice %153 {offsets = [0, 0], sizes = [32, 256], strides = [1, 1]} : vector<32x512xf32> to vector<32x256xf32>
    %155 = vector.extract_strided_slice %153 {offsets = [0, 256], sizes = [32, 256], strides = [1, 1]} : vector<32x512xf32> to vector<32x256xf32>
    %156 = tpu.concatenate %154, %155 in 0 : vector<32x256xf32>, vector<32x256xf32> -> vector<64x256xf32>
    %157 = arith.truncf %156 : vector<64x256xf32> to vector<64x256xbf16>
    %cst_60 = arith.constant dense<0.000000e+00> : vector<64x256xf32>
    %158 = tpu.matmul %1, %157, %cst_60 {dimension_numbers = #tpu.dot_dimension_numbers<[1], [0], [0], [1], [0, 0, 1, 1], [], []>} : vector<64x64xbf16>, vector<64x256xbf16>, vector<64x256xf32> -> vector<64x256xf32>
    %159 = vector.broadcast %5 : vector<64x1xf32> to vector<64x256xf32>
    %160 = arith.addf %158, %159 : vector<64x256xf32>
    %cst_61 = arith.constant 0.000000e+00 : f32
    %161 = vector.broadcast %cst_61 : f32 to vector<64x256xf32>
    %162 = arith.maximumf %160, %161 : vector<64x256xf32>
    %163 = vector.extract_strided_slice %162 {offsets = [0, 0], sizes = [32, 256], strides = [1, 1]} : vector<64x256xf32> to vector<32x256xf32>
    %164 = vector.extract_strided_slice %162 {offsets = [32, 0], sizes = [32, 256], strides = [1, 1]} : vector<64x256xf32> to vector<32x256xf32>
    %165 = tpu.concatenate %163, %164 in 1 : vector<32x256xf32>, vector<32x256xf32> -> vector<32x512xf32>
    %166 = vector.extract_strided_slice %74 {offsets = [224, 0], sizes = [32, 512], strides = [1, 1]} : vector<256x512xf32> to vector<32x512xf32>
    %167 = vector.extract_strided_slice %166 {offsets = [0, 0], sizes = [32, 256], strides = [1, 1]} : vector<32x512xf32> to vector<32x256xf32>
    %168 = vector.extract_strided_slice %166 {offsets = [0, 256], sizes = [32, 256], strides = [1, 1]} : vector<32x512xf32> to vector<32x256xf32>
    %169 = tpu.concatenate %167, %168 in 0 : vector<32x256xf32>, vector<32x256xf32> -> vector<64x256xf32>
    %170 = arith.truncf %169 : vector<64x256xf32> to vector<64x256xbf16>
    %cst_62 = arith.constant dense<0.000000e+00> : vector<64x256xf32>
    %171 = tpu.matmul %1, %170, %cst_62 {dimension_numbers = #tpu.dot_dimension_numbers<[1], [0], [0], [1], [0, 0, 1, 1], [], []>} : vector<64x64xbf16>, vector<64x256xbf16>, vector<64x256xf32> -> vector<64x256xf32>
    %172 = vector.broadcast %5 : vector<64x1xf32> to vector<64x256xf32>
    %173 = arith.addf %171, %172 : vector<64x256xf32>
    %cst_63 = arith.constant 0.000000e+00 : f32
    %174 = vector.broadcast %cst_63 : f32 to vector<64x256xf32>
    %175 = arith.maximumf %173, %174 : vector<64x256xf32>
    %176 = vector.extract_strided_slice %175 {offsets = [0, 0], sizes = [32, 256], strides = [1, 1]} : vector<64x256xf32> to vector<32x256xf32>
    %177 = vector.extract_strided_slice %175 {offsets = [32, 0], sizes = [32, 256], strides = [1, 1]} : vector<64x256xf32> to vector<32x256xf32>
    %178 = tpu.concatenate %176, %177 in 1 : vector<32x256xf32>, vector<32x256xf32> -> vector<32x512xf32>
    %179 = tpu.concatenate %87, %100, %113, %126, %139, %152, %165, %178 in 0 : vector<32x512xf32>, vector<32x512xf32>, vector<32x512xf32>, vector<32x512xf32>, vector<32x512xf32>, vector<32x512xf32>, vector<32x512xf32>, vector<32x512xf32> -> vector<256x512xf32>
    %180 = arith.truncf %179 : vector<256x512xf32> to vector<256x512xbf16>
    %c0_64 = arith.constant 0 : index
    %c0_65 = arith.constant 0 : index
    %181 = vector.load %arg7[%c0_64, %c0_65] : memref<512x256xbf16, #tpu.memory_space<vmem>>, vector<512x256xbf16>
    %cst_66 = arith.constant dense<0.000000e+00> : vector<256x256xf32>
    %182 = tpu.matmul %180, %181, %cst_66 {dimension_numbers = #tpu.dot_dimension_numbers<[1], [0], [0], [1], [0, 0, 1, 1], [], []>} : vector<256x512xbf16>, vector<512x256xbf16>, vector<256x256xf32> -> vector<256x256xf32>
    %183 = vector.extract_strided_slice %71 {offsets = [0, 0], sizes = [8, 256], strides = [1, 1]} : vector<256x256xf32> to vector<8x256xf32>
    %184 = vector.extract_strided_slice %71 {offsets = [32, 0], sizes = [8, 256], strides = [1, 1]} : vector<256x256xf32> to vector<8x256xf32>
    %185 = vector.extract_strided_slice %71 {offsets = [64, 0], sizes = [8, 256], strides = [1, 1]} : vector<256x256xf32> to vector<8x256xf32>
    %186 = vector.extract_strided_slice %71 {offsets = [96, 0], sizes = [8, 256], strides = [1, 1]} : vector<256x256xf32> to vector<8x256xf32>
    %187 = vector.extract_strided_slice %71 {offsets = [128, 0], sizes = [8, 256], strides = [1, 1]} : vector<256x256xf32> to vector<8x256xf32>
    %188 = vector.extract_strided_slice %71 {offsets = [160, 0], sizes = [8, 256], strides = [1, 1]} : vector<256x256xf32> to vector<8x256xf32>
    %189 = vector.extract_strided_slice %71 {offsets = [192, 0], sizes = [8, 256], strides = [1, 1]} : vector<256x256xf32> to vector<8x256xf32>
    %190 = vector.extract_strided_slice %71 {offsets = [224, 0], sizes = [8, 256], strides = [1, 1]} : vector<256x256xf32> to vector<8x256xf32>
    %191 = tpu.concatenate %183, %184, %185, %186, %187, %188, %189, %190 in 0 : vector<8x256xf32>, vector<8x256xf32>, vector<8x256xf32>, vector<8x256xf32>, vector<8x256xf32>, vector<8x256xf32>, vector<8x256xf32>, vector<8x256xf32> -> vector<64x256xf32>
    %192 = arith.truncf %191 : vector<64x256xf32> to vector<64x256xbf16>
    %c0_67 = arith.constant 0 : index
    %c0_68 = arith.constant 0 : index
    %193 = vector.load %arg8[%c0_67, %c0_68] : memref<256x1024xbf16, #tpu.memory_space<vmem>>, vector<256x1024xbf16>
    %cst_69 = arith.constant dense<0.000000e+00> : vector<64x1024xf32>
    %194 = tpu.matmul %192, %193, %cst_69 {dimension_numbers = #tpu.dot_dimension_numbers<[1], [0], [0], [1], [0, 0, 1, 1], [], []>} : vector<64x256xbf16>, vector<256x1024xbf16>, vector<64x1024xf32> -> vector<64x1024xf32>
    %195 = vector.extract_strided_slice %194 {offsets = [0, 0], sizes = [8, 1024], strides = [1, 1]} : vector<64x1024xf32> to vector<8x1024xf32>
    %196 = vector.extract_strided_slice %195 {offsets = [0, 0], sizes = [8, 128], strides = [1, 1]} : vector<8x1024xf32> to vector<8x128xf32>
    %197 = vector.extract_strided_slice %195 {offsets = [0, 256], sizes = [8, 128], strides = [1, 1]} : vector<8x1024xf32> to vector<8x128xf32>
    %198 = vector.extract_strided_slice %195 {offsets = [0, 512], sizes = [8, 128], strides = [1, 1]} : vector<8x1024xf32> to vector<8x128xf32>
    %199 = vector.extract_strided_slice %195 {offsets = [0, 768], sizes = [8, 128], strides = [1, 1]} : vector<8x1024xf32> to vector<8x128xf32>
    %200 = vector.extract_strided_slice %195 {offsets = [0, 128], sizes = [8, 128], strides = [1, 1]} : vector<8x1024xf32> to vector<8x128xf32>
    %201 = vector.extract_strided_slice %195 {offsets = [0, 384], sizes = [8, 128], strides = [1, 1]} : vector<8x1024xf32> to vector<8x128xf32>
    %202 = vector.extract_strided_slice %195 {offsets = [0, 640], sizes = [8, 128], strides = [1, 1]} : vector<8x1024xf32> to vector<8x128xf32>
    %203 = vector.extract_strided_slice %195 {offsets = [0, 896], sizes = [8, 128], strides = [1, 1]} : vector<8x1024xf32> to vector<8x128xf32>
    %204 = tpu.concatenate %196, %197, %198, %199, %200, %201, %202, %203 in 0 : vector<8x128xf32>, vector<8x128xf32>, vector<8x128xf32>, vector<8x128xf32>, vector<8x128xf32>, vector<8x128xf32>, vector<8x128xf32>, vector<8x128xf32> -> vector<64x128xf32>
    %205 = arith.truncf %204 : vector<64x128xf32> to vector<64x128xbf16>
    %cst_70 = arith.constant dense<0.000000e+00> : vector<64x128xf32>
    %206 = tpu.matmul %2, %205, %cst_70 {dimension_numbers = #tpu.dot_dimension_numbers<[1], [0], [0], [1], [0, 0, 1, 1], [], []>} : vector<64x64xbf16>, vector<64x128xbf16>, vector<64x128xf32> -> vector<64x128xf32>
    %207 = vector.broadcast %6 : vector<64x1xf32> to vector<64x128xf32>
    %208 = arith.addf %206, %207 : vector<64x128xf32>
    %cst_71 = arith.constant 0.000000e+00 : f32
    %209 = vector.broadcast %cst_71 : f32 to vector<64x128xf32>
    %210 = arith.maximumf %208, %209 : vector<64x128xf32>
    %211 = vector.extract_strided_slice %210 {offsets = [0, 0], sizes = [32, 128], strides = [1, 1]} : vector<64x128xf32> to vector<32x128xf32>
    %212 = vector.extract_strided_slice %210 {offsets = [32, 0], sizes = [32, 128], strides = [1, 1]} : vector<64x128xf32> to vector<32x128xf32>
    %213 = tpu.concatenate %211, %212 in 1 : vector<32x128xf32>, vector<32x128xf32> -> vector<32x256xf32>
    %214 = vector.extract_strided_slice %194 {offsets = [8, 0], sizes = [8, 1024], strides = [1, 1]} : vector<64x1024xf32> to vector<8x1024xf32>
    %215 = vector.extract_strided_slice %214 {offsets = [0, 0], sizes = [8, 128], strides = [1, 1]} : vector<8x1024xf32> to vector<8x128xf32>
    %216 = vector.extract_strided_slice %214 {offsets = [0, 256], sizes = [8, 128], strides = [1, 1]} : vector<8x1024xf32> to vector<8x128xf32>
    %217 = vector.extract_strided_slice %214 {offsets = [0, 512], sizes = [8, 128], strides = [1, 1]} : vector<8x1024xf32> to vector<8x128xf32>
    %218 = vector.extract_strided_slice %214 {offsets = [0, 768], sizes = [8, 128], strides = [1, 1]} : vector<8x1024xf32> to vector<8x128xf32>
    %219 = vector.extract_strided_slice %214 {offsets = [0, 128], sizes = [8, 128], strides = [1, 1]} : vector<8x1024xf32> to vector<8x128xf32>
    %220 = vector.extract_strided_slice %214 {offsets = [0, 384], sizes = [8, 128], strides = [1, 1]} : vector<8x1024xf32> to vector<8x128xf32>
    %221 = vector.extract_strided_slice %214 {offsets = [0, 640], sizes = [8, 128], strides = [1, 1]} : vector<8x1024xf32> to vector<8x128xf32>
    %222 = vector.extract_strided_slice %214 {offsets = [0, 896], sizes = [8, 128], strides = [1, 1]} : vector<8x1024xf32> to vector<8x128xf32>
    %223 = tpu.concatenate %215, %216, %217, %218, %219, %220, %221, %222 in 0 : vector<8x128xf32>, vector<8x128xf32>, vector<8x128xf32>, vector<8x128xf32>, vector<8x128xf32>, vector<8x128xf32>, vector<8x128xf32>, vector<8x128xf32> -> vector<64x128xf32>
    %224 = arith.truncf %223 : vector<64x128xf32> to vector<64x128xbf16>
    %cst_72 = arith.constant dense<0.000000e+00> : vector<64x128xf32>
    %225 = tpu.matmul %2, %224, %cst_72 {dimension_numbers = #tpu.dot_dimension_numbers<[1], [0], [0], [1], [0, 0, 1, 1], [], []>} : vector<64x64xbf16>, vector<64x128xbf16>, vector<64x128xf32> -> vector<64x128xf32>
    %226 = vector.broadcast %6 : vector<64x1xf32> to vector<64x128xf32>
    %227 = arith.addf %225, %226 : vector<64x128xf32>
    %cst_73 = arith.constant 0.000000e+00 : f32
    %228 = vector.broadcast %cst_73 : f32 to vector<64x128xf32>
    %229 = arith.maximumf %227, %228 : vector<64x128xf32>
    %230 = vector.extract_strided_slice %229 {offsets = [0, 0], sizes = [32, 128], strides = [1, 1]} : vector<64x128xf32> to vector<32x128xf32>
    %231 = vector.extract_strided_slice %229 {offsets = [32, 0], sizes = [32, 128], strides = [1, 1]} : vector<64x128xf32> to vector<32x128xf32>
    %232 = tpu.concatenate %230, %231 in 1 : vector<32x128xf32>, vector<32x128xf32> -> vector<32x256xf32>
    %233 = vector.extract_strided_slice %194 {offsets = [16, 0], sizes = [8, 1024], strides = [1, 1]} : vector<64x1024xf32> to vector<8x1024xf32>
    %234 = vector.extract_strided_slice %233 {offsets = [0, 0], sizes = [8, 128], strides = [1, 1]} : vector<8x1024xf32> to vector<8x128xf32>
    %235 = vector.extract_strided_slice %233 {offsets = [0, 256], sizes = [8, 128], strides = [1, 1]} : vector<8x1024xf32> to vector<8x128xf32>
    %236 = vector.extract_strided_slice %233 {offsets = [0, 512], sizes = [8, 128], strides = [1, 1]} : vector<8x1024xf32> to vector<8x128xf32>
    %237 = vector.extract_strided_slice %233 {offsets = [0, 768], sizes = [8, 128], strides = [1, 1]} : vector<8x1024xf32> to vector<8x128xf32>
    %238 = vector.extract_strided_slice %233 {offsets = [0, 128], sizes = [8, 128], strides = [1, 1]} : vector<8x1024xf32> to vector<8x128xf32>
    %239 = vector.extract_strided_slice %233 {offsets = [0, 384], sizes = [8, 128], strides = [1, 1]} : vector<8x1024xf32> to vector<8x128xf32>
    %240 = vector.extract_strided_slice %233 {offsets = [0, 640], sizes = [8, 128], strides = [1, 1]} : vector<8x1024xf32> to vector<8x128xf32>
    %241 = vector.extract_strided_slice %233 {offsets = [0, 896], sizes = [8, 128], strides = [1, 1]} : vector<8x1024xf32> to vector<8x128xf32>
    %242 = tpu.concatenate %234, %235, %236, %237, %238, %239, %240, %241 in 0 : vector<8x128xf32>, vector<8x128xf32>, vector<8x128xf32>, vector<8x128xf32>, vector<8x128xf32>, vector<8x128xf32>, vector<8x128xf32>, vector<8x128xf32> -> vector<64x128xf32>
    %243 = arith.truncf %242 : vector<64x128xf32> to vector<64x128xbf16>
    %cst_74 = arith.constant dense<0.000000e+00> : vector<64x128xf32>
    %244 = tpu.matmul %2, %243, %cst_74 {dimension_numbers = #tpu.dot_dimension_numbers<[1], [0], [0], [1], [0, 0, 1, 1], [], []>} : vector<64x64xbf16>, vector<64x128xbf16>, vector<64x128xf32> -> vector<64x128xf32>
    %245 = vector.broadcast %6 : vector<64x1xf32> to vector<64x128xf32>
    %246 = arith.addf %244, %245 : vector<64x128xf32>
    %cst_75 = arith.constant 0.000000e+00 : f32
    %247 = vector.broadcast %cst_75 : f32 to vector<64x128xf32>
    %248 = arith.maximumf %246, %247 : vector<64x128xf32>
    %249 = vector.extract_strided_slice %248 {offsets = [0, 0], sizes = [32, 128], strides = [1, 1]} : vector<64x128xf32> to vector<32x128xf32>
    %250 = vector.extract_strided_slice %248 {offsets = [32, 0], sizes = [32, 128], strides = [1, 1]} : vector<64x128xf32> to vector<32x128xf32>
    %251 = tpu.concatenate %249, %250 in 1 : vector<32x128xf32>, vector<32x128xf32> -> vector<32x256xf32>
    %252 = vector.extract_strided_slice %194 {offsets = [24, 0], sizes = [8, 1024], strides = [1, 1]} : vector<64x1024xf32> to vector<8x1024xf32>
    %253 = vector.extract_strided_slice %252 {offsets = [0, 0], sizes = [8, 128], strides = [1, 1]} : vector<8x1024xf32> to vector<8x128xf32>
    %254 = vector.extract_strided_slice %252 {offsets = [0, 256], sizes = [8, 128], strides = [1, 1]} : vector<8x1024xf32> to vector<8x128xf32>
    %255 = vector.extract_strided_slice %252 {offsets = [0, 512], sizes = [8, 128], strides = [1, 1]} : vector<8x1024xf32> to vector<8x128xf32>
    %256 = vector.extract_strided_slice %252 {offsets = [0, 768], sizes = [8, 128], strides = [1, 1]} : vector<8x1024xf32> to vector<8x128xf32>
    %257 = vector.extract_strided_slice %252 {offsets = [0, 128], sizes = [8, 128], strides = [1, 1]} : vector<8x1024xf32> to vector<8x128xf32>
    %258 = vector.extract_strided_slice %252 {offsets = [0, 384], sizes = [8, 128], strides = [1, 1]} : vector<8x1024xf32> to vector<8x128xf32>
    %259 = vector.extract_strided_slice %252 {offsets = [0, 640], sizes = [8, 128], strides = [1, 1]} : vector<8x1024xf32> to vector<8x128xf32>
    %260 = vector.extract_strided_slice %252 {offsets = [0, 896], sizes = [8, 128], strides = [1, 1]} : vector<8x1024xf32> to vector<8x128xf32>
    %261 = tpu.concatenate %253, %254, %255, %256, %257, %258, %259, %260 in 0 : vector<8x128xf32>, vector<8x128xf32>, vector<8x128xf32>, vector<8x128xf32>, vector<8x128xf32>, vector<8x128xf32>, vector<8x128xf32>, vector<8x128xf32> -> vector<64x128xf32>
    %262 = arith.truncf %261 : vector<64x128xf32> to vector<64x128xbf16>
    %cst_76 = arith.constant dense<0.000000e+00> : vector<64x128xf32>
    %263 = tpu.matmul %2, %262, %cst_76 {dimension_numbers = #tpu.dot_dimension_numbers<[1], [0], [0], [1], [0, 0, 1, 1], [], []>} : vector<64x64xbf16>, vector<64x128xbf16>, vector<64x128xf32> -> vector<64x128xf32>
    %264 = vector.broadcast %6 : vector<64x1xf32> to vector<64x128xf32>
    %265 = arith.addf %263, %264 : vector<64x128xf32>
    %cst_77 = arith.constant 0.000000e+00 : f32
    %266 = vector.broadcast %cst_77 : f32 to vector<64x128xf32>
    %267 = arith.maximumf %265, %266 : vector<64x128xf32>
    %268 = vector.extract_strided_slice %267 {offsets = [0, 0], sizes = [32, 128], strides = [1, 1]} : vector<64x128xf32> to vector<32x128xf32>
    %269 = vector.extract_strided_slice %267 {offsets = [32, 0], sizes = [32, 128], strides = [1, 1]} : vector<64x128xf32> to vector<32x128xf32>
    %270 = tpu.concatenate %268, %269 in 1 : vector<32x128xf32>, vector<32x128xf32> -> vector<32x256xf32>
    %271 = vector.extract_strided_slice %194 {offsets = [32, 0], sizes = [8, 1024], strides = [1, 1]} : vector<64x1024xf32> to vector<8x1024xf32>
    %272 = vector.extract_strided_slice %271 {offsets = [0, 0], sizes = [8, 128], strides = [1, 1]} : vector<8x1024xf32> to vector<8x128xf32>
    %273 = vector.extract_strided_slice %271 {offsets = [0, 256], sizes = [8, 128], strides = [1, 1]} : vector<8x1024xf32> to vector<8x128xf32>
    %274 = vector.extract_strided_slice %271 {offsets = [0, 512], sizes = [8, 128], strides = [1, 1]} : vector<8x1024xf32> to vector<8x128xf32>
    %275 = vector.extract_strided_slice %271 {offsets = [0, 768], sizes = [8, 128], strides = [1, 1]} : vector<8x1024xf32> to vector<8x128xf32>
    %276 = vector.extract_strided_slice %271 {offsets = [0, 128], sizes = [8, 128], strides = [1, 1]} : vector<8x1024xf32> to vector<8x128xf32>
    %277 = vector.extract_strided_slice %271 {offsets = [0, 384], sizes = [8, 128], strides = [1, 1]} : vector<8x1024xf32> to vector<8x128xf32>
    %278 = vector.extract_strided_slice %271 {offsets = [0, 640], sizes = [8, 128], strides = [1, 1]} : vector<8x1024xf32> to vector<8x128xf32>
    %279 = vector.extract_strided_slice %271 {offsets = [0, 896], sizes = [8, 128], strides = [1, 1]} : vector<8x1024xf32> to vector<8x128xf32>
    %280 = tpu.concatenate %272, %273, %274, %275, %276, %277, %278, %279 in 0 : vector<8x128xf32>, vector<8x128xf32>, vector<8x128xf32>, vector<8x128xf32>, vector<8x128xf32>, vector<8x128xf32>, vector<8x128xf32>, vector<8x128xf32> -> vector<64x128xf32>
    %281 = arith.truncf %280 : vector<64x128xf32> to vector<64x128xbf16>
    %cst_78 = arith.constant dense<0.000000e+00> : vector<64x128xf32>
    %282 = tpu.matmul %2, %281, %cst_78 {dimension_numbers = #tpu.dot_dimension_numbers<[1], [0], [0], [1], [0, 0, 1, 1], [], []>} : vector<64x64xbf16>, vector<64x128xbf16>, vector<64x128xf32> -> vector<64x128xf32>
    %283 = vector.broadcast %6 : vector<64x1xf32> to vector<64x128xf32>
    %284 = arith.addf %282, %283 : vector<64x128xf32>
    %cst_79 = arith.constant 0.000000e+00 : f32
    %285 = vector.broadcast %cst_79 : f32 to vector<64x128xf32>
    %286 = arith.maximumf %284, %285 : vector<64x128xf32>
    %287 = vector.extract_strided_slice %286 {offsets = [0, 0], sizes = [32, 128], strides = [1, 1]} : vector<64x128xf32> to vector<32x128xf32>
    %288 = vector.extract_strided_slice %286 {offsets = [32, 0], sizes = [32, 128], strides = [1, 1]} : vector<64x128xf32> to vector<32x128xf32>
    %289 = tpu.concatenate %287, %288 in 1 : vector<32x128xf32>, vector<32x128xf32> -> vector<32x256xf32>
    %290 = vector.extract_strided_slice %194 {offsets = [40, 0], sizes = [8, 1024], strides = [1, 1]} : vector<64x1024xf32> to vector<8x1024xf32>
    %291 = vector.extract_strided_slice %290 {offsets = [0, 0], sizes = [8, 128], strides = [1, 1]} : vector<8x1024xf32> to vector<8x128xf32>
    %292 = vector.extract_strided_slice %290 {offsets = [0, 256], sizes = [8, 128], strides = [1, 1]} : vector<8x1024xf32> to vector<8x128xf32>
    %293 = vector.extract_strided_slice %290 {offsets = [0, 512], sizes = [8, 128], strides = [1, 1]} : vector<8x1024xf32> to vector<8x128xf32>
    %294 = vector.extract_strided_slice %290 {offsets = [0, 768], sizes = [8, 128], strides = [1, 1]} : vector<8x1024xf32> to vector<8x128xf32>
    %295 = vector.extract_strided_slice %290 {offsets = [0, 128], sizes = [8, 128], strides = [1, 1]} : vector<8x1024xf32> to vector<8x128xf32>
    %296 = vector.extract_strided_slice %290 {offsets = [0, 384], sizes = [8, 128], strides = [1, 1]} : vector<8x1024xf32> to vector<8x128xf32>
    %297 = vector.extract_strided_slice %290 {offsets = [0, 640], sizes = [8, 128], strides = [1, 1]} : vector<8x1024xf32> to vector<8x128xf32>
    %298 = vector.extract_strided_slice %290 {offsets = [0, 896], sizes = [8, 128], strides = [1, 1]} : vector<8x1024xf32> to vector<8x128xf32>
    %299 = tpu.concatenate %291, %292, %293, %294, %295, %296, %297, %298 in 0 : vector<8x128xf32>, vector<8x128xf32>, vector<8x128xf32>, vector<8x128xf32>, vector<8x128xf32>, vector<8x128xf32>, vector<8x128xf32>, vector<8x128xf32> -> vector<64x128xf32>
    %300 = arith.truncf %299 : vector<64x128xf32> to vector<64x128xbf16>
    %cst_80 = arith.constant dense<0.000000e+00> : vector<64x128xf32>
    %301 = tpu.matmul %2, %300, %cst_80 {dimension_numbers = #tpu.dot_dimension_numbers<[1], [0], [0], [1], [0, 0, 1, 1], [], []>} : vector<64x64xbf16>, vector<64x128xbf16>, vector<64x128xf32> -> vector<64x128xf32>
    %302 = vector.broadcast %6 : vector<64x1xf32> to vector<64x128xf32>
    %303 = arith.addf %301, %302 : vector<64x128xf32>
    %cst_81 = arith.constant 0.000000e+00 : f32
    %304 = vector.broadcast %cst_81 : f32 to vector<64x128xf32>
    %305 = arith.maximumf %303, %304 : vector<64x128xf32>
    %306 = vector.extract_strided_slice %305 {offsets = [0, 0], sizes = [32, 128], strides = [1, 1]} : vector<64x128xf32> to vector<32x128xf32>
    %307 = vector.extract_strided_slice %305 {offsets = [32, 0], sizes = [32, 128], strides = [1, 1]} : vector<64x128xf32> to vector<32x128xf32>
    %308 = tpu.concatenate %306, %307 in 1 : vector<32x128xf32>, vector<32x128xf32> -> vector<32x256xf32>
    %309 = vector.extract_strided_slice %194 {offsets = [48, 0], sizes = [8, 1024], strides = [1, 1]} : vector<64x1024xf32> to vector<8x1024xf32>
    %310 = vector.extract_strided_slice %309 {offsets = [0, 0], sizes = [8, 128], strides = [1, 1]} : vector<8x1024xf32> to vector<8x128xf32>
    %311 = vector.extract_strided_slice %309 {offsets = [0, 256], sizes = [8, 128], strides = [1, 1]} : vector<8x1024xf32> to vector<8x128xf32>
    %312 = vector.extract_strided_slice %309 {offsets = [0, 512], sizes = [8, 128], strides = [1, 1]} : vector<8x1024xf32> to vector<8x128xf32>
    %313 = vector.extract_strided_slice %309 {offsets = [0, 768], sizes = [8, 128], strides = [1, 1]} : vector<8x1024xf32> to vector<8x128xf32>
    %314 = vector.extract_strided_slice %309 {offsets = [0, 128], sizes = [8, 128], strides = [1, 1]} : vector<8x1024xf32> to vector<8x128xf32>
    %315 = vector.extract_strided_slice %309 {offsets = [0, 384], sizes = [8, 128], strides = [1, 1]} : vector<8x1024xf32> to vector<8x128xf32>
    %316 = vector.extract_strided_slice %309 {offsets = [0, 640], sizes = [8, 128], strides = [1, 1]} : vector<8x1024xf32> to vector<8x128xf32>
    %317 = vector.extract_strided_slice %309 {offsets = [0, 896], sizes = [8, 128], strides = [1, 1]} : vector<8x1024xf32> to vector<8x128xf32>
    %318 = tpu.concatenate %310, %311, %312, %313, %314, %315, %316, %317 in 0 : vector<8x128xf32>, vector<8x128xf32>, vector<8x128xf32>, vector<8x128xf32>, vector<8x128xf32>, vector<8x128xf32>, vector<8x128xf32>, vector<8x128xf32> -> vector<64x128xf32>
    %319 = arith.truncf %318 : vector<64x128xf32> to vector<64x128xbf16>
    %cst_82 = arith.constant dense<0.000000e+00> : vector<64x128xf32>
    %320 = tpu.matmul %2, %319, %cst_82 {dimension_numbers = #tpu.dot_dimension_numbers<[1], [0], [0], [1], [0, 0, 1, 1], [], []>} : vector<64x64xbf16>, vector<64x128xbf16>, vector<64x128xf32> -> vector<64x128xf32>
    %321 = vector.broadcast %6 : vector<64x1xf32> to vector<64x128xf32>
    %322 = arith.addf %320, %321 : vector<64x128xf32>
    %cst_83 = arith.constant 0.000000e+00 : f32
    %323 = vector.broadcast %cst_83 : f32 to vector<64x128xf32>
    %324 = arith.maximumf %322, %323 : vector<64x128xf32>
    %325 = vector.extract_strided_slice %324 {offsets = [0, 0], sizes = [32, 128], strides = [1, 1]} : vector<64x128xf32> to vector<32x128xf32>
    %326 = vector.extract_strided_slice %324 {offsets = [32, 0], sizes = [32, 128], strides = [1, 1]} : vector<64x128xf32> to vector<32x128xf32>
    %327 = tpu.concatenate %325, %326 in 1 : vector<32x128xf32>, vector<32x128xf32> -> vector<32x256xf32>
    %328 = vector.extract_strided_slice %194 {offsets = [56, 0], sizes = [8, 1024], strides = [1, 1]} : vector<64x1024xf32> to vector<8x1024xf32>
    %329 = vector.extract_strided_slice %328 {offsets = [0, 0], sizes = [8, 128], strides = [1, 1]} : vector<8x1024xf32> to vector<8x128xf32>
    %330 = vector.extract_strided_slice %328 {offsets = [0, 256], sizes = [8, 128], strides = [1, 1]} : vector<8x1024xf32> to vector<8x128xf32>
    %331 = vector.extract_strided_slice %328 {offsets = [0, 512], sizes = [8, 128], strides = [1, 1]} : vector<8x1024xf32> to vector<8x128xf32>
    %332 = vector.extract_strided_slice %328 {offsets = [0, 768], sizes = [8, 128], strides = [1, 1]} : vector<8x1024xf32> to vector<8x128xf32>
    %333 = vector.extract_strided_slice %328 {offsets = [0, 128], sizes = [8, 128], strides = [1, 1]} : vector<8x1024xf32> to vector<8x128xf32>
    %334 = vector.extract_strided_slice %328 {offsets = [0, 384], sizes = [8, 128], strides = [1, 1]} : vector<8x1024xf32> to vector<8x128xf32>
    %335 = vector.extract_strided_slice %328 {offsets = [0, 640], sizes = [8, 128], strides = [1, 1]} : vector<8x1024xf32> to vector<8x128xf32>
    %336 = vector.extract_strided_slice %328 {offsets = [0, 896], sizes = [8, 128], strides = [1, 1]} : vector<8x1024xf32> to vector<8x128xf32>
    %337 = tpu.concatenate %329, %330, %331, %332, %333, %334, %335, %336 in 0 : vector<8x128xf32>, vector<8x128xf32>, vector<8x128xf32>, vector<8x128xf32>, vector<8x128xf32>, vector<8x128xf32>, vector<8x128xf32>, vector<8x128xf32> -> vector<64x128xf32>
    %338 = arith.truncf %337 : vector<64x128xf32> to vector<64x128xbf16>
    %cst_84 = arith.constant dense<0.000000e+00> : vector<64x128xf32>
    %339 = tpu.matmul %2, %338, %cst_84 {dimension_numbers = #tpu.dot_dimension_numbers<[1], [0], [0], [1], [0, 0, 1, 1], [], []>} : vector<64x64xbf16>, vector<64x128xbf16>, vector<64x128xf32> -> vector<64x128xf32>
    %340 = vector.broadcast %6 : vector<64x1xf32> to vector<64x128xf32>
    %341 = arith.addf %339, %340 : vector<64x128xf32>
    %cst_85 = arith.constant 0.000000e+00 : f32
    %342 = vector.broadcast %cst_85 : f32 to vector<64x128xf32>
    %343 = arith.maximumf %341, %342 : vector<64x128xf32>
    %344 = vector.extract_strided_slice %343 {offsets = [0, 0], sizes = [32, 128], strides = [1, 1]} : vector<64x128xf32> to vector<32x128xf32>
    %345 = vector.extract_strided_slice %343 {offsets = [32, 0], sizes = [32, 128], strides = [1, 1]} : vector<64x128xf32> to vector<32x128xf32>
    %346 = tpu.concatenate %344, %345 in 1 : vector<32x128xf32>, vector<32x128xf32> -> vector<32x256xf32>
    %347 = tpu.concatenate %213, %232, %251, %270, %289, %308, %327, %346 in 0 : vector<32x256xf32>, vector<32x256xf32>, vector<32x256xf32>, vector<32x256xf32>, vector<32x256xf32>, vector<32x256xf32>, vector<32x256xf32>, vector<32x256xf32> -> vector<256x256xf32>
    %348 = arith.truncf %347 : vector<256x256xf32> to vector<256x256xbf16>
    %c0_86 = arith.constant 0 : index
    %c0_87 = arith.constant 0 : index
    %349 = vector.load %arg11[%c0_86, %c0_87] : memref<256x256xbf16, #tpu.memory_space<vmem>>, vector<256x256xbf16>
    %cst_88 = arith.constant dense<0.000000e+00> : vector<256x256xf32>
    %350 = tpu.matmul %348, %349, %cst_88 {dimension_numbers = #tpu.dot_dimension_numbers<[1], [0], [0], [1], [0, 0, 1, 1], [], []>} : vector<256x256xbf16>, vector<256x256xbf16>, vector<256x256xf32> -> vector<256x256xf32>
    %351 = arith.addf %71, %182 : vector<256x256xf32>
    %352 = arith.addf %351, %350 : vector<256x256xf32>
    %353 = arith.truncf %352 : vector<256x256xf32> to vector<256x256xbf16>
    %354 = vector.extract_strided_slice %353 {offsets = [0, 0], sizes = [32, 256], strides = [1, 1]} : vector<256x256xbf16> to vector<32x256xbf16>
    %cst_89 = arith.constant dense<0.000000e+00> : vector<64x256xf32>
    %355 = tpu.matmul %3, %354, %cst_89 {dimension_numbers = #tpu.dot_dimension_numbers<[1], [0], [0], [1], [0, 0, 1, 1], [], []>} : vector<64x32xbf16>, vector<32x256xbf16>, vector<64x256xf32> -> vector<64x256xf32>
    %c0_90 = arith.constant 0 : index
    %c0_91 = arith.constant 0 : index
    %c0_92 = arith.constant 0 : index
    %356 = vector.load %arg13[%c0_90, %c0_91, %c0_92] : memref<8x64x256xf32, #tpu.memory_space<vmem>>, vector<1x64x256xf32>
    %357 = vector.shape_cast %356 : vector<1x64x256xf32> to vector<64x256xf32>
    %358 = vector.shape_cast %355 : vector<64x256xf32> to vector<1x64x256xf32>
    tpu.vector_store %arg13[%c0_90, %c0_91, %c0_92], %358 {strides = array<i32>} : memref<8x64x256xf32, #tpu.memory_space<vmem>>, vector<1x64x256xf32>,
    %359 = vector.extract_strided_slice %353 {offsets = [32, 0], sizes = [32, 256], strides = [1, 1]} : vector<256x256xbf16> to vector<32x256xbf16>
    %cst_93 = arith.constant dense<0.000000e+00> : vector<64x256xf32>
    %360 = tpu.matmul %3, %359, %cst_93 {dimension_numbers = #tpu.dot_dimension_numbers<[1], [0], [0], [1], [0, 0, 1, 1], [], []>} : vector<64x32xbf16>, vector<32x256xbf16>, vector<64x256xf32> -> vector<64x256xf32>
    %c1_94 = arith.constant 1 : index
    %c0_95 = arith.constant 0 : index
    %c0_96 = arith.constant 0 : index
    %361 = vector.load %arg13[%c1_94, %c0_95, %c0_96] : memref<8x64x256xf32, #tpu.memory_space<vmem>>, vector<1x64x256xf32>
    %362 = vector.shape_cast %361 : vector<1x64x256xf32> to vector<64x256xf32>
    %363 = vector.shape_cast %360 : vector<64x256xf32> to vector<1x64x256xf32>
    tpu.vector_store %arg13[%c1_94, %c0_95, %c0_96], %363 {strides = array<i32>} : memref<8x64x256xf32, #tpu.memory_space<vmem>>, vector<1x64x256xf32>,
    %364 = vector.extract_strided_slice %353 {offsets = [64, 0], sizes = [32, 256], strides = [1, 1]} : vector<256x256xbf16> to vector<32x256xbf16>
    %cst_97 = arith.constant dense<0.000000e+00> : vector<64x256xf32>
    %365 = tpu.matmul %3, %364, %cst_97 {dimension_numbers = #tpu.dot_dimension_numbers<[1], [0], [0], [1], [0, 0, 1, 1], [], []>} : vector<64x32xbf16>, vector<32x256xbf16>, vector<64x256xf32> -> vector<64x256xf32>
    %c2_98 = arith.constant 2 : index
    %c0_99 = arith.constant 0 : index
    %c0_100 = arith.constant 0 : index
    %366 = vector.load %arg13[%c2_98, %c0_99, %c0_100] : memref<8x64x256xf32, #tpu.memory_space<vmem>>, vector<1x64x256xf32>
    %367 = vector.shape_cast %366 : vector<1x64x256xf32> to vector<64x256xf32>
    %368 = vector.shape_cast %365 : vector<64x256xf32> to vector<1x64x256xf32>
    tpu.vector_store %arg13[%c2_98, %c0_99, %c0_100], %368 {strides = array<i32>} : memref<8x64x256xf32, #tpu.memory_space<vmem>>, vector<1x64x256xf32>,
    %369 = vector.extract_strided_slice %353 {offsets = [96, 0], sizes = [32, 256], strides = [1, 1]} : vector<256x256xbf16> to vector<32x256xbf16>
    %cst_101 = arith.constant dense<0.000000e+00> : vector<64x256xf32>
    %370 = tpu.matmul %3, %369, %cst_101 {dimension_numbers = #tpu.dot_dimension_numbers<[1], [0], [0], [1], [0, 0, 1, 1], [], []>} : vector<64x32xbf16>, vector<32x256xbf16>, vector<64x256xf32> -> vector<64x256xf32>
    %c3_102 = arith.constant 3 : index
    %c0_103 = arith.constant 0 : index
    %c0_104 = arith.constant 0 : index
    %371 = vector.load %arg13[%c3_102, %c0_103, %c0_104] : memref<8x64x256xf32, #tpu.memory_space<vmem>>, vector<1x64x256xf32>
    %372 = vector.shape_cast %371 : vector<1x64x256xf32> to vector<64x256xf32>
    %373 = vector.shape_cast %370 : vector<64x256xf32> to vector<1x64x256xf32>
    tpu.vector_store %arg13[%c3_102, %c0_103, %c0_104], %373 {strides = array<i32>} : memref<8x64x256xf32, #tpu.memory_space<vmem>>, vector<1x64x256xf32>,
    %374 = vector.extract_strided_slice %353 {offsets = [128, 0], sizes = [32, 256], strides = [1, 1]} : vector<256x256xbf16> to vector<32x256xbf16>
    %cst_105 = arith.constant dense<0.000000e+00> : vector<64x256xf32>
    %375 = tpu.matmul %3, %374, %cst_105 {dimension_numbers = #tpu.dot_dimension_numbers<[1], [0], [0], [1], [0, 0, 1, 1], [], []>} : vector<64x32xbf16>, vector<32x256xbf16>, vector<64x256xf32> -> vector<64x256xf32>
    %c4_106 = arith.constant 4 : index
    %c0_107 = arith.constant 0 : index
    %c0_108 = arith.constant 0 : index
    %376 = vector.load %arg13[%c4_106, %c0_107, %c0_108] : memref<8x64x256xf32, #tpu.memory_space<vmem>>, vector<1x64x256xf32>
    %377 = vector.shape_cast %376 : vector<1x64x256xf32> to vector<64x256xf32>
    %378 = vector.shape_cast %375 : vector<64x256xf32> to vector<1x64x256xf32>
    tpu.vector_store %arg13[%c4_106, %c0_107, %c0_108], %378 {strides = array<i32>} : memref<8x64x256xf32, #tpu.memory_space<vmem>>, vector<1x64x256xf32>,
    %379 = vector.extract_strided_slice %353 {offsets = [160, 0], sizes = [32, 256], strides = [1, 1]} : vector<256x256xbf16> to vector<32x256xbf16>
    %cst_109 = arith.constant dense<0.000000e+00> : vector<64x256xf32>
    %380 = tpu.matmul %3, %379, %cst_109 {dimension_numbers = #tpu.dot_dimension_numbers<[1], [0], [0], [1], [0, 0, 1, 1], [], []>} : vector<64x32xbf16>, vector<32x256xbf16>, vector<64x256xf32> -> vector<64x256xf32>
    %c5_110 = arith.constant 5 : index
    %c0_111 = arith.constant 0 : index
    %c0_112 = arith.constant 0 : index
    %381 = vector.load %arg13[%c5_110, %c0_111, %c0_112] : memref<8x64x256xf32, #tpu.memory_space<vmem>>, vector<1x64x256xf32>
    %382 = vector.shape_cast %381 : vector<1x64x256xf32> to vector<64x256xf32>
    %383 = vector.shape_cast %380 : vector<64x256xf32> to vector<1x64x256xf32>
    tpu.vector_store %arg13[%c5_110, %c0_111, %c0_112], %383 {strides = array<i32>} : memref<8x64x256xf32, #tpu.memory_space<vmem>>, vector<1x64x256xf32>,
    %384 = vector.extract_strided_slice %353 {offsets = [192, 0], sizes = [32, 256], strides = [1, 1]} : vector<256x256xbf16> to vector<32x256xbf16>
    %cst_113 = arith.constant dense<0.000000e+00> : vector<64x256xf32>
    %385 = tpu.matmul %3, %384, %cst_113 {dimension_numbers = #tpu.dot_dimension_numbers<[1], [0], [0], [1], [0, 0, 1, 1], [], []>} : vector<64x32xbf16>, vector<32x256xbf16>, vector<64x256xf32> -> vector<64x256xf32>
    %c6_114 = arith.constant 6 : index
    %c0_115 = arith.constant 0 : index
    %c0_116 = arith.constant 0 : index
    %386 = vector.load %arg13[%c6_114, %c0_115, %c0_116] : memref<8x64x256xf32, #tpu.memory_space<vmem>>, vector<1x64x256xf32>
    %387 = vector.shape_cast %386 : vector<1x64x256xf32> to vector<64x256xf32>
    %388 = vector.shape_cast %385 : vector<64x256xf32> to vector<1x64x256xf32>
    tpu.vector_store %arg13[%c6_114, %c0_115, %c0_116], %388 {strides = array<i32>} : memref<8x64x256xf32, #tpu.memory_space<vmem>>, vector<1x64x256xf32>,
    %389 = vector.extract_strided_slice %353 {offsets = [224, 0], sizes = [32, 256], strides = [1, 1]} : vector<256x256xbf16> to vector<32x256xbf16>
    %cst_117 = arith.constant dense<0.000000e+00> : vector<64x256xf32>
    %390 = tpu.matmul %3, %389, %cst_117 {dimension_numbers = #tpu.dot_dimension_numbers<[1], [0], [0], [1], [0, 0, 1, 1], [], []>} : vector<64x32xbf16>, vector<32x256xbf16>, vector<64x256xf32> -> vector<64x256xf32>
    %c7_118 = arith.constant 7 : index
    %c0_119 = arith.constant 0 : index
    %c0_120 = arith.constant 0 : index
    %391 = vector.load %arg13[%c7_118, %c0_119, %c0_120] : memref<8x64x256xf32, #tpu.memory_space<vmem>>, vector<1x64x256xf32>
    %392 = vector.shape_cast %391 : vector<1x64x256xf32> to vector<64x256xf32>
    %393 = vector.shape_cast %390 : vector<64x256xf32> to vector<1x64x256xf32>
    tpu.vector_store %arg13[%c7_118, %c0_119, %c0_120], %393 {strides = array<i32>} : memref<8x64x256xf32, #tpu.memory_space<vmem>>, vector<1x64x256xf32>,
    return
  }
  func.func @transform_0(%arg0: i32) -> (i32, i32, i32) {
    %c0_i32 = arith.constant 0 : i32
    %c0_i32_0 = arith.constant 0 : i32
    %c0_i32_1 = arith.constant 0 : i32
    return %arg0, %c0_i32, %c0_i32_0 : i32, i32, i32
  }
  func.func @transform_1(%arg0: i32) -> (i32, i32) {
    %c0_i32 = arith.constant 0 : i32
    %c0_i32_0 = arith.constant 0 : i32
    %c0_i32_1 = arith.constant 0 : i32
    return %c0_i32, %c0_i32_0 : i32, i32
  }
  func.func @transform_2(%arg0: i32) -> (i32, i32) {
    %c0_i32 = arith.constant 0 : i32
    %c0_i32_0 = arith.constant 0 : i32
    %c0_i32_1 = arith.constant 0 : i32
    return %c0_i32, %c0_i32_0 : i32, i32
  }
  func.func @transform_3(%arg0: i32) -> (i32, i32) {
    %c0_i32 = arith.constant 0 : i32
    %c0_i32_0 = arith.constant 0 : i32
    %c0_i32_1 = arith.constant 0 : i32
    return %c0_i32, %c0_i32_0 : i32, i32
  }
  func.func @transform_4(%arg0: i32) -> (i32, i32) {
    %c0_i32 = arith.constant 0 : i32
    %c0_i32_0 = arith.constant 0 : i32
    %c0_i32_1 = arith.constant 0 : i32
    return %c0_i32, %c0_i32_0 : i32, i32
  }
  func.func @transform_5(%arg0: i32) -> (i32, i32) {
    %c0_i32 = arith.constant 0 : i32
    %c0_i32_0 = arith.constant 0 : i32
    %c0_i32_1 = arith.constant 0 : i32
    return %c0_i32, %c0_i32_0 : i32, i32
  }
  func.func @transform_6(%arg0: i32) -> (i32, i32) {
    %c0_i32 = arith.constant 0 : i32
    %c0_i32_0 = arith.constant 0 : i32
    %c0_i32_1 = arith.constant 0 : i32
    return %c0_i32, %c0_i32_0 : i32, i32
  }
  func.func @transform_7(%arg0: i32) -> (i32, i32) {
    %c0_i32 = arith.constant 0 : i32
    %c0_i32_0 = arith.constant 0 : i32
    %c0_i32_1 = arith.constant 0 : i32
    return %c0_i32, %c0_i32_0 : i32, i32
  }
  func.func @transform_8(%arg0: i32) -> (i32, i32) {
    %c0_i32 = arith.constant 0 : i32
    %c0_i32_0 = arith.constant 0 : i32
    %c0_i32_1 = arith.constant 0 : i32
    return %c0_i32, %c0_i32_0 : i32, i32
  }
  func.func @transform_9(%arg0: i32) -> (i32, i32) {
    %c0_i32 = arith.constant 0 : i32
    %c0_i32_0 = arith.constant 0 : i32
    %c0_i32_1 = arith.constant 0 : i32
    return %c0_i32, %c0_i32_0 : i32, i32
  }
  func.func @transform_10(%arg0: i32) -> (i32, i32) {
    %c0_i32 = arith.constant 0 : i32
    %c0_i32_0 = arith.constant 0 : i32
    %c0_i32_1 = arith.constant 0 : i32
    return %c0_i32, %c0_i32_0 : i32, i32
  }
  func.func @transform_11(%arg0: i32) -> (i32, i32) {
    %c0_i32 = arith.constant 0 : i32
    %c0_i32_0 = arith.constant 0 : i32
    %c0_i32_1 = arith.constant 0 : i32
    return %c0_i32, %c0_i32_0 : i32, i32
  }
  func.func @transform_12(%arg0: i32) -> (i32, i32, i32) {
    %c0_i32 = arith.constant 0 : i32
    %c0_i32_0 = arith.constant 0 : i32
    %c0_i32_1 = arith.constant 0 : i32
    return %arg0, %c0_i32, %c0_i32_0 : i32, i32, i32
  }
}

</mosaic_0001>

<bundles_post_ra>
// kernel: tpu_custom_call.1
= control target key start
LH: loop header
LB: loop body
LE: loop exit
PB: predicated region body
PF: predicated region fallthrough
CT: control target
= control target key end

     0   :  { %s12876_s0 = inlined_call_operand.hbm [shape: f32[16,32,256], index: 0, kind: input, shape index: {}]   ;;  %s12877_s1 = inlined_call_operand.vmem [shape: bf16[32,32], index: 1, kind: input, shape index: {}]   ;;  %s12878_s2 = inlined_call_operand.vmem [shape: f32[32,1], index: 2, kind: input, shape index: {}]   ;;  %s12879_s3 = inlined_call_operand.hbm [shape: bf16[256,512], index: 3, kind: input, shape index: {}]   ;;  %s12880_s4 = inlined_call_operand.vmem [shape: bf16[64,64], index: 4, kind: input, shape index: {}]   ;;  %s12881_s5 = inlined_call_operand.vmem [shape: f32[64,1], index: 5, kind: input, shape index: {}]   ;;  %s12882_s6 = inlined_call_operand.hbm [shape: bf16[512,256], index: 6, kind: input, shape index: {}]   ;;  %s12883_s7 = inlined_call_operand.hbm [shape: bf16[256,1024], index: 7, kind: input, shape index: {}]   ;;  %s12884_s8 = inlined_call_operand.vmem [shape: bf16[64,64], index: 8, kind: input, shape index: {}]   ;;  %s12885_s9 = inlined_call_operand.vmem [shape: f32[64,1], index: 9, kind: input, shape index: {}]   ;;  %s12886_s10 = inlined_call_operand.hbm [shape: bf16[256,256], index: 10, kind: input, shape index: {}]   ;;  %s12887_s11 = inlined_call_operand.vmem [shape: bf16[64,32], index: 11, kind: input, shape index: {}]   ;;  %s12888_s12 = inlined_call_operand.hbm [shape: f32[16,64,256], index: 12, kind: output, shape index: {}]  }
   0x1   :  { %13086 = sst [smem:[#allocation164_spill]] %s12879_s3 }
   0x2   :  { %13087 = sst [smem:[#allocation165_spill]] %s12882_s6 }
   0x3   :  { %13088 = sst [smem:[#allocation166_spill]] %s12883_s7 }
   0x4   :  { %13089 = sst [smem:[#allocation167_spill]] %s12886_s10 }
   0x5   :  { %17 = vsyncpa [#allocation3], 0 }
   0x6   :  { %19 = vsyncpa [#allocation3 + $0x1], 0 }
   0x7   :  { %20 = vsyncpa [#allocation6], 0 }
   0x8   :  { %21 = vsyncpa [#allocation9], 0 }
   0x9   :  { %22 = vsyncpa [#allocation4], 0 }
   0xa   :  { %24 = vsyncpa [#allocation4 + $0x1], 0  ;;  %s9677_s21 = smov 0   ;;  %s9679_s22 = smov 0  }
   0xb   :  { %s9681_s23 = smov 0   ;;  %s9683_s24 = smov 0  }
   0xc LB: > { %13090 = sst [smem:[#allocation16_spill]] %s9585_s21  ;;  %s9698_s25 = sadd.s32 4294967295, %s9597_s24   ;;  %s9597_s24 = sphi %s9683_s24, %s13644_s24   ;;  %s9593_s23 = sphi %s9681_s23, %s13643_s23   ;;  %s9589_s22 = sphi %s9679_s22, %s13642_s22   ;;  %s9585_s21 = sphi %s9677_s21, %s13641_s21  }
   0xd   : > { %s7376_s26 = sadd.s32 4294967294, %s9597_s24   ;;  %p50_p0 = scmp.ne.s32.totalorder %s9589_s22, %s9585_s21 }
   0xe   : > { %p51_p1 = scmp.eq.s32.totalorder %s9698_s25, 0  ;;  %p305_p2 = scmp.eq.s32.totalorder %s9698_s25, 1 }
   0xf   : > { %p311_p3 = scmp.eq.s32.totalorder %s7376_s26, 1  ;;  %p7377_p5 = scmp.ge.s32.totalorder %s9597_s24, 1 }
  0x10   : > { %p9707_p4 = por %p51_p1, %p50_p0  ;;  %p318_p7 = scmp.lt.s32.totalorder %s9597_s24, 3 }
  0x11   : > { %p9712_p6 = por %p311_p3, %p50_p0  ;;  %s13094_s3 = sld [smem:[#allocation164_spill]] }
  0x12   : > { %p9720_p8 = pnand %p7377_p5, %p318_p7  ;;  %s9599_s15 = smov [#allocation5]  }
  0x13   : > { %s13092_s28 = scalar_select %p9712_p6, 1, 0 }
  0x14   : > { %p9294_p9 = pneg %p9720_p8  ;;  %s337_s16 = sshll.u32 %s9599_s15, 4  ;;  %s338_s16 = int_to_ptr.vmem [resolvable:$true] %s337_s16 }
  0x15   : > { %13093 = sst [smem:[#allocation17_spill]] %s13092_s28  ;;  %s12891_s26 = smov 256  }
  0x16   : > { %p9728_p10 = pnand %p9294_p9, %p51_p1  ;;  %s13097_s7 = sld [smem:[#allocation166_spill]] }
  0x17   : > { %s335_s13 = sshll.u32 %s13094_s3, 4  ;;  %s12892_s29 = smov 16   ;;  %s336_s13 = int_to_ptr.hbm [resolvable:$true] %s335_s13 }
  0x18   : > { %9297 = dma.hbm_to_vmem [thread:$0]  (!%p9728_p10), %s336_s13, 8192, %s338_s16, [#allocation6], %s12891_s26, %s12891_s26, %s12892_s29  }
  0x19   : > { %s9602_s30 = smov [#allocation8]   ;;  %s9603_s3 = smov 512  }
  0x1a   : > { %s371_s15 = sshll.u32 %s9602_s30, 4  ;;  %s9604_s28 = smov 32   ;;  %s372_s15 = int_to_ptr.vmem [resolvable:$true] %s371_s15 }
  0x1b   : > { %s13098_s6 = sld [smem:[#allocation165_spill]]  ;;  %s9605_s21 = smov [#allocation7]  }
  0x1c   : > { %s369_s20 = sshll.u32 %s13097_s7, 4  ;;  %s357_s13 = sshll.u32 %s9605_s21, 4  ;;  %s370_s20 = int_to_ptr.hbm [resolvable:$true] %s369_s20  ;;  %s358_s13 = int_to_ptr.vmem [resolvable:$true] %s357_s13 }
  0x1d   : > { %9303 = dma.hbm_to_vmem [thread:$0]  (!%p9728_p10), %s370_s20, 16384, %s372_s15, [#allocation9], %s9603_s3, %s9603_s3, %s9604_s28  }
  0x1e   : > { %s13099_s10 = sld [smem:[#allocation167_spill]]  ;;  %s9606_s3 = smov 128  }
  0x1f   : > { %s9607_s28 = smov 8   ;;  %s9608_s20 = smov [#allocation10]  }
  0x20   : > { %s391_s15 = sshll.u32 %s9608_s20, 4  ;;  %s9754_s21 = sadd.s32 1, %s9597_s24   ;;  %s392_s15 = int_to_ptr.vmem [resolvable:$true] %s391_s15 }
  0x21   : > { %s355_s7 = sshll.u32 %s13098_s6, 4  ;;  %s37_s18 = sadd.s32 1, %s9593_s23  ;;  %s356_s7 = int_to_ptr.hbm [resolvable:$true] %s355_s7 }
  0x22   : > { %9300 = dma.hbm_to_vmem [thread:$0]  (!%p9728_p10), %s356_s7, 8192, %s358_s13, [#allocation6], %s9606_s3, %s9606_s3, %s9607_s28  }
  0x23   : > { %s34_s19 = ssub.s32 %s9597_s24, %s9754_s21  ;;  %p44_p12 = scmp.ne.s32.totalorder %s9593_s23, %s9589_s22 }
  0x24   : > { %s389_s26 = sshll.u32 %s13099_s10, 4  ;;  %p35_p13 = scmp.eq.s32.totalorder %s34_s19, 0  ;;  %s390_s26 = int_to_ptr.hbm [resolvable:$true] %s389_s26 }
  0x25   : > { %9306 = dma.hbm_to_vmem [thread:$0]  (!%p9728_p10), %s390_s26, 4096, %s392_s15, [#allocation9], %s9606_s3, %s9606_s3, %s9607_s28  }
  0x26   : > { %p45_p0 = scmp.eq.s32.totalorder %s9597_s24, 0  ;;  %p9764_p3 = por %p305_p2, %p44_p12 }
  0x27   : > { %p9319_p5 = scmp.lt.s32.totalorder %s9597_s24, 2  ;;  %s408_s13 = sand.u32 1, %s9593_s23  }
  0x28   : > { %s9770_s7 = scalar_select %p35_p13, %s9593_s23, %s37_s18  }
  0x29   : > { %p46_p7 = por %p45_p0, %p44_p12  ;;  %s7383_s17 = sshll.u32 %s408_s13, 9 }
  0x2a   : > { %s8969_s26 = sshll.u32 %s9597_s24, 9  ;;  %s412_s20 = scalar_lea.vmem [#allocation2], %s7383_s17 }
  0x2b   : > { %s418_s28 = scalar_lea.hbm %s12876_s0, %s8969_s26  ;;  %s421_s15 = sshll.u32 %s412_s20, 4  ;;  %s422_s15 = int_to_ptr.vmem [resolvable:$true] %s421_s15 }
  0x2c   : > { %s419_s19 = sshll.u32 %s418_s28, 4  ;;  %p9777_p2 = pnand %p9319_p5, %p46_p7  ;;  %s420_s19 = int_to_ptr.hbm [resolvable:$true] %s419_s19 }
  0x2d   : > { %s409_s18 = scalar_lea.sflag [#allocation3], %s408_s13  ;;  %s9493_s6 = sshra.s32 %s420_s19, 4  ;;  %s9494_s6 = int_to_ptr.hbm [resolvable:$true] %s9493_s6 }
  0x2e   : > { %s9495_s10 = scalar_lea.hbm %s9494_s6, 512  ;;  %p9497_p10 = pneg %p9777_p2 }
  0x2f   : > { %p9496_p9 = scmp.ne.s32.totalorder %s9494_s6, %s9495_s10  ;;  %s9500_s30 = scalar_lea.hbm %s12876_s0, 1024 }
  0x30   : > { %p9501_p0 = scmp.lt.s32.totalorder %s9494_s6, %s12876_s0  ;;  %p9502_p5 = scmp.lt.s32.totalorder %s9500_s30, %s9495_s10 }
  0x31   : > { %p9498_p12 = pnand %p9497_p10, %p9496_p9 }
  0x32   : > { %p9503_p7 = por %p9502_p5, %p9501_p0 }
  0x33   : > { %p9499_p13 = pneg %p9498_p12 }
  0x35   : > { %p9504_p11 = pnand %p9503_p7, %p9499_p13 }
  0x37   : > { %9507 = shalt.err (!%p9504_p11)
}
  0x38   : > { %s13102_s13 = smov 16   ;;  %s13103_s20 = smov 256  }
  0x39   : > { %9310 = dma.hbm_to_vmem [thread:$0]  (!%p9777_p2), %s420_s19, 8192, %s422_s15, %s409_s18, %s13103_s20, %s13103_s20, %s13102_s13  }
  0x3a   : > { %433 = sbr.rel (%p9720_p8) target bundleno = 2659 (0xa63), region = 68 }
  0x3f   : > { %s9797_s26 = sand.u32 1, %s9589_s22  }
  0x40   : > { %s7388_s6 = sshll.u32 %s9797_s26, 9  ;;  %s436_s10 = scalar_lea.sflag [#allocation3], %s9797_s26 }
  0x41   : > { %s9801_s17 = scalar_lea.vmem [#allocation2], %s7388_s6 }
  0x42   : > { %9568 = dma.done.wait (%p9707_p4), %s436_s10, 8192  }
  0x43   : > { %9570 = vsyncadd (%p9707_p4), %s436_s10, 4294959104 }
  0x44   : > { %9572 = dma.done.wait (%p51_p1), [#allocation6], 16384  }
  0x45   : > { %9574 = vsyncadd (%p51_p1), [#allocation6], 4294950912 }
  0x46   : > { %9576 = dma.done.wait (%p51_p1), [#allocation9], 20480  }
  0x47   : > { %9578 = vsyncadd (%p51_p1), [#allocation9], 4294946816  ;;  %v9609_v0 = vmov 0   ;;  %v534_v1 = vld [vmem:[%s12878_s2 + $0x10] sm:$0xff]  ;;  %v532_v2 = vld [vmem:[%s12878_s2] sm:$0xff]  ;;  %vm594_vm0 = vcmask 261120  }
  0x48   : > { %9371 = vset.pattern.permute.xlu1 %v9609_v0  ;;  %9370 = vset.pattern.permute.xlu0 %v9609_v0  ;;  %v556_v3 = vld [vmem:[%s9801_s17 + $0x20] sm:$0xff]  ;;  %v558_v4 = vld [vmem:[%s9801_s17 + $0x30] sm:$0xff]  ;;  %v557_v5 = vld [vmem:[%s9801_s17 + $0x28] sm:$0xff]  ;;  %vm2256_vm1 = vcmask 523264   ;;  %s7393_s27 = sshll.u32 %s9797_s26, 10  ;;  %s9273_s29 = sshll.u32 %s9698_s25, 10 }
  0x49   : > { %9372 = vset.pattern.permute.xlu2 %v9609_v0  ;;  %576 = vperm.xlu1 %9371, %v534_v1   ;;  %v559_v6 = vld [vmem:[%s9801_s17 + $0x38] sm:$0xff]  ;;  %v562_v7 = vpack.c.bf16 %v558_v4, %v556_v3  ;;  %v7410_v9 = vld [vmem:[%s9801_s17 + $0x60] sm:$0xff]  ;;  %v7412_v10 = vld [vmem:[%s9801_s17 + $0x70] sm:$0xff]  ;;  %s12611_s14 = scalar_lea.vmem [#allocation11], %s7393_s27  ;;  %s7261_s18 = scalar_lea.hbm %s12888_s12, %s9273_s29 }
  0x4a   : > { %566 = vperm.xlu0 %9370, %v532_v2   ;;  %v563_v8 = vpack.c.bf16 %v559_v6, %v557_v5  ;;  %v7411_v11 = vld [vmem:[%s9801_s17 + $0x68] sm:$0xff]  ;;  %v658_v12 = vpack.c.bf16 %v7412_v10, %v7410_v9  ;;  %v7413_v13 = vld [vmem:[%s9801_s17 + $0x78] sm:$0xff]  ;;  %v552_v14 = vld [vmem:[%s9801_s17] sm:$0xff]  ;;  %s7264_s30 = sshll.u32 %s7261_s18, 4  ;;  %s7249_s3 = scalar_lea.sflag [#allocation4], %s9797_s26  ;;  %s7265_s30 = int_to_ptr.hbm [resolvable:$true] %s7264_s30 }
  0x4b   : > { %v554_v15 = vld [vmem:[%s9801_s17 + $0x10] sm:$0xff]  ;;  %607 = vmatpush.bf16.msra.mxu0 %v562_v7  ;;  %v659_v16 = vpack.c.bf16 %v7413_v13, %v7411_v11  ;;  %v553_v18 = vld [vmem:[%s9801_s17 + $0x8] sm:$0xff]  ;;  %v555_v19 = vld [vmem:[%s9801_s17 + $0x18] sm:$0xff]  ;;  %s9537_s28 = sshra.s32 %s7265_s30, 4  ;;  %s9543_s6 = scalar_lea.hbm %s12888_s12, 2048  ;;  %s9538_s28 = int_to_ptr.hbm [resolvable:$true] %s9537_s28 }
  0x4c   : > { %626 = vmatpush.bf16.msra.mxu1 %v563_v8  ;;  %v560_v17 = vpack.c.bf16 %v554_v15, %v552_v14  ;;  %v7406_v20 = vld [vmem:[%s9801_s17 + $0x40] sm:$0xff]  ;;  %666 = vmatpush.bf16.msra.mxu2 %v658_v12  ;;  %v561_v21 = vpack.c.bf16 %v555_v19, %v553_v18  ;;  %v7408_v22 = vld [vmem:[%s9801_s17 + $0x50] sm:$0xff]  ;;  %v7407_v23 = vld [vmem:[%s9801_s17 + $0x48] sm:$0xff]  ;;  %s9539_s13 = scalar_lea.hbm %s9538_s28, 1024  ;;  %p9544_p11 = scmp.lt.s32.totalorder %s9538_s28, %s12888_s12 }
  0x4d   : > { %v7409_v24 = vld [vmem:[%s9801_s17 + $0x58] sm:$0xff]  ;;  %685 = vmatpush.bf16.msra.mxu3 %v659_v16  ;;  %v656_v25 = vpack.c.bf16 %v7408_v22, %v7406_v20  ;;  %v533_v28 = vld [vmem:[%s12878_s2 + $0x8] sm:$0xff]  ;;  %v9846_v29 = vld [vmem:[%s12877_s1] sm:$0xff]  ;;  %p9540_p1 = scmp.ne.s32.totalorder %s9538_s28, %s9539_s13  ;;  %p9545_p2 = scmp.lt.s32.totalorder %s9543_s6, %s9539_s13 }
  0x4e   : > { %v657_v26 = vpack.c.bf16 %v7409_v24, %v7407_v23  ;;  %v535_v27 = vld [vmem:[%s12878_s2 + $0x18] sm:$0xff]  ;;  %v7422_v30 = vld [vmem:[%s9801_s17 + $0xa0] sm:$0xff]  ;;  %v7424_v31 = vld [vmem:[%s9801_s17 + $0xb0] sm:$0xff] }
  0x4f   : > { %608 = vmatpush.bf16.msra.mxu0 %v560_v17  ;;  %v717_v32 = vpack.c.bf16 %v7424_v31, %v7422_v30  ;;  %v7423_v33 = vld [vmem:[%s9801_s17 + $0xa8] sm:$0xff]  ;;  %v7425_v34 = vld [vmem:[%s9801_s17 + $0xb8] sm:$0xff]  ;;  %v7434_v35 = vld [vmem:[%s9801_s17 + $0xe0] sm:$0xff]  ;;  %p9541_p4 = pnand %p9540_p1, %p9764_p3  ;;  %p9546_p9 = por %p9545_p2, %p9544_p11 }
  0x50   : > { %627 = vmatpush.bf16.msra.mxu1 %v561_v21  ;;  %667 = vmatpush.bf16.msra.mxu2 %v656_v25  ;;  %v718_v36 = vpack.c.bf16 %v7425_v34, %v7423_v33  ;;  %v7436_v37 = vld [vmem:[%s9801_s17 + $0xf0] sm:$0xff]  ;;  %v7435_v38 = vld [vmem:[%s9801_s17 + $0xe8] sm:$0xff]  ;;  %v7437_v39 = vld [vmem:[%s9801_s17 + $0xf8] sm:$0xff] }
  0x51   : > { %581 = vperm.xlu1 %9371, %v535_v27   ;;  %686 = vmatpush.bf16.msra.mxu3 %v657_v26  ;;  %v776_v40 = vpack.c.bf16 %v7436_v37, %v7434_v35  ;;  %v777_v41 = vpack.c.bf16 %v7437_v39, %v7435_v38  ;;  %v7418_v42 = vld [vmem:[%s9801_s17 + $0x80] sm:$0xff]  ;;  %v7420_v43 = vld [vmem:[%s9801_s17 + $0x90] sm:$0xff]  ;;  %v7419_v44 = vld [vmem:[%s9801_s17 + $0x88] sm:$0xff]  ;;  %p9542_p8 = pneg %p9541_p4 }
  0x52   : > { %571 = vperm.xlu0 %9370, %v533_v28   ;;  %7402 = vmatmul.msk.bf16.vlgmr.msra.gmra.mxu0 %vm594_vm0, %v9846_v29  ;;  %v715_v45 = vpack.c.bf16 %v7420_v43, %v7418_v42  ;;  %v7421_v46 = vld [vmem:[%s9801_s17 + $0x98] sm:$0xff]  ;;  %v7430_v47 = vld [vmem:[%s9801_s17 + $0xc0] sm:$0xff]  ;;  %v7432_v48 = vld [vmem:[%s9801_s17 + $0xd0] sm:$0xff] }
  0x53   : > { %7404 = vmatmul.msk.bf16.vlgmr.msra.gmra.mxu1 %vm594_vm0, %v9846_v29  ;;  %7414 = vmatmul.msk.bf16.vlgmr.msra.gmra.mxu2 %vm594_vm0, %v9846_v29  ;;  %v537_v49 = vld [vmem:[%s12881_s5 + $0x8] sm:$0xff]  ;;  %v716_v50 = vpack.c.bf16 %v7421_v46, %v7419_v44  ;;  %v774_v51 = vpack.c.bf16 %v7432_v48, %v7430_v47  ;;  %v7433_v53 = vld [vmem:[%s9801_s17 + $0xd8] sm:$0xff]  ;;  %v536_v54 = vld [vmem:[%s12881_s5] sm:$0xff]  ;;  %p9547_p10 = pnand %p9546_p9, %p9542_p8 }
  0x54   : > { %725 = vmatpush.bf16.msrb.mxu0 %v717_v32  ;;  %7416 = vmatmul.msk.bf16.vlgmr.msra.gmra.mxu3 %vm594_vm0, %v9846_v29  ;;  %v7431_v52 = vld [vmem:[%s9801_s17 + $0xc8] sm:$0xff]  ;;  %v538_v56 = vld [vmem:[%s12881_s5 + $0x10] sm:$0xff]  ;;  %v543_v57 = vld [vmem:[%s12881_s5 + $0x38] sm:$0xff] }
  0x55   : > { %744 = vmatpush.bf16.msrb.mxu1 %v718_v36  ;;  %784 = vmatpush.bf16.msrb.mxu2 %v776_v40  ;;  %v775_v55 = vpack.c.bf16 %v7433_v53, %v7431_v52  ;;  %v9887_v58 = vld [vmem:[%s12877_s1 + $0x8] sm:$0xff]  ;;  %v544_v60 = vld [vmem:[%s12885_s9] sm:$0xff]  ;;  %v7448_v62 = vld [vmem:[%s9801_s17 + $0x130] sm:$0xff] }
  0x56   : > { %803 = vmatpush.bf16.msrb.mxu3 %v777_v41  ;;  %v545_v59 = vld [vmem:[%s12885_s9 + $0x8] sm:$0xff]  ;;  %v7446_v61 = vld [vmem:[%s9801_s17 + $0x120] sm:$0xff]  ;;  %v7449_v1 = vld [vmem:[%s9801_s17 + $0x138] sm:$0xff] }
  0x57   : > { %v7447_v63 = vld [vmem:[%s9801_s17 + $0x128] sm:$0xff]  ;;  %v835_v0 = vpack.c.bf16 %v7448_v62, %v7446_v61  ;;  %v7458_v2 = vld [vmem:[%s9801_s17 + $0x160] sm:$0xff]  ;;  %v7460_v3 = vld [vmem:[%s9801_s17 + $0x170] sm:$0xff] }
  0x58   : > { %726 = vmatpush.bf16.msrb.mxu0 %v715_v45  ;;  %v836_v4 = vpack.c.bf16 %v7449_v1, %v7447_v63  ;;  %v894_v5 = vpack.c.bf16 %v7460_v3, %v7458_v2  ;;  %v7459_v6 = vld [vmem:[%s9801_s17 + $0x168] sm:$0xff]  ;;  %v7461_v7 = vld [vmem:[%s9801_s17 + $0x178] sm:$0xff]  ;;  %v7442_v8 = vld [vmem:[%s9801_s17 + $0x100] sm:$0xff] }
  0x59   : > { %2203 = vperm.xlu1 %9371, %v537_v49   ;;  %745 = vmatpush.bf16.msrb.mxu1 %v716_v50  ;;  %v895_v9 = vpack.c.bf16 %v7461_v7, %v7459_v6  ;;  %v7444_v10 = vld [vmem:[%s9801_s17 + $0x110] sm:$0xff]  ;;  %v7443_v11 = vld [vmem:[%s9801_s17 + $0x108] sm:$0xff]  ;;  %v7445_v12 = vld [vmem:[%s9801_s17 + $0x118] sm:$0xff] }
  0x5a   : > { %2198 = vperm.xlu0 %9370, %v536_v54   ;;  %785 = vmatpush.bf16.msrb.mxu2 %v774_v51  ;;  %v833_v13 = vpack.c.bf16 %v7444_v10, %v7442_v8  ;;  %v834_v14 = vpack.c.bf16 %v7445_v12, %v7443_v11  ;;  %v7454_v15 = vld [vmem:[%s9801_s17 + $0x140] sm:$0xff]  ;;  %v7456_v16 = vld [vmem:[%s9801_s17 + $0x150] sm:$0xff]  ;;  %v7455_v17 = vld [vmem:[%s9801_s17 + $0x148] sm:$0xff] }
  0x5b   : > { %804 = vmatpush.bf16.msrb.mxu3 %v775_v55  ;;  %v892_v18 = vpack.c.bf16 %v7456_v16, %v7454_v15  ;;  %v7457_v19 = vld [vmem:[%s9801_s17 + $0x158] sm:$0xff]  ;;  %v546_v21 = vld [vmem:[%s12885_s9 + $0x10] sm:$0xff]  ;;  %v549_v22 = vld [vmem:[%s12885_s9 + $0x28] sm:$0xff] }
  0x5c   : > { %843 = vmatpush.bf16.msra.mxu0 %v835_v0  ;;  %v893_v20 = vpack.c.bf16 %v7457_v19, %v7455_v17  ;;  %v551_v23 = vld [vmem:[%s12885_s9 + $0x38] sm:$0xff]  ;;  %v550_v24 = vld [vmem:[%s12885_s9 + $0x30] sm:$0xff]  ;;  %v7470_v25 = vld [vmem:[%s9801_s17 + $0x1a0] sm:$0xff] }
  0x5d   : > { %862 = vmatpush.bf16.msra.mxu1 %v836_v4  ;;  %v7472_v26 = vld [vmem:[%s9801_s17 + $0x1b0] sm:$0xff]  ;;  %v7471_v27 = vld [vmem:[%s9801_s17 + $0x1a8] sm:$0xff]  ;;  %v7473_v30 = vld [vmem:[%s9801_s17 + $0x1b8] sm:$0xff] }
  0x5e   : > { %902 = vmatpush.bf16.msra.mxu2 %v894_v5  ;;  %v953_v28 = vpack.c.bf16 %v7472_v26, %v7470_v25  ;;  %v7482_v31 = vld [vmem:[%s9801_s17 + $0x1e0] sm:$0xff]  ;;  %v7484_v32 = vld [vmem:[%s9801_s17 + $0x1f0] sm:$0xff]  ;;  %v954_v33 = vpack.c.bf16 %v7473_v30, %v7471_v27  ;;  %v7483_v35 = vld [vmem:[%s9801_s17 + $0x1e8] sm:$0xff] }
  0x5f   : > { %921 = vmatpush.bf16.msra.mxu3 %v895_v9  ;;  %v1012_v34 = vpack.c.bf16 %v7484_v32, %v7482_v31  ;;  %v7485_v36 = vld [vmem:[%s9801_s17 + $0x1f8] sm:$0xff]  ;;  %v7466_v37 = vld [vmem:[%s9801_s17 + $0x180] sm:$0xff]  ;;  %v7468_v39 = vld [vmem:[%s9801_s17 + $0x190] sm:$0xff] }
  0x60   : > { %844 = vmatpush.bf16.msra.mxu0 %v833_v13  ;;  %v1013_v38 = vpack.c.bf16 %v7485_v36, %v7483_v35  ;;  %v7467_v40 = vld [vmem:[%s9801_s17 + $0x188] sm:$0xff]  ;;  %v7469_v41 = vld [vmem:[%s9801_s17 + $0x198] sm:$0xff]  ;;  %v951_v42 = vpack.c.bf16 %v7468_v39, %v7466_v37  ;;  %v7478_v44 = vld [vmem:[%s9801_s17 + $0x1c0] sm:$0xff] }
  0x61   : > { %2208 = vperm.xlu1 %9371, %v538_v56   ;;  %863 = vmatpush.bf16.msra.mxu1 %v834_v14  ;;  %v952_v43 = vpack.c.bf16 %v7469_v41, %v7467_v40  ;;  %v7480_v45 = vld [vmem:[%s9801_s17 + $0x1d0] sm:$0xff]  ;;  %v7479_v46 = vld [vmem:[%s9801_s17 + $0x1c8] sm:$0xff]  ;;  %v7481_v48 = vld [vmem:[%s9801_s17 + $0x1d8] sm:$0xff]  ;;  %s7262_s17 = sshll.u32 %s12611_s14, 4  ;;  %s7263_s17 = int_to_ptr.vmem [resolvable:$true] %s7262_s17 }
  0x62   : > { %2233 = vperm.xlu0 %9370, %v543_v57   ;;  %7403 = vmatmul.msk.bf16.gmra.mxu0 %vm594_vm0, %v9887_v58  ;;  %v1010_v47 = vpack.c.bf16 %v7480_v45, %v7478_v44  ;;  %v1011_v49 = vpack.c.bf16 %v7481_v48, %v7479_v46  ;;  %v7604_v50 = vld [vmem:[#allocation5 + $0xe0] sm:$0xf]  ;;  %v9014_v51 = vld [vmem:[#allocation5 + $0xec] sm:$0xf0]  ;;  %v9012_v55 = vld [vmem:[#allocation5 + $0xe4] sm:$0xf] }
  0x63   : > { %7405 = vmatmul.msk.bf16.gmra.mxu1 %vm594_vm0, %v9887_v58  ;;  %7415 = vmatmul.msk.bf16.gmra.mxu2 %vm594_vm0, %v9887_v58  ;;  %v7732_v52 = vld [vmem:[#allocation5 + $0x1e0] sm:$0xf]  ;;  %v7605_v53 = vor.u32 %v9014_v51, %v7604_v50  ;;  %v9046_v54 = vld [vmem:[#allocation5 + $0x1ec] sm:$0xf0]  ;;  %v7606_v56 = vld [vmem:[#allocation5 + $0xf0] sm:$0xf0] }
  0x64   : > { %7417 = vmatmul.msk.bf16.gmra.mxu3 %vm594_vm0, %v9887_v58  ;;  %903 = vmatpush.bf16.msra.mxu2 %v892_v18  ;;  %v7733_v57 = vor.u32 %v9046_v54, %v7732_v52  ;;  %v7734_v61 = vld [vmem:[#allocation5 + $0x1f0] sm:$0xf0]  ;;  %v7588_v63 = vld [vmem:[#allocation5 + $0xc0] sm:$0xf]  ;;  %v9010_v0 = vld [vmem:[#allocation5 + $0xcc] sm:$0xf0] }
  0x65   : > { %922 = vmatpush.bf16.msra.mxu3 %v893_v20  ;;  %v7716_v1 = vld [vmem:[#allocation5 + $0x1c0] sm:$0xf]  ;;  %v7589_v2 = vor.u32 %v9010_v0, %v7588_v63  ;;  %v9042_v3 = vld [vmem:[#allocation5 + $0x1cc] sm:$0xf0]  ;;  %v9008_v4 = vld [vmem:[#allocation5 + $0xc4] sm:$0xf] }
  0x66   : > { %v7590_v5 = vld [vmem:[#allocation5 + $0xd0] sm:$0xf0]  ;;  %v7717_v6 = vor.u32 %v9042_v3, %v7716_v1  ;;  %v9040_v8 = vld [vmem:[#allocation5 + $0x1c4] sm:$0xf]  ;;  %v7572_v10 = vld [vmem:[#allocation5 + $0xa0] sm:$0xf] }
  0x67   : > { %v7593_v7 = vor.u32 %v9008_v4, %v7590_v5  ;;  %v7718_v9 = vld [vmem:[#allocation5 + $0x1d0] sm:$0xf0]  ;;  %v9006_v12 = vld [vmem:[#allocation5 + $0xac] sm:$0xf0]  ;;  %v7700_v13 = vld [vmem:[#allocation5 + $0x1a0] sm:$0xf] }
  0x68   : > { %v7721_v11 = vor.u32 %v9040_v8, %v7718_v9  ;;  %v9038_v14 = vld [vmem:[#allocation5 + $0x1ac] sm:$0xf0]  ;;  %v7573_v15 = vor.u32 %v9006_v12, %v7572_v10  ;;  %v9004_v17 = vld [vmem:[#allocation5 + $0xa4] sm:$0xf]  ;;  %v7574_v18 = vld [vmem:[#allocation5 + $0xb0] sm:$0xf0] }
  0x69   : > { %5328 = vperm.xlu1 %9371, %v545_v59   ;;  %v7609_v59 = vor.u32 %v9012_v55, %v7606_v56  ;;  %v7701_v16 = vor.u32 %v9038_v14, %v7700_v13  ;;  %v9036_v19 = vld [vmem:[#allocation5 + $0x1a4] sm:$0xf]  ;;  %v7577_v20 = vor.u32 %v9004_v17, %v7574_v18  ;;  %v7684_v25 = vld [vmem:[#allocation5 + $0x180] sm:$0xf]  ;;  %v9034_v27 = vld [vmem:[#allocation5 + $0x18c] sm:$0xf0] }
  0x6a   : > { %5323 = vperm.xlu0 %9370, %v544_v60   ;;  %v9044_v60 = vld [vmem:[#allocation5 + $0x1e4] sm:$0xf]  ;;  %v7558_v30 = vld [vmem:[#allocation5 + $0x90] sm:$0xf0]  ;;  %v7685_v31 = vor.u32 %v9034_v27, %v7684_v25  ;;  %v7540_v36 = vld [vmem:[#allocation5 + $0x60] sm:$0xf] }
  0x6b   : > { %v7737_v62 = vor.u32 %v9044_v60, %v7734_v61  ;;  %v8998_v37 = vld [vmem:[#allocation5 + $0x6c] sm:$0xf0]  ;;  %v8996_v41 = vld [vmem:[#allocation5 + $0x64] sm:$0xf]  ;;  %v7670_v46 = vld [vmem:[#allocation5 + $0x170] sm:$0xf0] }
  0x6c   : > { %v7541_v39 = vor.u32 %v8998_v37, %v7540_v36  ;;  %v9030_v40 = vld [vmem:[#allocation5 + $0x16c] sm:$0xf0]  ;;  %v9028_v45 = vld [vmem:[#allocation5 + $0x164] sm:$0xf]  ;;  %v7524_v48 = vld [vmem:[#allocation5 + $0x40] sm:$0xf] }
  0x6d   : > { %v7652_v50 = vld [vmem:[#allocation5 + $0x140] sm:$0xf]  ;;  %v9026_v52 = vld [vmem:[#allocation5 + $0x14c] sm:$0xf0]  ;;  %v7526_v54 = vld [vmem:[#allocation5 + $0x50] sm:$0xf0] }
  0x6e   : > { %v7653_v55 = vor.u32 %v9026_v52, %v7652_v50  ;;  %v7508_v61 = vld [vmem:[#allocation5 + $0x20] sm:$0xf]  ;;  %v9022_v1 = vld [vmem:[#allocation5 + $0x12c] sm:$0xf0]  ;;  %v7510_v3 = vld [vmem:[#allocation5 + $0x30] sm:$0xf0] }
  0x6f   : > { %v7636_v63 = vld [vmem:[#allocation5 + $0x120] sm:$0xf]  ;;  %v8986_v9 = vld [vmem:[#allocation5 + $0xc] sm:$0xf0]  ;;  %v8984_v13 = vld [vmem:[#allocation5 + $0x4] sm:$0xf] }
  0x70   : > { %v7637_v4 = vor.u32 %v9022_v1, %v7636_v63  ;;  %v7492_v8 = vld [vmem:[#allocation5] sm:$0xf]  ;;  %v9018_v12 = vld [vmem:[#allocation5 + $0x10c] sm:$0xf0]  ;;  %v7494_v14 = vld [vmem:[#allocation5 + $0x10] sm:$0xf0] }
  0x71   : > { %5333 = vperm.xlu1 %9371, %v546_v21   ;;  %v7702_v21 = vld [vmem:[#allocation5 + $0x1b0] sm:$0xf0]  ;;  %v7620_v10 = vld [vmem:[#allocation5 + $0x100] sm:$0xf]  ;;  %v9016_v17 = vld [vmem:[#allocation5 + $0x104] sm:$0xf] }
  0x72   : > { %5348 = vperm.xlu0 %9370, %v549_v22   ;;  %7426 = vmatmul.msk.bf16.vlgmr.msrb.gmra.mxu0 %vm594_vm0, %v9846_v29  ;;  %v7705_v22 = vor.u32 %v9036_v19, %v7702_v21  ;;  %v7622_v18 = vld [vmem:[#allocation5 + $0x110] sm:$0xf0] }
  0x73   : > { %7428 = vmatmul.msk.bf16.vlgmr.msrb.gmra.mxu1 %vm594_vm0, %v9846_v29  ;;  %7438 = vmatmul.msk.bf16.vlgmr.msrb.gmra.mxu2 %vm594_vm0, %v9846_v29  ;;  %v7625_v19 = vor.u32 %v9016_v17, %v7622_v18 }
  0x74   : > { %7440 = vmatmul.msk.bf16.vlgmr.msrb.gmra.mxu3 %vm594_vm0, %v9846_v29  ;;  %961 = vmatpush.bf16.msrb.mxu0 %v953_v28  ;;  %v9000_v28 = vld [vmem:[#allocation5 + $0x84] sm:$0xf] }
  0x75   : > { %980 = vmatpush.bf16.msrb.mxu1 %v954_v33  ;;  %1020 = vmatpush.bf16.msrb.mxu2 %v1012_v34  ;;  %v7561_v32 = vor.u32 %v9000_v28, %v7558_v30  ;;  %v9032_v33 = vld [vmem:[#allocation5 + $0x184] sm:$0xf]  ;;  %v7686_v34 = vld [vmem:[#allocation5 + $0x190] sm:$0xf0] }
  0x76   : > { %1039 = vmatpush.bf16.msrb.mxu3 %v1013_v38  ;;  %v7689_v35 = vor.u32 %v9032_v33, %v7686_v34  ;;  %v7668_v38 = vld [vmem:[#allocation5 + $0x160] sm:$0xf] }
  0x78   : > { %962 = vmatpush.bf16.msrb.mxu0 %v951_v42  ;;  %v7542_v42 = vld [vmem:[#allocation5 + $0x70] sm:$0xf0] }
  0x79   : > { %5358 = vperm.xlu1 %9371, %v551_v23   ;;  %981 = vmatpush.bf16.msrb.mxu1 %v952_v43  ;;  %v7556_v23 = vld [vmem:[#allocation5 + $0x80] sm:$0xf]  ;;  %v7669_v43 = vor.u32 %v9030_v40, %v7668_v38  ;;  %v7545_v44 = vor.u32 %v8996_v41, %v7542_v42 }
  0x7a   : > { %5353 = vperm.xlu0 %9370, %v550_v24   ;;  %1021 = vmatpush.bf16.msrb.mxu2 %v1010_v47  ;;  %v9002_v24 = vld [vmem:[#allocation5 + $0x8c] sm:$0xf0]  ;;  %v7673_v47 = vor.u32 %v9028_v45, %v7670_v46 }
  0x7b   : > { %1040 = vmatpush.bf16.msrb.mxu3 %v1011_v49  ;;  %v7557_v26 = vor.u32 %v9002_v24, %v7556_v23  ;;  %v8994_v49 = vld [vmem:[#allocation5 + $0x4c] sm:$0xf0] }
  0x7c   : > { %v7525_v51 = vor.u32 %v8994_v49, %v7524_v48 }
  0x82   : > { %7427 = vmatmul.msk.bf16.gmra.mxu0 %vm594_vm0, %v9887_v58 }
  0x83   : > { %7429 = vmatmul.msk.bf16.gmra.mxu1 %vm594_vm0, %v9887_v58  ;;  %7439 = vmatmul.msk.bf16.gmra.mxu2 %vm594_vm0, %v9887_v58 }
  0x84   : > { %7441 = vmatmul.msk.bf16.gmra.mxu3 %vm594_vm0, %v9887_v58 }
  0x92   : > { %7450 = vmatmul.msk.bf16.vlgmr.msra.gmra.mxu0 %vm594_vm0, %v9846_v29 }
  0x93   : > { %7452 = vmatmul.msk.bf16.vlgmr.msra.gmra.mxu1 %vm594_vm0, %v9846_v29  ;;  %7462 = vmatmul.msk.bf16.vlgmr.msra.gmra.mxu2 %vm594_vm0, %v9846_v29 }
  0x94   : > { %7464 = vmatmul.msk.bf16.vlgmr.msra.gmra.mxu3 %vm594_vm0, %v9846_v29  ;;  %1476 = vmatpush.bf16.msra.mxu0 %v7605_v53  ;;  %v8992_v53 = vld [vmem:[#allocation5 + $0x44] sm:$0xf] }
  0x95   : > { %1565 = vmatpush.bf16.msra.mxu1 %v7733_v57  ;;  %1654 = vmatpush.bf16.msra.mxu2 %v7609_v59  ;;  %v7529_v56 = vor.u32 %v8992_v53, %v7526_v54  ;;  %v9024_v57 = vld [vmem:[#allocation5 + $0x144] sm:$0xf]  ;;  %v7654_v59 = vld [vmem:[#allocation5 + $0x150] sm:$0xf0] }
  0x96   : > { %1743 = vmatpush.bf16.msra.mxu3 %v7737_v62  ;;  %v7657_v60 = vor.u32 %v9024_v57, %v7654_v59  ;;  %v8990_v62 = vld [vmem:[#allocation5 + $0x2c] sm:$0xf0] }
  0x97   : > { %v7509_v0 = vor.u32 %v8990_v62, %v7508_v61 }
  0x98   : > { %1477 = vmatpush.bf16.msra.mxu0 %v7589_v2  ;;  %v8988_v2 = vld [vmem:[#allocation5 + $0x24] sm:$0xf] }
  0x99   : > { %1566 = vmatpush.bf16.msra.mxu1 %v7717_v6  ;;  %1655 = vmatpush.bf16.msra.mxu2 %v7593_v7  ;;  %v7513_v5 = vor.u32 %v8988_v2, %v7510_v3  ;;  %v7638_v6 = vld [vmem:[#allocation5 + $0x130] sm:$0xf0] }
  0x9a   : > { %1744 = vmatpush.bf16.msra.mxu3 %v7721_v11  ;;  %v7493_v11 = vor.u32 %v8986_v9, %v7492_v8 }
  0x9c   : > { %1478 = vmatpush.bf16.msra.mxu0 %v7573_v15  ;;  %v7621_v15 = vor.u32 %v9018_v12, %v7620_v10 }
  0x9d   : > { %1567 = vmatpush.bf16.msra.mxu1 %v7701_v16  ;;  %1656 = vmatpush.bf16.msra.mxu2 %v7577_v20  ;;  %v7497_v16 = vor.u32 %v8984_v13, %v7494_v14 }
  0x9e   : > { %1745 = vmatpush.bf16.msra.mxu3 %v7705_v22 }
  0xa0   : > { %1479 = vmatpush.bf16.msra.mxu0 %v7557_v26 }
  0xa1   : > { %1568 = vmatpush.bf16.msra.mxu1 %v7685_v31  ;;  %1657 = vmatpush.bf16.msra.mxu2 %v7561_v32 }
  0xa2   : > { %7451 = vmatmul.msk.bf16.gmra.mxu0 %vm594_vm0, %v9887_v58  ;;  %1746 = vmatpush.bf16.msra.mxu3 %v7689_v35 }
  0xa3   : > { %7453 = vmatmul.msk.bf16.gmra.mxu1 %vm594_vm0, %v9887_v58  ;;  %7463 = vmatmul.msk.bf16.gmra.mxu2 %vm594_vm0, %v9887_v58 }
  0xa4   : > { %7465 = vmatmul.msk.bf16.gmra.mxu3 %vm594_vm0, %v9887_v58  ;;  %1480 = vmatpush.bf16.msra.mxu0 %v7541_v39 }
  0xa5   : > { %1569 = vmatpush.bf16.msra.mxu1 %v7669_v43  ;;  %1658 = vmatpush.bf16.msra.mxu2 %v7545_v44 }
  0xa6   : > { %1747 = vmatpush.bf16.msra.mxu3 %v7673_v47 }
  0xa8   : > { %1481 = vmatpush.bf16.msra.mxu0 %v7525_v51 }
  0xa9   : > { %1570 = vmatpush.bf16.msra.mxu1 %v7653_v55  ;;  %1659 = vmatpush.bf16.msra.mxu2 %v7529_v56 }
  0xaa   : > { %1748 = vmatpush.bf16.msra.mxu3 %v7657_v60 }
  0xac   : > { %1482 = vmatpush.bf16.msra.mxu0 %v7509_v0 }
  0xad   : > { %1571 = vmatpush.bf16.msra.mxu1 %v7637_v4  ;;  %1660 = vmatpush.bf16.msra.mxu2 %v7513_v5 }
  0xb0   : > { %1483 = vmatpush.bf16.msra.mxu0 %v7493_v11 }
  0xb1   : > { %1572 = vmatpush.bf16.msra.mxu1 %v7621_v15  ;;  %1661 = vmatpush.bf16.msra.mxu2 %v7497_v16 }
  0xb2   : > { %7474 = vmatmul.msk.bf16.vlgmr.msrb.gmra.mxu0 %vm594_vm0, %v9846_v29 }
  0xb3   : > { %7476 = vmatmul.msk.bf16.vlgmr.msrb.gmra.mxu1 %vm594_vm0, %v9846_v29  ;;  %7486 = vmatmul.msk.bf16.vlgmr.msrb.gmra.mxu2 %vm594_vm0, %v9846_v29 }
  0xb4   : > { %7488 = vmatmul.msk.bf16.vlgmr.msrb.gmra.mxu3 %vm594_vm0, %v9846_v29  ;;  %v9020_v29 = vld [vmem:[#allocation5 + $0x124] sm:$0xf] }
  0xb5   : > { %v7641_v7 = vor.u32 %v9020_v29, %v7638_v6 }
  0xb7   : > { %1749 = vmatpush.bf16.msra.mxu3 %v7641_v7 }
  0xbb   : > { %1750 = vmatpush.bf16.msra.mxu3 %v7625_v19  ;;  %v10013_v36 = vpop.permute.xlu1 %576 }
  0xbc   : > { %v9995_v20 = vpop.permute.xlu0 %566 }
  0xc2   : > { %7475 = vmatmul.msk.bf16.gmra.mxu0 %vm594_vm0, %v9887_v58 }
  0xc3   : > { %7477 = vmatmul.msk.bf16.gmra.mxu1 %vm594_vm0, %v9887_v58  ;;  %7487 = vmatmul.msk.bf16.gmra.mxu2 %vm594_vm0, %v9887_v58  ;;  %v10029_v43 = vpop.permute.xlu1 %581 }
  0xc4   : > { %7489 = vmatmul.msk.bf16.gmra.mxu3 %vm594_vm0, %v9887_v58  ;;  %v9997_v23 = vpop.permute.xlu0 %571 }
  0xcf   : > { %v610_v21 = vpop.f32.mrf.mxu0 }
  0xd0   : > { %v629_v22 = vpop.f32.mrf.mxu1  ;;  %v611_v24 = vadd.f32 %v610_v21, %v9995_v20 }
  0xd1   : > { %v630_v26 = vadd.f32 %v629_v22, %v9995_v20 }
  0xd2   : > { %v10007_v58 = vmax.f32 %v611_v24, 0.0 }
  0xd3   : > { %v10010_v34 = vmax.f32 %v630_v26, 0.0 }
  0xd4   : > { %13106 = vst [vmem:[#allocation20_spill] sm:$0xff] %v10007_v58 }
  0xd5   : > { %13107 = vst [vmem:[#allocation21_spill] sm:$0xff] %v10010_v34 }
  0xd6   : > { %v669_v25 = vpop.f32.mrf.mxu2 }
  0xd7   : > { %v688_v27 = vpop.f32.mrf.mxu3  ;;  %v612_v28 = vpop.f32.mrf.mxu0  ;;  %v670_v1 = vadd.f32 %v669_v25, %v9995_v20 }
  0xd8   : > { %v10002_v30 = vadd.f32 %v612_v28, %v9997_v23  ;;  %v631_v31 = vpop.f32.mrf.mxu1  ;;  %v689_v3 = vadd.f32 %v688_v27, %v9995_v20 }
  0xd9   : > { %v10005_v32 = vadd.f32 %v631_v31, %v9997_v23  ;;  %v10077_v8 = vmax.f32 %v670_v1, 0.0 }
  0xda   : > { %13104 = vst [vmem:[#allocation18_spill] sm:$0xff] %v10002_v30  ;;  %v12906_v33 = vmax.f32 %v10002_v30, 0.0  ;;  %v10079_v9 = vmax.f32 %v689_v3, 0.0 }
  0xdb   : > { %13105 = vst [vmem:[#allocation19_spill] sm:$0xff] %v10005_v32  ;;  %v12905_v35 = vmax.f32 %v10005_v32, 0.0 }
  0xdc   : > { %v10018_v37 = vpack.c.bf16 %v12906_v33, %v10007_v58  ;;  %13114 = vst [vmem:[#allocation28_spill] sm:$0xff] %v10077_v8 }
  0xdd   : > { %v10023_v38 = vpack.c.bf16 %v12905_v35, %v10010_v34  ;;  %13115 = vst [vmem:[#allocation29_spill] sm:$0xff] %v10079_v9 }
  0xde   : > { %v671_v39 = vpop.f32.mrf.mxu2  ;;  %1484 = vmatmul.bf16.vlgmr.msra.gmra.mxu0 %v10018_v37  ;;  %1662 = vmatmul.bf16.vlgmr.msra.gmra.mxu2 %v10018_v37 }
  0xdf   : > { %v690_v40 = vpop.f32.mrf.mxu3  ;;  %1573 = vmatmul.bf16.vlgmr.msra.gmra.mxu1 %v10023_v38  ;;  %1751 = vmatmul.bf16.vlgmr.msra.gmra.mxu3 %v10023_v38  ;;  %v615_v41 = vpop.f32.mrf.mxu0  ;;  %v10064_v63 = vadd.f32 %v671_v39, %v9997_v23 }
  0xe0   : > { %v634_v42 = vpop.f32.mrf.mxu1  ;;  %v10032_v44 = vadd.f32 %v615_v41, %v10013_v36  ;;  %v10067_v0 = vadd.f32 %v690_v40, %v9997_v23 }
  0xe1   : > { %v10035_v46 = vadd.f32 %v634_v42, %v10013_v36  ;;  %13112 = vst [vmem:[#allocation26_spill] sm:$0xff] %v10064_v63  ;;  %v12899_v29 = vmax.f32 %v10064_v63, 0.0 }
  0xe2   : > { %13108 = vst [vmem:[#allocation22_spill] sm:$0xff] %v10032_v44  ;;  %v12904_v52 = vmax.f32 %v10032_v44, 0.0  ;;  %v12897_v7 = vmax.f32 %v10067_v0, 0.0 }
  0xe3   : > { %13109 = vst [vmem:[#allocation23_spill] sm:$0xff] %v10035_v46  ;;  %v12903_v54 = vmax.f32 %v10035_v46, 0.0  ;;  %v10084_v10 = vpack.c.bf16 %v12899_v29, %v10077_v8 }
  0xe4   : > { %13113 = vst [vmem:[#allocation27_spill] sm:$0xff] %v10067_v0  ;;  %v10089_v11 = vpack.c.bf16 %v12897_v7, %v10079_v9 }
  0xe6   : > { %v674_v45 = vpop.f32.mrf.mxu2 }
  0xe7   : > { %v693_v47 = vpop.f32.mrf.mxu3  ;;  %v617_v48 = vpop.f32.mrf.mxu0  ;;  %v10106_v18 = vadd.f32 %v674_v45, %v10013_v36 }
  0xe8   : > { %v10038_v49 = vadd.f32 %v617_v48, %v10029_v43  ;;  %v636_v50 = vpop.f32.mrf.mxu1  ;;  %v10111_v21 = vadd.f32 %v693_v47, %v10013_v36 }
  0xe9   : > { %v10041_v51 = vadd.f32 %v636_v50, %v10029_v43  ;;  %13118 = vst [vmem:[#allocation32_spill] sm:$0xff] %v10106_v18  ;;  %v12896_v28 = vmax.f32 %v10106_v18, 0.0 }
  0xea   : > { %13110 = vst [vmem:[#allocation24_spill] sm:$0xff] %v10038_v49  ;;  %v12902_v53 = vmax.f32 %v10038_v49, 0.0  ;;  %v12895_v31 = vmax.f32 %v10111_v21, 0.0 }
  0xeb   : > { %13111 = vst [vmem:[#allocation25_spill] sm:$0xff] %v10041_v51  ;;  %v12901_v55 = vmax.f32 %v10041_v51, 0.0 }
  0xec   : > { %v10051_v56 = vpack.c.bf16 %v12902_v53, %v12904_v52  ;;  %13119 = vst [vmem:[#allocation33_spill] sm:$0xff] %v10111_v21 }
  0xed   : > { %v10057_v57 = vpack.c.bf16 %v12901_v55, %v12903_v54 }
  0xee   : > { %v676_v59 = vpop.f32.mrf.mxu2  ;;  %1489 = vmatmul.bf16.gmra.mxu0 %v10051_v56  ;;  %1667 = vmatmul.bf16.gmra.mxu2 %v10051_v56 }
  0xef   : > { %v695_v60 = vpop.f32.mrf.mxu3  ;;  %1578 = vmatmul.bf16.gmra.mxu1 %v10057_v57  ;;  %1756 = vmatmul.bf16.gmra.mxu3 %v10057_v57  ;;  %v728_v61 = vpop.f32.mrf.mxu0  ;;  %v10100_v16 = vadd.f32 %v676_v59, %v10029_v43 }
  0xf0   : > { %v747_v62 = vpop.f32.mrf.mxu1  ;;  %v10103_v17 = vadd.f32 %v695_v60, %v10029_v43  ;;  %v729_v59 = vadd.f32 %v728_v61, %v9995_v20 }
  0xf1   : > { %13116 = vst [vmem:[#allocation30_spill] sm:$0xff] %v10100_v16  ;;  %v12894_v25 = vmax.f32 %v10100_v16, 0.0  ;;  %v748_v1 = vadd.f32 %v747_v62, %v9995_v20 }
  0xf2   : > { %13117 = vst [vmem:[#allocation31_spill] sm:$0xff] %v10103_v17  ;;  %v12893_v27 = vmax.f32 %v10103_v17, 0.0 }
  0xf3   : > { %v10123_v39 = vpack.c.bf16 %v12894_v25, %v12896_v28  ;;  %v10161_v28 = vmax.f32 %v729_v59, 0.0 }
  0xf4   : > { %v10129_v40 = vpack.c.bf16 %v12893_v27, %v12895_v31 }
  0xf5   : > { %13122 = vst [vmem:[#allocation36_spill] sm:$0xff] %v10161_v28 }
  0xf6   : > { %v10070_v2 = vpop.f32.mrf.mxu2 }
  0xf7   : > { %v10073_v4 = vpop.f32.mrf.mxu3  ;;  %v730_v5 = vpop.f32.mrf.mxu0 }
  0xf8   : > { %v749_v6 = vpop.f32.mrf.mxu1  ;;  %v10144_v48 = vadd.f32 %v730_v5, %v9997_v23 }
  0xf9   : > { %v10147_v50 = vadd.f32 %v749_v6, %v9997_v23  ;;  %v10163_v6 = vmax.f32 %v748_v1, 0.0 }
  0xfa   : > { %13120 = vst [vmem:[#allocation34_spill] sm:$0xff] %v10144_v48  ;;  %v12898_v25 = vmax.f32 %v10144_v48, 0.0 }
  0xfb   : > { %13121 = vst [vmem:[#allocation35_spill] sm:$0xff] %v10147_v50  ;;  %v12900_v5 = vmax.f32 %v10147_v50, 0.0 }
  0xfc   : > { %13123 = vst [vmem:[#allocation37_spill] sm:$0xff] %v10163_v6  ;;  %v10168_v61 = vpack.c.bf16 %v12898_v25, %v10161_v28 }
  0xfd   : > { %v10173_v62 = vpack.c.bf16 %v12900_v5, %v10163_v6 }
  0xfe   : > { %v10091_v12 = vpop.f32.mrf.mxu2  ;;  %1494 = vmatmul.bf16.gmra.mxu0 %v10084_v10  ;;  %1672 = vmatmul.bf16.gmra.mxu2 %v10084_v10 }
  0xff   : > { %v10095_v13 = vpop.f32.mrf.mxu3  ;;  %1583 = vmatmul.bf16.gmra.mxu1 %v10089_v11  ;;  %1761 = vmatmul.bf16.gmra.mxu3 %v10089_v11  ;;  %v733_v14 = vpop.f32.mrf.mxu0 }
 0x100   : > { %v752_v15 = vpop.f32.mrf.mxu1  ;;  %v10194_v55 = vadd.f32 %v733_v14, %v10013_v36 }
 0x101   : > { %v10197_v53 = vadd.f32 %v752_v15, %v10013_v36 }
 0x102   : > { %13126 = vst [vmem:[#allocation40_spill] sm:$0xff] %v10194_v55 }
 0x103   : > { %13127 = vst [vmem:[#allocation41_spill] sm:$0xff] %v10197_v53  ;;  %v12913_v50 = vmax.f32 %v10197_v53, 0.0  ;;  %v807_v53 = vadd.f32 %v10073_v4, %v9995_v20 }
 0x105   : > { %v10251_v21 = vmax.f32 %v807_v53, 0.0 }
 0x106   : > { %v10108_v19 = vpop.f32.mrf.mxu2 }
 0x107   : > { %v10113_v22 = vpop.f32.mrf.mxu3  ;;  %v735_v24 = vpop.f32.mrf.mxu0  ;;  %13131 = vst [vmem:[#allocation45_spill] sm:$0xff] %v10251_v21 }
 0x108   : > { %v754_v26 = vpop.f32.mrf.mxu1  ;;  %v10188_v29 = vadd.f32 %v735_v24, %v10029_v43  ;;  %v12911_v24 = vmax.f32 %v10194_v55, 0.0  ;;  %v10293_v63 = vadd.f32 %v10113_v22, %v10013_v36 }
 0x109   : > { %v10191_v5 = vadd.f32 %v754_v26, %v10029_v43 }
 0x10a   : > { %13124 = vst [vmem:[#allocation38_spill] sm:$0xff] %v10188_v29  ;;  %v12910_v52 = vmax.f32 %v10188_v29, 0.0  ;;  %v12936_v44 = vmax.f32 %v10293_v63, 0.0 }
 0x10b   : > { %13125 = vst [vmem:[#allocation39_spill] sm:$0xff] %v10191_v5  ;;  %v12912_v33 = vmax.f32 %v10191_v5, 0.0  ;;  %v788_v5 = vadd.f32 %v10070_v2, %v9995_v20 }
 0x10c   : > { %v10213_v14 = vpack.c.bf16 %v12910_v52, %v12911_v24  ;;  %v10233_v24 = vadd.f32 %v10091_v12, %v9997_v23  ;;  %13135 = vst [vmem:[#allocation49_spill] sm:$0xff] %v10293_v63 }
 0x10d   : > { %v10221_v48 = vpack.c.bf16 %v12912_v33, %v12913_v50  ;;  %v10237_v33 = vadd.f32 %v10095_v13, %v9997_v23  ;;  %v10249_v12 = vmax.f32 %v788_v5, 0.0 }
 0x10e   : > { %v10131_v41 = vpop.f32.mrf.mxu2  ;;  %1499 = vmatmul.bf16.gmra.mxu0 %v10123_v39  ;;  %1677 = vmatmul.bf16.gmra.mxu2 %v10123_v39  ;;  %13128 = vst [vmem:[#allocation42_spill] sm:$0xff] %v10233_v24  ;;  %v12921_v17 = vmax.f32 %v10233_v24, 0.0  ;;  %v10287_v24 = vadd.f32 %v10108_v19, %v10013_v36 }
 0x10f   : > { %v10135_v42 = vpop.f32.mrf.mxu3  ;;  %1588 = vmatmul.bf16.gmra.mxu1 %v10129_v40  ;;  %1766 = vmatmul.bf16.gmra.mxu3 %v10129_v40  ;;  %v10139_v45 = vpop.f32.mrf.mxu0  ;;  %13129 = vst [vmem:[#allocation43_spill] sm:$0xff] %v10237_v33  ;;  %v12922_v16 = vmax.f32 %v10237_v33, 0.0 }
 0x110   : > { %v10141_v47 = vpop.f32.mrf.mxu1  ;;  %13130 = vst [vmem:[#allocation44_spill] sm:$0xff] %v10249_v12  ;;  %v10258_v18 = vpack.c.bf16 %v12921_v17, %v10249_v12  ;;  %v10277_v17 = vadd.f32 %v10131_v41, %v10029_v43 }
 0x111   : > { %v10265_v4 = vpack.c.bf16 %v12922_v16, %v10251_v21  ;;  %v10281_v16 = vadd.f32 %v10135_v42, %v10029_v43  ;;  %13134 = vst [vmem:[#allocation48_spill] sm:$0xff] %v10287_v24  ;;  %v12934_v42 = vmax.f32 %v10287_v24, 0.0 }
 0x112   : > { %13132 = vst [vmem:[#allocation46_spill] sm:$0xff] %v10277_v17  ;;  %v12933_v51 = vmax.f32 %v10277_v17, 0.0  ;;  %v866_v17 = vadd.f32 %v10141_v47, %v9995_v20 }
 0x113   : > { %13133 = vst [vmem:[#allocation47_spill] sm:$0xff] %v10281_v16  ;;  %v12935_v41 = vmax.f32 %v10281_v16, 0.0  ;;  %v847_v16 = vadd.f32 %v10139_v45, %v9995_v20 }
 0x114   : > { %v10307_v19 = vpack.c.bf16 %v12933_v51, %v12934_v42  ;;  %v10347_v12 = vmax.f32 %v866_v17, 0.0 }
 0x115   : > { %v10313_v22 = vpack.c.bf16 %v12935_v41, %v12936_v44 }
 0x116   : > { %v10150_v60 = vpop.f32.mrf.mxu2  ;;  %13139 = vst [vmem:[#allocation53_spill] sm:$0xff] %v10347_v12 }
 0x117   : > { %v10153_v3 = vpop.f32.mrf.mxu3  ;;  %v10155_v27 = vpop.f32.mrf.mxu0 }
 0x118   : > { %v10158_v31 = vpop.f32.mrf.mxu1  ;;  %v10327_v42 = vadd.f32 %v10155_v27, %v9997_v23  ;;  %v10343_v27 = vmax.f32 %v847_v16, 0.0 }
 0x119   : > { %v10333_v44 = vadd.f32 %v10158_v31, %v9997_v23 }
 0x11a   : > { %13136 = vst [vmem:[#allocation50_spill] sm:$0xff] %v10327_v42  ;;  %v12951_v63 = vmax.f32 %v10327_v42, 0.0 }
 0x11b   : > { %13137 = vst [vmem:[#allocation51_spill] sm:$0xff] %v10333_v44  ;;  %v12954_v30 = vmax.f32 %v10333_v44, 0.0 }
 0x11c   : > { %13138 = vst [vmem:[#allocation52_spill] sm:$0xff] %v10343_v27  ;;  %v10352_v45 = vpack.c.bf16 %v12951_v63, %v10343_v27 }
 0x11d   : > { %v10357_v47 = vpack.c.bf16 %v12954_v30, %v10347_v12 }
 0x11e   : > { %v10175_v7 = vpop.f32.mrf.mxu2  ;;  %1504 = vmatmul.bf16.gmra.mxu0 %v10168_v61  ;;  %1682 = vmatmul.bf16.gmra.mxu2 %v10168_v61 }
 0x11f   : > { %v10179_v59 = vpop.f32.mrf.mxu3  ;;  %1593 = vmatmul.bf16.gmra.mxu1 %v10173_v62  ;;  %1771 = vmatmul.bf16.gmra.mxu3 %v10173_v62  ;;  %v10183_v1 = vpop.f32.mrf.mxu0 }
 0x120   : > { %v10185_v25 = vpop.f32.mrf.mxu1  ;;  %v10379_v12 = vadd.f32 %v10183_v1, %v10013_v36 }
 0x122   : > { %13145 = vst [vmem:[#allocation59_spill] sm:$0xff] %v10379_v12 }
 0x126   : > { %v10199_v54 = vpop.f32.mrf.mxu2 }
 0x127   : > { %v10202_v35 = vpop.f32.mrf.mxu3  ;;  %v10207_v26 = vpop.f32.mrf.mxu0 }
 0x128   : > { %v10215_v15 = vpop.f32.mrf.mxu1  ;;  %v10369_v44 = vadd.f32 %v10207_v26, %v10029_v43 }
 0x12a   : > { %13142 = vst [vmem:[#allocation56_spill] sm:$0xff] %v10369_v44  ;;  %v12967_v26 = vmax.f32 %v10369_v44, 0.0 }
 0x12e   : > { %1509 = vmatmul.bf16.gmra.mxu0 %v10213_v14  ;;  %1687 = vmatmul.bf16.gmra.mxu2 %v10213_v14  ;;  %v10227_v55 = vpop.f32.mrf.mxu2 }
 0x12f   : > { %1598 = vmatmul.bf16.gmra.mxu1 %v10221_v48  ;;  %1776 = vmatmul.bf16.gmra.mxu3 %v10221_v48  ;;  %v10229_v52 = vpop.f32.mrf.mxu3  ;;  %v10239_v50 = vpop.f32.mrf.mxu0 }
 0x130   : > { %v10243_v29 = vpop.f32.mrf.mxu1 }
 0x136   : > { %v10253_v13 = vpop.f32.mrf.mxu2 }
 0x137   : > { %v10260_v2 = vpop.f32.mrf.mxu3  ;;  %v10269_v53 = vpop.f32.mrf.mxu0 }
 0x138   : > { %v10273_v5 = vpop.f32.mrf.mxu1 }
 0x13e   : > { %1514 = vmatmul.bf16.gmra.mxu0 %v10258_v18  ;;  %1692 = vmatmul.bf16.gmra.mxu2 %v10258_v18  ;;  %v10283_v33 = vpop.f32.mrf.mxu2 }
 0x13f   : > { %1603 = vmatmul.bf16.gmra.mxu1 %v10265_v4  ;;  %1781 = vmatmul.bf16.gmra.mxu3 %v10265_v4  ;;  %v10289_v0 = vpop.f32.mrf.mxu3  ;;  %v10297_v49 = vpop.f32.mrf.mxu0 }
 0x140   : > { %v10300_v46 = vpop.f32.mrf.mxu1 }
 0x146   : > { %v10317_v32 = vpop.f32.mrf.mxu2 }
 0x147   : > { %v10321_v24 = vpop.f32.mrf.mxu3  ;;  %v10323_v51 = vpop.f32.mrf.mxu0 }
 0x148   : > { %v10329_v41 = vpop.f32.mrf.mxu1 }
 0x14e   : > { %1519 = vmatmul.bf16.gmra.mxu0 %v10307_v19  ;;  %1697 = vmatmul.bf16.gmra.mxu2 %v10307_v19  ;;  %v10341_v21 = vpop.f32.mrf.mxu2 }
 0x14f   : > { %1608 = vmatmul.bf16.gmra.mxu1 %v10313_v22  ;;  %1786 = vmatmul.bf16.gmra.mxu3 %v10313_v22  ;;  %v10345_v6 = vpop.f32.mrf.mxu3 }
 0x15b   : > { %v1485_v31 = vpop.f32.mrf.mxu0 }
 0x15c   : > { %v1574_v28 = vpop.f32.mrf.mxu1 }
 0x15d   : > { %v10359_v9 = vadd.f32 %v1574_v28, %v1485_v31  ;;  %v10373_v28 = vadd.f32 %v10215_v15, %v10029_v43  ;;  %v12968_v15 = vmax.f32 %v10379_v12, 0.0 }
 0x15e   : > { %1524 = vmatmul.bf16.gmra.mxu0 %v10352_v45  ;;  %1702 = vmatmul.bf16.gmra.mxu2 %v10352_v45 }
 0x15f   : > { %13140 = vst [vmem:[#allocation54_spill] sm:$0xff] %v10359_v9  ;;  %1613 = vmatmul.bf16.gmra.mxu1 %v10357_v47  ;;  %1791 = vmatmul.bf16.gmra.mxu3 %v10357_v47  ;;  %v12969_v27 = vmax.f32 %v10373_v28, 0.0  ;;  %v906_v9 = vadd.f32 %v10150_v60, %v9995_v20 }
 0x160   : > { %13143 = vst [vmem:[#allocation57_spill] sm:$0xff] %v10373_v28  ;;  %v925_v28 = vadd.f32 %v10153_v3, %v9995_v20 }
 0x161   : > { %v1663_v16 = vpop.f32.mrf.mxu2 }
 0x162   : > { %v1752_v17 = vpop.f32.mrf.mxu3  ;;  %v10435_v12 = vmax.f32 %v925_v28, 0.0 }
 0x163   : > { %v10365_v63 = vadd.f32 %v1752_v17, %v1663_v16  ;;  %v1487_v42 = vpop.f32.mrf.mxu0  ;;  %v10383_v16 = vadd.f32 %v10185_v25, %v10013_v36  ;;  %v10397_v25 = vpack.c.bf16 %v12967_v26, %v12968_v15 }
 0x164   : > { %v1576_v30 = vpop.f32.mrf.mxu1  ;;  %13153 = vst [vmem:[#allocation67_spill] sm:$0xff] %v10435_v12 }
 0x165   : > { %13141 = vst [vmem:[#allocation55_spill] sm:$0xff] %v10365_v63  ;;  %v10375_v31 = vadd.f32 %v1576_v30, %v1487_v42  ;;  %v12970_v42 = vmax.f32 %v10383_v16, 0.0 }
 0x166   : > { %13146 = vst [vmem:[#allocation60_spill] sm:$0xff] %v10383_v16  ;;  %v10433_v16 = vmax.f32 %v906_v9, 0.0 }
 0x167   : > { %13144 = vst [vmem:[#allocation58_spill] sm:$0xff] %v10375_v31  ;;  %v10403_v58 = vpack.c.bf16 %v12969_v27, %v12970_v42  ;;  %v10417_v27 = vadd.f32 %v10175_v7, %v9997_v23 }
 0x168   : > { %13152 = vst [vmem:[#allocation66_spill] sm:$0xff] %v10433_v16 }
 0x169   : > { %v1665_v34 = vpop.f32.mrf.mxu2  ;;  %13150 = vst [vmem:[#allocation64_spill] sm:$0xff] %v10417_v27 }
 0x16a   : > { %v1754_v30 = vpop.f32.mrf.mxu3 }
 0x16b   : > { %v10391_v8 = vadd.f32 %v1754_v30, %v1665_v34  ;;  %v1490_v1 = vpop.f32.mrf.mxu0 }
 0x16c   : > { %v1579_v17 = vpop.f32.mrf.mxu1 }
 0x16d   : > { %13147 = vst [vmem:[#allocation61_spill] sm:$0xff] %v10391_v8  ;;  %v10407_v31 = vadd.f32 %v1579_v17, %v1490_v1  ;;  %v10421_v17 = vadd.f32 %v10179_v59, %v9997_v23  ;;  %v7742_v8 = vld [vmem:[#allocation5 + $0x1f8] sm:$0xf0] }
 0x16e   : > { %1529 = vmatmul.bf16.gmra.mxu0 %v10397_v25  ;;  %1707 = vmatmul.bf16.gmra.mxu2 %v10397_v25 }
 0x16f   : > { %13148 = vst [vmem:[#allocation62_spill] sm:$0xff] %v10407_v31  ;;  %1618 = vmatmul.bf16.gmra.mxu1 %v10403_v58  ;;  %1796 = vmatmul.bf16.gmra.mxu3 %v10403_v58  ;;  %v12977_v7 = vmax.f32 %v10421_v17, 0.0 }
 0x170   : > { %13151 = vst [vmem:[#allocation65_spill] sm:$0xff] %v10421_v17  ;;  %v10471_v17 = vadd.f32 %v10199_v54, %v10013_v36 }
 0x171   : > { %v1668_v34 = vpop.f32.mrf.mxu2 }
 0x172   : > { %v1757_v30 = vpop.f32.mrf.mxu3  ;;  %13160 = vst [vmem:[#allocation74_spill] sm:$0xff] %v10471_v17  ;;  %v12991_v54 = vmax.f32 %v10471_v17, 0.0 }
 0x173   : > { %v10413_v26 = vadd.f32 %v1757_v30, %v1668_v34  ;;  %v1492_v15 = vpop.f32.mrf.mxu0  ;;  %v12976_v30 = vmax.f32 %v10417_v27, 0.0  ;;  %v10447_v34 = vpack.c.bf16 %v12977_v7, %v10435_v12  ;;  %v10461_v7 = vadd.f32 %v10227_v55, %v10029_v43  ;;  %v9013_v55 = vld [vmem:[#allocation5 + $0xec] sm:$0xf]  ;;  %v7614_v27 = vld [vmem:[#allocation5 + $0xf8] sm:$0xf0] }
 0x174   : > { %v1581_v42 = vpop.f32.mrf.mxu1  ;;  %v9045_v12 = vld [vmem:[#allocation5 + $0x1ec] sm:$0xf] }
 0x175   : > { %13149 = vst [vmem:[#allocation63_spill] sm:$0xff] %v10413_v26  ;;  %v10423_v1 = vadd.f32 %v1581_v42, %v1492_v15  ;;  %v10442_v60 = vpack.c.bf16 %v12976_v30, %v10433_v16  ;;  %v12988_v16 = vmax.f32 %v10461_v7, 0.0  ;;  %v7745_v26 = vor.u32 %v9045_v12, %v7742_v8 }
 0x176   : > { %13157 = vst [vmem:[#allocation71_spill] sm:$0xff] %v10461_v7  ;;  %v10513_v7 = vadd.f32 %v10273_v5, %v9997_v23 }
 0x177   : > { %2099 = vmatpush.bf16.msrb.mxu3 %v7745_v26 }
 0x178   : > { %13166 = vst [vmem:[#allocation80_spill] sm:$0xff] %v10513_v7 }
 0x179   : > { %v1670_v44 = vpop.f32.mrf.mxu2 }
 0x17a   : > { %v1759_v59 = vpop.f32.mrf.mxu3 }
 0x17b   : > { %v10437_v15 = vadd.f32 %v1759_v59, %v1670_v44  ;;  %v1495_v42 = vpop.f32.mrf.mxu0 }
 0x17c   : > { %v1584_v3 = vpop.f32.mrf.mxu1 }
 0x17d   : > { %13154 = vst [vmem:[#allocation68_spill] sm:$0xff] %v10437_v15  ;;  %v10451_v63 = vadd.f32 %v1584_v3, %v1495_v42  ;;  %v10465_v42 = vadd.f32 %v10229_v52, %v10029_v43  ;;  %v7617_v52 = vor.u32 %v9013_v55, %v7614_v27  ;;  %v10489_v27 = vpack.c.bf16 %v12988_v16, %v12991_v54  ;;  %v7740_v54 = vld [vmem:[#allocation5 + $0x1e8] sm:$0xf] }
 0x17e   : > { %1534 = vmatmul.bf16.gmra.mxu0 %v10442_v60  ;;  %1712 = vmatmul.bf16.gmra.mxu2 %v10442_v60 }
 0x17f   : > { %13155 = vst [vmem:[#allocation69_spill] sm:$0xff] %v10451_v63  ;;  %1623 = vmatmul.bf16.gmra.mxu1 %v10447_v34  ;;  %1801 = vmatmul.bf16.gmra.mxu3 %v10447_v34  ;;  %v9041_v63 = vld [vmem:[#allocation5 + $0x1cc] sm:$0xf] }
 0x180   : > { %13158 = vst [vmem:[#allocation72_spill] sm:$0xff] %v10465_v42  ;;  %2010 = vmatpush.bf16.msrb.mxu2 %v7617_v52 }
 0x181   : > { %v1673_v44 = vpop.f32.mrf.mxu2 }
 0x182   : > { %v1762_v28 = vpop.f32.mrf.mxu3 }
 0x183   : > { %v10457_v59 = vadd.f32 %v1762_v28, %v1673_v44  ;;  %v1497_v30 = vpop.f32.mrf.mxu0  ;;  %v10475_v44 = vadd.f32 %v10202_v35, %v10013_v36 }
 0x184   : > { %v1586_v9 = vpop.f32.mrf.mxu1 }
 0x185   : > { %13156 = vst [vmem:[#allocation70_spill] sm:$0xff] %v10457_v59  ;;  %v10467_v3 = vadd.f32 %v1586_v9, %v1497_v30  ;;  %v12989_v30 = vmax.f32 %v10465_v42, 0.0  ;;  %v12990_v35 = vmax.f32 %v10475_v44, 0.0  ;;  %v9047_v42 = vld [vmem:[#allocation5 + $0x1f4] sm:$0xf0] }
 0x186   : > { %13161 = vst [vmem:[#allocation75_spill] sm:$0xff] %v10475_v44  ;;  %v7741_v17 = vor.u32 %v9047_v42, %v7740_v54 }
 0x187   : > { %13159 = vst [vmem:[#allocation73_spill] sm:$0xff] %v10467_v3  ;;  %v10495_v8 = vpack.c.bf16 %v12989_v30, %v12990_v35  ;;  %v7612_v30 = vld [vmem:[#allocation5 + $0xe8] sm:$0xf]  ;;  %v9015_v35 = vld [vmem:[#allocation5 + $0xf4] sm:$0xf0] }
 0x188   : > { %v7613_v12 = vor.u32 %v9015_v35, %v7612_v30  ;;  %1921 = vmatpush.bf16.msrb.mxu1 %v7741_v17  ;;  %v12998_v35 = vmax.f32 %v10513_v7, 0.0  ;;  %v7726_v3 = vld [vmem:[#allocation5 + $0x1d8] sm:$0xf0] }
 0x189   : > { %v1675_v9 = vpop.f32.mrf.mxu2 }
 0x18a   : > { %v1764_v15 = vpop.f32.mrf.mxu3  ;;  %1832 = vmatpush.bf16.msrb.mxu0 %v7613_v12 }
 0x18b   : > { %v10483_v31 = vadd.f32 %v1764_v15, %v1675_v9  ;;  %v1500_v28 = vpop.f32.mrf.mxu0 }
 0x18c   : > { %v1589_v55 = vpop.f32.mrf.mxu1 }
 0x18d   : > { %13162 = vst [vmem:[#allocation76_spill] sm:$0xff] %v10483_v31  ;;  %v10499_v15 = vadd.f32 %v1589_v55, %v1500_v28  ;;  %v10509_v28 = vadd.f32 %v10269_v53, %v9997_v23  ;;  %v7724_v53 = vld [vmem:[#allocation5 + $0x1c8] sm:$0xf] }
 0x18e   : > { %1539 = vmatmul.bf16.gmra.mxu0 %v10489_v27  ;;  %1717 = vmatmul.bf16.gmra.mxu2 %v10489_v27 }
 0x18f   : > { %13163 = vst [vmem:[#allocation77_spill] sm:$0xff] %v10499_v15  ;;  %1628 = vmatmul.bf16.gmra.mxu1 %v10495_v8  ;;  %1806 = vmatmul.bf16.gmra.mxu3 %v10495_v8  ;;  %v12997_v30 = vmax.f32 %v10509_v28, 0.0  ;;  %v7582_v15 = vld [vmem:[#allocation5 + $0xb8] sm:$0xf0] }
 0x190   : > { %13165 = vst [vmem:[#allocation79_spill] sm:$0xff] %v10509_v28 }
 0x191   : > { %v1678_v26 = vpop.f32.mrf.mxu2 }
 0x192   : > { %v1767_v52 = vpop.f32.mrf.mxu3 }
 0x193   : > { %v10505_v9 = vadd.f32 %v1767_v52, %v1678_v26  ;;  %v1502_v16 = vpop.f32.mrf.mxu0  ;;  %v965_v26 = vadd.f32 %v10239_v50, %v9995_v20  ;;  %v984_v52 = vadd.f32 %v10243_v29, %v9995_v20 }
 0x194   : > { %v1591_v55 = vpop.f32.mrf.mxu1 }
 0x195   : > { %13164 = vst [vmem:[#allocation78_spill] sm:$0xff] %v10505_v9  ;;  %v10515_v44 = vadd.f32 %v1591_v55, %v1502_v16  ;;  %v10525_v59 = vmax.f32 %v965_v26, 0.0  ;;  %v10527_v42 = vmax.f32 %v984_v52, 0.0  ;;  %v9043_v55 = vld [vmem:[#allocation5 + $0x1d4] sm:$0xf0] }
 0x196   : > { %v7725_v9 = vor.u32 %v9043_v55, %v7724_v53  ;;  %v7708_v53 = vld [vmem:[#allocation5 + $0x1a8] sm:$0xf] }
 0x197   : > { %13167 = vst [vmem:[#allocation81_spill] sm:$0xff] %v10515_v44  ;;  %v10534_v29 = vpack.c.bf16 %v12997_v30, %v10525_v59  ;;  %v10539_v17 = vpack.c.bf16 %v12998_v35, %v10527_v42  ;;  %v9011_v30 = vld [vmem:[#allocation5 + $0xd4] sm:$0xf0] }
 0x198   : > { %13168 = vst [vmem:[#allocation82_spill] sm:$0xff] %v10525_v59  ;;  %v10557_v59 = vadd.f32 %v10323_v51, %v10029_v43  ;;  %1922 = vmatpush.bf16.msrb.mxu1 %v7725_v9  ;;  %v7580_v51 = vld [vmem:[#allocation5 + $0xa8] sm:$0xf] }
 0x199   : > { %v1680_v5 = vpop.f32.mrf.mxu2  ;;  %13169 = vst [vmem:[#allocation83_spill] sm:$0xff] %v10527_v42  ;;  %v10553_v42 = vadd.f32 %v10297_v49, %v10013_v36  ;;  %v7729_v49 = vor.u32 %v9041_v63, %v7726_v3  ;;  %v7566_v63 = vld [vmem:[#allocation5 + $0x98] sm:$0xf0] }
 0x19a   : > { %v1769_v16 = vpop.f32.mrf.mxu3  ;;  %13174 = vst [vmem:[#allocation88_spill] sm:$0xff] %v10557_v59  ;;  %v13179_v9 = vmax.f32 %v10557_v59, 0.0 }
 0x19b   : > { %v10529_v54 = vadd.f32 %v1769_v16, %v1680_v5  ;;  %v1505_v50 = vpop.f32.mrf.mxu0  ;;  %v7596_v16 = vld [vmem:[#allocation5 + $0xc8] sm:$0xf]  ;;  %13173 = vst [vmem:[#allocation87_spill] sm:$0xff] %v10553_v42  ;;  %2100 = vmatpush.bf16.msrb.mxu3 %v7729_v49  ;;  %v13178_v3 = vmax.f32 %v10553_v42, 0.0  ;;  %v7534_v42 = vld [vmem:[#allocation5 + $0x58] sm:$0xf0] }
 0x19c   : > { %v1594_v12 = vpop.f32.mrf.mxu1  ;;  %v7597_v28 = vor.u32 %v9011_v30, %v7596_v16  ;;  %v10565_v30 = vadd.f32 %v10329_v41, %v10029_v43  ;;  %v9007_v16 = vld [vmem:[#allocation5 + $0xb4] sm:$0xf0] }
 0x19d   : > { %13170 = vst [vmem:[#allocation84_spill] sm:$0xff] %v10529_v54  ;;  %v10543_v26 = vadd.f32 %v1594_v12, %v1505_v50  ;;  %v9009_v50 = vld [vmem:[#allocation5 + $0xcc] sm:$0xf]  ;;  %v7598_v12 = vld [vmem:[#allocation5 + $0xd8] sm:$0xf0] }
 0x19e   : > { %1544 = vmatmul.bf16.gmra.mxu0 %v10534_v29  ;;  %1722 = vmatmul.bf16.gmra.mxu2 %v10534_v29  ;;  %v7601_v54 = vor.u32 %v9009_v50, %v7598_v12  ;;  %13176 = vst [vmem:[#allocation90_spill] sm:$0xff] %v10565_v30  ;;  %v7581_v50 = vor.u32 %v9007_v16, %v7580_v51  ;;  %v9005_v12 = vld [vmem:[#allocation5 + $0xac] sm:$0xf]  ;;  %v7564_v51 = vld [vmem:[#allocation5 + $0x88] sm:$0xf] }
 0x19f   : > { %13171 = vst [vmem:[#allocation85_spill] sm:$0xff] %v10543_v26  ;;  %1633 = vmatmul.bf16.gmra.mxu1 %v10539_v17  ;;  %1811 = vmatmul.bf16.gmra.mxu3 %v10539_v17  ;;  %v9003_v16 = vld [vmem:[#allocation5 + $0x94] sm:$0xf0]  ;;  %v7692_v26 = vld [vmem:[#allocation5 + $0x188] sm:$0xf] }
 0x1a0   : > { %1833 = vmatpush.bf16.msrb.mxu0 %v7597_v28  ;;  %2011 = vmatpush.bf16.msrb.mxu2 %v7601_v54  ;;  %v7710_v28 = vld [vmem:[#allocation5 + $0x1b8] sm:$0xf0] }
 0x1a1   : > { %v1683_v52 = vpop.f32.mrf.mxu2 }
 0x1a2   : > { %v1772_v5 = vpop.f32.mrf.mxu3 }
 0x1a3   : > { %v10549_v35 = vadd.f32 %v1772_v5, %v1683_v52  ;;  %v1507_v7 = vpop.f32.mrf.mxu0  ;;  %v10561_v52 = vadd.f32 %v10300_v46, %v10013_v36  ;;  %v9039_v46 = vld [vmem:[#allocation5 + $0x1b4] sm:$0xf0] }
 0x1a4   : > { %v1596_v31 = vpop.f32.mrf.mxu1  ;;  %v7709_v44 = vor.u32 %v9039_v46, %v7708_v53  ;;  %1834 = vmatpush.bf16.msrb.mxu0 %v7581_v50  ;;  %v7565_v53 = vor.u32 %v9003_v16, %v7564_v51  ;;  %v9035_v46 = vld [vmem:[#allocation5 + $0x194] sm:$0xf0]  ;;  %v10581_v50 = vpack.c.bf16 %v13179_v9, %v13178_v3  ;;  %v7676_v3 = vld [vmem:[#allocation5 + $0x168] sm:$0xf] }
 0x1a5   : > { %13172 = vst [vmem:[#allocation86_spill] sm:$0xff] %v10549_v35  ;;  %v10567_v5 = vadd.f32 %v1596_v31, %v1507_v7  ;;  %v7585_v31 = vor.u32 %v9005_v12, %v7582_v15  ;;  %v9037_v7 = vld [vmem:[#allocation5 + $0x1ac] sm:$0xf]  ;;  %v7662_v35 = vld [vmem:[#allocation5 + $0x158] sm:$0xf0] }
 0x1a6   : > { %13175 = vst [vmem:[#allocation89_spill] sm:$0xff] %v10561_v52  ;;  %v7713_v55 = vor.u32 %v9037_v7, %v7710_v28  ;;  %1923 = vmatpush.bf16.msrb.mxu1 %v7709_v44  ;;  %v9001_v12 = vld [vmem:[#allocation5 + $0x8c] sm:$0xf]  ;;  %v7693_v44 = vor.u32 %v9035_v46, %v7692_v26  ;;  %v7548_v26 = vld [vmem:[#allocation5 + $0x68] sm:$0xf] }
 0x1a7   : > { %13177 = vst [vmem:[#allocation91_spill] sm:$0xff] %v10567_v5  ;;  %2012 = vmatpush.bf16.msrb.mxu2 %v7585_v31  ;;  %v7569_v31 = vor.u32 %v9001_v12, %v7566_v63  ;;  %v9033_v28 = vld [vmem:[#allocation5 + $0x18c] sm:$0xf]  ;;  %v7694_v5 = vld [vmem:[#allocation5 + $0x198] sm:$0xf0] }
 0x1a8   : > { %2101 = vmatpush.bf16.msrb.mxu3 %v7713_v55  ;;  %1835 = vmatpush.bf16.msrb.mxu0 %v7565_v53  ;;  %v7697_v59 = vor.u32 %v9033_v28, %v7694_v5  ;;  %v8999_v63 = vld [vmem:[#allocation5 + $0x74] sm:$0xf0]  ;;  %v8997_v12 = vld [vmem:[#allocation5 + $0x6c] sm:$0xf]  ;;  %v10599_v28 = vadd.f32 %v10283_v33, %v9997_v23  ;;  %v10607_v33 = vadd.f32 %v10289_v0, %v9997_v23  ;;  %v7644_v0 = vld [vmem:[#allocation5 + $0x128] sm:$0xf] }
 0x1a9   : > { %v1685_v54 = vpop.f32.mrf.mxu2  ;;  %v7549_v9 = vor.u32 %v8999_v63, %v7548_v26  ;;  %v9031_v46 = vld [vmem:[#allocation5 + $0x174] sm:$0xf0]  ;;  %v9029_v5 = vld [vmem:[#allocation5 + $0x16c] sm:$0xf]  ;;  %v7660_v63 = vld [vmem:[#allocation5 + $0x148] sm:$0xf] }
 0x1aa   : > { %v1774_v49 = vpop.f32.mrf.mxu3  ;;  %1924 = vmatpush.bf16.msrb.mxu1 %v7693_v44  ;;  %13182 = vst [vmem:[#allocation92_spill] sm:$0xff] %v10599_v28  ;;  %v8995_v26 = vld [vmem:[#allocation5 + $0x54] sm:$0xf0]  ;;  %v1024_v44 = vadd.f32 %v10253_v13, %v9995_v20  ;;  %v1043_v13 = vadd.f32 %v10260_v2, %v9995_v20 }
 0x1ab   : > { %v10575_v41 = vadd.f32 %v1774_v49, %v1685_v54  ;;  %v1510_v15 = vpop.f32.mrf.mxu0  ;;  %v13180_v54 = vmax.f32 %v10561_v52, 0.0  ;;  %v13181_v49 = vmax.f32 %v10565_v30, 0.0  ;;  %2013 = vmatpush.bf16.msrb.mxu2 %v7569_v31  ;;  %v7532_v52 = vld [vmem:[#allocation5 + $0x48] sm:$0xf]  ;;  %13183 = vst [vmem:[#allocation93_spill] sm:$0xff] %v10607_v33 }
 0x1ac   : > { %v1599_v7 = vpop.f32.mrf.mxu1  ;;  %2102 = vmatpush.bf16.msrb.mxu3 %v7697_v59  ;;  %1836 = vmatpush.bf16.msrb.mxu0 %v7549_v9  ;;  %v8991_v23 = vld [vmem:[#allocation5 + $0x34] sm:$0xf0] }
 0x1ad   : > { %v10587_v55 = vpack.c.bf16 %v13181_v49, %v13180_v54  ;;  %v10591_v16 = vadd.f32 %v1599_v7, %v1510_v15  ;;  %v7550_v54 = vld [vmem:[#allocation5 + $0x78] sm:$0xf0]  ;;  %v7677_v15 = vor.u32 %v9031_v46, %v7676_v3  ;;  %v7533_v46 = vor.u32 %v8995_v26, %v7532_v52  ;;  %v7516_v26 = vld [vmem:[#allocation5 + $0x28] sm:$0xf] }
 0x1ae   : > { %1549 = vmatmul.bf16.gmra.mxu0 %v10581_v50  ;;  %1727 = vmatmul.bf16.gmra.mxu2 %v10581_v50  ;;  %v7553_v53 = vor.u32 %v8997_v12, %v7550_v54  ;;  %v7678_v7 = vld [vmem:[#allocation5 + $0x178] sm:$0xf0]  ;;  %v9027_v12 = vld [vmem:[#allocation5 + $0x154] sm:$0xf0]  ;;  %v8993_v54 = vld [vmem:[#allocation5 + $0x4c] sm:$0xf] }
 0x1af   : > { %1638 = vmatmul.bf16.gmra.mxu1 %v10587_v55  ;;  %1816 = vmatmul.bf16.gmra.mxu3 %v10587_v55  ;;  %v7681_v51 = vor.u32 %v9029_v5, %v7678_v7  ;;  %v7661_v9 = vor.u32 %v9027_v12, %v7660_v63  ;;  %v7537_v5 = vor.u32 %v8993_v54, %v7534_v42  ;;  %v9025_v7 = vld [vmem:[#allocation5 + $0x14c] sm:$0xf]  ;;  %v9023_v42 = vld [vmem:[#allocation5 + $0x134] sm:$0xf0]  ;;  %v7518_v12 = vld [vmem:[#allocation5 + $0x38] sm:$0xf0] }
 0x1b0   : > { %1925 = vmatpush.bf16.msrb.mxu1 %v7677_v15  ;;  %2014 = vmatpush.bf16.msrb.mxu2 %v7553_v53  ;;  %v7517_v53 = vor.u32 %v8991_v23, %v7516_v26  ;;  %v8989_v63 = vld [vmem:[#allocation5 + $0x2c] sm:$0xf]  ;;  %v13024_v54 = vmax.f32 %v10607_v33, 0.0  ;;  %v7645_v20 = vor.u32 %v9023_v42, %v7644_v0  ;;  %v7500_v23 = vld [vmem:[#allocation5 + $0x8] sm:$0xf] }
 0x1b1   : > { %v1688_v49 = vpop.f32.mrf.mxu2  ;;  %2103 = vmatpush.bf16.msrb.mxu3 %v7681_v51  ;;  %1837 = vmatpush.bf16.msrb.mxu0 %v7533_v46  ;;  %v7521_v2 = vor.u32 %v8989_v63, %v7518_v12  ;;  %v7646_v51 = vld [vmem:[#allocation5 + $0x138] sm:$0xf0]  ;;  %v10617_v46 = vmax.f32 %v1024_v44, 0.0  ;;  %v8987_v15 = vld [vmem:[#allocation5 + $0x14] sm:$0xf0] }
 0x1b2   : > { %v1777_v30 = vpop.f32.mrf.mxu3  ;;  %v7501_v44 = vor.u32 %v8987_v15, %v7500_v23  ;;  %v9019_v63 = vld [vmem:[#allocation5 + $0x114] sm:$0xf0]  ;;  %v7502_v12 = vld [vmem:[#allocation5 + $0x18] sm:$0xf0] }
 0x1b3   : > { %v10603_v31 = vadd.f32 %v1777_v30, %v1688_v49  ;;  %v1512_v3 = vpop.f32.mrf.mxu0  ;;  %v7665_v49 = vor.u32 %v9025_v7, %v7662_v35  ;;  %13184 = vst [vmem:[#allocation94_spill] sm:$0xff] %v10617_v46  ;;  %v10619_v35 = vmax.f32 %v1043_v13, 0.0  ;;  %v7628_v30 = vld [vmem:[#allocation5 + $0x108] sm:$0xf]  ;;  %v8985_v13 = vld [vmem:[#allocation5 + $0xc] sm:$0xf] }
 0x1b4   : > { %v1601_v59 = vpop.f32.mrf.mxu1  ;;  %1926 = vmatpush.bf16.msrb.mxu1 %v7661_v9  ;;  %2015 = vmatpush.bf16.msrb.mxu2 %v7537_v5  ;;  %v13186_v9 = vmax.f32 %v10599_v28, 0.0  ;;  %v9017_v28 = vld [vmem:[#allocation5 + $0x10c] sm:$0xf] }
 0x1b5   : > { %v10612_v52 = vadd.f32 %v1601_v59, %v1512_v3  ;;  %v9021_v3 = vld [vmem:[#allocation5 + $0x12c] sm:$0xf]  ;;  %13185 = vst [vmem:[#allocation95_spill] sm:$0xff] %v10619_v35  ;;  %2104 = vmatpush.bf16.msrb.mxu3 %v7665_v49  ;;  %1838 = vmatpush.bf16.msrb.mxu0 %v7517_v53  ;;  %v10631_v49 = vpack.c.bf16 %v13024_v54, %v10619_v35 }
 0x1b6   : > { %v7649_v7 = vor.u32 %v9021_v3, %v7646_v51  ;;  %v10624_v5 = vpack.c.bf16 %v13186_v9, %v10617_v46  ;;  %v7629_v3 = vor.u32 %v9019_v63, %v7628_v30  ;;  %v7505_v51 = vor.u32 %v8985_v13, %v7502_v12  ;;  %v7630_v9 = vld [vmem:[#allocation5 + $0x118] sm:$0xf0] }
 0x1b7   : > { %v7633_v15 = vor.u32 %v9017_v28, %v7630_v9  ;;  %v10655_v63 = vadd.f32 %v10317_v32, %v10013_v36  ;;  %v10659_v13 = vadd.f32 %v10321_v24, %v10013_v36 }
 0x1b8   : > { %1927 = vmatpush.bf16.msrb.mxu1 %v7645_v20  ;;  %2016 = vmatpush.bf16.msrb.mxu2 %v7521_v2 }
 0x1b9   : > { %v1690_v59 = vpop.f32.mrf.mxu2  ;;  %2105 = vmatpush.bf16.msrb.mxu3 %v7649_v7  ;;  %1839 = vmatpush.bf16.msrb.mxu0 %v7501_v44  ;;  %v10645_v7 = vadd.f32 %v10341_v21, %v10029_v43  ;;  %13189 = vst [vmem:[#allocation98_spill] sm:$0xff] %v10655_v63 }
 0x1ba   : > { %v1779_v26 = vpop.f32.mrf.mxu3  ;;  %13190 = vst [vmem:[#allocation99_spill] sm:$0xff] %v10659_v13 }
 0x1bb   : > { %v10626_v0 = vadd.f32 %v1779_v26, %v1690_v59  ;;  %v1515_v42 = vpop.f32.mrf.mxu0  ;;  %13187 = vst [vmem:[#allocation96_spill] sm:$0xff] %v10645_v7  ;;  %v13021_v21 = vmax.f32 %v10645_v7, 0.0 }
 0x1bc   : > { %v1604_v53 = vpop.f32.mrf.mxu1  ;;  %1928 = vmatpush.bf16.msrb.mxu1 %v7629_v3  ;;  %2017 = vmatpush.bf16.msrb.mxu2 %v7505_v51  ;;  %v13022_v51 = vmax.f32 %v10659_v13, 0.0 }
 0x1bd   : > { %v10635_v26 = vadd.f32 %v1604_v53, %v1515_v42  ;;  %2106 = vmatpush.bf16.msrb.mxu3 %v7633_v15  ;;  %v10649_v42 = vadd.f32 %v10345_v6, %v10029_v43  ;;  %v13023_v43 = vmax.f32 %v10655_v63, 0.0 }
 0x1be   : > { %1554 = vmatmul.bf16.gmra.mxu0 %v10624_v5  ;;  %1732 = vmatmul.bf16.gmra.mxu2 %v10624_v5 }
 0x1bf   : > { %1643 = vmatmul.bf16.gmra.mxu1 %v10631_v49  ;;  %1821 = vmatmul.bf16.gmra.mxu3 %v10631_v49  ;;  %13188 = vst [vmem:[#allocation97_spill] sm:$0xff] %v10649_v42  ;;  %v13020_v53 = vmax.f32 %v10649_v42, 0.0  ;;  %v10673_v36 = vpack.c.bf16 %v13021_v21, %v13023_v43 }
 0x1c1   : > { %v1693_v30 = vpop.f32.mrf.mxu2  ;;  %v10679_v15 = vpack.c.bf16 %v13020_v53, %v13022_v51 }
 0x1c2   : > { %v1782_v20 = vpop.f32.mrf.mxu3 }
 0x1c3   : > { %v10641_v2 = vadd.f32 %v1782_v20, %v1693_v30  ;;  %v1517_v23 = vpop.f32.mrf.mxu0 }
 0x1c4   : > { %v1606_v28 = vpop.f32.mrf.mxu1 }
 0x1c5   : > { %v10651_v44 = vadd.f32 %v1606_v28, %v1517_v23 }
 0x1c9   : > { %v1695_v3 = vpop.f32.mrf.mxu2 }
 0x1ca   : > { %v1784_v6 = vpop.f32.mrf.mxu3 }
 0x1cb   : > { %v10667_v9 = vadd.f32 %v1784_v6, %v1695_v3  ;;  %v1520_v32 = vpop.f32.mrf.mxu0 }
 0x1cc   : > { %v1609_v24 = vpop.f32.mrf.mxu1 }
 0x1cd   : > { %v10683_v20 = vadd.f32 %v1609_v24, %v1520_v32 }
 0x1ce   : > { %1559 = vmatmul.bf16.gmra.mxu0 %v10673_v36  ;;  %1737 = vmatmul.bf16.gmra.mxu2 %v10673_v36 }
 0x1cf   : > { %1648 = vmatmul.bf16.gmra.mxu1 %v10679_v15  ;;  %1826 = vmatmul.bf16.gmra.mxu3 %v10679_v15 }
 0x1d1   : > { %v1698_v23 = vpop.f32.mrf.mxu2 }
 0x1d2   : > { %v1787_v28 = vpop.f32.mrf.mxu3 }
 0x1d3   : > { %v10689_v3 = vadd.f32 %v1787_v28, %v1698_v23  ;;  %v1522_v6 = vpop.f32.mrf.mxu0 }
 0x1d4   : > { %v1611_v53 = vpop.f32.mrf.mxu1 }
 0x1d5   : > { %v10691_v21 = vadd.f32 %v1611_v53, %v1522_v6 }
 0x1d9   : > { %v1700_v24 = vpop.f32.mrf.mxu2 }
 0x1da   : > { %v1789_v51 = vpop.f32.mrf.mxu3 }
 0x1db   : > { %v10695_v43 = vadd.f32 %v1789_v51, %v1700_v24  ;;  %v1525_v54 = vpop.f32.mrf.mxu0 }
 0x1dc   : > { %v1614_v30 = vpop.f32.mrf.mxu1 }
 0x1dd   : > { %v10699_v59 = vadd.f32 %v1614_v30, %v1525_v54 }
 0x1de   : > { %1840 = vmatmul.bf16.vlgmr.msrb.gmra.mxu0 %v10018_v37  ;;  %2018 = vmatmul.bf16.vlgmr.msrb.gmra.mxu2 %v10018_v37 }
 0x1df   : > { %1929 = vmatmul.bf16.vlgmr.msrb.gmra.mxu1 %v10023_v38  ;;  %2107 = vmatmul.bf16.vlgmr.msrb.gmra.mxu3 %v10023_v38 }
 0x1e1   : > { %v1703_v53 = vpop.f32.mrf.mxu2 }
 0x1e2   : > { %v1792_v23 = vpop.f32.mrf.mxu3 }
 0x1e3   : > { %v10705_v28 = vadd.f32 %v1792_v23, %v1703_v53  ;;  %v1527_v51 = vpop.f32.mrf.mxu0 }
 0x1e4   : > { %v1616_v6 = vpop.f32.mrf.mxu1 }
 0x1e5   : > { %v10707_v24 = vadd.f32 %v1616_v6, %v1527_v51 }
 0x1e9   : > { %v1705_v30 = vpop.f32.mrf.mxu2 }
 0x1ea   : > { %v1794_v12 = vpop.f32.mrf.mxu3 }
 0x1eb   : > { %v10711_v32 = vadd.f32 %v1794_v12, %v1705_v30  ;;  %v1530_v37 = vpop.f32.mrf.mxu0 }
 0x1ec   : > { %v1619_v42 = vpop.f32.mrf.mxu1 }
 0x1ed   : > { %v10715_v7 = vadd.f32 %v1619_v42, %v1530_v37 }
 0x1ee   : > { %1845 = vmatmul.bf16.gmra.mxu0 %v10051_v56  ;;  %2023 = vmatmul.bf16.gmra.mxu2 %v10051_v56 }
 0x1ef   : > { %1934 = vmatmul.bf16.gmra.mxu1 %v10057_v57  ;;  %2112 = vmatmul.bf16.gmra.mxu3 %v10057_v57 }
 0x1f1   : > { %v1708_v53 = vpop.f32.mrf.mxu2 }
 0x1f2   : > { %v1797_v23 = vpop.f32.mrf.mxu3 }
 0x1f3   : > { %v10721_v51 = vadd.f32 %v1797_v23, %v1708_v53  ;;  %v1532_v12 = vpop.f32.mrf.mxu0 }
 0x1f4   : > { %v1621_v6 = vpop.f32.mrf.mxu1 }
 0x1f5   : > { %v10723_v30 = vadd.f32 %v1621_v6, %v1532_v12 }
 0x1f9   : > { %v1710_v37 = vpop.f32.mrf.mxu2 }
 0x1fa   : > { %v1799_v38 = vpop.f32.mrf.mxu3 }
 0x1fb   : > { %v10727_v54 = vadd.f32 %v1799_v38, %v1710_v37  ;;  %v1535_v56 = vpop.f32.mrf.mxu0 }
 0x1fc   : > { %v1624_v13 = vpop.f32.mrf.mxu1 }
 0x1fd   : > { %v10731_v63 = vadd.f32 %v1624_v13, %v1535_v56 }
 0x1fe   : > { %1850 = vmatmul.bf16.gmra.mxu0 %v10084_v10  ;;  %2028 = vmatmul.bf16.gmra.mxu2 %v10084_v10 }
 0x1ff   : > { %13191 = vst [vmem:[#allocation100_spill] sm:$0xff] %v10731_v63  ;;  %1939 = vmatmul.bf16.gmra.mxu1 %v10089_v11  ;;  %2117 = vmatmul.bf16.gmra.mxu3 %v10089_v11 }
 0x201   : > { %v1713_v53 = vpop.f32.mrf.mxu2 }
 0x202   : > { %v1802_v23 = vpop.f32.mrf.mxu3 }
 0x203   : > { %v10737_v12 = vadd.f32 %v1802_v23, %v1713_v53  ;;  %v1537_v38 = vpop.f32.mrf.mxu0 }
 0x204   : > { %v1626_v6 = vpop.f32.mrf.mxu1 }
 0x205   : > { %13192 = vst [vmem:[#allocation101_spill] sm:$0xff] %v10737_v12  ;;  %v10739_v37 = vadd.f32 %v1626_v6, %v1537_v38 }
 0x207   : > { %13193 = vst [vmem:[#allocation102_spill] sm:$0xff] %v10739_v37 }
 0x209   : > { %v1715_v56 = vpop.f32.mrf.mxu2 }
 0x20a   : > { %v1804_v57 = vpop.f32.mrf.mxu3 }
 0x20b   : > { %v10743_v42 = vadd.f32 %v1804_v57, %v1715_v56  ;;  %v1540_v10 = vpop.f32.mrf.mxu0 }
 0x20c   : > { %v1629_v33 = vpop.f32.mrf.mxu1 }
 0x20d   : > { %13194 = vst [vmem:[#allocation103_spill] sm:$0xff] %v10743_v42  ;;  %v10747_v35 = vadd.f32 %v1629_v33, %v1540_v10 }
 0x20e   : > { %1855 = vmatmul.bf16.gmra.mxu0 %v10123_v39  ;;  %2033 = vmatmul.bf16.gmra.mxu2 %v10123_v39 }
 0x20f   : > { %1944 = vmatmul.bf16.gmra.mxu1 %v10129_v40  ;;  %2122 = vmatmul.bf16.gmra.mxu3 %v10129_v40 }
 0x211   : > { %v1718_v53 = vpop.f32.mrf.mxu2 }
 0x212   : > { %v1807_v23 = vpop.f32.mrf.mxu3 }
 0x213   : > { %v10753_v38 = vadd.f32 %v1807_v23, %v1718_v53  ;;  %v1542_v57 = vpop.f32.mrf.mxu0 }
 0x214   : > { %v1631_v6 = vpop.f32.mrf.mxu1 }
 0x215   : > { %13195 = vst [vmem:[#allocation104_spill] sm:$0xff] %v10753_v38  ;;  %v10755_v56 = vadd.f32 %v1631_v6, %v1542_v57 }
 0x219   : > { %v1720_v10 = vpop.f32.mrf.mxu2 }
 0x21a   : > { %v1809_v11 = vpop.f32.mrf.mxu3 }
 0x21b   : > { %v10759_v13 = vadd.f32 %v1809_v11, %v1720_v10  ;;  %v1545_v39 = vpop.f32.mrf.mxu0 }
 0x21c   : > { %v1634_v46 = vpop.f32.mrf.mxu1 }
 0x21d   : > { %13196 = vst [vmem:[#allocation105_spill] sm:$0xff] %v10759_v13  ;;  %v10763_v12 = vadd.f32 %v1634_v46, %v1545_v39 }
 0x21e   : > { %1860 = vmatmul.bf16.gmra.mxu0 %v10168_v61  ;;  %2038 = vmatmul.bf16.gmra.mxu2 %v10168_v61 }
 0x21f   : > { %13197 = vst [vmem:[#allocation106_spill] sm:$0xff] %v10763_v12  ;;  %1949 = vmatmul.bf16.gmra.mxu1 %v10173_v62  ;;  %2127 = vmatmul.bf16.gmra.mxu3 %v10173_v62 }
 0x221   : > { %v1723_v53 = vpop.f32.mrf.mxu2 }
 0x222   : > { %v1812_v23 = vpop.f32.mrf.mxu3 }
 0x223   : > { %v10769_v57 = vadd.f32 %v1812_v23, %v1723_v53  ;;  %v1547_v11 = vpop.f32.mrf.mxu0 }
 0x224   : > { %v1636_v6 = vpop.f32.mrf.mxu1 }
 0x225   : > { %13198 = vst [vmem:[#allocation107_spill] sm:$0xff] %v10769_v57  ;;  %v10771_v10 = vadd.f32 %v1636_v6, %v1547_v11 }
 0x227   : > { %13199 = vst [vmem:[#allocation108_spill] sm:$0xff] %v10771_v10 }
 0x229   : > { %v1725_v39 = vpop.f32.mrf.mxu2 }
 0x22a   : > { %v1814_v40 = vpop.f32.mrf.mxu3 }
 0x22b   : > { %v10775_v33 = vadd.f32 %v1814_v40, %v1725_v39  ;;  %v1550_v61 = vpop.f32.mrf.mxu0 }
 0x22c   : > { %v1639_v42 = vpop.f32.mrf.mxu1 }
 0x22d   : > { %13200 = vst [vmem:[#allocation109_spill] sm:$0xff] %v10775_v33  ;;  %v10779_v38 = vadd.f32 %v1639_v42, %v1550_v61 }
 0x22e   : > { %1865 = vmatmul.bf16.gmra.mxu0 %v10213_v14  ;;  %2043 = vmatmul.bf16.gmra.mxu2 %v10213_v14 }
 0x22f   : > { %13201 = vst [vmem:[#allocation110_spill] sm:$0xff] %v10779_v38  ;;  %1954 = vmatmul.bf16.gmra.mxu1 %v10221_v48  ;;  %2132 = vmatmul.bf16.gmra.mxu3 %v10221_v48 }
 0x231   : > { %v1728_v53 = vpop.f32.mrf.mxu2 }
 0x232   : > { %v1817_v23 = vpop.f32.mrf.mxu3 }
 0x233   : > { %v10785_v11 = vadd.f32 %v1817_v23, %v1728_v53  ;;  %v1552_v40 = vpop.f32.mrf.mxu0 }
 0x234   : > { %v1641_v6 = vpop.f32.mrf.mxu1 }
 0x235   : > { %13202 = vst [vmem:[#allocation111_spill] sm:$0xff] %v10785_v11  ;;  %v10787_v39 = vadd.f32 %v1641_v6, %v1552_v40 }
 0x237   : > { %13203 = vst [vmem:[#allocation112_spill] sm:$0xff] %v10787_v39 }
 0x239   : > { %v1730_v61 = vpop.f32.mrf.mxu2 }
 0x23a   : > { %v1819_v62 = vpop.f32.mrf.mxu3 }
 0x23b   : > { %v10791_v46 = vadd.f32 %v1819_v62, %v1730_v61  ;;  %v1555_v14 = vpop.f32.mrf.mxu0 }
 0x23c   : > { %v1644_v57 = vpop.f32.mrf.mxu1 }
 0x23d   : > { %13204 = vst [vmem:[#allocation113_spill] sm:$0xff] %v10791_v46  ;;  %v10795_v33 = vadd.f32 %v1644_v57, %v1555_v14 }
 0x23e   : > { %1870 = vmatmul.bf16.gmra.mxu0 %v10258_v18  ;;  %2048 = vmatmul.bf16.gmra.mxu2 %v10258_v18 }
 0x23f   : > { %13205 = vst [vmem:[#allocation114_spill] sm:$0xff] %v10795_v33  ;;  %1959 = vmatmul.bf16.gmra.mxu1 %v10265_v4  ;;  %2137 = vmatmul.bf16.gmra.mxu3 %v10265_v4 }
 0x241   : > { %v1733_v53 = vpop.f32.mrf.mxu2 }
 0x242   : > { %v1822_v23 = vpop.f32.mrf.mxu3 }
 0x243   : > { %v10801_v40 = vadd.f32 %v1822_v23, %v1733_v53  ;;  %v1557_v62 = vpop.f32.mrf.mxu0 }
 0x244   : > { %v1646_v6 = vpop.f32.mrf.mxu1 }
 0x245   : > { %13206 = vst [vmem:[#allocation115_spill] sm:$0xff] %v10801_v40  ;;  %v10803_v61 = vadd.f32 %v1646_v6, %v1557_v62 }
 0x247   : > { %13207 = vst [vmem:[#allocation116_spill] sm:$0xff] %v10803_v61 }
 0x249   : > { %v1735_v14 = vpop.f32.mrf.mxu2 }
 0x24a   : > { %v1824_v48 = vpop.f32.mrf.mxu3 }
 0x24b   : > { %v10807_v42 = vadd.f32 %v1824_v48, %v1735_v14  ;;  %v1560_v18 = vpop.f32.mrf.mxu0 }
 0x24c   : > { %v1649_v11 = vpop.f32.mrf.mxu1 }
 0x24d   : > { %13208 = vst [vmem:[#allocation117_spill] sm:$0xff] %v10807_v42  ;;  %v10811_v46 = vadd.f32 %v1649_v11, %v1560_v18 }
 0x24e   : > { %1875 = vmatmul.bf16.gmra.mxu0 %v10307_v19  ;;  %2053 = vmatmul.bf16.gmra.mxu2 %v10307_v19 }
 0x24f   : > { %13209 = vst [vmem:[#allocation118_spill] sm:$0xff] %v10811_v46  ;;  %1964 = vmatmul.bf16.gmra.mxu1 %v10313_v22  ;;  %2142 = vmatmul.bf16.gmra.mxu3 %v10313_v22 }
 0x251   : > { %v1738_v53 = vpop.f32.mrf.mxu2 }
 0x252   : > { %v1827_v23 = vpop.f32.mrf.mxu3 }
 0x253   : > { %v10817_v62 = vadd.f32 %v1827_v23, %v1738_v53  ;;  %v1562_v48 = vpop.f32.mrf.mxu0 }
 0x254   : > { %v1651_v6 = vpop.f32.mrf.mxu1 }
 0x255   : > { %13210 = vst [vmem:[#allocation119_spill] sm:$0xff] %v10817_v62  ;;  %v10819_v14 = vadd.f32 %v1651_v6, %v1562_v48 }
 0x257   : > { %13211 = vst [vmem:[#allocation120_spill] sm:$0xff] %v10819_v14 }
 0x259   : > { %v1740_v18 = vpop.f32.mrf.mxu2 }
 0x25a   : > { %v1829_v4 = vpop.f32.mrf.mxu3 }
 0x25b   : > { %v10823_v57 = vadd.f32 %v1829_v4, %v1740_v18  ;;  %v1841_v19 = vpop.f32.mrf.mxu0 }
 0x25c   : > { %v1930_v40 = vpop.f32.mrf.mxu1 }
 0x25d   : > { %13212 = vst [vmem:[#allocation121_spill] sm:$0xff] %v10823_v57  ;;  %v1931_v14 = vadd.f32 %v1930_v40, %v1841_v19  ;;  %v13221_v19 = vld [vmem:[#allocation61_spill] sm:$0xff] }
 0x25e   : > { %1880 = vmatmul.bf16.gmra.mxu0 %v10352_v45  ;;  %2058 = vmatmul.bf16.gmra.mxu2 %v10352_v45 }
 0x25f   : > { %1969 = vmatmul.bf16.gmra.mxu1 %v10357_v47  ;;  %2147 = vmatmul.bf16.gmra.mxu3 %v10357_v47 }
 0x261   : > { %v2019_v53 = vpop.f32.mrf.mxu2 }
 0x262   : > { %v2108_v23 = vpop.f32.mrf.mxu3 }
 0x263   : > { %v1843_v48 = vpop.f32.mrf.mxu0 }
 0x264   : > { %v1932_v6 = vpop.f32.mrf.mxu1 }
 0x265   : > { %v1933_v61 = vadd.f32 %v1932_v6, %v1843_v48 }
 0x267   : > { %v2192_v38 = vpack.c.bf16 %v1933_v61, %v1931_v14  ;;  %v13216_v61 = vld [vmem:[#allocation54_spill] sm:$0xff] }
 0x269   : > { %v2021_v11 = vpop.f32.mrf.mxu2 }
 0x26a   : > { %v2110_v4 = vpop.f32.mrf.mxu3 }
 0x26b   : > { %v1846_v18 = vpop.f32.mrf.mxu0 }
 0x26c   : > { %v1935_v42 = vpop.f32.mrf.mxu1 }
 0x26d   : > { %v1936_v57 = vadd.f32 %v1935_v42, %v1846_v18 }
 0x26e   : > { %1885 = vmatmul.bf16.gmra.mxu0 %v10397_v25  ;;  %2063 = vmatmul.bf16.gmra.mxu2 %v10397_v25 }
 0x26f   : > { %1974 = vmatmul.bf16.gmra.mxu1 %v10403_v58  ;;  %2152 = vmatmul.bf16.gmra.mxu3 %v10403_v58  ;;  %v2111_v58 = vadd.f32 %v2110_v4, %v2021_v11 }
 0x271   : > { %v2024_v45 = vpop.f32.mrf.mxu2 }
 0x272   : > { %v2113_v22 = vpop.f32.mrf.mxu3 }
 0x273   : > { %v1848_v62 = vpop.f32.mrf.mxu0  ;;  %v2114_v39 = vadd.f32 %v2113_v22, %v2024_v45 }
 0x274   : > { %v1937_v47 = vpop.f32.mrf.mxu1 }
 0x275   : > { %v1938_v33 = vadd.f32 %v1937_v47, %v1848_v62  ;;  %v13219_v62 = vld [vmem:[#allocation63_spill] sm:$0xff] }
 0x277   : > { %v2194_v46 = vpack.c.bf16 %v1938_v33, %v1936_v57  ;;  %v2109_v33 = vadd.f32 %v2108_v23, %v2019_v53 }
 0x279   : > { %2273 = vmatpush.bf16.msra.mxu0 %v2194_v46  ;;  %v2026_v12 = vpop.f32.mrf.mxu2  ;;  %v13213_v46 = vld [vmem:[#allocation62_spill] sm:$0xff] }
 0x27a   : > { %v2115_v10 = vpop.f32.mrf.mxu3  ;;  %v13214_v42 = vpack.c.bf16 %v10423_v1, %v13213_v46  ;;  %v13222_v1 = vld [vmem:[#allocation55_spill] sm:$0xff] }
 0x27b   : > { %v2116_v13 = vadd.f32 %v2115_v10, %v2026_v12  ;;  %v1851_v25 = vpop.f32.mrf.mxu0  ;;  %v2193_v10 = vpack.c.bf16 %v2111_v58, %v2109_v33  ;;  %v13223_v22 = vpack.c.bf16 %v13221_v19, %v13222_v1  ;;  %v13228_v1 = vld [vmem:[#allocation69_spill] sm:$0xff] }
 0x27c   : > { %v1940_v63 = vpop.f32.mrf.mxu1 }
 0x27d   : > { %v2195_v37 = vpack.c.bf16 %v2116_v13, %v2114_v39  ;;  %2274 = vmatpush.bf16.msra.mxu0 %v2192_v38  ;;  %v13215_v39 = vld [vmem:[#allocation58_spill] sm:$0xff]  ;;  %v1941_v33 = vadd.f32 %v1940_v63, %v1851_v25  ;;  %v13224_v25 = vld [vmem:[#allocation81_spill] sm:$0xff] }
 0x27e   : > { %1890 = vmatmul.bf16.gmra.mxu0 %v10442_v60  ;;  %2068 = vmatmul.bf16.gmra.mxu2 %v10442_v60  ;;  %v13217_v57 = vpack.c.bf16 %v13215_v39, %v13216_v61  ;;  %v13218_v60 = vld [vmem:[#allocation68_spill] sm:$0xff] }
 0x27f   : > { %1979 = vmatmul.bf16.gmra.mxu1 %v10447_v34  ;;  %2157 = vmatmul.bf16.gmra.mxu3 %v10447_v34  ;;  %v13220_v14 = vpack.c.bf16 %v13218_v60, %v13219_v62 }
 0x280   : > { %2302 = vmatpush.bf16.msra.mxu1 %v2195_v37 }
 0x281   : > { %2275 = vmatpush.bf16.msra.mxu0 %v13214_v42  ;;  %v2029_v12 = vpop.f32.mrf.mxu2 }
 0x282   : > { %v2118_v40 = vpop.f32.mrf.mxu3 }
 0x283   : > { %v1853_v13 = vpop.f32.mrf.mxu0  ;;  %v2119_v63 = vadd.f32 %v2118_v40, %v2029_v12 }
 0x284   : > { %2303 = vmatpush.bf16.msra.mxu1 %v2193_v10  ;;  %v1942_v38 = vpop.f32.mrf.mxu1 }
 0x285   : > { %2276 = vmatpush.bf16.msra.mxu0 %v13217_v57  ;;  %v1943_v47 = vadd.f32 %v1942_v38, %v1853_v13  ;;  %v13225_v13 = vld [vmem:[#allocation77_spill] sm:$0xff] }
 0x286   : > { %v13226_v38 = vpack.c.bf16 %v13224_v25, %v13225_v13 }
 0x287   : > { %v2347_v10 = vpack.c.bf16 %v1943_v47, %v1941_v33 }
 0x288   : > { %2304 = vmatpush.bf16.msra.mxu1 %v13220_v14 }
 0x289   : > { %v2031_v34 = vpop.f32.mrf.mxu2 }
 0x28a   : > { %v2120_v37 = vpop.f32.mrf.mxu3 }
 0x28b   : > { %v1856_v11 = vpop.f32.mrf.mxu0 }
 0x28c   : > { %2305 = vmatpush.bf16.msra.mxu1 %v13223_v22  ;;  %v1945_v53 = vpop.f32.mrf.mxu1 }
 0x28d   : > { %v1946_v18 = vadd.f32 %v1945_v53, %v1856_v11  ;;  %v13231_v53 = vld [vmem:[#allocation78_spill] sm:$0xff] }
 0x28e   : > { %1895 = vmatmul.bf16.gmra.mxu0 %v10489_v27  ;;  %2073 = vmatmul.bf16.gmra.mxu2 %v10489_v27 }
 0x28f   : > { %1984 = vmatmul.bf16.gmra.mxu1 %v10495_v8  ;;  %2162 = vmatmul.bf16.gmra.mxu3 %v10495_v8  ;;  %v2121_v8 = vadd.f32 %v2120_v37, %v2031_v34  ;;  %v13227_v37 = vld [vmem:[#allocation73_spill] sm:$0xff] }
 0x290   : > { %v13229_v22 = vpack.c.bf16 %v13227_v37, %v13228_v1 }
 0x291   : > { %v2034_v23 = vpop.f32.mrf.mxu2  ;;  %v2348_v14 = vpack.c.bf16 %v2121_v8, %v2119_v63 }
 0x292   : > { %v2123_v48 = vpop.f32.mrf.mxu3 }
 0x293   : > { %v1858_v6 = vpop.f32.mrf.mxu0  ;;  %v2124_v39 = vadd.f32 %v2123_v48, %v2034_v23  ;;  %v13233_v48 = vld [vmem:[#allocation76_spill] sm:$0xff] }
 0x294   : > { %v1947_v4 = vpop.f32.mrf.mxu1 }
 0x295   : > { %v1948_v45 = vadd.f32 %v1947_v4, %v1858_v6  ;;  %v13234_v6 = vld [vmem:[#allocation70_spill] sm:$0xff] }
 0x296   : > { %v13235_v4 = vpack.c.bf16 %v13233_v48, %v13234_v6 }
 0x297   : > { %v2349_v58 = vpack.c.bf16 %v1948_v45, %v1946_v18 }
 0x299   : > { %2355 = vmatpush.bf16.msra.mxu2 %v2349_v58  ;;  %v2036_v46 = vpop.f32.mrf.mxu2 }
 0x29a   : > { %v2125_v42 = vpop.f32.mrf.mxu3 }
 0x29b   : > { %v2126_v61 = vadd.f32 %v2125_v42, %v2036_v46  ;;  %v1861_v27 = vpop.f32.mrf.mxu0 }
 0x29c   : > { %v1950_v57 = vpop.f32.mrf.mxu1 }
 0x29d   : > { %v2350_v60 = vpack.c.bf16 %v2126_v61, %v2124_v39  ;;  %2356 = vmatpush.bf16.msra.mxu2 %v2347_v10  ;;  %v1951_v61 = vadd.f32 %v1950_v57, %v1861_v27  ;;  %v13236_v57 = vpack.c.bf16 %v10612_v52, %v10591_v16  ;;  %v13241_v16 = vld [vmem:[#allocation86_spill] sm:$0xff] }
 0x29e   : > { %1900 = vmatmul.bf16.gmra.mxu0 %v10534_v29  ;;  %2078 = vmatmul.bf16.gmra.mxu2 %v10534_v29  ;;  %v13230_v29 = vld [vmem:[#allocation84_spill] sm:$0xff]  ;;  %v13242_v52 = vpack.c.bf16 %v10575_v41, %v13241_v16 }
 0x29f   : > { %1989 = vmatmul.bf16.gmra.mxu1 %v10539_v17  ;;  %2167 = vmatmul.bf16.gmra.mxu3 %v10539_v17  ;;  %v13232_v23 = vpack.c.bf16 %v13230_v29, %v13231_v53  ;;  %v13237_v29 = vld [vmem:[#allocation91_spill] sm:$0xff]  ;;  %v13238_v53 = vld [vmem:[#allocation85_spill] sm:$0xff] }
 0x2a0   : > { %2384 = vmatpush.bf16.msra.mxu3 %v2350_v60 }
 0x2a1   : > { %2357 = vmatpush.bf16.msra.mxu2 %v13226_v38  ;;  %v2039_v62 = vpop.f32.mrf.mxu2 }
 0x2a2   : > { %v2128_v11 = vpop.f32.mrf.mxu3 }
 0x2a3   : > { %v1863_v19 = vpop.f32.mrf.mxu0  ;;  %v2129_v27 = vadd.f32 %v2128_v11, %v2039_v62 }
 0x2a4   : > { %2385 = vmatpush.bf16.msra.mxu3 %v2348_v14  ;;  %v1952_v34 = vpop.f32.mrf.mxu1 }
 0x2a5   : > { %2358 = vmatpush.bf16.msra.mxu2 %v13229_v22  ;;  %v1953_v10 = vadd.f32 %v1952_v34, %v1863_v19 }
 0x2a7   : > { %v2429_v63 = vpack.c.bf16 %v1953_v10, %v1951_v61 }
 0x2a8   : > { %2386 = vmatpush.bf16.msra.mxu3 %v13232_v23  ;;  %v13239_v23 = vpack.c.bf16 %v13237_v29, %v13238_v53 }
 0x2a9   : > { %v2041_v17 = vpop.f32.mrf.mxu2 }
 0x2aa   : > { %v2130_v12 = vpop.f32.mrf.mxu3 }
 0x2ab   : > { %v1866_v40 = vpop.f32.mrf.mxu0 }
 0x2ac   : > { %2387 = vmatpush.bf16.msra.mxu3 %v13235_v4  ;;  %v1955_v18 = vpop.f32.mrf.mxu1 }
 0x2ad   : > { %v1956_v46 = vadd.f32 %v1955_v18, %v1866_v40 }
 0x2ae   : > { %1905 = vmatmul.bf16.gmra.mxu0 %v10581_v50  ;;  %2083 = vmatmul.bf16.gmra.mxu2 %v10581_v50 }
 0x2af   : > { %1994 = vmatmul.bf16.gmra.mxu1 %v10587_v55  ;;  %2172 = vmatmul.bf16.gmra.mxu3 %v10587_v55  ;;  %v2131_v55 = vadd.f32 %v2130_v12, %v2041_v17 }
 0x2b1   : > { %v2044_v45 = vpop.f32.mrf.mxu2  ;;  %v2430_v34 = vpack.c.bf16 %v2131_v55, %v2129_v27  ;;  %v13245_v55 = vpack.c.bf16 %v10695_v43, %v10689_v3  ;;  %v542_v43 = vld [vmem:[%s12881_s5 + $0x30] sm:$0xff] }
 0x2b2   : > { %v2133_v47 = vpop.f32.mrf.mxu3 }
 0x2b3   : > { %v1868_v58 = vpop.f32.mrf.mxu0  ;;  %v2134_v25 = vadd.f32 %v2133_v47, %v2044_v45 }
 0x2b4   : > { %v1957_v33 = vpop.f32.mrf.mxu1 }
 0x2b5   : > { %v1958_v42 = vadd.f32 %v1957_v33, %v1868_v58 }
 0x2b7   : > { %v2431_v39 = vpack.c.bf16 %v1958_v42, %v1956_v46 }
 0x2b9   : > { %2437 = vmatpush.bf16.msrb.mxu0 %v2431_v39  ;;  %v2046_v60 = vpop.f32.mrf.mxu2 }
 0x2ba   : > { %v2135_v8 = vpop.f32.mrf.mxu3 }
 0x2bb   : > { %v2136_v13 = vadd.f32 %v2135_v8, %v2046_v60  ;;  %v1871_v50 = vpop.f32.mrf.mxu0  ;;  %v13243_v60 = vpack.c.bf16 %v10691_v21, %v10683_v20  ;;  %v541_v21 = vld [vmem:[%s12881_s5 + $0x28] sm:$0xff] }
 0x2bc   : > { %v1960_v38 = vpop.f32.mrf.mxu1 }
 0x2bd   : > { %v2432_v14 = vpack.c.bf16 %v2136_v13, %v2134_v25  ;;  %2438 = vmatpush.bf16.msrb.mxu0 %v2429_v63  ;;  %v1961_v45 = vadd.f32 %v1960_v38, %v1871_v50  ;;  %v540_v63 = vld [vmem:[%s12881_s5 + $0x20] sm:$0xff] }
 0x2be   : > { %1910 = vmatmul.bf16.gmra.mxu0 %v10624_v5  ;;  %2088 = vmatmul.bf16.gmra.mxu2 %v10624_v5  ;;  %v13240_v5 = vpack.c.bf16 %v10626_v0, %v10603_v31 }
 0x2bf   : > { %1999 = vmatmul.bf16.gmra.mxu1 %v10631_v49  ;;  %2177 = vmatmul.bf16.gmra.mxu3 %v10631_v49 }
 0x2c0   : > { %2466 = vmatpush.bf16.msrb.mxu1 %v2432_v14  ;;  %2218 = vperm.xlu2 %9372, %v540_v63   ;;  %v13244_v14 = vpack.c.bf16 %v10651_v44, %v10635_v26  ;;  %v13246_v26 = vpack.c.bf16 %v10667_v9, %v10641_v2 }
 0x2c1   : > { %2439 = vmatpush.bf16.msrb.mxu0 %v13236_v57  ;;  %v2049_v19 = vpop.f32.mrf.mxu2  ;;  %v10926_v57 = vld [vmem:[%s12880_s4 + $0x8] sm:$0xff] }
 0x2c2   : > { %v2138_v37 = vpop.f32.mrf.mxu3 }
 0x2c3   : > { %v1873_v1 = vpop.f32.mrf.mxu0  ;;  %v2139_v61 = vadd.f32 %v2138_v37, %v2049_v19 }
 0x2c4   : > { %2467 = vmatpush.bf16.msrb.mxu1 %v2430_v34  ;;  %v1962_v22 = vpop.f32.mrf.mxu1 }
 0x2c5   : > { %2440 = vmatpush.bf16.msrb.mxu0 %v13239_v23  ;;  %v1963_v4 = vadd.f32 %v1962_v22, %v1873_v1 }
 0x2c7   : > { %v2511_v58 = vpack.c.bf16 %v1963_v4, %v1961_v45 }
 0x2c8   : > { %2468 = vmatpush.bf16.msrb.mxu1 %v13240_v5  ;;  %2223 = vperm.xlu2 %9372, %v541_v21   ;;  %v539_v5 = vld [vmem:[%s12881_s5 + $0x18] sm:$0xff] }
 0x2c9   : > { %v2051_v49 = vpop.f32.mrf.mxu2 }
 0x2ca   : > { %v2140_v62 = vpop.f32.mrf.mxu3 }
 0x2cb   : > { %v1876_v11 = vpop.f32.mrf.mxu0  ;;  %v2141_v39 = vadd.f32 %v2140_v62, %v2051_v49  ;;  %v10948_v62 = vld [vmem:[%s12880_s4 + $0x10] sm:$0xff] }
 0x2cc   : > { %2469 = vmatpush.bf16.msrb.mxu1 %v13242_v52  ;;  %v1965_v17 = vpop.f32.mrf.mxu1 }
 0x2cd   : > { %v1966_v48 = vadd.f32 %v1965_v17, %v1876_v11  ;;  %v2512_v25 = vpack.c.bf16 %v2141_v39, %v2139_v61 }
 0x2ce   : > { %1915 = vmatmul.bf16.gmra.mxu0 %v10673_v36  ;;  %2093 = vmatmul.bf16.gmra.mxu2 %v10673_v36  ;;  %v10898_v36 = vld [vmem:[%s12880_s4] sm:$0xff] }
 0x2cf   : > { %2004 = vmatmul.bf16.gmra.mxu1 %v10679_v15  ;;  %2182 = vmatmul.bf16.gmra.mxu3 %v10679_v15 }
 0x2d0   : > { %2228 = vperm.xlu2 %9372, %v542_v43  }
 0x2d1   : > { %v2054_v12 = vpop.f32.mrf.mxu2 }
 0x2d2   : > { %v2143_v40 = vpop.f32.mrf.mxu3 }
 0x2d3   : > { %v1878_v31 = vpop.f32.mrf.mxu0  ;;  %v2144_v33 = vadd.f32 %v2143_v40, %v2054_v12 }
 0x2d4   : > { %v1967_v0 = vpop.f32.mrf.mxu1 }
 0x2d5   : > { %v1968_v6 = vadd.f32 %v1967_v0, %v1878_v31 }
 0x2d7   : > { %v2513_v18 = vpack.c.bf16 %v1968_v6, %v1966_v48  ;;  %v13247_v48 = vpack.c.bf16 %v10723_v30, %v10715_v7  ;;  %v10970_v7 = vld [vmem:[%s12880_s4 + $0x18] sm:$0xff] }
 0x2d8   : > { %2213 = vperm.xlu2 %9372, %v539_v5  }
 0x2d9   : > { %2519 = vmatpush.bf16.msrb.mxu2 %v2513_v18  ;;  %v2056_v41 = vpop.f32.mrf.mxu2 }
 0x2da   : > { %v2145_v47 = vpop.f32.mrf.mxu3 }
 0x2db   : > { %v2146_v15 = vadd.f32 %v2145_v47, %v2056_v41  ;;  %v1881_v46 = vpop.f32.mrf.mxu0  ;;  %v13248_v47 = vpack.c.bf16 %v10707_v24, %v10699_v59 }
 0x2dc   : > { %v1970_v42 = vpop.f32.mrf.mxu1 }
 0x2dd   : > { %v2514_v10 = vpack.c.bf16 %v2146_v15, %v2144_v33  ;;  %2520 = vmatpush.bf16.msrb.mxu2 %v2511_v58  ;;  %v1971_v53 = vadd.f32 %v1970_v42, %v1881_v46  ;;  %v13249_v58 = vpack.c.bf16 %v10727_v54, %v10721_v51  ;;  %v13250_v46 = vpack.c.bf16 %v10711_v32, %v10705_v28 }
 0x2de   : > { %7762 = vmatmul.msk.bf16.vlgmr.msra.gmra.mxu0 %vm2256_vm1, %v10898_v36  ;;  %7770 = vmatmul.msk.bf16.vlgmr.msra.gmra.mxu2 %vm2256_vm1, %v10898_v36 }
 0x2df   : > { %7766 = vmatmul.msk.bf16.vlgmr.msra.gmra.mxu1 %vm2256_vm1, %v10898_v36  ;;  %7774 = vmatmul.msk.bf16.vlgmr.msra.gmra.mxu3 %vm2256_vm1, %v10898_v36 }
 0x2e0   : > { %2548 = vmatpush.bf16.msrb.mxu3 %v2514_v10 }
 0x2e1   : > { %2521 = vmatpush.bf16.msrb.mxu2 %v13243_v60  ;;  %v2059_v8 = vpop.f32.mrf.mxu2 }
 0x2e2   : > { %v2148_v13 = vpop.f32.mrf.mxu3 }
 0x2e3   : > { %v1883_v50 = vpop.f32.mrf.mxu0  ;;  %v2149_v0 = vadd.f32 %v2148_v13, %v2059_v8 }
 0x2e4   : > { %2549 = vmatpush.bf16.msrb.mxu3 %v2512_v25  ;;  %v1972_v38 = vpop.f32.mrf.mxu1 }
 0x2e5   : > { %2522 = vmatpush.bf16.msrb.mxu2 %v13244_v14  ;;  %v1973_v22 = vadd.f32 %v1972_v38, %v1883_v50 }
 0x2e7   : > { %v2593_v11 = vpack.c.bf16 %v1973_v22, %v1971_v53 }
 0x2e8   : > { %2550 = vmatpush.bf16.msrb.mxu3 %v13245_v55 }
 0x2e9   : > { %v2061_v20 = vpop.f32.mrf.mxu2 }
 0x2ea   : > { %v2150_v27 = vpop.f32.mrf.mxu3 }
 0x2eb   : > { %v1886_v19 = vpop.f32.mrf.mxu0  ;;  %v2151_v31 = vadd.f32 %v2150_v27, %v2061_v20  ;;  %v13251_v20 = vpack.c.bf16 %v10755_v56, %v10747_v35  ;;  %v13259_v35 = vld [vmem:[#allocation101_spill] sm:$0xff] }
 0x2ec   : > { %2551 = vmatpush.bf16.msrb.mxu3 %v13246_v26  ;;  %v1975_v44 = vpop.f32.mrf.mxu1 }
 0x2ed   : > { %v1976_v37 = vadd.f32 %v1975_v44, %v1886_v19  ;;  %v2594_v4 = vpack.c.bf16 %v2151_v31, %v2149_v0 }
 0x2ee   : > { %7763 = vmatmul.msk.bf16.gmra.mxu0 %vm2256_vm1, %v10926_v57  ;;  %7771 = vmatmul.msk.bf16.gmra.mxu2 %vm2256_vm1, %v10926_v57 }
 0x2ef   : > { %7767 = vmatmul.msk.bf16.gmra.mxu1 %vm2256_vm1, %v10926_v57  ;;  %7775 = vmatmul.msk.bf16.gmra.mxu3 %vm2256_vm1, %v10926_v57 }
 0x2f1   : > { %v2064_v3 = vpop.f32.mrf.mxu2 }
 0x2f2   : > { %v2153_v2 = vpop.f32.mrf.mxu3 }
 0x2f3   : > { %v1888_v9 = vpop.f32.mrf.mxu0  ;;  %v2154_v16 = vadd.f32 %v2153_v2, %v2064_v3  ;;  %v13252_v3 = vld [vmem:[#allocation102_spill] sm:$0xff]  ;;  %v13253_v2 = vld [vmem:[#allocation100_spill] sm:$0xff] }
 0x2f4   : > { %v1977_v34 = vpop.f32.mrf.mxu1 }
 0x2f5   : > { %v1978_v1 = vadd.f32 %v1977_v34, %v1888_v9  ;;  %v13254_v9 = vpack.c.bf16 %v13252_v3, %v13253_v2  ;;  %v13255_v34 = vld [vmem:[#allocation105_spill] sm:$0xff] }
 0x2f6   : > { %v547_v2 = vld [vmem:[%s12885_s9 + $0x18] sm:$0xff] }
 0x2f7   : > { %v2595_v29 = vpack.c.bf16 %v1978_v1, %v1976_v37  ;;  %v13256_v37 = vld [vmem:[#allocation104_spill] sm:$0xff] }
 0x2f8   : > { %v13257_v1 = vpack.c.bf16 %v13255_v34, %v13256_v37 }
 0x2f9   : > { %2601 = vmatpush.bf16.msra.mxu0 %v2595_v29  ;;  %v2066_v23 = vpop.f32.mrf.mxu2 }
 0x2fa   : > { %v2155_v49 = vpop.f32.mrf.mxu3 }
 0x2fb   : > { %v2156_v52 = vadd.f32 %v2155_v49, %v2066_v23  ;;  %v1891_v17 = vpop.f32.mrf.mxu0  ;;  %v13258_v23 = vld [vmem:[#allocation103_spill] sm:$0xff] }
 0x2fc   : > { %v1980_v12 = vpop.f32.mrf.mxu1  ;;  %v13260_v56 = vpack.c.bf16 %v13258_v23, %v13259_v35 }
 0x2fd   : > { %v2596_v40 = vpack.c.bf16 %v2156_v52, %v2154_v16  ;;  %2602 = vmatpush.bf16.msra.mxu0 %v2593_v11  ;;  %v1981_v61 = vadd.f32 %v1980_v12, %v1891_v17 }
 0x2fe   : > { %7764 = vmatmul.msk.bf16.gmra.mxu0 %vm2256_vm1, %v10948_v62  ;;  %7772 = vmatmul.msk.bf16.gmra.mxu2 %vm2256_vm1, %v10948_v62 }
 0x2ff   : > { %7768 = vmatmul.msk.bf16.gmra.mxu1 %vm2256_vm1, %v10948_v62  ;;  %7776 = vmatmul.msk.bf16.gmra.mxu3 %vm2256_vm1, %v10948_v62 }
 0x300   : > { %2630 = vmatpush.bf16.msra.mxu1 %v2596_v40 }
 0x301   : > { %2603 = vmatpush.bf16.msra.mxu0 %v13247_v48  ;;  %v2069_v6 = vpop.f32.mrf.mxu2 }
 0x302   : > { %v2158_v18 = vpop.f32.mrf.mxu3 }
 0x303   : > { %v1893_v45 = vpop.f32.mrf.mxu0  ;;  %v2159_v21 = vadd.f32 %v2158_v18, %v2069_v6 }
 0x304   : > { %2631 = vmatpush.bf16.msra.mxu1 %v2594_v4  ;;  %v1982_v41 = vpop.f32.mrf.mxu1 }
 0x305   : > { %2604 = vmatpush.bf16.msra.mxu0 %v13248_v47  ;;  %v1983_v28 = vadd.f32 %v1982_v41, %v1893_v45 }
 0x307   : > { %v2675_v63 = vpack.c.bf16 %v1983_v28, %v1981_v61  ;;  %v13265_v28 = vld [vmem:[#allocation106_spill] sm:$0xff]  ;;  %v13267_v61 = vld [vmem:[#allocation113_spill] sm:$0xff] }
 0x308   : > { %2632 = vmatpush.bf16.msra.mxu1 %v13249_v58 }
 0x309   : > { %v2071_v33 = vpop.f32.mrf.mxu2 }
 0x30a   : > { %v2160_v15 = vpop.f32.mrf.mxu3 }
 0x30b   : > { %v1896_v30 = vpop.f32.mrf.mxu0  ;;  %v2161_v55 = vadd.f32 %v2160_v15, %v2071_v33 }
 0x30c   : > { %2633 = vmatpush.bf16.msra.mxu1 %v13250_v46  ;;  %v1985_v42 = vpop.f32.mrf.mxu1  ;;  %v13262_v46 = vld [vmem:[#allocation110_spill] sm:$0xff] }
 0x30d   : > { %v1986_v10 = vadd.f32 %v1985_v42, %v1896_v30  ;;  %v2676_v19 = vpack.c.bf16 %v2161_v55, %v2159_v21  ;;  %v13261_v30 = vld [vmem:[#allocation112_spill] sm:$0xff]  ;;  %v548_v21 = vld [vmem:[%s12885_s9 + $0x20] sm:$0xff] }
 0x30e   : > { %7765 = vmatmul.msk.bf16.gmra.mxu0 %vm2256_vm1, %v10970_v7  ;;  %7773 = vmatmul.msk.bf16.gmra.mxu2 %vm2256_vm1, %v10970_v7  ;;  %v13263_v42 = vpack.c.bf16 %v13261_v30, %v13262_v46 }
 0x30f   : > { %7769 = vmatmul.msk.bf16.gmra.mxu1 %vm2256_vm1, %v10970_v7  ;;  %7777 = vmatmul.msk.bf16.gmra.mxu3 %vm2256_vm1, %v10970_v7 }
 0x310   : > { %5343 = vperm.xlu2 %9372, %v548_v21   ;;  %v13283_v21 = vld [vmem:[#allocation115_spill] sm:$0xff] }
 0x311   : > { %v2074_v59 = vpop.f32.mrf.mxu2 }
 0x312   : > { %v2163_v24 = vpop.f32.mrf.mxu3 }
 0x313   : > { %v1898_v54 = vpop.f32.mrf.mxu0  ;;  %v2164_v25 = vadd.f32 %v2163_v24, %v2074_v59 }
 0x314   : > { %v1987_v51 = vpop.f32.mrf.mxu1 }
 0x315   : > { %v1988_v32 = vadd.f32 %v1987_v51, %v1898_v54 }
 0x317   : > { %v2677_v39 = vpack.c.bf16 %v1988_v32, %v1986_v10  ;;  %v13264_v32 = vld [vmem:[#allocation108_spill] sm:$0xff] }
 0x318   : > { %5338 = vperm.xlu2 %9372, %v547_v2  }
 0x319   : > { %2683 = vmatpush.bf16.msra.mxu2 %v2677_v39  ;;  %v2076_v60 = vpop.f32.mrf.mxu2  ;;  %v13266_v39 = vpack.c.bf16 %v13264_v32, %v13265_v28  ;;  %v13279_v32 = vld [vmem:[#allocation121_spill] sm:$0xff]  ;;  %v13280_v28 = vld [vmem:[#allocation119_spill] sm:$0xff] }
 0x31a   : > { %v2165_v8 = vpop.f32.mrf.mxu3 }
 0x31b   : > { %v2166_v13 = vadd.f32 %v2165_v8, %v2076_v60  ;;  %v1901_v50 = vpop.f32.mrf.mxu0  ;;  %v13268_v60 = vld [vmem:[#allocation111_spill] sm:$0xff] }
 0x31c   : > { %v1990_v38 = vpop.f32.mrf.mxu1  ;;  %v13269_v8 = vpack.c.bf16 %v13267_v61, %v13268_v60 }
 0x31d   : > { %v2678_v14 = vpack.c.bf16 %v2166_v13, %v2164_v25  ;;  %2684 = vmatpush.bf16.msra.mxu2 %v2675_v63  ;;  %v1991_v0 = vadd.f32 %v1990_v38, %v1901_v50  ;;  %v13270_v50 = vld [vmem:[#allocation109_spill] sm:$0xff]  ;;  %v13271_v38 = vld [vmem:[#allocation107_spill] sm:$0xff] }
 0x31e   : > { %7778 = vmatmul.msk.bf16.vlgmr.msrb.gmra.mxu0 %vm2256_vm1, %v10898_v36  ;;  %7786 = vmatmul.msk.bf16.vlgmr.msrb.gmra.mxu2 %vm2256_vm1, %v10898_v36 }
 0x31f   : > { %7782 = vmatmul.msk.bf16.vlgmr.msrb.gmra.mxu1 %vm2256_vm1, %v10898_v36  ;;  %7790 = vmatmul.msk.bf16.vlgmr.msrb.gmra.mxu3 %vm2256_vm1, %v10898_v36 }
 0x320   : > { %2712 = vmatpush.bf16.msra.mxu3 %v2678_v14  ;;  %v13272_v14 = vpack.c.bf16 %v13270_v50, %v13271_v38 }
 0x321   : > { %2685 = vmatpush.bf16.msra.mxu2 %v13251_v20  ;;  %v2079_v27 = vpop.f32.mrf.mxu2 }
 0x322   : > { %v2168_v26 = vpop.f32.mrf.mxu3 }
 0x323   : > { %v1903_v44 = vpop.f32.mrf.mxu0  ;;  %v2169_v15 = vadd.f32 %v2168_v26, %v2079_v27  ;;  %v11042_v26 = vpop.permute.xlu2 %2218 }
 0x324   : > { %2713 = vmatpush.bf16.msra.mxu3 %v2676_v19  ;;  %v1992_v43 = vpop.f32.mrf.mxu1 }
 0x325   : > { %2686 = vmatpush.bf16.msra.mxu2 %v13254_v9  ;;  %v1993_v40 = vadd.f32 %v1992_v43, %v1903_v44 }
 0x327   : > { %v2757_v4 = vpack.c.bf16 %v1993_v40, %v1991_v0 }
 0x328   : > { %2714 = vmatpush.bf16.msra.mxu3 %v13257_v1 }
 0x329   : > { %v2081_v22 = vpop.f32.mrf.mxu2 }
 0x32a   : > { %v2170_v29 = vpop.f32.mrf.mxu3 }
 0x32b   : > { %v1906_v53 = vpop.f32.mrf.mxu0  ;;  %v2171_v33 = vadd.f32 %v2170_v29, %v2081_v22 }
 0x32c   : > { %2715 = vmatpush.bf16.msra.mxu3 %v13260_v56  ;;  %v1995_v5 = vpop.f32.mrf.mxu1 }
 0x32d   : > { %v1996_v17 = vadd.f32 %v1995_v5, %v1906_v53  ;;  %v2758_v24 = vpack.c.bf16 %v2171_v33, %v2169_v15  ;;  %v13276_v33 = vld [vmem:[#allocation116_spill] sm:$0xff]  ;;  %v13277_v15 = vld [vmem:[#allocation114_spill] sm:$0xff] }
 0x32e   : > { %7779 = vmatmul.msk.bf16.gmra.mxu0 %vm2256_vm1, %v10926_v57  ;;  %7787 = vmatmul.msk.bf16.gmra.mxu2 %vm2256_vm1, %v10926_v57  ;;  %v13278_v30 = vpack.c.bf16 %v13276_v33, %v13277_v15 }
 0x32f   : > { %7783 = vmatmul.msk.bf16.gmra.mxu1 %vm2256_vm1, %v10926_v57  ;;  %7791 = vmatmul.msk.bf16.gmra.mxu3 %vm2256_vm1, %v10926_v57 }
 0x331   : > { %v2084_v49 = vpop.f32.mrf.mxu2 }
 0x332   : > { %v2173_v11 = vpop.f32.mrf.mxu3 }
 0x333   : > { %v1908_v16 = vpop.f32.mrf.mxu0  ;;  %v2174_v18 = vadd.f32 %v2173_v11, %v2084_v49  ;;  %v11047_v49 = vpop.permute.xlu2 %2223 }
 0x334   : > { %v1997_v52 = vpop.f32.mrf.mxu1 }
 0x335   : > { %v1998_v12 = vadd.f32 %v1997_v52, %v1908_v16  ;;  %v11057_v52 = vpop.permute.xlu0 %2198 }
 0x337   : > { %v2759_v31 = vpack.c.bf16 %v1998_v12, %v1996_v17  ;;  %v13273_v17 = vld [vmem:[#allocation120_spill] sm:$0xff]  ;;  %v13274_v12 = vld [vmem:[#allocation118_spill] sm:$0xff] }
 0x338   : > { %v13275_v40 = vpack.c.bf16 %v13273_v17, %v13274_v12 }
 0x339   : > { %2765 = vmatpush.bf16.msrb.mxu0 %v2759_v31  ;;  %v2086_v48 = vpop.f32.mrf.mxu2 }
 0x33a   : > { %v2175_v6 = vpop.f32.mrf.mxu3 }
 0x33b   : > { %v2176_v45 = vadd.f32 %v2175_v6, %v2086_v48  ;;  %v1911_v41 = vpop.f32.mrf.mxu0 }
 0x33c   : > { %v2000_v47 = vpop.f32.mrf.mxu1 }
 0x33d   : > { %v2760_v58 = vpack.c.bf16 %v2176_v45, %v2174_v18  ;;  %2766 = vmatpush.bf16.msrb.mxu0 %v2757_v4  ;;  %v2001_v37 = vadd.f32 %v2000_v47, %v1911_v41  ;;  %v11063_v4 = vpop.permute.xlu1 %2203 }
 0x33e   : > { %7780 = vmatmul.msk.bf16.gmra.mxu0 %vm2256_vm1, %v10948_v62  ;;  %7788 = vmatmul.msk.bf16.gmra.mxu2 %vm2256_vm1, %v10948_v62 }
 0x33f   : > { %7784 = vmatmul.msk.bf16.gmra.mxu1 %vm2256_vm1, %v10948_v62  ;;  %7792 = vmatmul.msk.bf16.gmra.mxu3 %vm2256_vm1, %v10948_v62 }
 0x340   : > { %2794 = vmatpush.bf16.msrb.mxu1 %v2760_v58 }
 0x341   : > { %2767 = vmatpush.bf16.msrb.mxu0 %v13263_v42  ;;  %v2089_v59 = vpop.f32.mrf.mxu2 }
 0x342   : > { %v2178_v54 = vpop.f32.mrf.mxu3 }
 0x343   : > { %v1913_v51 = vpop.f32.mrf.mxu0  ;;  %v2179_v16 = vadd.f32 %v2178_v54, %v2089_v59  ;;  %v11071_v54 = vpop.permute.xlu2 %2228 }
 0x344   : > { %2795 = vmatpush.bf16.msrb.mxu1 %v2758_v24  ;;  %v2002_v10 = vpop.f32.mrf.mxu1 }
 0x345   : > { %2768 = vmatpush.bf16.msrb.mxu0 %v13266_v39  ;;  %v2003_v9 = vadd.f32 %v2002_v10, %v1913_v51  ;;  %v13281_v39 = vpack.c.bf16 %v13279_v32, %v13280_v28  ;;  %v11099_v2 = vpop.permute.xlu1 %2208 }
 0x347   : > { %v2839_v29 = vpack.c.bf16 %v2003_v9, %v2001_v37 }
 0x348   : > { %2796 = vmatpush.bf16.msrb.mxu1 %v13269_v8 }
 0x349   : > { %v2091_v63 = vpop.f32.mrf.mxu2 }
 0x34a   : > { %v2180_v25 = vpop.f32.mrf.mxu3 }
 0x34b   : > { %v1916_v13 = vpop.f32.mrf.mxu0  ;;  %v2181_v11 = vadd.f32 %v2180_v25, %v2091_v63 }
 0x34c   : > { %2797 = vmatpush.bf16.msrb.mxu1 %v13272_v14  ;;  %v2005_v55 = vpop.f32.mrf.mxu1 }
 0x34d   : > { %v2006_v43 = vadd.f32 %v2005_v55, %v1916_v13  ;;  %v2840_v0 = vpack.c.bf16 %v2181_v11, %v2179_v16  ;;  %v13282_v55 = vld [vmem:[#allocation117_spill] sm:$0xff] }
 0x34e   : > { %7781 = vmatmul.msk.bf16.gmra.mxu0 %vm2256_vm1, %v10970_v7  ;;  %7789 = vmatmul.msk.bf16.gmra.mxu2 %vm2256_vm1, %v10970_v7 }
 0x34f   : > { %7785 = vmatmul.msk.bf16.gmra.mxu1 %vm2256_vm1, %v10970_v7  ;;  %7793 = vmatmul.msk.bf16.gmra.mxu3 %vm2256_vm1, %v10970_v7 }
 0x351   : > { %v2094_v20 = vpop.f32.mrf.mxu2 }
 0x352   : > { %v2183_v27 = vpop.f32.mrf.mxu3 }
 0x353   : > { %v1918_v19 = vpop.f32.mrf.mxu0  ;;  %v2184_v53 = vadd.f32 %v2183_v27, %v2094_v20  ;;  %v13284_v20 = vpack.c.bf16 %v13282_v55, %v13283_v21 }
 0x354   : > { %v2007_v44 = vpop.f32.mrf.mxu1 }
 0x355   : > { %v2008_v3 = vadd.f32 %v2007_v44, %v1918_v19 }
 0x357   : > { %v2841_v34 = vpack.c.bf16 %v2008_v3, %v2006_v43 }
 0x359   : > { %2847 = vmatpush.bf16.msrb.mxu2 %v2841_v34  ;;  %v2096_v1 = vpop.f32.mrf.mxu2  ;;  %v11101_v34 = vpop.permute.xlu2 %2213 }
 0x35a   : > { %v2185_v22 = vpop.f32.mrf.mxu3 }
 0x35b   : > { %v2186_v23 = vadd.f32 %v2185_v22, %v2096_v1  ;;  %v2278_v35 = vpop.f32.mrf.mxu0 }
 0x35c   : > { %v2307_v56 = vpop.f32.mrf.mxu1  ;;  %v2279_v48 = vadd.f32 %v2278_v35, %v11057_v52 }
 0x35d   : > { %v2842_v5 = vpack.c.bf16 %v2186_v23, %v2184_v53  ;;  %2848 = vmatpush.bf16.msrb.mxu2 %v2839_v29  ;;  %v2308_v18 = vadd.f32 %v2307_v56, %v11057_v52 }
 0x35e   : > { %7794 = vmatmul.msk.bf16.vlgmr.msra.gmra.mxu0 %vm2256_vm1, %v10898_v36  ;;  %7802 = vmatmul.msk.bf16.vlgmr.msra.gmra.mxu2 %vm2256_vm1, %v10898_v36  ;;  %v2327_v46 = vmax.f32 %v2279_v48, 0.0 }
 0x35f   : > { %7798 = vmatmul.msk.bf16.vlgmr.msra.gmra.mxu1 %vm2256_vm1, %v10898_v36  ;;  %7806 = vmatmul.msk.bf16.vlgmr.msra.gmra.mxu3 %vm2256_vm1, %v10898_v36  ;;  %v2328_v59 = vmax.f32 %v2308_v18, 0.0 }
 0x360   : > { %2876 = vmatpush.bf16.msrb.mxu3 %v2842_v5 }
 0x361   : > { %2849 = vmatpush.bf16.msrb.mxu2 %v13275_v40  ;;  %v2360_v31 = vpop.f32.mrf.mxu2 }
 0x362   : > { %v2389_v6 = vpop.f32.mrf.mxu3  ;;  %v2361_v51 = vadd.f32 %v2360_v31, %v11057_v52 }
 0x363   : > { %v2280_v45 = vpop.f32.mrf.mxu0  ;;  %v2390_v61 = vadd.f32 %v2389_v6, %v11057_v52 }
 0x364   : > { %2877 = vmatpush.bf16.msrb.mxu3 %v2840_v0  ;;  %v2281_v41 = vadd.f32 %v2280_v45, %v11063_v4  ;;  %v2309_v47 = vpop.f32.mrf.mxu1  ;;  %v2409_v38 = vmax.f32 %v2361_v51, 0.0 }
 0x365   : > { %v2310_v58 = vadd.f32 %v2309_v47, %v11063_v4  ;;  %2850 = vmatpush.bf16.msrb.mxu2 %v13278_v30  ;;  %v2410_v19 = vmax.f32 %v2390_v61, 0.0 }
 0x366   : > { %v2329_v42 = vmax.f32 %v2281_v41, 0.0 }
 0x367   : > { %v2330_v24 = vmax.f32 %v2310_v58, 0.0 }
 0x368   : > { %v11074_v10 = vpack.c.bf16 %v2329_v42, %v2327_v46  ;;  %2878 = vmatpush.bf16.msrb.mxu3 %v13281_v39 }
 0x369   : > { %v11080_v60 = vpack.c.bf16 %v2330_v24, %v2328_v59  ;;  %v2362_v8 = vpop.f32.mrf.mxu2 }
 0x36a   : > { %v2363_v63 = vadd.f32 %v2362_v8, %v11063_v4  ;;  %v2391_v25 = vpop.f32.mrf.mxu3 }
 0x36b   : > { %v2392_v13 = vadd.f32 %v2391_v25, %v11063_v4  ;;  %v2283_v50 = vpop.f32.mrf.mxu0 }
 0x36c   : > { %v2411_v14 = vmax.f32 %v2363_v63, 0.0  ;;  %2879 = vmatpush.bf16.msrb.mxu3 %v13284_v20  ;;  %v2312_v27 = vpop.f32.mrf.mxu1  ;;  %v2284_v37 = vadd.f32 %v2283_v50, %v11099_v2 }
 0x36d   : > { %v2412_v44 = vmax.f32 %v2392_v13, 0.0  ;;  %v2313_v22 = vadd.f32 %v2312_v27, %v11099_v2 }
 0x36e   : > { %7795 = vmatmul.msk.bf16.gmra.mxu0 %vm2256_vm1, %v10926_v57  ;;  %7803 = vmatmul.msk.bf16.gmra.mxu2 %vm2256_vm1, %v10926_v57  ;;  %v11091_v43 = vpack.c.bf16 %v2411_v14, %v2409_v38  ;;  %v2331_v56 = vmax.f32 %v2284_v37, 0.0 }
 0x36f   : > { %7799 = vmatmul.msk.bf16.gmra.mxu1 %vm2256_vm1, %v10926_v57  ;;  %7807 = vmatmul.msk.bf16.gmra.mxu3 %vm2256_vm1, %v10926_v57  ;;  %v11097_v3 = vpack.c.bf16 %v2412_v44, %v2410_v19  ;;  %v2332_v11 = vmax.f32 %v2313_v22, 0.0 }
 0x370   : > { %13285 = vst [vmem:[#allocation62_spill] sm:$0xff] %v11091_v43 }
 0x371   : > { %13286 = vst [vmem:[#allocation58_spill] sm:$0xff] %v11097_v3  ;;  %v2365_v9 = vpop.f32.mrf.mxu2 }
 0x372   : > { %v2394_v1 = vpop.f32.mrf.mxu3  ;;  %v2366_v17 = vadd.f32 %v2365_v9, %v11099_v2 }
 0x373   : > { %v2285_v29 = vpop.f32.mrf.mxu0  ;;  %v2395_v40 = vadd.f32 %v2394_v1, %v11099_v2 }
 0x374   : > { %v2286_v53 = vadd.f32 %v2285_v29, %v11101_v34  ;;  %v2314_v23 = vpop.f32.mrf.mxu1  ;;  %v2413_v41 = vmax.f32 %v2366_v17, 0.0 }
 0x375   : > { %v2315_v35 = vadd.f32 %v2314_v23, %v11101_v34  ;;  %v2414_v33 = vmax.f32 %v2395_v40, 0.0 }
 0x376   : > { %v2333_v5 = vmax.f32 %v2286_v53, 0.0 }
 0x377   : > { %v2334_v16 = vmax.f32 %v2315_v35, 0.0 }
 0x378   : > { %v11108_v12 = vpack.c.bf16 %v2333_v5, %v2331_v56 }
 0x379   : > { %v2367_v31 = vpop.f32.mrf.mxu2  ;;  %v11111_v0 = vpack.c.bf16 %v2334_v16, %v2332_v11  ;;  %v11153_v16 = vpop.permute.xlu0 %2233 }
 0x37a   : > { %v2368_v48 = vadd.f32 %v2367_v31, %v11101_v34  ;;  %v2396_v6 = vpop.f32.mrf.mxu3 }
 0x37b   : > { %v2397_v18 = vadd.f32 %v2396_v6, %v11101_v34  ;;  %v2288_v45 = vpop.f32.mrf.mxu0 }
 0x37c   : > { %v2415_v47 = vmax.f32 %v2368_v48, 0.0  ;;  %v2317_v58 = vpop.f32.mrf.mxu1  ;;  %v2289_v42 = vadd.f32 %v2288_v45, %v11042_v26 }
 0x37d   : > { %v2416_v15 = vmax.f32 %v2397_v18, 0.0  ;;  %v2318_v59 = vadd.f32 %v2317_v58, %v11042_v26 }
 0x37e   : > { %7796 = vmatmul.msk.bf16.gmra.mxu0 %vm2256_vm1, %v10948_v62  ;;  %7804 = vmatmul.msk.bf16.gmra.mxu2 %vm2256_vm1, %v10948_v62  ;;  %v11119_v30 = vpack.c.bf16 %v2415_v47, %v2413_v41  ;;  %v2335_v28 = vmax.f32 %v2289_v42, 0.0 }
 0x37f   : > { %7800 = vmatmul.msk.bf16.gmra.mxu1 %vm2256_vm1, %v10948_v62  ;;  %7808 = vmatmul.msk.bf16.gmra.mxu3 %vm2256_vm1, %v10948_v62  ;;  %v11125_v46 = vpack.c.bf16 %v2416_v15, %v2414_v33  ;;  %v2336_v8 = vmax.f32 %v2318_v59, 0.0 }
 0x380   : > { %13287 = vst [vmem:[#allocation54_spill] sm:$0xff] %v11119_v30 }
 0x381   : > { %13288 = vst [vmem:[#allocation68_spill] sm:$0xff] %v11125_v46  ;;  %v2370_v24 = vpop.f32.mrf.mxu2 }
 0x382   : > { %v2399_v51 = vpop.f32.mrf.mxu3  ;;  %v2371_v50 = vadd.f32 %v2370_v24, %v11042_v26 }
 0x383   : > { %v2290_v32 = vpop.f32.mrf.mxu0  ;;  %v2400_v14 = vadd.f32 %v2399_v51, %v11042_v26 }
 0x384   : > { %v2291_v39 = vadd.f32 %v2290_v32, %v11047_v49  ;;  %v2319_v61 = vpop.f32.mrf.mxu1  ;;  %v2417_v9 = vmax.f32 %v2371_v50, 0.0 }
 0x385   : > { %v2320_v63 = vadd.f32 %v2319_v61, %v11047_v49  ;;  %v2418_v22 = vmax.f32 %v2400_v14, 0.0 }
 0x386   : > { %v2337_v25 = vmax.f32 %v2291_v39, 0.0 }
 0x387   : > { %v2338_v13 = vmax.f32 %v2320_v63, 0.0 }
 0x388   : > { %v11132_v38 = vpack.c.bf16 %v2337_v25, %v2335_v28  ;;  %v7884_v25 = vld [vmem:[#allocation7 + $0x70] sm:$0xf] }
 0x389   : > { %v11135_v55 = vpack.c.bf16 %v2338_v13, %v2336_v8  ;;  %v2372_v21 = vpop.f32.mrf.mxu2  ;;  %v9063_v13 = vld [vmem:[#allocation7 + $0x74] sm:$0xf0] }
 0x38a   : > { %v2373_v20 = vadd.f32 %v2372_v21, %v11047_v49  ;;  %v2401_v27 = vpop.f32.mrf.mxu3  ;;  %v7885_v14 = vor.u32 %v9063_v13, %v7884_v25  ;;  %v7948_v21 = vld [vmem:[#allocation7 + $0xf0] sm:$0xf] }
 0x38b   : > { %v2402_v19 = vadd.f32 %v2401_v27, %v11047_v49  ;;  %v2293_v44 = vpop.f32.mrf.mxu0 }
 0x38c   : > { %v2419_v37 = vmax.f32 %v2373_v20, 0.0  ;;  %v2322_v1 = vpop.f32.mrf.mxu1  ;;  %v2294_v35 = vadd.f32 %v2293_v44, %v11071_v54  ;;  %v9079_v20 = vld [vmem:[#allocation7 + $0xf4] sm:$0xf0]  ;;  %v8012_v44 = vld [vmem:[#allocation7 + $0x170] sm:$0xf]  ;;  %3365 = vmatpush.bf16.msra.mxu0 %v7885_v14 }
 0x38d   : > { %v2420_v29 = vmax.f32 %v2402_v19, 0.0  ;;  %v2323_v56 = vadd.f32 %v2322_v1, %v11071_v54  ;;  %v7949_v19 = vor.u32 %v9079_v20, %v7948_v21  ;;  %v7932_v14 = vld [vmem:[#allocation7 + $0xd0] sm:$0xf]  ;;  %v9075_v21 = vld [vmem:[#allocation7 + $0xd4] sm:$0xf0] }
 0x38e   : > { %7797 = vmatmul.msk.bf16.gmra.mxu0 %vm2256_vm1, %v10970_v7  ;;  %7805 = vmatmul.msk.bf16.gmra.mxu2 %vm2256_vm1, %v10970_v7  ;;  %v11143_v53 = vpack.c.bf16 %v2419_v37, %v2417_v9  ;;  %v2339_v40 = vmax.f32 %v2294_v35, 0.0  ;;  %v9095_v9 = vld [vmem:[#allocation7 + $0x174] sm:$0xf0]  ;;  %v8076_v37 = vld [vmem:[#allocation7 + $0x1f0] sm:$0xf] }
 0x38f   : > { %7801 = vmatmul.msk.bf16.gmra.mxu1 %vm2256_vm1, %v10970_v7  ;;  %7809 = vmatmul.msk.bf16.gmra.mxu3 %vm2256_vm1, %v10970_v7  ;;  %v11149_v23 = vpack.c.bf16 %v2420_v29, %v2418_v22  ;;  %v2340_v6 = vmax.f32 %v2323_v56, 0.0  ;;  %v8013_v22 = vor.u32 %v9095_v9, %v8012_v44  ;;  %v9111_v29 = vld [vmem:[#allocation7 + $0x1f4] sm:$0xf0]  ;;  %v7996_v44 = vld [vmem:[#allocation7 + $0x150] sm:$0xf] }
 0x390   : > { %13289 = vst [vmem:[#allocation63_spill] sm:$0xff] %v11143_v53  ;;  %3454 = vmatpush.bf16.msra.mxu1 %v7949_v19  ;;  %v7933_v19 = vor.u32 %v9075_v21, %v7932_v14  ;;  %v9091_v9 = vld [vmem:[#allocation7 + $0x154] sm:$0xf0] }
 0x391   : > { %13290 = vst [vmem:[#allocation61_spill] sm:$0xff] %v11149_v23  ;;  %v2375_v5 = vpop.f32.mrf.mxu2  ;;  %3543 = vmatpush.bf16.msra.mxu2 %v8013_v22 }
 0x392   : > { %v2404_v11 = vpop.f32.mrf.mxu3  ;;  %v2376_v47 = vadd.f32 %v2375_v5, %v11071_v54  ;;  %v8077_v5 = vor.u32 %v9111_v29, %v8076_v37  ;;  %v8060_v37 = vld [vmem:[#allocation7 + $0x1d0] sm:$0xf] }
 0x393   : > { %v2295_v17 = vpop.f32.mrf.mxu0  ;;  %v2405_v33 = vadd.f32 %v2404_v11, %v11071_v54  ;;  %v7876_v11 = vld [vmem:[#allocation7 + $0x60] sm:$0xf] }
 0x394   : > { %v2296_v31 = vadd.f32 %v2295_v17, %v11153_v16  ;;  %v2324_v48 = vpop.f32.mrf.mxu1  ;;  %v2421_v28 = vmax.f32 %v2376_v47, 0.0  ;;  %v7940_v17 = vld [vmem:[#allocation7 + $0xe0] sm:$0xf]  ;;  %3632 = vmatpush.bf16.msra.mxu3 %v8077_v5  ;;  %v7997_v5 = vor.u32 %v9091_v9, %v7996_v44 }
 0x395   : > { %v2325_v18 = vadd.f32 %v2324_v48, %v11153_v16  ;;  %v2422_v8 = vmax.f32 %v2405_v33, 0.0 }
 0x396   : > { %v2341_v45 = vmax.f32 %v2296_v31, 0.0 }
 0x397   : > { %v2342_v41 = vmax.f32 %v2325_v18, 0.0  ;;  %v8004_v18 = vld [vmem:[#allocation7 + $0x160] sm:$0xf] }
 0x398   : > { %v11158_v58 = vpack.c.bf16 %v2341_v45, %v2339_v40  ;;  %v9093_v45 = vld [vmem:[#allocation7 + $0x164] sm:$0xf0] }
 0x399   : > { %v2377_v15 = vpop.f32.mrf.mxu2  ;;  %v11161_v42 = vpack.c.bf16 %v2342_v41, %v2340_v6  ;;  %v9077_v6 = vld [vmem:[#allocation7 + $0xe4] sm:$0xf0] }
 0x39a   : > { %v2378_v59 = vadd.f32 %v2377_v15, %v11153_v16  ;;  %v2406_v24 = vpop.f32.mrf.mxu3  ;;  %v7941_v33 = vor.u32 %v9077_v6, %v7940_v17  ;;  %v8005_v15 = vor.u32 %v9093_v45, %v8004_v18  ;;  %v7924_v6 = vld [vmem:[#allocation7 + $0xc0] sm:$0xf] }
 0x39b   : > { %v2407_v51 = vadd.f32 %v2406_v24, %v11153_v16  ;;  %v2442_v32 = vpop.f32.mrf.mxu0  ;;  %v9109_v24 = vld [vmem:[#allocation7 + $0x1e4] sm:$0xf0] }
 0x39c   : > { %v2423_v39 = vmax.f32 %v2378_v59, 0.0  ;;  %v2471_v61 = vpop.f32.mrf.mxu1  ;;  %v2443_v35 = vadd.f32 %v2442_v32, %v11057_v52  ;;  %v8068_v59 = vld [vmem:[#allocation7 + $0x1e0] sm:$0xf]  ;;  %3455 = vmatpush.bf16.msra.mxu1 %v7941_v33  ;;  %3544 = vmatpush.bf16.msra.mxu2 %v8005_v15  ;;  %v9089_v33 = vld [vmem:[#allocation7 + $0x144] sm:$0xf0] }
 0x39d   : > { %v2424_v63 = vmax.f32 %v2407_v51, 0.0  ;;  %v2472_v40 = vadd.f32 %v2471_v61, %v11057_v52  ;;  %v8069_v32 = vor.u32 %v9109_v24, %v8068_v59  ;;  %v7868_v61 = vld [vmem:[#allocation7 + $0x50] sm:$0xf] }
 0x39e   : > { %7810 = vmatmul.msk.bf16.vlgmr.msrb.gmra.mxu0 %vm2256_vm1, %v10898_v36  ;;  %7818 = vmatmul.msk.bf16.vlgmr.msrb.gmra.mxu2 %vm2256_vm1, %v10898_v36  ;;  %v11169_v50 = vpack.c.bf16 %v2423_v39, %v2421_v28  ;;  %v2491_v28 = vmax.f32 %v2443_v35, 0.0 }
 0x39f   : > { %7814 = vmatmul.msk.bf16.vlgmr.msrb.gmra.mxu1 %vm2256_vm1, %v10898_v36  ;;  %7822 = vmatmul.msk.bf16.vlgmr.msrb.gmra.mxu3 %vm2256_vm1, %v10898_v36  ;;  %v11175_v27 = vpack.c.bf16 %v2424_v63, %v2422_v8  ;;  %v9061_v36 = vld [vmem:[#allocation7 + $0x64] sm:$0xf0]  ;;  %v9059_v8 = vld [vmem:[#allocation7 + $0x54] sm:$0xf0]  ;;  %v2492_v63 = vmax.f32 %v2472_v40, 0.0 }
 0x3a0   : > { %13291 = vst [vmem:[#allocation55_spill] sm:$0xff] %v11169_v50  ;;  %v7877_v48 = vor.u32 %v9061_v36, %v7876_v11  ;;  %v7869_v13 = vor.u32 %v9059_v8, %v7868_v61  ;;  %3633 = vmatpush.bf16.msra.mxu3 %v8069_v32  ;;  %v9107_v11 = vld [vmem:[#allocation7 + $0x1d4] sm:$0xf0]  ;;  %3456 = vmatpush.bf16.msra.mxu1 %v7933_v19 }
 0x3a1   : > { %13292 = vst [vmem:[#allocation81_spill] sm:$0xff] %v11175_v27  ;;  %v2524_v1 = vpop.f32.mrf.mxu2  ;;  %3545 = vmatpush.bf16.msra.mxu2 %v7997_v5  ;;  %v9071_v19 = vld [vmem:[#allocation7 + $0xb4] sm:$0xf0] }
 0x3a2   : > { %v2553_v56 = vpop.f32.mrf.mxu3  ;;  %3366 = vmatpush.bf16.msra.mxu0 %v7877_v48  ;;  %v2525_v20 = vadd.f32 %v2524_v1, %v11057_v52  ;;  %v8061_v1 = vor.u32 %v9107_v11, %v8060_v37  ;;  %v9057_v48 = vld [vmem:[#allocation7 + $0x44] sm:$0xf0]  ;;  %v7980_v37 = vld [vmem:[#allocation7 + $0x130] sm:$0xf] }
 0x3a3   : > { %v2444_v31 = vpop.f32.mrf.mxu0  ;;  %v2554_v29 = vadd.f32 %v2553_v56, %v11057_v52  ;;  %v9073_v56 = vld [vmem:[#allocation7 + $0xc4] sm:$0xf0] }
 0x3a4   : > { %v2445_v41 = vadd.f32 %v2444_v31, %v11063_v4  ;;  %v2473_v47 = vpop.f32.mrf.mxu1  ;;  %v7860_v31 = vld [vmem:[#allocation7 + $0x40] sm:$0xf]  ;;  %v2573_v15 = vmax.f32 %v2525_v20, 0.0  ;;  %3634 = vmatpush.bf16.msra.mxu3 %v8061_v1  ;;  %v7916_v20 = vld [vmem:[#allocation7 + $0xb0] sm:$0xf] }
 0x3a5   : > { %v2474_v51 = vadd.f32 %v2473_v47, %v11063_v4  ;;  %v7988_v47 = vld [vmem:[#allocation7 + $0x140] sm:$0xf]  ;;  %v2574_v61 = vmax.f32 %v2554_v29, 0.0  ;;  %v7917_v9 = vor.u32 %v9071_v19, %v7916_v20  ;;  %v9087_v29 = vld [vmem:[#allocation7 + $0x134] sm:$0xf0] }
 0x3a6   : > { %v2493_v39 = vmax.f32 %v2445_v41, 0.0  ;;  %3367 = vmatpush.bf16.msra.mxu0 %v7869_v13  ;;  %v7861_v41 = vor.u32 %v9057_v48, %v7860_v31  ;;  %v7989_v32 = vor.u32 %v9089_v33, %v7988_v47  ;;  %v9055_v13 = vld [vmem:[#allocation7 + $0x34] sm:$0xf0]  ;;  %v7981_v11 = vor.u32 %v9087_v29, %v7980_v37  ;;  %v7844_v31 = vld [vmem:[#allocation7 + $0x20] sm:$0xf] }
 0x3a7   : > { %v2494_v25 = vmax.f32 %v2474_v51, 0.0  ;;  %v7925_v51 = vor.u32 %v9073_v56, %v7924_v6  ;;  %v9053_v48 = vld [vmem:[#allocation7 + $0x24] sm:$0xf0]  ;;  %v7908_v6 = vld [vmem:[#allocation7 + $0xa0] sm:$0xf] }
 0x3a8   : > { %v11182_v22 = vpack.c.bf16 %v2493_v39, %v2491_v28  ;;  %v8052_v28 = vld [vmem:[#allocation7 + $0x1c0] sm:$0xf]  ;;  %v9105_v39 = vld [vmem:[#allocation7 + $0x1c4] sm:$0xf0]  ;;  %3546 = vmatpush.bf16.msra.mxu2 %v7989_v32  ;;  %v7845_v56 = vor.u32 %v9053_v48, %v7844_v31  ;;  %v7900_v37 = vld [vmem:[#allocation7 + $0x90] sm:$0xf] }
 0x3a9   : > { %v2526_v35 = vpop.f32.mrf.mxu2  ;;  %v11185_v36 = vpack.c.bf16 %v2494_v25, %v2492_v63  ;;  %v8053_v63 = vor.u32 %v9105_v39, %v8052_v28  ;;  %v7852_v25 = vld [vmem:[#allocation7 + $0x30] sm:$0xf]  ;;  %3457 = vmatpush.bf16.msra.mxu1 %v7925_v51  ;;  %v9069_v47 = vld [vmem:[#allocation7 + $0xa4] sm:$0xf0]  ;;  %v7972_v33 = vld [vmem:[#allocation7 + $0x120] sm:$0xf] }
 0x3aa   : > { %13293 = vst [vmem:[#allocation77_spill] sm:$0xff] %v11182_v22  ;;  %v2527_v17 = vadd.f32 %v2526_v35, %v11063_v4  ;;  %v2555_v40 = vpop.f32.mrf.mxu3  ;;  %3368 = vmatpush.bf16.msra.mxu0 %v7861_v41  ;;  %v7853_v21 = vor.u32 %v9055_v13, %v7852_v25  ;;  %v8044_v35 = vld [vmem:[#allocation7 + $0x1b0] sm:$0xf]  ;;  %v7909_v32 = vor.u32 %v9069_v47, %v7908_v6  ;;  %v9101_v39 = vld [vmem:[#allocation7 + $0x1a4] sm:$0xf0] }
 0x3ab   : > { %13294 = vst [vmem:[#allocation73_spill] sm:$0xff] %v11185_v36  ;;  %v2556_v18 = vadd.f32 %v2555_v40, %v11063_v4  ;;  %v2447_v45 = vpop.f32.mrf.mxu0  ;;  %3635 = vmatpush.bf16.msra.mxu3 %v8053_v63  ;;  %v7836_v25 = vld [vmem:[#allocation7 + $0x10] sm:$0xf]  ;;  %v9051_v13 = vld [vmem:[#allocation7 + $0x14] sm:$0xf0] }
 0x3ac   : > { %v2575_v59 = vmax.f32 %v2527_v17, 0.0  ;;  %v2476_v24 = vpop.f32.mrf.mxu1  ;;  %v9103_v17 = vld [vmem:[#allocation7 + $0x1b4] sm:$0xf0]  ;;  %v2448_v40 = vadd.f32 %v2447_v45, %v11099_v2  ;;  %3547 = vmatpush.bf16.msra.mxu2 %v7981_v11  ;;  %v8036_v45 = vld [vmem:[#allocation7 + $0x1a0] sm:$0xf]  ;;  %v7837_v19 = vor.u32 %v9051_v13, %v7836_v25 }
 0x3ad   : > { %v2576_v8 = vmax.f32 %v2556_v18, 0.0  ;;  %v2477_v18 = vadd.f32 %v2476_v24, %v11099_v2  ;;  %3458 = vmatpush.bf16.msra.mxu1 %v7917_v9  ;;  %v9067_v29 = vld [vmem:[#allocation7 + $0x94] sm:$0xf0]  ;;  %v7964_v11 = vld [vmem:[#allocation7 + $0x110] sm:$0xf] }
 0x3ae   : > { %7811 = vmatmul.msk.bf16.gmra.mxu0 %vm2256_vm1, %v10926_v57  ;;  %7819 = vmatmul.msk.bf16.gmra.mxu2 %vm2256_vm1, %v10926_v57  ;;  %v11193_v14 = vpack.c.bf16 %v2575_v59, %v2573_v15  ;;  %v9085_v15 = vld [vmem:[#allocation7 + $0x124] sm:$0xf0]  ;;  %v2495_v24 = vmax.f32 %v2448_v40, 0.0  ;;  %v8028_v31 = vld [vmem:[#allocation7 + $0x190] sm:$0xf] }
 0x3af   : > { %7815 = vmatmul.msk.bf16.gmra.mxu1 %vm2256_vm1, %v10926_v57  ;;  %7823 = vmatmul.msk.bf16.gmra.mxu3 %vm2256_vm1, %v10926_v57  ;;  %v11199_v44 = vpack.c.bf16 %v2576_v8, %v2574_v61  ;;  %v8045_v57 = vor.u32 %v9103_v17, %v8044_v35  ;;  %v7973_v28 = vor.u32 %v9085_v15, %v7972_v33  ;;  %v9083_v17 = vld [vmem:[#allocation7 + $0x114] sm:$0xf0]  ;;  %v7828_v33 = vld [vmem:[#allocation7] sm:$0xf]  ;;  %v9049_v15 = vld [vmem:[#allocation7 + $0x4] sm:$0xf0] }
 0x3b0   : > { %3369 = vmatpush.bf16.msra.mxu0 %v7853_v21  ;;  %v8037_v8 = vor.u32 %v9101_v39, %v8036_v45  ;;  %v2496_v21 = vmax.f32 %v2477_v18, 0.0  ;;  %v7901_v35 = vor.u32 %v9067_v29, %v7900_v37  ;;  %v7965_v6 = vor.u32 %v9083_v17, %v7964_v11  ;;  %v9099_v18 = vld [vmem:[#allocation7 + $0x194] sm:$0xf0]  ;;  %v9065_v45 = vld [vmem:[#allocation7 + $0x84] sm:$0xf0] }
 0x3b1   : > { %13295 = vst [vmem:[#allocation69_spill] sm:$0xff] %v11199_v44  ;;  %v2529_v5 = vpop.f32.mrf.mxu2  ;;  %3636 = vmatpush.bf16.msra.mxu3 %v8045_v57  ;;  %3459 = vmatpush.bf16.msra.mxu1 %v7909_v32  ;;  %v8029_v47 = vor.u32 %v9099_v18, %v8028_v31  ;;  %v9081_v39 = vld [vmem:[#allocation7 + $0x104] sm:$0xf0]  ;;  %v8020_v13 = vld [vmem:[#allocation7 + $0x180] sm:$0xf] }
 0x3b2   : > { %v2558_v1 = vpop.f32.mrf.mxu3  ;;  %v2530_v9 = vadd.f32 %v2529_v5, %v11099_v2  ;;  %3548 = vmatpush.bf16.msra.mxu2 %v7973_v28  ;;  %v7829_v28 = vor.u32 %v9049_v15, %v7828_v33 }
 0x3b3   : > { %v2449_v41 = vpop.f32.mrf.mxu0  ;;  %v2559_v40 = vadd.f32 %v2558_v1, %v11099_v2  ;;  %v7956_v1 = vld [vmem:[#allocation7 + $0x100] sm:$0xf] }
 0x3b4   : > { %v2450_v59 = vadd.f32 %v2449_v41, %v11101_v34  ;;  %v2478_v51 = vpop.f32.mrf.mxu1  ;;  %3370 = vmatpush.bf16.msra.mxu0 %v7845_v56  ;;  %v7957_v25 = vor.u32 %v9081_v39, %v7956_v1 }
 0x3b5   : > { %v2479_v61 = vadd.f32 %v2478_v51, %v11101_v34  ;;  %3637 = vmatpush.bf16.msra.mxu3 %v8037_v8  ;;  %3460 = vmatpush.bf16.msra.mxu1 %v7901_v35 }
 0x3b6   : > { %v2497_v63 = vmax.f32 %v2450_v59, 0.0  ;;  %v7892_v59 = vld [vmem:[#allocation7 + $0x80] sm:$0xf]  ;;  %3549 = vmatpush.bf16.msra.mxu2 %v7965_v6 }
 0x3b7   : > { %v2498_v20 = vmax.f32 %v2479_v61, 0.0  ;;  %v2577_v61 = vmax.f32 %v2530_v9, 0.0 }
 0x3b8   : > { %v11206_v57 = vpack.c.bf16 %v2497_v63, %v2495_v24  ;;  %3371 = vmatpush.bf16.msra.mxu0 %v7837_v19  ;;  %v7893_v63 = vor.u32 %v9065_v45, %v7892_v59 }
 0x3b9   : > { %v2531_v48 = vpop.f32.mrf.mxu2  ;;  %v11209_v41 = vpack.c.bf16 %v2498_v20, %v2496_v21  ;;  %v9097_v21 = vld [vmem:[#allocation7 + $0x184] sm:$0xf0]  ;;  %v2578_v20 = vmax.f32 %v2559_v40, 0.0  ;;  %3638 = vmatpush.bf16.msra.mxu3 %v8029_v47 }
 0x3ba   : > { %v2532_v56 = vadd.f32 %v2531_v48, %v11101_v34  ;;  %v2560_v5 = vpop.f32.mrf.mxu3  ;;  %v8021_v37 = vor.u32 %v9097_v21, %v8020_v13  ;;  %3461 = vmatpush.bf16.msra.mxu1 %v7893_v63  ;;  %3550 = vmatpush.bf16.msra.mxu2 %v7957_v25 }
 0x3bb   : > { %13296 = vst [vmem:[#allocation84_spill] sm:$0xff] %v11209_v41  ;;  %v2561_v51 = vadd.f32 %v2560_v5, %v11101_v34  ;;  %v2452_v32 = vpop.f32.mrf.mxu0 }
 0x3bc   : > { %v2579_v8 = vmax.f32 %v2532_v56, 0.0  ;;  %v2481_v24 = vpop.f32.mrf.mxu1  ;;  %3372 = vmatpush.bf16.msra.mxu0 %v7829_v28  ;;  %v2453_v35 = vadd.f32 %v2452_v32, %v11042_v26 }
 0x3bd   : > { %v2580_v19 = vmax.f32 %v2561_v51, 0.0  ;;  %v2482_v11 = vadd.f32 %v2481_v24, %v11042_v26  ;;  %3639 = vmatpush.bf16.msra.mxu3 %v8021_v37 }
 0x3be   : > { %7812 = vmatmul.msk.bf16.gmra.mxu0 %vm2256_vm1, %v10948_v62  ;;  %7820 = vmatmul.msk.bf16.gmra.mxu2 %vm2256_vm1, %v10948_v62  ;;  %v11217_v29 = vpack.c.bf16 %v2579_v8, %v2577_v61  ;;  %v2499_v48 = vmax.f32 %v2453_v35, 0.0 }
 0x3bf   : > { %7816 = vmatmul.msk.bf16.gmra.mxu1 %vm2256_vm1, %v10948_v62  ;;  %7824 = vmatmul.msk.bf16.gmra.mxu3 %vm2256_vm1, %v10948_v62  ;;  %v11223_v9 = vpack.c.bf16 %v2580_v19, %v2578_v20  ;;  %v2500_v56 = vmax.f32 %v2482_v11, 0.0 }
 0x3c1   : > { %13297 = vst [vmem:[#allocation78_spill] sm:$0xff] %v11223_v9  ;;  %v2534_v17 = vpop.f32.mrf.mxu2 }
 0x3c2   : > { %v2563_v31 = vpop.f32.mrf.mxu3  ;;  %v2535_v33 = vadd.f32 %v2534_v17, %v11042_v26 }
 0x3c3   : > { %v2454_v40 = vpop.f32.mrf.mxu0  ;;  %v2564_v59 = vadd.f32 %v2563_v31, %v11042_v26 }
 0x3c4   : > { %v2455_v6 = vadd.f32 %v2454_v40, %v11047_v49  ;;  %v2483_v18 = vpop.f32.mrf.mxu1  ;;  %v2581_v61 = vmax.f32 %v2535_v33, 0.0 }
 0x3c5   : > { %v2484_v5 = vadd.f32 %v2483_v18, %v11047_v49  ;;  %v2582_v63 = vmax.f32 %v2564_v59, 0.0 }
 0x3c6   : > { %v2501_v62 = vmax.f32 %v2455_v6, 0.0 }
 0x3c7   : > { %v2502_v47 = vmax.f32 %v2484_v5, 0.0 }
 0x3c8   : > { %v11230_v15 = vpack.c.bf16 %v2501_v62, %v2499_v48 }
 0x3c9   : > { %v2536_v51 = vpop.f32.mrf.mxu2  ;;  %v11233_v32 = vpack.c.bf16 %v2502_v47, %v2500_v56 }
 0x3ca   : > { %13298 = vst [vmem:[#allocation76_spill] sm:$0xff] %v11230_v15  ;;  %v2537_v28 = vadd.f32 %v2536_v51, %v11047_v49  ;;  %v2565_v45 = vpop.f32.mrf.mxu3 }
 0x3cb   : > { %13299 = vst [vmem:[#allocation70_spill] sm:$0xff] %v11233_v32  ;;  %v2566_v1 = vadd.f32 %v2565_v45, %v11047_v49  ;;  %v2457_v39 = vpop.f32.mrf.mxu0 }
 0x3cc   : > { %v2583_v8 = vmax.f32 %v2537_v28, 0.0  ;;  %v2486_v24 = vpop.f32.mrf.mxu1  ;;  %v2458_v19 = vadd.f32 %v2457_v39, %v11071_v54 }
 0x3cd   : > { %v2584_v25 = vmax.f32 %v2566_v1, 0.0  ;;  %v2487_v35 = vadd.f32 %v2486_v24, %v11071_v54 }
 0x3ce   : > { %7813 = vmatmul.msk.bf16.gmra.mxu0 %vm2256_vm1, %v10970_v7  ;;  %7821 = vmatmul.msk.bf16.gmra.mxu2 %vm2256_vm1, %v10970_v7  ;;  %v11241_v13 = vpack.c.bf16 %v2583_v8, %v2581_v61  ;;  %v2503_v48 = vmax.f32 %v2458_v19, 0.0 }
 0x3cf   : > { %7817 = vmatmul.msk.bf16.gmra.mxu1 %vm2256_vm1, %v10970_v7  ;;  %7825 = vmatmul.msk.bf16.gmra.mxu3 %vm2256_vm1, %v10970_v7  ;;  %v11247_v21 = vpack.c.bf16 %v2584_v25, %v2582_v63  ;;  %v2504_v18 = vmax.f32 %v2487_v35, 0.0 }
 0x3d1   : > { %13300 = vst [vmem:[#allocation91_spill] sm:$0xff] %v11247_v21  ;;  %v2539_v20 = vpop.f32.mrf.mxu2 }
 0x3d2   : > { %v2568_v37 = vpop.f32.mrf.mxu3  ;;  %v2540_v7 = vadd.f32 %v2539_v20, %v11071_v54 }
 0x3d3   : > { %v2459_v11 = vpop.f32.mrf.mxu0  ;;  %v2569_v62 = vadd.f32 %v2568_v37, %v11071_v54 }
 0x3d4   : > { %v2460_v17 = vadd.f32 %v2459_v11, %v11153_v16  ;;  %v2488_v31 = vpop.f32.mrf.mxu1  ;;  %v2585_v1 = vmax.f32 %v2540_v7, 0.0 }
 0x3d5   : > { %v2489_v40 = vadd.f32 %v2488_v31, %v11153_v16  ;;  %v2586_v8 = vmax.f32 %v2569_v62, 0.0 }
 0x3d6   : > { %v2505_v6 = vmax.f32 %v2460_v17, 0.0 }
 0x3d7   : > { %v2506_v56 = vmax.f32 %v2489_v40, 0.0 }
 0x3d8   : > { %v11254_v5 = vpack.c.bf16 %v2505_v6, %v2503_v48 }
 0x3d9   : > { %v2541_v47 = vpop.f32.mrf.mxu2  ;;  %v11257_v33 = vpack.c.bf16 %v2506_v56, %v2504_v18 }
 0x3da   : > { %v2542_v59 = vadd.f32 %v2541_v47, %v11153_v16  ;;  %v2570_v51 = vpop.f32.mrf.mxu3 }
 0x3db   : > { %13301 = vst [vmem:[#allocation85_spill] sm:$0xff] %v11257_v33  ;;  %v2571_v28 = vadd.f32 %v2570_v51, %v11153_v16  ;;  %v2606_v45 = vpop.f32.mrf.mxu0 }
 0x3dc   : > { %v2587_v39 = vmax.f32 %v2542_v59, 0.0  ;;  %v2635_v61 = vpop.f32.mrf.mxu1  ;;  %v2607_v19 = vadd.f32 %v2606_v45, %v11057_v52 }
 0x3dd   : > { %v2588_v24 = vmax.f32 %v2571_v28, 0.0  ;;  %v2636_v35 = vadd.f32 %v2635_v61, %v11057_v52 }
 0x3de   : > { %3373 = vmatmul.bf16.vlgmr.msra.gmra.mxu0 %v11074_v10  ;;  %3551 = vmatmul.bf16.vlgmr.msra.gmra.mxu2 %v11132_v38  ;;  %v11263_v63 = vpack.c.bf16 %v2587_v39, %v2585_v1  ;;  %v2655_v48 = vmax.f32 %v2607_v19, 0.0 }
 0x3df   : > { %3462 = vmatmul.bf16.vlgmr.msra.gmra.mxu1 %v11080_v60  ;;  %3640 = vmatmul.bf16.vlgmr.msra.gmra.mxu3 %v11135_v55  ;;  %v11267_v25 = vpack.c.bf16 %v2588_v24, %v2586_v8  ;;  %v2656_v18 = vmax.f32 %v2636_v35, 0.0 }
 0x3e0   : > { %13302 = vst [vmem:[#allocation86_spill] sm:$0xff] %v11263_v63 }
 0x3e1   : > { %13303 = vst [vmem:[#allocation102_spill] sm:$0xff] %v11267_v25  ;;  %v2688_v20 = vpop.f32.mrf.mxu2 }
 0x3e2   : > { %v2717_v37 = vpop.f32.mrf.mxu3  ;;  %v2689_v7 = vadd.f32 %v2688_v20, %v11057_v52 }
 0x3e3   : > { %v2608_v11 = vpop.f32.mrf.mxu0  ;;  %v2718_v47 = vadd.f32 %v2717_v37, %v11057_v52 }
 0x3e4   : > { %v2609_v17 = vadd.f32 %v2608_v11, %v11063_v4  ;;  %v2637_v31 = vpop.f32.mrf.mxu1  ;;  %v2737_v61 = vmax.f32 %v2689_v7, 0.0 }
 0x3e5   : > { %v2638_v40 = vadd.f32 %v2637_v31, %v11063_v4  ;;  %v2738_v19 = vmax.f32 %v2718_v47, 0.0 }
 0x3e6   : > { %v2657_v6 = vmax.f32 %v2609_v17, 0.0 }
 0x3e7   : > { %v2658_v56 = vmax.f32 %v2638_v40, 0.0 }
 0x3e8   : > { %v11274_v62 = vpack.c.bf16 %v2657_v6, %v2655_v48 }
 0x3e9   : > { %v2690_v59 = vpop.f32.mrf.mxu2  ;;  %v11277_v51 = vpack.c.bf16 %v2658_v56, %v2656_v18 }
 0x3ea   : > { %v2691_v28 = vadd.f32 %v2690_v59, %v11063_v4  ;;  %v2719_v45 = vpop.f32.mrf.mxu3 }
 0x3eb   : > { %v2720_v1 = vadd.f32 %v2719_v45, %v11063_v4  ;;  %v2611_v39 = vpop.f32.mrf.mxu0 }
 0x3ec   : > { %v2739_v8 = vmax.f32 %v2691_v28, 0.0  ;;  %v2640_v24 = vpop.f32.mrf.mxu1  ;;  %v2612_v17 = vadd.f32 %v2611_v39, %v11099_v2 }
 0x3ed   : > { %v2740_v35 = vmax.f32 %v2720_v1, 0.0  ;;  %v2641_v40 = vadd.f32 %v2640_v24, %v11099_v2 }
 0x3ee   : > { %3378 = vmatmul.bf16.gmra.mxu0 %v11108_v12  ;;  %3556 = vmatmul.bf16.gmra.mxu2 %v11158_v58  ;;  %v11283_v20 = vpack.c.bf16 %v2739_v8, %v2737_v61  ;;  %v2659_v7 = vmax.f32 %v2612_v17, 0.0 }
 0x3ef   : > { %3467 = vmatmul.bf16.gmra.mxu1 %v11111_v0  ;;  %3645 = vmatmul.bf16.gmra.mxu3 %v11161_v42  ;;  %v11287_v37 = vpack.c.bf16 %v2740_v35, %v2738_v19  ;;  %v2660_v59 = vmax.f32 %v2641_v40, 0.0 }
 0x3f1   : > { %v2693_v11 = vpop.f32.mrf.mxu2 }
 0x3f2   : > { %v2722_v31 = vpop.f32.mrf.mxu3  ;;  %v2694_v45 = vadd.f32 %v2693_v11, %v11099_v2 }
 0x3f3   : > { %v2613_v48 = vpop.f32.mrf.mxu0  ;;  %v2723_v61 = vadd.f32 %v2722_v31, %v11099_v2 }
 0x3f4   : > { %v2614_v6 = vadd.f32 %v2613_v48, %v11101_v34  ;;  %v2642_v18 = vpop.f32.mrf.mxu1 }
 0x3f5   : > { %v2643_v56 = vadd.f32 %v2642_v18, %v11101_v34  ;;  %v2741_v18 = vmax.f32 %v2694_v45, 0.0  ;;  %v2742_v40 = vmax.f32 %v2723_v61, 0.0 }
 0x3f6   : > { %v2661_v47 = vmax.f32 %v2614_v6, 0.0 }
 0x3f7   : > { %v2662_v28 = vmax.f32 %v2643_v56, 0.0 }
 0x3f8   : > { %v11294_v1 = vpack.c.bf16 %v2661_v47, %v2659_v7 }
 0x3f9   : > { %v2695_v39 = vpop.f32.mrf.mxu2  ;;  %v11297_v8 = vpack.c.bf16 %v2662_v28, %v2660_v59 }
 0x3fa   : > { %v2696_v24 = vadd.f32 %v2695_v39, %v11101_v34  ;;  %v2724_v19 = vpop.f32.mrf.mxu3 }
 0x3fb   : > { %v2725_v35 = vadd.f32 %v2724_v19, %v11101_v34  ;;  %v2616_v48 = vpop.f32.mrf.mxu0 }
 0x3fc   : > { %v2743_v17 = vmax.f32 %v2696_v24, 0.0  ;;  %v2645_v6 = vpop.f32.mrf.mxu1  ;;  %v2617_v47 = vadd.f32 %v2616_v48, %v11042_v26 }
 0x3fd   : > { %v2744_v56 = vmax.f32 %v2725_v35, 0.0  ;;  %v2646_v28 = vadd.f32 %v2645_v6, %v11042_v26 }
 0x3fe   : > { %3383 = vmatmul.bf16.gmra.mxu0 %v11091_v43  ;;  %3561 = vmatmul.bf16.gmra.mxu2 %v11143_v53  ;;  %v11303_v11 = vpack.c.bf16 %v2743_v17, %v2741_v18  ;;  %v2663_v19 = vmax.f32 %v2617_v47, 0.0 }
 0x3ff   : > { %3472 = vmatmul.bf16.gmra.mxu1 %v11097_v3  ;;  %3650 = vmatmul.bf16.gmra.mxu3 %v11149_v23  ;;  %v11307_v31 = vpack.c.bf16 %v2744_v56, %v2742_v40  ;;  %v2664_v18 = vmax.f32 %v2646_v28, 0.0 }
 0x401   : > { %v2698_v7 = vpop.f32.mrf.mxu2 }
 0x402   : > { %v2727_v59 = vpop.f32.mrf.mxu3  ;;  %v2699_v23 = vadd.f32 %v2698_v7, %v11042_v26 }
 0x403   : > { %v2618_v45 = vpop.f32.mrf.mxu0  ;;  %v2728_v56 = vadd.f32 %v2727_v59, %v11042_v26 }
 0x404   : > { %v2619_v61 = vadd.f32 %v2618_v45, %v11047_v49  ;;  %v2647_v39 = vpop.f32.mrf.mxu1 }
 0x405   : > { %v2648_v24 = vadd.f32 %v2647_v39, %v11047_v49  ;;  %v2745_v39 = vmax.f32 %v2699_v23, 0.0  ;;  %v2746_v28 = vmax.f32 %v2728_v56, 0.0 }
 0x406   : > { %v2665_v35 = vmax.f32 %v2619_v61, 0.0 }
 0x407   : > { %v2666_v17 = vmax.f32 %v2648_v24, 0.0 }
 0x408   : > { %v11314_v40 = vpack.c.bf16 %v2665_v35, %v2663_v19 }
 0x409   : > { %v2700_v48 = vpop.f32.mrf.mxu2  ;;  %v11317_v3 = vpack.c.bf16 %v2666_v17, %v2664_v18 }
 0x40a   : > { %v2701_v6 = vadd.f32 %v2700_v48, %v11047_v49  ;;  %v2729_v53 = vpop.f32.mrf.mxu3 }
 0x40b   : > { %v2730_v45 = vadd.f32 %v2729_v53, %v11047_v49  ;;  %v2621_v43 = vpop.f32.mrf.mxu0 }
 0x40c   : > { %v2747_v47 = vmax.f32 %v2701_v6, 0.0  ;;  %v2650_v61 = vpop.f32.mrf.mxu1  ;;  %v2622_v53 = vadd.f32 %v2621_v43, %v11071_v54 }
 0x40d   : > { %v2748_v24 = vmax.f32 %v2730_v45, 0.0  ;;  %v2651_v35 = vadd.f32 %v2650_v61, %v11071_v54 }
 0x40e   : > { %3388 = vmatmul.bf16.gmra.mxu0 %v11119_v30  ;;  %3566 = vmatmul.bf16.gmra.mxu2 %v11169_v50  ;;  %v11323_v7 = vpack.c.bf16 %v2747_v47, %v2745_v39  ;;  %v2667_v6 = vmax.f32 %v2622_v53, 0.0 }
 0x40f   : > { %3477 = vmatmul.bf16.gmra.mxu1 %v11125_v46  ;;  %3655 = vmatmul.bf16.gmra.mxu3 %v11175_v27  ;;  %v11327_v59 = vpack.c.bf16 %v2748_v24, %v2746_v28  ;;  %v2668_v39 = vmax.f32 %v2651_v35, 0.0 }
 0x411   : > { %v2703_v19 = vpop.f32.mrf.mxu2 }
 0x412   : > { %v2732_v23 = vpop.f32.mrf.mxu3  ;;  %v2704_v27 = vadd.f32 %v2703_v19, %v11071_v54 }
 0x413   : > { %v2623_v18 = vpop.f32.mrf.mxu0  ;;  %v2733_v24 = vadd.f32 %v2732_v23, %v11071_v54 }
 0x414   : > { %v2624_v17 = vadd.f32 %v2623_v18, %v11153_v16  ;;  %v2652_v56 = vpop.f32.mrf.mxu1 }
 0x415   : > { %v2653_v48 = vadd.f32 %v2652_v56, %v11153_v16  ;;  %v2749_v56 = vmax.f32 %v2704_v27, 0.0  ;;  %v2750_v35 = vmax.f32 %v2733_v24, 0.0 }
 0x416   : > { %v2669_v45 = vmax.f32 %v2624_v17, 0.0 }
 0x417   : > { %v2670_v47 = vmax.f32 %v2653_v48, 0.0 }
 0x418   : > { %v11334_v28 = vpack.c.bf16 %v2669_v45, %v2667_v6 }
 0x419   : > { %v2705_v43 = vpop.f32.mrf.mxu2  ;;  %v11337_v46 = vpack.c.bf16 %v2670_v47, %v2668_v39 }
 0x41a   : > { %v2706_v61 = vadd.f32 %v2705_v43, %v11153_v16  ;;  %v2734_v50 = vpop.f32.mrf.mxu3 }
 0x41b   : > { %v2735_v18 = vadd.f32 %v2734_v50, %v11153_v16  ;;  %v2770_v30 = vpop.f32.mrf.mxu0 }
 0x41c   : > { %v2751_v53 = vmax.f32 %v2706_v61, 0.0  ;;  %v2799_v17 = vpop.f32.mrf.mxu1  ;;  %v2771_v50 = vadd.f32 %v2770_v30, %v11057_v52 }
 0x41d   : > { %v2752_v48 = vmax.f32 %v2735_v18, 0.0  ;;  %v2800_v45 = vadd.f32 %v2799_v17, %v11057_v52 }
 0x41e   : > { %3393 = vmatmul.bf16.gmra.mxu0 %v11182_v22  ;;  %3571 = vmatmul.bf16.gmra.mxu2 %v11230_v15  ;;  %v11343_v19 = vpack.c.bf16 %v2751_v53, %v2749_v56  ;;  %v2819_v61 = vmax.f32 %v2771_v50, 0.0 }
 0x41f   : > { %3482 = vmatmul.bf16.gmra.mxu1 %v11185_v36  ;;  %3660 = vmatmul.bf16.gmra.mxu3 %v11233_v32  ;;  %v11347_v23 = vpack.c.bf16 %v2752_v48, %v2750_v35  ;;  %v2820_v56 = vmax.f32 %v2800_v45, 0.0 }
 0x421   : > { %v2852_v6 = vpop.f32.mrf.mxu2 }
 0x422   : > { %v2881_v27 = vpop.f32.mrf.mxu3  ;;  %v2853_v32 = vadd.f32 %v2852_v6, %v11057_v52 }
 0x423   : > { %v2772_v39 = vpop.f32.mrf.mxu0  ;;  %v2882_v48 = vadd.f32 %v2881_v27, %v11057_v52 }
 0x424   : > { %v2773_v47 = vadd.f32 %v2772_v39, %v11063_v4  ;;  %v2801_v24 = vpop.f32.mrf.mxu1 }
 0x425   : > { %v2802_v43 = vadd.f32 %v2801_v24, %v11063_v4  ;;  %v2901_v24 = vmax.f32 %v2853_v32, 0.0  ;;  %v2902_v45 = vmax.f32 %v2882_v48, 0.0 }
 0x426   : > { %v2821_v18 = vmax.f32 %v2773_v47, 0.0 }
 0x427   : > { %v2822_v53 = vmax.f32 %v2802_v43, 0.0 }
 0x428   : > { %v11354_v35 = vpack.c.bf16 %v2821_v18, %v2819_v61 }
 0x429   : > { %v2854_v30 = vpop.f32.mrf.mxu2  ;;  %v11357_v36 = vpack.c.bf16 %v2822_v53, %v2820_v56 }
 0x42a   : > { %13304 = vst [vmem:[#allocation100_spill] sm:$0xff] %v11354_v35  ;;  %v2855_v17 = vadd.f32 %v2854_v30, %v11063_v4  ;;  %v2883_v15 = vpop.f32.mrf.mxu3 }
 0x42b   : > { %13305 = vst [vmem:[#allocation105_spill] sm:$0xff] %v11357_v36  ;;  %v2884_v39 = vadd.f32 %v2883_v15, %v11063_v4  ;;  %v2775_v22 = vpop.f32.mrf.mxu0 }
 0x42c   : > { %v2903_v50 = vmax.f32 %v2855_v17, 0.0  ;;  %v2804_v47 = vpop.f32.mrf.mxu1  ;;  %v2776_v4 = vadd.f32 %v2775_v22, %v11099_v2 }
 0x42d   : > { %v2904_v43 = vmax.f32 %v2884_v39, 0.0  ;;  %v2805_v32 = vadd.f32 %v2804_v47, %v11099_v2 }
 0x42e   : > { %3398 = vmatmul.bf16.gmra.mxu0 %v11206_v57  ;;  %3576 = vmatmul.bf16.gmra.mxu2 %v11254_v5  ;;  %v11363_v6 = vpack.c.bf16 %v2903_v50, %v2901_v24  ;;  %v2823_v48 = vmax.f32 %v2776_v4, 0.0 }
 0x42f   : > { %3487 = vmatmul.bf16.gmra.mxu1 %v11209_v41  ;;  %3665 = vmatmul.bf16.gmra.mxu3 %v11257_v33  ;;  %v11367_v52 = vpack.c.bf16 %v2904_v43, %v2902_v45  ;;  %v2824_v17 = vmax.f32 %v2805_v32, 0.0 }
 0x431   : > { %v2857_v27 = vpop.f32.mrf.mxu2 }
 0x432   : > { %v2886_v15 = vpop.f32.mrf.mxu3  ;;  %v2858_v24 = vadd.f32 %v2857_v27, %v11099_v2 }
 0x433   : > { %v2777_v61 = vpop.f32.mrf.mxu0  ;;  %v2887_v45 = vadd.f32 %v2886_v15, %v11099_v2 }
 0x434   : > { %v2778_v18 = vadd.f32 %v2777_v61, %v11101_v34  ;;  %v2806_v56 = vpop.f32.mrf.mxu1 }
 0x435   : > { %v2807_v53 = vadd.f32 %v2806_v56, %v11101_v34  ;;  %v2905_v56 = vmax.f32 %v2858_v24, 0.0  ;;  %v2906_v32 = vmax.f32 %v2887_v45, 0.0 }
 0x436   : > { %v2825_v30 = vmax.f32 %v2778_v18, 0.0 }
 0x437   : > { %v2826_v39 = vmax.f32 %v2807_v53, 0.0 }
 0x438   : > { %v11374_v50 = vpack.c.bf16 %v2825_v30, %v2823_v48 }
 0x439   : > { %v2859_v22 = vpop.f32.mrf.mxu2  ;;  %v11377_v43 = vpack.c.bf16 %v2826_v39, %v2824_v17 }
 0x43a   : > { %v2860_v47 = vadd.f32 %v2859_v22, %v11101_v34  ;;  %v2888_v33 = vpop.f32.mrf.mxu3 }
 0x43b   : > { %13306 = vst [vmem:[#allocation104_spill] sm:$0xff] %v11377_v43  ;;  %v2889_v61 = vadd.f32 %v2888_v33, %v11101_v34  ;;  %v2780_v41 = vpop.f32.mrf.mxu0 }
 0x43c   : > { %v2907_v4 = vmax.f32 %v2860_v47, 0.0  ;;  %v2809_v18 = vpop.f32.mrf.mxu1  ;;  %v2781_v34 = vadd.f32 %v2780_v41, %v11042_v26 }
 0x43d   : > { %v2908_v53 = vmax.f32 %v2889_v61, 0.0  ;;  %v2810_v48 = vadd.f32 %v2809_v18, %v11042_v26 }
 0x43e   : > { %3403 = vmatmul.bf16.gmra.mxu0 %v11193_v14  ;;  %3581 = vmatmul.bf16.gmra.mxu2 %v11241_v13  ;;  %v11383_v27 = vpack.c.bf16 %v2907_v4, %v2905_v56  ;;  %v2827_v45 = vmax.f32 %v2781_v34, 0.0 }
 0x43f   : > { %3492 = vmatmul.bf16.gmra.mxu1 %v11199_v44  ;;  %3670 = vmatmul.bf16.gmra.mxu3 %v11247_v21  ;;  %v11387_v2 = vpack.c.bf16 %v2908_v53, %v2906_v32  ;;  %v2828_v47 = vmax.f32 %v2810_v48, 0.0 }
 0x441   : > { %v2862_v15 = vpop.f32.mrf.mxu2 }
 0x442   : > { %v2891_v33 = vpop.f32.mrf.mxu3  ;;  %v2863_v56 = vadd.f32 %v2862_v15, %v11042_v26 }
 0x443   : > { %v2782_v30 = vpop.f32.mrf.mxu0  ;;  %v2892_v32 = vadd.f32 %v2891_v33, %v11042_v26 }
 0x444   : > { %v2783_v17 = vadd.f32 %v2782_v30, %v11047_v49  ;;  %v2811_v39 = vpop.f32.mrf.mxu1 }
 0x445   : > { %v2812_v24 = vadd.f32 %v2811_v39, %v11047_v49  ;;  %v2909_v39 = vmax.f32 %v2863_v56, 0.0  ;;  %v2910_v48 = vmax.f32 %v2892_v32, 0.0 }
 0x446   : > { %v2829_v22 = vmax.f32 %v2783_v17, 0.0 }
 0x447   : > { %v2830_v61 = vmax.f32 %v2812_v24, 0.0 }
 0x448   : > { %v11394_v4 = vpack.c.bf16 %v2829_v22, %v2827_v45 }
 0x449   : > { %v2864_v41 = vpop.f32.mrf.mxu2  ;;  %v11397_v53 = vpack.c.bf16 %v2830_v61, %v2828_v47 }
 0x44a   : > { %13307 = vst [vmem:[#allocation103_spill] sm:$0xff] %v11394_v4  ;;  %v2865_v18 = vadd.f32 %v2864_v41, %v11047_v49  ;;  %v2893_v21 = vpop.f32.mrf.mxu3 }
 0x44b   : > { %13308 = vst [vmem:[#allocation101_spill] sm:$0xff] %v11397_v53  ;;  %v2894_v30 = vadd.f32 %v2893_v21, %v11047_v49  ;;  %v2785_v44 = vpop.f32.mrf.mxu0 }
 0x44c   : > { %v2911_v34 = vmax.f32 %v2865_v18, 0.0  ;;  %v2814_v17 = vpop.f32.mrf.mxu1  ;;  %v2786_v49 = vadd.f32 %v2785_v44, %v11071_v54 }
 0x44d   : > { %v2912_v24 = vmax.f32 %v2894_v30, 0.0  ;;  %v2815_v45 = vadd.f32 %v2814_v17, %v11071_v54 }
 0x44e   : > { %3408 = vmatmul.bf16.gmra.mxu0 %v11217_v29  ;;  %3586 = vmatmul.bf16.gmra.mxu2 %v11263_v63  ;;  %v11403_v15 = vpack.c.bf16 %v2911_v34, %v2909_v39  ;;  %v2831_v32 = vmax.f32 %v2786_v49, 0.0 }
 0x44f   : > { %3497 = vmatmul.bf16.gmra.mxu1 %v11223_v9  ;;  %3675 = vmatmul.bf16.gmra.mxu3 %v11267_v25  ;;  %v11407_v26 = vpack.c.bf16 %v2912_v24, %v2910_v48  ;;  %v2832_v18 = vmax.f32 %v2815_v45, 0.0 }
 0x451   : > { %v2867_v33 = vpop.f32.mrf.mxu2 }
 0x452   : > { %v2896_v21 = vpop.f32.mrf.mxu3  ;;  %v2868_v39 = vadd.f32 %v2867_v33, %v11071_v54 }
 0x453   : > { %v2787_v22 = vpop.f32.mrf.mxu0  ;;  %v2897_v48 = vadd.f32 %v2896_v21, %v11071_v54 }
 0x454   : > { %v2788_v47 = vadd.f32 %v2787_v22, %v11153_v16  ;;  %v2816_v61 = vpop.f32.mrf.mxu1 }
 0x455   : > { %v2817_v56 = vadd.f32 %v2816_v61, %v11153_v16  ;;  %v2913_v61 = vmax.f32 %v2868_v39, 0.0  ;;  %v2914_v45 = vmax.f32 %v2897_v48, 0.0 }
 0x456   : > { %v2833_v41 = vmax.f32 %v2788_v47, 0.0 }
 0x457   : > { %v2834_v30 = vmax.f32 %v2817_v56, 0.0 }
 0x458   : > { %v11414_v34 = vpack.c.bf16 %v2833_v41, %v2831_v32 }
 0x459   : > { %v2869_v44 = vpop.f32.mrf.mxu2  ;;  %v11417_v24 = vpack.c.bf16 %v2834_v30, %v2832_v18 }
 0x45a   : > { %13309 = vst [vmem:[#allocation112_spill] sm:$0xff] %v11414_v34  ;;  %v2870_v17 = vadd.f32 %v2869_v44, %v11153_v16  ;;  %v2898_v25 = vpop.f32.mrf.mxu3 }
 0x45b   : > { %13310 = vst [vmem:[#allocation110_spill] sm:$0xff] %v11417_v24  ;;  %v2899_v22 = vadd.f32 %v2898_v25, %v11153_v16  ;;  %v3374_v9 = vpop.f32.mrf.mxu0 }
 0x45c   : > { %v2915_v49 = vmax.f32 %v2870_v17, 0.0  ;;  %v3463_v47 = vpop.f32.mrf.mxu1 }
 0x45d   : > { %v2916_v56 = vmax.f32 %v2899_v22, 0.0  ;;  %v3464_v63 = vadd.f32 %v3463_v47, %v3374_v9 }
 0x45e   : > { %3413 = vmatmul.bf16.gmra.mxu0 %v11274_v62  ;;  %3591 = vmatmul.bf16.gmra.mxu2 %v11314_v40  ;;  %v11423_v54 = vpack.c.bf16 %v2915_v49, %v2913_v61 }
 0x45f   : > { %3502 = vmatmul.bf16.gmra.mxu1 %v11277_v51  ;;  %3680 = vmatmul.bf16.gmra.mxu3 %v11317_v3  ;;  %v11427_v33 = vpack.c.bf16 %v2916_v56, %v2914_v45 }
 0x461   : > { %v3552_v16 = vpop.f32.mrf.mxu2 }
 0x462   : > { %v3553_v25 = vadd.f32 %v3552_v16, %v3464_v63  ;;  %v3641_v21 = vpop.f32.mrf.mxu3 }
 0x463   : > { %v3376_v32 = vpop.f32.mrf.mxu0 }
 0x464   : > { %v11429_v41 = vadd.f32 %v3641_v21, %v3553_v25  ;;  %v3465_v18 = vpop.f32.mrf.mxu1 }
 0x465   : > { %v3466_v9 = vadd.f32 %v3465_v18, %v3376_v32 }
 0x466   : > { %13311 = vst [vmem:[#allocation108_spill] sm:$0xff] %v11429_v41 }
 0x469   : > { %v3554_v30 = vpop.f32.mrf.mxu2 }
 0x46a   : > { %v3555_v39 = vadd.f32 %v3554_v30, %v3466_v9  ;;  %v3643_v48 = vpop.f32.mrf.mxu3 }
 0x46b   : > { %v3379_v44 = vpop.f32.mrf.mxu0 }
 0x46c   : > { %v11431_v17 = vadd.f32 %v3643_v48, %v3555_v39  ;;  %v3468_v22 = vpop.f32.mrf.mxu1 }
 0x46d   : > { %v3469_v61 = vadd.f32 %v3468_v22, %v3379_v44 }
 0x46e   : > { %13312 = vst [vmem:[#allocation106_spill] sm:$0xff] %v11431_v17  ;;  %3418 = vmatmul.bf16.gmra.mxu0 %v11294_v1  ;;  %3596 = vmatmul.bf16.gmra.mxu2 %v11334_v28 }
 0x46f   : > { %3507 = vmatmul.bf16.gmra.mxu1 %v11297_v8  ;;  %3685 = vmatmul.bf16.gmra.mxu3 %v11337_v46 }
 0x471   : > { %v3557_v63 = vpop.f32.mrf.mxu2 }
 0x472   : > { %v3558_v49 = vadd.f32 %v3557_v63, %v3469_v61  ;;  %v3646_v47 = vpop.f32.mrf.mxu3 }
 0x473   : > { %v3381_v45 = vpop.f32.mrf.mxu0 }
 0x474   : > { %v11437_v56 = vadd.f32 %v3646_v47, %v3558_v49  ;;  %v3470_v16 = vpop.f32.mrf.mxu1 }
 0x475   : > { %v3471_v25 = vadd.f32 %v3470_v16, %v3381_v45  ;;  %v9094_v16 = vld [vmem:[#allocation7 + $0x174] sm:$0xf] }
 0x476   : > { %13313 = vst [vmem:[#allocation113_spill] sm:$0xff] %v11437_v56 }
 0x479   : > { %v3559_v21 = vpop.f32.mrf.mxu2 }
 0x47a   : > { %v3560_v32 = vadd.f32 %v3559_v21, %v3471_v25  ;;  %v3648_v18 = vpop.f32.mrf.mxu3  ;;  %v8014_v25 = vld [vmem:[#allocation7 + $0x178] sm:$0xf0]  ;;  %v9110_v21 = vld [vmem:[#allocation7 + $0x1f4] sm:$0xf] }
 0x47b   : > { %v3384_v9 = vpop.f32.mrf.mxu0 }
 0x47c   : > { %v11439_v30 = vadd.f32 %v3648_v18, %v3560_v32  ;;  %v3473_v39 = vpop.f32.mrf.mxu1  ;;  %v8017_v32 = vor.u32 %v9094_v16, %v8014_v25  ;;  %v8078_v18 = vld [vmem:[#allocation7 + $0x1f8] sm:$0xf0] }
 0x47d   : > { %v3474_v48 = vadd.f32 %v3473_v39, %v3384_v9  ;;  %v8081_v9 = vor.u32 %v9110_v21, %v8078_v18  ;;  %v9078_v21 = vld [vmem:[#allocation7 + $0xf4] sm:$0xf] }
 0x47e   : > { %13314 = vst [vmem:[#allocation111_spill] sm:$0xff] %v11439_v30  ;;  %3423 = vmatmul.bf16.gmra.mxu0 %v11283_v20  ;;  %3601 = vmatmul.bf16.gmra.mxu2 %v11323_v7 }
 0x47f   : > { %3512 = vmatmul.bf16.gmra.mxu1 %v11287_v37  ;;  %3690 = vmatmul.bf16.gmra.mxu3 %v11327_v59 }
 0x480   : > { %3899 = vmatpush.bf16.msrb.mxu2 %v8017_v32  ;;  %3988 = vmatpush.bf16.msrb.mxu3 %v8081_v9  ;;  %v7950_v32 = vld [vmem:[#allocation7 + $0xf8] sm:$0xf0] }
 0x481   : > { %v3562_v44 = vpop.f32.mrf.mxu2  ;;  %v7953_v18 = vor.u32 %v9078_v21, %v7950_v32  ;;  %v9092_v32 = vld [vmem:[#allocation7 + $0x164] sm:$0xf] }
 0x482   : > { %v3563_v22 = vadd.f32 %v3562_v44, %v3474_v48  ;;  %v3651_v61 = vpop.f32.mrf.mxu3 }
 0x483   : > { %v3386_v63 = vpop.f32.mrf.mxu0  ;;  %3810 = vmatpush.bf16.msrb.mxu1 %v7953_v18  ;;  %v8006_v18 = vld [vmem:[#allocation7 + $0x168] sm:$0xf0] }
 0x484   : > { %v11445_v49 = vadd.f32 %v3651_v61, %v3563_v22  ;;  %v3475_v47 = vpop.f32.mrf.mxu1 }
 0x485   : > { %v3476_v45 = vadd.f32 %v3475_v47, %v3386_v63 }
 0x486   : > { %13315 = vst [vmem:[#allocation109_spill] sm:$0xff] %v11445_v49 }
 0x489   : > { %v3564_v39 = vpop.f32.mrf.mxu2 }
 0x48a   : > { %v3565_v30 = vadd.f32 %v3564_v39, %v3476_v45  ;;  %v3653_v56 = vpop.f32.mrf.mxu3 }
 0x48b   : > { %v3389_v17 = vpop.f32.mrf.mxu0 }
 0x48c   : > { %v11447_v41 = vadd.f32 %v3653_v56, %v3565_v30  ;;  %v3478_v48 = vpop.f32.mrf.mxu1  ;;  %v9062_v56 = vld [vmem:[#allocation7 + $0x74] sm:$0xf]  ;;  %v7886_v30 = vld [vmem:[#allocation7 + $0x78] sm:$0xf0] }
 0x48d   : > { %v3479_v44 = vadd.f32 %v3478_v48, %v3389_v17  ;;  %v7889_v17 = vor.u32 %v9062_v56, %v7886_v30  ;;  %v9076_v56 = vld [vmem:[#allocation7 + $0xe4] sm:$0xf] }
 0x48e   : > { %13316 = vst [vmem:[#allocation107_spill] sm:$0xff] %v11447_v41  ;;  %3428 = vmatmul.bf16.gmra.mxu0 %v11303_v11  ;;  %3606 = vmatmul.bf16.gmra.mxu2 %v11343_v19 }
 0x48f   : > { %3517 = vmatmul.bf16.gmra.mxu1 %v11307_v31  ;;  %3695 = vmatmul.bf16.gmra.mxu3 %v11347_v23 }
 0x490   : > { %3721 = vmatpush.bf16.msrb.mxu0 %v7889_v17  ;;  %v7942_v17 = vld [vmem:[#allocation7 + $0xe8] sm:$0xf0] }
 0x491   : > { %v3567_v22 = vpop.f32.mrf.mxu2 }
 0x492   : > { %v3568_v61 = vadd.f32 %v3567_v22, %v3479_v44  ;;  %v3656_v63 = vpop.f32.mrf.mxu3 }
 0x493   : > { %v3391_v47 = vpop.f32.mrf.mxu0 }
 0x494   : > { %v11453_v45 = vadd.f32 %v3656_v63, %v3568_v61  ;;  %v3480_v16 = vpop.f32.mrf.mxu1 }
 0x495   : > { %v3481_v25 = vadd.f32 %v3480_v16, %v3391_v47  ;;  %v9060_v16 = vld [vmem:[#allocation7 + $0x64] sm:$0xf] }
 0x496   : > { %13317 = vst [vmem:[#allocation120_spill] sm:$0xff] %v11453_v45 }
 0x499   : > { %v3569_v9 = vpop.f32.mrf.mxu2 }
 0x49a   : > { %v3570_v39 = vadd.f32 %v3569_v9, %v3481_v25  ;;  %v3658_v48 = vpop.f32.mrf.mxu3  ;;  %v7878_v25 = vld [vmem:[#allocation7 + $0x68] sm:$0xf0] }
 0x49b   : > { %v3394_v41 = vpop.f32.mrf.mxu0  ;;  %v7881_v21 = vor.u32 %v9060_v16, %v7878_v25  ;;  %v7934_v25 = vld [vmem:[#allocation7 + $0xd8] sm:$0xf0] }
 0x49c   : > { %v11455_v49 = vadd.f32 %v3658_v48, %v3570_v39  ;;  %v3483_v44 = vpop.f32.mrf.mxu1  ;;  %v7945_v39 = vor.u32 %v9076_v56, %v7942_v17  ;;  %v8009_v48 = vor.u32 %v9092_v32, %v8006_v18  ;;  %v8062_v56 = vld [vmem:[#allocation7 + $0x1d8] sm:$0xf0]  ;;  %v7862_v18 = vld [vmem:[#allocation7 + $0x48] sm:$0xf0] }
 0x49d   : > { %v3484_v22 = vadd.f32 %v3483_v44, %v3394_v41  ;;  %v9108_v44 = vld [vmem:[#allocation7 + $0x1e4] sm:$0xf]  ;;  %3722 = vmatpush.bf16.msrb.mxu0 %v7881_v21 }
 0x49e   : > { %13318 = vst [vmem:[#allocation118_spill] sm:$0xff] %v11455_v49  ;;  %3433 = vmatmul.bf16.gmra.mxu0 %v11354_v35  ;;  %3611 = vmatmul.bf16.gmra.mxu2 %v11394_v4  ;;  %v8070_v49 = vld [vmem:[#allocation7 + $0x1e8] sm:$0xf0]  ;;  %v9090_v4 = vld [vmem:[#allocation7 + $0x154] sm:$0xf] }
 0x49f   : > { %3522 = vmatmul.bf16.gmra.mxu1 %v11357_v36  ;;  %3700 = vmatmul.bf16.gmra.mxu3 %v11397_v53  ;;  %v8073_v53 = vor.u32 %v9108_v44, %v8070_v49  ;;  %v9074_v36 = vld [vmem:[#allocation7 + $0xd4] sm:$0xf]  ;;  %v7998_v35 = vld [vmem:[#allocation7 + $0x158] sm:$0xf0]  ;;  %v9056_v49 = vld [vmem:[#allocation7 + $0x44] sm:$0xf] }
 0x4a0   : > { %3811 = vmatpush.bf16.msrb.mxu1 %v7945_v39  ;;  %3900 = vmatpush.bf16.msrb.mxu2 %v8009_v48  ;;  %v7926_v48 = vld [vmem:[#allocation7 + $0xc8] sm:$0xf0]  ;;  %v9088_v44 = vld [vmem:[#allocation7 + $0x144] sm:$0xf] }
 0x4a1   : > { %v3572_v61 = vpop.f32.mrf.mxu2  ;;  %3989 = vmatpush.bf16.msrb.mxu3 %v8073_v53  ;;  %v7865_v53 = vor.u32 %v9056_v49, %v7862_v18 }
 0x4a2   : > { %v3573_v63 = vadd.f32 %v3572_v61, %v3484_v22  ;;  %v3661_v47 = vpop.f32.mrf.mxu3  ;;  %v9058_v22 = vld [vmem:[#allocation7 + $0x54] sm:$0xf]  ;;  %v7870_v61 = vld [vmem:[#allocation7 + $0x58] sm:$0xf0] }
 0x4a3   : > { %v3396_v30 = vpop.f32.mrf.mxu0  ;;  %v7873_v16 = vor.u32 %v9058_v22, %v7870_v61  ;;  %v7990_v22 = vld [vmem:[#allocation7 + $0x148] sm:$0xf0] }
 0x4a4   : > { %v11461_v41 = vadd.f32 %v3661_v47, %v3573_v63  ;;  %v3485_v9 = vpop.f32.mrf.mxu1  ;;  %v7937_v63 = vor.u32 %v9074_v36, %v7934_v25  ;;  %v8001_v47 = vor.u32 %v9090_v4, %v7998_v35  ;;  %v7993_v61 = vor.u32 %v9088_v44, %v7990_v22 }
 0x4a5   : > { %v3486_v45 = vadd.f32 %v3485_v9, %v3396_v30  ;;  %3723 = vmatpush.bf16.msrb.mxu0 %v7873_v16  ;;  %v9072_v9 = vld [vmem:[#allocation7 + $0xc4] sm:$0xf] }
 0x4a6   : > { %13319 = vst [vmem:[#allocation116_spill] sm:$0xff] %v11461_v41  ;;  %v9106_v41 = vld [vmem:[#allocation7 + $0x1d4] sm:$0xf]  ;;  %3812 = vmatpush.bf16.msrb.mxu1 %v7937_v63  ;;  %3901 = vmatpush.bf16.msrb.mxu2 %v8001_v47  ;;  %v7929_v4 = vor.u32 %v9072_v9, %v7926_v48  ;;  %v9104_v16 = vld [vmem:[#allocation7 + $0x1c4] sm:$0xf] }
 0x4a7   : > { %v8065_v32 = vor.u32 %v9106_v41, %v8062_v56  ;;  %v8054_v41 = vld [vmem:[#allocation7 + $0x1c8] sm:$0xf0]  ;;  %v9054_v63 = vld [vmem:[#allocation7 + $0x34] sm:$0xf]  ;;  %v7854_v47 = vld [vmem:[#allocation7 + $0x38] sm:$0xf0] }
 0x4a8   : > { %v8057_v25 = vor.u32 %v9104_v16, %v8054_v41  ;;  %v9070_v56 = vld [vmem:[#allocation7 + $0xb4] sm:$0xf]  ;;  %v7846_v16 = vld [vmem:[#allocation7 + $0x28] sm:$0xf0]  ;;  %v9068_v41 = vld [vmem:[#allocation7 + $0xa4] sm:$0xf] }
 0x4a9   : > { %v3574_v17 = vpop.f32.mrf.mxu2  ;;  %3990 = vmatpush.bf16.msrb.mxu3 %v8065_v32  ;;  %3724 = vmatpush.bf16.msrb.mxu0 %v7865_v53  ;;  %v7918_v32 = vld [vmem:[#allocation7 + $0xb8] sm:$0xf0]  ;;  %v9102_v9 = vld [vmem:[#allocation7 + $0x1b4] sm:$0xf] }
 0x4aa   : > { %v3575_v30 = vadd.f32 %v3574_v17, %v3486_v45  ;;  %v3663_v21 = vpop.f32.mrf.mxu3  ;;  %v7857_v17 = vor.u32 %v9054_v63, %v7854_v47  ;;  %3813 = vmatpush.bf16.msrb.mxu1 %v7929_v4  ;;  %3902 = vmatpush.bf16.msrb.mxu2 %v7993_v61  ;;  %v7921_v49 = vor.u32 %v9070_v56, %v7918_v32  ;;  %v7910_v47 = vld [vmem:[#allocation7 + $0xa8] sm:$0xf0] }
 0x4ab   : > { %v3399_v39 = vpop.f32.mrf.mxu0  ;;  %v7913_v56 = vor.u32 %v9068_v41, %v7910_v47  ;;  %v9048_v41 = vld [vmem:[#allocation7 + $0x4] sm:$0xf] }
 0x4ac   : > { %v11463_v36 = vadd.f32 %v3663_v21, %v3575_v30  ;;  %v3488_v35 = vpop.f32.mrf.mxu1  ;;  %v9086_v30 = vld [vmem:[#allocation7 + $0x134] sm:$0xf]  ;;  %v7982_v21 = vld [vmem:[#allocation7 + $0x138] sm:$0xf0]  ;;  %v9064_v47 = vld [vmem:[#allocation7 + $0x84] sm:$0xf] }
 0x4ad   : > { %v3489_v45 = vadd.f32 %v3488_v35, %v3399_v39  ;;  %v7985_v18 = vor.u32 %v9086_v30, %v7982_v21  ;;  %v8046_v39 = vld [vmem:[#allocation7 + $0x1b8] sm:$0xf0]  ;;  %3991 = vmatpush.bf16.msrb.mxu3 %v8057_v25  ;;  %3725 = vmatpush.bf16.msrb.mxu0 %v7857_v17  ;;  %v9052_v35 = vld [vmem:[#allocation7 + $0x24] sm:$0xf]  ;;  %v8038_v17 = vld [vmem:[#allocation7 + $0x1a8] sm:$0xf0] }
 0x4ae   : > { %13320 = vst [vmem:[#allocation114_spill] sm:$0xff] %v11463_v36  ;;  %3438 = vmatmul.bf16.gmra.mxu0 %v11374_v50  ;;  %3616 = vmatmul.bf16.gmra.mxu2 %v11414_v34  ;;  %v8049_v48 = vor.u32 %v9102_v9, %v8046_v39  ;;  %v7849_v63 = vor.u32 %v9052_v35, %v7846_v16  ;;  %v9100_v25 = vld [vmem:[#allocation7 + $0x1a4] sm:$0xf]  ;;  %v9050_v21 = vld [vmem:[#allocation7 + $0x14] sm:$0xf] }
 0x4af   : > { %3527 = vmatmul.bf16.gmra.mxu1 %v11377_v43  ;;  %3705 = vmatmul.bf16.gmra.mxu3 %v11417_v24  ;;  %v9084_v24 = vld [vmem:[#allocation7 + $0x124] sm:$0xf]  ;;  %v7974_v43 = vld [vmem:[#allocation7 + $0x128] sm:$0xf0]  ;;  %v7838_v9 = vld [vmem:[#allocation7 + $0x18] sm:$0xf0] }
 0x4b0   : > { %3814 = vmatpush.bf16.msrb.mxu1 %v7921_v49  ;;  %3903 = vmatpush.bf16.msrb.mxu2 %v7985_v18  ;;  %v7977_v32 = vor.u32 %v9084_v24, %v7974_v43  ;;  %v9066_v39 = vld [vmem:[#allocation7 + $0x94] sm:$0xf]  ;;  %v7902_v35 = vld [vmem:[#allocation7 + $0x98] sm:$0xf0] }
 0x4b1   : > { %v3577_v53 = vpop.f32.mrf.mxu2  ;;  %3992 = vmatpush.bf16.msrb.mxu3 %v8049_v48  ;;  %3726 = vmatpush.bf16.msrb.mxu0 %v7849_v63  ;;  %v9082_v16 = vld [vmem:[#allocation7 + $0x114] sm:$0xf]  ;;  %v7966_v34 = vld [vmem:[#allocation7 + $0x118] sm:$0xf0]  ;;  %v7830_v63 = vld [vmem:[#allocation7 + $0x8] sm:$0xf0] }
 0x4b2   : > { %v3578_v44 = vadd.f32 %v3577_v53, %v3489_v45  ;;  %v3666_v22 = vpop.f32.mrf.mxu3  ;;  %v8041_v45 = vor.u32 %v9100_v25, %v8038_v17  ;;  %v7841_v53 = vor.u32 %v9050_v21, %v7838_v9  ;;  %v7969_v49 = vor.u32 %v9082_v16, %v7966_v34  ;;  %v9098_v18 = vld [vmem:[#allocation7 + $0x194] sm:$0xf]  ;;  %v7894_v17 = vld [vmem:[#allocation7 + $0x88] sm:$0xf0]  ;;  %v9080_v21 = vld [vmem:[#allocation7 + $0x104] sm:$0xf] }
 0x4b3   : > { %v3401_v36 = vpop.f32.mrf.mxu0  ;;  %v7833_v25 = vor.u32 %v9048_v41, %v7830_v63  ;;  %v7958_v9 = vld [vmem:[#allocation7 + $0x108] sm:$0xf0]  ;;  %v7897_v34 = vor.u32 %v9064_v47, %v7894_v17 }
 0x4b4   : > { %v11469_v4 = vadd.f32 %v3666_v22, %v3578_v44  ;;  %v3490_v61 = vpop.f32.mrf.mxu1  ;;  %3815 = vmatpush.bf16.msrb.mxu1 %v7913_v56  ;;  %3904 = vmatpush.bf16.msrb.mxu2 %v7977_v32  ;;  %v7905_v44 = vor.u32 %v9066_v39, %v7902_v35  ;;  %v8030_v22 = vld [vmem:[#allocation7 + $0x198] sm:$0xf0]  ;;  %v7961_v39 = vor.u32 %v9080_v21, %v7958_v9 }
 0x4b5   : > { %v3491_v30 = vadd.f32 %v3490_v61, %v3401_v36  ;;  %3993 = vmatpush.bf16.msrb.mxu3 %v8041_v45  ;;  %3727 = vmatpush.bf16.msrb.mxu0 %v7841_v53  ;;  %v8033_v24 = vor.u32 %v9098_v18, %v8030_v22  ;;  %v9096_v45 = vld [vmem:[#allocation7 + $0x184] sm:$0xf]  ;;  %v8022_v53 = vld [vmem:[#allocation7 + $0x188] sm:$0xf0] }
 0x4b6   : > { %13321 = vst [vmem:[#allocation121_spill] sm:$0xff] %v11469_v4 }
 0x4b8   : > { %3816 = vmatpush.bf16.msrb.mxu1 %v7905_v44  ;;  %3905 = vmatpush.bf16.msrb.mxu2 %v7969_v49 }
 0x4b9   : > { %v3579_v43 = vpop.f32.mrf.mxu2  ;;  %3994 = vmatpush.bf16.msrb.mxu3 %v8033_v24  ;;  %3728 = vmatpush.bf16.msrb.mxu0 %v7833_v25 }
 0x4ba   : > { %v3580_v36 = vadd.f32 %v3579_v43, %v3491_v30  ;;  %v3668_v48 = vpop.f32.mrf.mxu3  ;;  %v8025_v30 = vor.u32 %v9096_v45, %v8022_v53 }
 0x4bb   : > { %v3404_v61 = vpop.f32.mrf.mxu0 }
 0x4bc   : > { %v11471_v56 = vadd.f32 %v3668_v48, %v3580_v36  ;;  %v3493_v32 = vpop.f32.mrf.mxu1  ;;  %3817 = vmatpush.bf16.msrb.mxu1 %v7897_v34  ;;  %3906 = vmatpush.bf16.msrb.mxu2 %v7961_v39 }
 0x4bd   : > { %v3494_v35 = vadd.f32 %v3493_v32, %v3404_v61  ;;  %3995 = vmatpush.bf16.msrb.mxu3 %v8025_v30 }
 0x4be   : > { %13322 = vst [vmem:[#allocation119_spill] sm:$0xff] %v11471_v56  ;;  %3443 = vmatmul.bf16.gmra.mxu0 %v11363_v6  ;;  %3621 = vmatmul.bf16.gmra.mxu2 %v11403_v15 }
 0x4bf   : > { %3532 = vmatmul.bf16.gmra.mxu1 %v11367_v52  ;;  %3710 = vmatmul.bf16.gmra.mxu3 %v11407_v26 }
 0x4c1   : > { %v3582_v16 = vpop.f32.mrf.mxu2 }
 0x4c2   : > { %v3583_v44 = vadd.f32 %v3582_v16, %v3494_v35  ;;  %v3671_v49 = vpop.f32.mrf.mxu3 }
 0x4c3   : > { %v3406_v18 = vpop.f32.mrf.mxu0 }
 0x4c4   : > { %v11477_v22 = vadd.f32 %v3671_v49, %v3583_v44  ;;  %v3495_v43 = vpop.f32.mrf.mxu1 }
 0x4c5   : > { %v3496_v24 = vadd.f32 %v3495_v43, %v3406_v18 }
 0x4c6   : > { %13323 = vst [vmem:[#allocation117_spill] sm:$0xff] %v11477_v22 }
 0x4c9   : > { %v3584_v36 = vpop.f32.mrf.mxu2 }
 0x4ca   : > { %v3585_v48 = vadd.f32 %v3584_v36, %v3496_v24  ;;  %v3673_v41 = vpop.f32.mrf.mxu3 }
 0x4cb   : > { %v3409_v63 = vpop.f32.mrf.mxu0 }
 0x4cc   : > { %v11479_v47 = vadd.f32 %v3673_v41, %v3585_v48  ;;  %v3498_v61 = vpop.f32.mrf.mxu1 }
 0x4cd   : > { %v3499_v25 = vadd.f32 %v3498_v61, %v3409_v63 }
 0x4ce   : > { %13324 = vst [vmem:[#allocation115_spill] sm:$0xff] %v11479_v47  ;;  %3448 = vmatmul.bf16.gmra.mxu0 %v11383_v27  ;;  %3626 = vmatmul.bf16.gmra.mxu2 %v11423_v54 }
 0x4cf   : > { %3537 = vmatmul.bf16.gmra.mxu1 %v11387_v2  ;;  %3715 = vmatmul.bf16.gmra.mxu3 %v11427_v33 }
 0x4d1   : > { %v3587_v17 = vpop.f32.mrf.mxu2 }
 0x4d2   : > { %v3588_v21 = vadd.f32 %v3587_v17, %v3499_v25  ;;  %v3676_v9 = vpop.f32.mrf.mxu3 }
 0x4d3   : > { %v3411_v32 = vpop.f32.mrf.mxu0 }
 0x4d4   : > { %v11485_v34 = vadd.f32 %v3676_v9, %v3588_v21  ;;  %v3500_v39 = vpop.f32.mrf.mxu1 }
 0x4d5   : > { %v3501_v45 = vadd.f32 %v3500_v39, %v3411_v32 }
 0x4d6   : > { %13325 = vst [vmem:[#allocation122_spill] sm:$0xff] %v11485_v34  ;;  %v9187_v34 = vld [vmem:[#allocation8 + $0x25c] sm:$0xf] }
 0x4d9   : > { %v3589_v53 = vpop.f32.mrf.mxu2 }
 0x4da   : > { %v3590_v35 = vadd.f32 %v3589_v53, %v3501_v45  ;;  %v3678_v30 = vpop.f32.mrf.mxu3 }
 0x4db   : > { %v3414_v16 = vpop.f32.mrf.mxu0 }
 0x4dc   : > { %v11487_v44 = vadd.f32 %v3678_v30, %v3590_v35  ;;  %v3503_v49 = vpop.f32.mrf.mxu1 }
 0x4dd   : > { %v3504_v18 = vadd.f32 %v3503_v49, %v3414_v16 }
 0x4de   : > { %13326 = vst [vmem:[#allocation123_spill] sm:$0xff] %v11487_v44  ;;  %3729 = vmatmul.bf16.vlgmr.msrb.gmra.mxu0 %v11074_v10  ;;  %3907 = vmatmul.bf16.vlgmr.msrb.gmra.mxu2 %v11132_v38  ;;  %v9131_v44 = vld [vmem:[#allocation8 + $0x9c] sm:$0xf] }
 0x4df   : > { %3818 = vmatmul.bf16.vlgmr.msrb.gmra.mxu1 %v11080_v60  ;;  %3996 = vmatmul.bf16.vlgmr.msrb.gmra.mxu3 %v11135_v55 }
 0x4e1   : > { %v3592_v43 = vpop.f32.mrf.mxu2 }
 0x4e2   : > { %v3593_v24 = vadd.f32 %v3592_v43, %v3504_v18  ;;  %v3681_v36 = vpop.f32.mrf.mxu3 }
 0x4e3   : > { %v3416_v48 = vpop.f32.mrf.mxu0 }
 0x4e4   : > { %v11493_v41 = vadd.f32 %v3681_v36, %v3593_v24  ;;  %v3505_v63 = vpop.f32.mrf.mxu1  ;;  %v13331_v36 = vld [vmem:[#allocation62_spill] sm:$0xff] }
 0x4e5   : > { %v3506_v61 = vadd.f32 %v3505_v63, %v3416_v48  ;;  %v13334_v48 = vld [vmem:[#allocation61_spill] sm:$0xff] }
 0x4e6   : > { %13327 = vst [vmem:[#allocation124_spill] sm:$0xff] %v11493_v41  ;;  %v8166_v41 = vld [vmem:[#allocation8 + $0xb0] sm:$0xf0] }
 0x4e9   : > { %v3594_v25 = vpop.f32.mrf.mxu2 }
 0x4ea   : > { %v3595_v17 = vadd.f32 %v3594_v25, %v3506_v61  ;;  %v3683_v21 = vpop.f32.mrf.mxu3 }
 0x4eb   : > { %v3419_v9 = vpop.f32.mrf.mxu0 }
 0x4ec   : > { %v11495_v32 = vadd.f32 %v3683_v21, %v3595_v17  ;;  %v3508_v10 = vpop.f32.mrf.mxu1 }
 0x4ed   : > { %v3509_v38 = vadd.f32 %v3508_v10, %v3419_v9 }
 0x4ee   : > { %13328 = vst [vmem:[#allocation125_spill] sm:$0xff] %v11495_v32  ;;  %3734 = vmatmul.bf16.gmra.mxu0 %v11108_v12  ;;  %3912 = vmatmul.bf16.gmra.mxu2 %v11158_v58  ;;  %v8294_v32 = vld [vmem:[#allocation8 + $0x1b0] sm:$0xf0] }
 0x4ef   : > { %3823 = vmatmul.bf16.gmra.mxu1 %v11111_v0  ;;  %4001 = vmatmul.bf16.gmra.mxu3 %v11161_v42  ;;  %v13332_v0 = vld [vmem:[#allocation63_spill] sm:$0xff]  ;;  %v13333_v42 = vld [vmem:[#allocation58_spill] sm:$0xff] }
 0x4f1   : > { %v3597_v60 = vpop.f32.mrf.mxu2 }
 0x4f2   : > { %v3598_v55 = vadd.f32 %v3597_v60, %v3509_v38  ;;  %v3686_v39 = vpop.f32.mrf.mxu3 }
 0x4f3   : > { %v3421_v45 = vpop.f32.mrf.mxu0 }
 0x4f4   : > { %v11501_v53 = vadd.f32 %v3686_v39, %v3598_v55  ;;  %v3510_v35 = vpop.f32.mrf.mxu1 }
 0x4f5   : > { %v3511_v30 = vadd.f32 %v3510_v35, %v3421_v45 }
 0x4f6   : > { %13329 = vst [vmem:[#allocation126_spill] sm:$0xff] %v11501_v53  ;;  %v8126_v53 = vld [vmem:[#allocation8 + $0x68] sm:$0xf0] }
 0x4f9   : > { %v3599_v16 = vpop.f32.mrf.mxu2 }
 0x4fa   : > { %v3600_v49 = vadd.f32 %v3599_v16, %v3511_v30  ;;  %v3688_v18 = vpop.f32.mrf.mxu3  ;;  %v13337_v16 = vld [vmem:[#allocation54_spill] sm:$0xff] }
 0x4fb   : > { %v3424_v43 = vpop.f32.mrf.mxu0 }
 0x4fc   : > { %v11503_v24 = vadd.f32 %v3688_v18, %v3600_v49  ;;  %v3513_v12 = vpop.f32.mrf.mxu1  ;;  %v13338_v49 = vld [vmem:[#allocation55_spill] sm:$0xff]  ;;  %v13339_v18 = vld [vmem:[#allocation68_spill] sm:$0xff] }
 0x4fd   : > { %v3514_v58 = vadd.f32 %v3513_v12, %v3424_v43  ;;  %v13340_v43 = vld [vmem:[#allocation81_spill] sm:$0xff] }
 0x4fe   : > { %13330 = vst [vmem:[#allocation127_spill] sm:$0xff] %v11503_v24  ;;  %3739 = vmatmul.bf16.gmra.mxu0 %v13331_v36  ;;  %3917 = vmatmul.bf16.gmra.mxu2 %v13332_v0  ;;  %v8158_v24 = vld [vmem:[#allocation8 + $0xa8] sm:$0xf0] }
 0x4ff   : > { %3828 = vmatmul.bf16.gmra.mxu1 %v13333_v42  ;;  %4006 = vmatmul.bf16.gmra.mxu3 %v13334_v48 }
 0x501   : > { %v3602_v63 = vpop.f32.mrf.mxu2 }
 0x502   : > { %v3603_v61 = vadd.f32 %v3602_v63, %v3514_v58  ;;  %v3691_v25 = vpop.f32.mrf.mxu3 }
 0x503   : > { %v3426_v17 = vpop.f32.mrf.mxu0 }
 0x504   : > { %v11509_v21 = vadd.f32 %v3691_v25, %v3603_v61  ;;  %v3515_v9 = vpop.f32.mrf.mxu1 }
 0x505   : > { %v3516_v10 = vadd.f32 %v3515_v9, %v3426_v17 }
 0x506   : > { %13335 = vst [vmem:[#allocation62_spill] sm:$0xff] %v11509_v21  ;;  %v9129_v21 = vld [vmem:[#allocation8 + $0x8c] sm:$0xf] }
 0x509   : > { %v3604_v38 = vpop.f32.mrf.mxu2 }
 0x50a   : > { %v3605_v60 = vadd.f32 %v3604_v38, %v3516_v10  ;;  %v3693_v55 = vpop.f32.mrf.mxu3 }
 0x50b   : > { %v3429_v39 = vpop.f32.mrf.mxu0 }
 0x50c   : > { %v11511_v45 = vadd.f32 %v3693_v55, %v3605_v60  ;;  %v3518_v35 = vpop.f32.mrf.mxu1  ;;  %v13343_v55 = vld [vmem:[#allocation77_spill] sm:$0xff] }
 0x50d   : > { %v3519_v30 = vadd.f32 %v3518_v35, %v3429_v39  ;;  %v13344_v39 = vld [vmem:[#allocation76_spill] sm:$0xff]  ;;  %v13345_v35 = vld [vmem:[#allocation73_spill] sm:$0xff] }
 0x50e   : > { %13336 = vst [vmem:[#allocation63_spill] sm:$0xff] %v11511_v45  ;;  %3744 = vmatmul.bf16.gmra.mxu0 %v13337_v16  ;;  %3922 = vmatmul.bf16.gmra.mxu2 %v13338_v49 }
 0x50f   : > { %3833 = vmatmul.bf16.gmra.mxu1 %v13339_v18  ;;  %4011 = vmatmul.bf16.gmra.mxu3 %v13340_v43 }
 0x511   : > { %v3607_v12 = vpop.f32.mrf.mxu2 }
 0x512   : > { %v3608_v58 = vadd.f32 %v3607_v12, %v3519_v30  ;;  %v3696_v36 = vpop.f32.mrf.mxu3  ;;  %v13346_v30 = vld [vmem:[#allocation70_spill] sm:$0xff] }
 0x513   : > { %v3431_v0 = vpop.f32.mrf.mxu0 }
 0x514   : > { %v11517_v42 = vadd.f32 %v3696_v36, %v3608_v58  ;;  %v3520_v48 = vpop.f32.mrf.mxu1 }
 0x515   : > { %v3521_v63 = vadd.f32 %v3520_v48, %v3431_v0 }
 0x516   : > { %13341 = vst [vmem:[#allocation58_spill] sm:$0xff] %v11517_v42  ;;  %v8412_v42 = vld [vmem:[#allocation8 + $0x288] sm:$0xf] }
 0x519   : > { %v3609_v61 = vpop.f32.mrf.mxu2 }
 0x51a   : > { %v3610_v25 = vadd.f32 %v3609_v61, %v3521_v63  ;;  %v3698_v17 = vpop.f32.mrf.mxu3 }
 0x51b   : > { %v3434_v9 = vpop.f32.mrf.mxu0 }
 0x51c   : > { %v11519_v10 = vadd.f32 %v3698_v17, %v3610_v25  ;;  %v3523_v38 = vpop.f32.mrf.mxu1 }
 0x51d   : > { %v3524_v60 = vadd.f32 %v3523_v38, %v3434_v9  ;;  %v13349_v38 = vld [vmem:[#allocation84_spill] sm:$0xff] }
 0x51e   : > { %13342 = vst [vmem:[#allocation61_spill] sm:$0xff] %v11519_v10  ;;  %3749 = vmatmul.bf16.gmra.mxu0 %v13343_v55  ;;  %3927 = vmatmul.bf16.gmra.mxu2 %v13344_v39  ;;  %v9133_v10 = vld [vmem:[#allocation8 + $0xa4] sm:$0xf0] }
 0x51f   : > { %3838 = vmatmul.bf16.gmra.mxu1 %v13345_v35  ;;  %4016 = vmatmul.bf16.gmra.mxu3 %v13346_v30 }
 0x521   : > { %v3612_v16 = vpop.f32.mrf.mxu2 }
 0x522   : > { %v3613_v49 = vadd.f32 %v3612_v16, %v3524_v60  ;;  %v3701_v18 = vpop.f32.mrf.mxu3  ;;  %v13350_v60 = vld [vmem:[#allocation85_spill] sm:$0xff] }
 0x523   : > { %v3436_v43 = vpop.f32.mrf.mxu0 }
 0x524   : > { %v11525_v12 = vadd.f32 %v3701_v18, %v3613_v49  ;;  %v3525_v58 = vpop.f32.mrf.mxu1 }
 0x525   : > { %v3526_v36 = vadd.f32 %v3525_v58, %v3436_v43 }
 0x526   : > { %13347 = vst [vmem:[#allocation54_spill] sm:$0xff] %v11525_v12  ;;  %v8156_v12 = vld [vmem:[#allocation8 + $0x88] sm:$0xf] }
 0x529   : > { %v3614_v0 = vpop.f32.mrf.mxu2 }
 0x52a   : > { %v3615_v48 = vadd.f32 %v3614_v0, %v3526_v36  ;;  %v3703_v63 = vpop.f32.mrf.mxu3 }
 0x52b   : > { %v3439_v61 = vpop.f32.mrf.mxu0 }
 0x52c   : > { %v11527_v25 = vadd.f32 %v3703_v63, %v3615_v48  ;;  %v3528_v17 = vpop.f32.mrf.mxu1  ;;  %v13353_v63 = vld [vmem:[#allocation69_spill] sm:$0xff] }
 0x52d   : > { %v3529_v9 = vadd.f32 %v3528_v17, %v3439_v61  ;;  %v13354_v61 = vld [vmem:[#allocation91_spill] sm:$0xff] }
 0x52e   : > { %13348 = vst [vmem:[#allocation55_spill] sm:$0xff] %v11527_v25  ;;  %3754 = vmatmul.bf16.gmra.mxu0 %v11206_v57  ;;  %3932 = vmatmul.bf16.gmra.mxu2 %v11254_v5 }
 0x52f   : > { %3843 = vmatmul.bf16.gmra.mxu1 %v13349_v38  ;;  %4021 = vmatmul.bf16.gmra.mxu3 %v13350_v60 }
 0x531   : > { %v3617_v55 = vpop.f32.mrf.mxu2 }
 0x532   : > { %v3618_v39 = vadd.f32 %v3617_v55, %v3529_v9  ;;  %v3706_v35 = vpop.f32.mrf.mxu3 }
 0x533   : > { %v3441_v30 = vpop.f32.mrf.mxu0 }
 0x534   : > { %v11533_v16 = vadd.f32 %v3706_v35, %v3618_v39  ;;  %v3530_v49 = vpop.f32.mrf.mxu1 }
 0x535   : > { %v3531_v18 = vadd.f32 %v3530_v49, %v3441_v30 }
 0x536   : > { %13351 = vst [vmem:[#allocation68_spill] sm:$0xff] %v11533_v16 }
 0x539   : > { %v3619_v43 = vpop.f32.mrf.mxu2 }
 0x53a   : > { %v3620_v58 = vadd.f32 %v3619_v43, %v3531_v18  ;;  %v3708_v36 = vpop.f32.mrf.mxu3 }
 0x53b   : > { %v3444_v0 = vpop.f32.mrf.mxu0 }
 0x53c   : > { %v11535_v48 = vadd.f32 %v3708_v36, %v3620_v58  ;;  %v3533_v57 = vpop.f32.mrf.mxu1  ;;  %v13357_v36 = vld [vmem:[#allocation86_spill] sm:$0xff] }
 0x53d   : > { %v3534_v5 = vadd.f32 %v3533_v57, %v3444_v0  ;;  %v13358_v0 = vld [vmem:[#allocation78_spill] sm:$0xff] }
 0x53e   : > { %13352 = vst [vmem:[#allocation81_spill] sm:$0xff] %v11535_v48  ;;  %3759 = vmatmul.bf16.gmra.mxu0 %v11193_v14  ;;  %3937 = vmatmul.bf16.gmra.mxu2 %v11241_v13  ;;  %v13359_v57 = vld [vmem:[#allocation102_spill] sm:$0xff]  ;;  %v9141_v48 = vld [vmem:[#allocation8 + $0xe4] sm:$0xf0] }
 0x53f   : > { %3848 = vmatmul.bf16.gmra.mxu1 %v13353_v63  ;;  %4026 = vmatmul.bf16.gmra.mxu3 %v13354_v61 }
 0x541   : > { %v3622_v17 = vpop.f32.mrf.mxu2 }
 0x542   : > { %v3623_v9 = vadd.f32 %v3622_v17, %v3534_v5  ;;  %v3711_v38 = vpop.f32.mrf.mxu3 }
 0x543   : > { %v3446_v60 = vpop.f32.mrf.mxu0 }
 0x544   : > { %v11541_v55 = vadd.f32 %v3711_v38, %v3623_v9  ;;  %v3535_v39 = vpop.f32.mrf.mxu1 }
 0x545   : > { %v3536_v35 = vadd.f32 %v3535_v39, %v3446_v60 }
 0x546   : > { %13355 = vst [vmem:[#allocation77_spill] sm:$0xff] %v11541_v55  ;;  %v9217_v55 = vld [vmem:[#allocation8 + $0x34c] sm:$0xf] }
 0x549   : > { %v3624_v30 = vpop.f32.mrf.mxu2 }
 0x54a   : > { %v3625_v49 = vadd.f32 %v3624_v30, %v3536_v35  ;;  %v3713_v18 = vpop.f32.mrf.mxu3 }
 0x54b   : > { %v3449_v43 = vpop.f32.mrf.mxu0 }
 0x54c   : > { %v11543_v58 = vadd.f32 %v3713_v18, %v3625_v49  ;;  %v3538_v14 = vpop.f32.mrf.mxu1 }
 0x54d   : > { %v3539_v13 = vadd.f32 %v3538_v14, %v3449_v43 }
 0x54e   : > { %13356 = vst [vmem:[#allocation76_spill] sm:$0xff] %v11543_v58  ;;  %3764 = vmatmul.bf16.gmra.mxu0 %v11217_v29  ;;  %3942 = vmatmul.bf16.gmra.mxu2 %v13357_v36  ;;  %v8254_v58 = vld [vmem:[#allocation8 + $0x168] sm:$0xf0] }
 0x54f   : > { %3853 = vmatmul.bf16.gmra.mxu1 %v13358_v0  ;;  %4031 = vmatmul.bf16.gmra.mxu3 %v13359_v57 }
 0x551   : > { %v3627_v5 = vpop.f32.mrf.mxu2 }
 0x552   : > { %v3628_v63 = vadd.f32 %v3627_v5, %v3539_v13  ;;  %v3716_v61 = vpop.f32.mrf.mxu3 }
 0x553   : > { %v3451_v17 = vpop.f32.mrf.mxu0 }
 0x554   : > { %v11549_v9 = vadd.f32 %v3716_v61, %v3628_v63  ;;  %v3540_v38 = vpop.f32.mrf.mxu1 }
 0x555   : > { %v3541_v60 = vadd.f32 %v3540_v38, %v3451_v17 }
 0x556   : > { %13360 = vst [vmem:[#allocation73_spill] sm:$0xff] %v11549_v9  ;;  %v8118_v9 = vld [vmem:[#allocation8 + $0x60] sm:$0xf0] }
 0x559   : > { %v3629_v39 = vpop.f32.mrf.mxu2 }
 0x55a   : > { %v3630_v35 = vadd.f32 %v3629_v39, %v3541_v60  ;;  %v3718_v30 = vpop.f32.mrf.mxu3 }
 0x55b   : > { %v3730_v49 = vpop.f32.mrf.mxu0 }
 0x55c   : > { %v11551_v18 = vadd.f32 %v3718_v30, %v3630_v35  ;;  %v3819_v29 = vpop.f32.mrf.mxu1 }
 0x55d   : > { %v3820_v43 = vadd.f32 %v3819_v29, %v3730_v49 }
 0x55e   : > { %13361 = vst [vmem:[#allocation70_spill] sm:$0xff] %v11551_v18  ;;  %3769 = vmatmul.bf16.gmra.mxu0 %v11274_v62  ;;  %3947 = vmatmul.bf16.gmra.mxu2 %v11314_v40  ;;  %v8150_v18 = vld [vmem:[#allocation8 + $0xa0] sm:$0xf0] }
 0x55f   : > { %3858 = vmatmul.bf16.gmra.mxu1 %v11277_v51  ;;  %4036 = vmatmul.bf16.gmra.mxu3 %v11317_v3 }
 0x561   : > { %v3908_v14 = vpop.f32.mrf.mxu2 }
 0x562   : > { %v3909_v13 = vadd.f32 %v3908_v14, %v3820_v43  ;;  %v3997_v36 = vpop.f32.mrf.mxu3 }
 0x563   : > { %v3732_v0 = vpop.f32.mrf.mxu0 }
 0x564   : > { %v11557_v57 = vadd.f32 %v3997_v36, %v3909_v13  ;;  %v3821_v5 = vpop.f32.mrf.mxu1 }
 0x565   : > { %v3822_v63 = vadd.f32 %v3821_v5, %v3732_v0 }
 0x566   : > { %13362 = vst [vmem:[#allocation84_spill] sm:$0xff] %v11557_v57 }
 0x569   : > { %v3910_v61 = vpop.f32.mrf.mxu2 }
 0x56a   : > { %v3911_v17 = vadd.f32 %v3910_v61, %v3822_v63  ;;  %v3999_v38 = vpop.f32.mrf.mxu3 }
 0x56b   : > { %v3735_v60 = vpop.f32.mrf.mxu0 }
 0x56c   : > { %v11559_v39 = vadd.f32 %v3999_v38, %v3911_v17  ;;  %v3824_v62 = vpop.f32.mrf.mxu1 }
 0x56d   : > { %v3825_v40 = vadd.f32 %v3824_v62, %v3735_v60  ;;  %v9168_v62 = vld [vmem:[#allocation8 + $0x1c4] sm:$0xf] }
 0x56e   : > { %13363 = vst [vmem:[#allocation85_spill] sm:$0xff] %v11559_v39  ;;  %3774 = vmatmul.bf16.gmra.mxu0 %v11294_v1  ;;  %3952 = vmatmul.bf16.gmra.mxu2 %v11334_v28 }
 0x56f   : > { %3863 = vmatmul.bf16.gmra.mxu1 %v11297_v8  ;;  %4041 = vmatmul.bf16.gmra.mxu3 %v11337_v46 }
 0x571   : > { %v3913_v3 = vpop.f32.mrf.mxu2 }
 0x572   : > { %v3914_v51 = vadd.f32 %v3913_v3, %v3825_v40  ;;  %v4002_v35 = vpop.f32.mrf.mxu3  ;;  %v8310_v40 = vld [vmem:[#allocation8 + $0x1e0] sm:$0xf0] }
 0x573   : > { %v3737_v30 = vpop.f32.mrf.mxu0  ;;  %v9232_v3 = vld [vmem:[#allocation8 + $0x3c4] sm:$0xf] }
 0x574   : > { %v11565_v49 = vadd.f32 %v4002_v35, %v3914_v51  ;;  %v3826_v29 = vpop.f32.mrf.mxu1  ;;  %v8313_v51 = vor.u32 %v9168_v62, %v8310_v40  ;;  %v8566_v35 = vld [vmem:[#allocation8 + $0x3e0] sm:$0xf0]  ;;  %v9236_v62 = vld [vmem:[#allocation8 + $0x3dc] sm:$0xf0] }
 0x575   : > { %v3827_v43 = vadd.f32 %v3826_v29, %v3737_v30 }
 0x576   : > { %13364 = vst [vmem:[#allocation69_spill] sm:$0xff] %v11565_v49  ;;  %4911 = vmatpush.bf16.msra.mxu2 %v8313_v51 }
 0x579   : > { %v3915_v14 = vpop.f32.mrf.mxu2 }
 0x57a   : > { %v3916_v13 = vadd.f32 %v3915_v14, %v3827_v43  ;;  %v4004_v36 = vpop.f32.mrf.mxu3 }
 0x57b   : > { %v3740_v0 = vpop.f32.mrf.mxu0 }
 0x57c   : > { %v11567_v5 = vadd.f32 %v4004_v36, %v3916_v13  ;;  %v3829_v1 = vpop.f32.mrf.mxu1 }
 0x57d   : > { %v3830_v28 = vadd.f32 %v3829_v1, %v3740_v0 }
 0x57e   : > { %13365 = vst [vmem:[#allocation91_spill] sm:$0xff] %v11567_v5  ;;  %3779 = vmatmul.bf16.gmra.mxu0 %v11283_v20  ;;  %3957 = vmatmul.bf16.gmra.mxu2 %v11323_v7  ;;  %v8569_v20 = vor.u32 %v9232_v3, %v8566_v35 }
 0x57f   : > { %3868 = vmatmul.bf16.gmra.mxu1 %v11287_v37  ;;  %4046 = vmatmul.bf16.gmra.mxu3 %v11327_v59 }
 0x580   : > { %4940 = vmatpush.bf16.msra.mxu3 %v8569_v20  ;;  %v13370_v20 = vld [vmem:[#allocation100_spill] sm:$0xff] }
 0x581   : > { %v3918_v46 = vpop.f32.mrf.mxu2 }
 0x582   : > { %v3919_v8 = vadd.f32 %v3918_v46, %v3830_v28  ;;  %v4007_v63 = vpop.f32.mrf.mxu3 }
 0x583   : > { %v3742_v61 = vpop.f32.mrf.mxu0 }
 0x584   : > { %v11573_v17 = vadd.f32 %v4007_v63, %v3919_v8  ;;  %v3831_v38 = vpop.f32.mrf.mxu1  ;;  %v8308_v63 = vld [vmem:[#allocation8 + $0x1c0] sm:$0xf] }
 0x585   : > { %v3832_v60 = vadd.f32 %v3831_v38, %v3742_v61  ;;  %v9172_v61 = vld [vmem:[#allocation8 + $0x1dc] sm:$0xf0] }
 0x586   : > { %13366 = vst [vmem:[#allocation86_spill] sm:$0xff] %v11573_v17  ;;  %v8564_v38 = vld [vmem:[#allocation8 + $0x3c0] sm:$0xf] }
 0x589   : > { %v3920_v30 = vpop.f32.mrf.mxu2 }
 0x58a   : > { %v3921_v7 = vadd.f32 %v3920_v30, %v3832_v60  ;;  %v4009_v37 = vpop.f32.mrf.mxu3  ;;  %v8309_v60 = vor.u32 %v9172_v61, %v8308_v63  ;;  %v13371_v30 = vld [vmem:[#allocation103_spill] sm:$0xff]  ;;  %v9160_v63 = vld [vmem:[#allocation8 + $0x184] sm:$0xf] }
 0x58b   : > { %v3745_v59 = vpop.f32.mrf.mxu0  ;;  %v8278_v61 = vld [vmem:[#allocation8 + $0x1a0] sm:$0xf0] }
 0x58c   : > { %v11575_v29 = vadd.f32 %v4009_v37, %v3921_v7  ;;  %v3834_v43 = vpop.f32.mrf.mxu1  ;;  %4853 = vmatpush.bf16.msra.mxu0 %v8309_v60  ;;  %v13372_v7 = vld [vmem:[#allocation105_spill] sm:$0xff] }
 0x58d   : > { %v3835_v14 = vadd.f32 %v3834_v43, %v3745_v59  ;;  %v13373_v37 = vld [vmem:[#allocation101_spill] sm:$0xff] }
 0x58e   : > { %13367 = vst [vmem:[#allocation78_spill] sm:$0xff] %v11575_v29  ;;  %3784 = vmatmul.bf16.gmra.mxu0 %v11303_v11  ;;  %3962 = vmatmul.bf16.gmra.mxu2 %v11343_v19  ;;  %v8565_v11 = vor.u32 %v9236_v62, %v8564_v38 }
 0x58f   : > { %3873 = vmatmul.bf16.gmra.mxu1 %v11307_v31  ;;  %4051 = vmatmul.bf16.gmra.mxu3 %v11347_v23 }
 0x590   : > { %4882 = vmatpush.bf16.msra.mxu1 %v8565_v11  ;;  %v8281_v11 = vor.u32 %v9160_v63, %v8278_v61  ;;  %v8212_v63 = vld [vmem:[#allocation8 + $0x100] sm:$0xf] }
 0x591   : > { %v3923_v13 = vpop.f32.mrf.mxu2  ;;  %v9148_v61 = vld [vmem:[#allocation8 + $0x11c] sm:$0xf0] }
 0x592   : > { %v3924_v36 = vadd.f32 %v3923_v13, %v3835_v14  ;;  %v4012_v0 = vpop.f32.mrf.mxu3  ;;  %v8276_v13 = vld [vmem:[#allocation8 + $0x180] sm:$0xf]  ;;  %4912 = vmatpush.bf16.msra.mxu2 %v8281_v11  ;;  %v8213_v11 = vor.u32 %v9148_v61, %v8212_v63  ;;  %v9136_v63 = vld [vmem:[#allocation8 + $0xc4] sm:$0xf] }
 0x593   : > { %v3747_v1 = vpop.f32.mrf.mxu0  ;;  %v8182_v61 = vld [vmem:[#allocation8 + $0xe0] sm:$0xf0] }
 0x594   : > { %v11581_v28 = vadd.f32 %v4012_v0, %v3924_v36  ;;  %v3836_v46 = vpop.f32.mrf.mxu1  ;;  %v9164_v36 = vld [vmem:[#allocation8 + $0x19c] sm:$0xf0] }
 0x595   : > { %v3837_v8 = vadd.f32 %v3836_v46, %v3747_v1  ;;  %v8532_v0 = vld [vmem:[#allocation8 + $0x380] sm:$0xf]  ;;  %v8277_v46 = vor.u32 %v9164_v36, %v8276_v13  ;;  %v9216_v13 = vld [vmem:[#allocation8 + $0x344] sm:$0xf] }
 0x596   : > { %13368 = vst [vmem:[#allocation102_spill] sm:$0xff] %v11581_v28  ;;  %v8502_v36 = vld [vmem:[#allocation8 + $0x360] sm:$0xf0] }
 0x597   : > { %4854 = vmatpush.bf16.msra.mxu0 %v8277_v46 }
 0x599   : > { %v3925_v40 = vpop.f32.mrf.mxu2 }
 0x59a   : > { %v3926_v19 = vadd.f32 %v3925_v40, %v3837_v8  ;;  %v4014_v31 = vpop.f32.mrf.mxu3  ;;  %v9228_v8 = vld [vmem:[#allocation8 + $0x39c] sm:$0xf0]  ;;  %v9224_v40 = vld [vmem:[#allocation8 + $0x384] sm:$0xf] }
 0x59b   : > { %v3750_v23 = vpop.f32.mrf.mxu0  ;;  %v8533_v62 = vor.u32 %v9228_v8, %v8532_v0  ;;  %v8505_v8 = vor.u32 %v9216_v13, %v8502_v36  ;;  %v9140_v13 = vld [vmem:[#allocation8 + $0xdc] sm:$0xf0] }
 0x59c   : > { %v11583_v3 = vadd.f32 %v4014_v31, %v3926_v19  ;;  %v3839_v51 = vpop.f32.mrf.mxu1  ;;  %v8534_v19 = vld [vmem:[#allocation8 + $0x3a0] sm:$0xf0]  ;;  %v8436_v36 = vld [vmem:[#allocation8 + $0x2c0] sm:$0xf] }
 0x59d   : > { %v3840_v35 = vadd.f32 %v3839_v51, %v3750_v23  ;;  %v8537_v23 = vor.u32 %v9224_v40, %v8534_v19  ;;  %4883 = vmatpush.bf16.msra.mxu1 %v8533_v62  ;;  %v8244_v51 = vld [vmem:[#allocation8 + $0x140] sm:$0xf]  ;;  %v9144_v19 = vld [vmem:[#allocation8 + $0x104] sm:$0xf] }
 0x59e   : > { %13369 = vst [vmem:[#allocation128_spill] sm:$0xff] %v11583_v3  ;;  %3789 = vmatmul.bf16.gmra.mxu0 %v13370_v20  ;;  %3967 = vmatmul.bf16.gmra.mxu2 %v13371_v30  ;;  %v8500_v20 = vld [vmem:[#allocation8 + $0x340] sm:$0xf] }
 0x59f   : > { %3878 = vmatmul.bf16.gmra.mxu1 %v13372_v7  ;;  %4056 = vmatmul.bf16.gmra.mxu3 %v13373_v37  ;;  %v9220_v7 = vld [vmem:[#allocation8 + $0x35c] sm:$0xf0]  ;;  %v9152_v37 = vld [vmem:[#allocation8 + $0x144] sm:$0xf] }
 0x5a0   : > { %4941 = vmatpush.bf16.msra.mxu3 %v8537_v23  ;;  %v9212_v40 = vld [vmem:[#allocation8 + $0x31c] sm:$0xf0]  ;;  %v8214_v23 = vld [vmem:[#allocation8 + $0x120] sm:$0xf0] }
 0x5a1   : > { %v3928_v59 = vpop.f32.mrf.mxu2 }
 0x5a2   : > { %v3929_v43 = vadd.f32 %v3928_v59, %v3840_v35  ;;  %v4017_v14 = vpop.f32.mrf.mxu3  ;;  %v9156_v35 = vld [vmem:[#allocation8 + $0x15c] sm:$0xf0]  ;;  %v8246_v59 = vld [vmem:[#allocation8 + $0x160] sm:$0xf0] }
 0x5a3   : > { %v3752_v1 = vpop.f32.mrf.mxu0  ;;  %v8245_v30 = vor.u32 %v9156_v35, %v8244_v51 }
 0x5a4   : > { %v11589_v38 = vadd.f32 %v4017_v14, %v3929_v43  ;;  %v3841_v60 = vpop.f32.mrf.mxu1  ;;  %v8501_v43 = vor.u32 %v9220_v7, %v8500_v20  ;;  %v8249_v14 = vor.u32 %v9152_v37, %v8246_v59  ;;  %4942 = vmatpush.bf16.msra.mxu3 %v8505_v8  ;;  %v8217_v7 = vor.u32 %v9144_v19, %v8214_v23  ;;  %v8470_v37 = vld [vmem:[#allocation8 + $0x320] sm:$0xf0] }
 0x5a5   : > { %v3842_v31 = vadd.f32 %v3841_v60, %v3752_v1  ;;  %4855 = vmatpush.bf16.msra.mxu0 %v8245_v30  ;;  %v8468_v60 = vld [vmem:[#allocation8 + $0x300] sm:$0xf]  ;;  %v9208_v30 = vld [vmem:[#allocation8 + $0x304] sm:$0xf] }
 0x5a6   : > { %13374 = vst [vmem:[#allocation100_spill] sm:$0xff] %v11589_v38  ;;  %4884 = vmatpush.bf16.msra.mxu1 %v8501_v43  ;;  %4913 = vmatpush.bf16.msra.mxu2 %v8249_v14  ;;  %v8469_v20 = vor.u32 %v9212_v40, %v8468_v60  ;;  %v8473_v59 = vor.u32 %v9208_v30, %v8470_v37  ;;  %v13376_v43 = vld [vmem:[#allocation112_spill] sm:$0xff]  ;;  %v8180_v14 = vld [vmem:[#allocation8 + $0xc0] sm:$0xf]  ;;  %v8438_v40 = vld [vmem:[#allocation8 + $0x2e0] sm:$0xf0] }
 0x5a7   : > { %v13378_v8 = vld [vmem:[#allocation110_spill] sm:$0xff] }
 0x5a8   : > { %4943 = vmatpush.bf16.msra.mxu3 %v8473_v59  ;;  %v8148_v30 = vld [vmem:[#allocation8 + $0x80] sm:$0xf]  ;;  %v9192_v59 = vld [vmem:[#allocation8 + $0x284] sm:$0xf] }
 0x5a9   : > { %v3930_v0 = vpop.f32.mrf.mxu2  ;;  %4856 = vmatpush.bf16.msra.mxu0 %v8213_v11  ;;  %v9200_v11 = vld [vmem:[#allocation8 + $0x2c4] sm:$0xf]  ;;  %v9132_v37 = vld [vmem:[#allocation8 + $0x9c] sm:$0xf0] }
 0x5aa   : > { %v3931_v1 = vadd.f32 %v3930_v0, %v3842_v31  ;;  %v4019_v46 = vpop.f32.mrf.mxu3  ;;  %v13377_v0 = vld [vmem:[#allocation104_spill] sm:$0xff]  ;;  %4885 = vmatpush.bf16.msra.mxu1 %v8469_v20  ;;  %4914 = vmatpush.bf16.msra.mxu2 %v8217_v7  ;;  %v8441_v19 = vor.u32 %v9200_v11, %v8438_v40  ;;  %v9124_v11 = vld [vmem:[#allocation8 + $0x5c] sm:$0xf0] }
 0x5ab   : > { %v3755_v62 = vpop.f32.mrf.mxu0  ;;  %v8372_v40 = vld [vmem:[#allocation8 + $0x240] sm:$0xf] }
 0x5ac   : > { %v11591_v51 = vadd.f32 %v4019_v46, %v3931_v1  ;;  %v3844_v35 = vpop.f32.mrf.mxu1  ;;  %v8181_v1 = vor.u32 %v9140_v13, %v8180_v14  ;;  %v9204_v46 = vld [vmem:[#allocation8 + $0x2dc] sm:$0xf0]  ;;  %v8149_v14 = vor.u32 %v9132_v37, %v8148_v30  ;;  %4944 = vmatpush.bf16.msra.mxu3 %v8441_v19  ;;  %v9120_v37 = vld [vmem:[#allocation8 + $0x44] sm:$0xf] }
 0x5ad   : > { %v3845_v31 = vadd.f32 %v3844_v35, %v3755_v62  ;;  %v8437_v60 = vor.u32 %v9204_v46, %v8436_v36  ;;  %v8185_v62 = vor.u32 %v9136_v63, %v8182_v61  ;;  %v9196_v13 = vld [vmem:[#allocation8 + $0x29c] sm:$0xf0] }
 0x5ae   : > { %13375 = vst [vmem:[#allocation103_spill] sm:$0xff] %v11591_v51  ;;  %3794 = vmatmul.bf16.gmra.mxu0 %v11374_v50  ;;  %3972 = vmatmul.bf16.gmra.mxu2 %v13376_v43  ;;  %v8404_v43 = vld [vmem:[#allocation8 + $0x280] sm:$0xf] }
 0x5af   : > { %3883 = vmatmul.bf16.gmra.mxu1 %v13377_v0  ;;  %4061 = vmatmul.bf16.gmra.mxu3 %v13378_v8  ;;  %v9128_v8 = vld [vmem:[#allocation8 + $0x84] sm:$0xf]  ;;  %v8405_v36 = vor.u32 %v9196_v13, %v8404_v43  ;;  %v8116_v61 = vld [vmem:[#allocation8 + $0x40] sm:$0xf] }
 0x5b0   : > { %4857 = vmatpush.bf16.msra.mxu0 %v8181_v1  ;;  %4886 = vmatpush.bf16.msra.mxu1 %v8437_v60  ;;  %v8153_v46 = vor.u32 %v9128_v8, %v8150_v18  ;;  %v8406_v1 = vld [vmem:[#allocation8 + $0x2a0] sm:$0xf0]  ;;  %v9188_v30 = vld [vmem:[#allocation8 + $0x25c] sm:$0xf0]  ;;  %v8121_v60 = vor.u32 %v9120_v37, %v8118_v9 }
 0x5b1   : > { %v3933_v50 = vpop.f32.mrf.mxu2  ;;  %4915 = vmatpush.bf16.msra.mxu2 %v8185_v62  ;;  %v9184_v62 = vld [vmem:[#allocation8 + $0x244] sm:$0xf]  ;;  %v9116_v13 = vld [vmem:[#allocation8 + $0x1c] sm:$0xf0] }
 0x5b2   : > { %v3934_v23 = vadd.f32 %v3933_v50, %v3845_v31  ;;  %v4022_v35 = vpop.f32.mrf.mxu3  ;;  %v8409_v31 = vor.u32 %v9192_v59, %v8406_v1  ;;  %v8117_v50 = vor.u32 %v9124_v11, %v8116_v61  ;;  %v8340_v8 = vld [vmem:[#allocation8 + $0x200] sm:$0xf]  ;;  %v9112_v61 = vld [vmem:[#allocation8 + $0x4] sm:$0xf] }
 0x5b3   : > { %v3757_v0 = vpop.f32.mrf.mxu0  ;;  %v9180_v1 = vld [vmem:[#allocation8 + $0x21c] sm:$0xf0]  ;;  %v8086_v11 = vld [vmem:[#allocation8 + $0x20] sm:$0xf0] }
 0x5b4   : > { %v11597_v20 = vadd.f32 %v4022_v35, %v3934_v23  ;;  %v3846_v7 = vpop.f32.mrf.mxu1  ;;  %4858 = vmatpush.bf16.msra.mxu0 %v8149_v14  ;;  %4887 = vmatpush.bf16.msra.mxu1 %v8405_v36  ;;  %v8373_v23 = vor.u32 %v9188_v30, %v8372_v40  ;;  %v8374_v35 = vld [vmem:[#allocation8 + $0x260] sm:$0xf0]  ;;  %v8084_v14 = vld [vmem:[#allocation8] sm:$0xf]  ;;  %v8341_v9 = vor.u32 %v9180_v1, %v8340_v8 }
 0x5b5   : > { %v3847_v63 = vadd.f32 %v3846_v7, %v3757_v0  ;;  %4916 = vmatpush.bf16.msra.mxu2 %v8153_v46  ;;  %4945 = vmatpush.bf16.msra.mxu3 %v8409_v31  ;;  %v8377_v43 = vor.u32 %v9184_v62, %v8374_v35  ;;  %v8085_v59 = vor.u32 %v9116_v13, %v8084_v14  ;;  %v9176_v31 = vld [vmem:[#allocation8 + $0x204] sm:$0xf] }
 0x5b6   : > { %13379 = vst [vmem:[#allocation105_spill] sm:$0xff] %v11597_v20  ;;  %v8089_v40 = vor.u32 %v9112_v61, %v8086_v11 }
 0x5b8   : > { %4859 = vmatpush.bf16.msra.mxu0 %v8117_v50  ;;  %4888 = vmatpush.bf16.msra.mxu1 %v8373_v23  ;;  %v8342_v50 = vld [vmem:[#allocation8 + $0x220] sm:$0xf0] }
 0x5b9   : > { %v3935_v18 = vpop.f32.mrf.mxu2  ;;  %4917 = vmatpush.bf16.msra.mxu2 %v8121_v60  ;;  %4946 = vmatpush.bf16.msra.mxu3 %v8377_v43 }
 0x5ba   : > { %v3936_v19 = vadd.f32 %v3935_v18, %v3847_v63  ;;  %v4024_v0 = vpop.f32.mrf.mxu3  ;;  %v8345_v63 = vor.u32 %v9176_v31, %v8342_v50  ;;  %v13384_v50 = vld [vmem:[#allocation20_spill] sm:$0xff] }
 0x5bb   : > { %v3760_v7 = vpop.f32.mrf.mxu0 }
 0x5bc   : > { %v11599_v36 = vadd.f32 %v4024_v0, %v3936_v19  ;;  %v3849_v46 = vpop.f32.mrf.mxu1  ;;  %4860 = vmatpush.bf16.msra.mxu0 %v8085_v59  ;;  %4889 = vmatpush.bf16.msra.mxu1 %v8341_v9 }
 0x5bd   : > { %v3850_v30 = vadd.f32 %v3849_v46, %v3760_v7  ;;  %4918 = vmatpush.bf16.msra.mxu2 %v8089_v40  ;;  %4947 = vmatpush.bf16.msra.mxu3 %v8345_v63  ;;  %v13388_v63 = vld [vmem:[#allocation29_spill] sm:$0xff] }
 0x5be   : > { %13380 = vst [vmem:[#allocation101_spill] sm:$0xff] %v11599_v36  ;;  %3799 = vmatmul.bf16.gmra.mxu0 %v11363_v6  ;;  %3977 = vmatmul.bf16.gmra.mxu2 %v11403_v15 }
 0x5bf   : > { %3888 = vmatmul.bf16.gmra.mxu1 %v11367_v52  ;;  %4066 = vmatmul.bf16.gmra.mxu3 %v11407_v26 }
 0x5c1   : > { %v3938_v37 = vpop.f32.mrf.mxu2 }
 0x5c2   : > { %v3939_v23 = vadd.f32 %v3938_v37, %v3850_v30  ;;  %v4027_v60 = vpop.f32.mrf.mxu3 }
 0x5c3   : > { %v3762_v62 = vpop.f32.mrf.mxu0 }
 0x5c4   : > { %v11605_v35 = vadd.f32 %v4027_v60, %v3939_v23  ;;  %v3851_v18 = vpop.f32.mrf.mxu1  ;;  %v8316_v60 = vld [vmem:[#allocation8 + $0x1c8] sm:$0xf] }
 0x5c5   : > { %v3852_v43 = vadd.f32 %v3851_v18, %v3762_v62  ;;  %v9173_v62 = vld [vmem:[#allocation8 + $0x1e4] sm:$0xf0] }
 0x5c6   : > { %13381 = vst [vmem:[#allocation112_spill] sm:$0xff] %v11605_v35  ;;  %v8572_v18 = vld [vmem:[#allocation8 + $0x3c8] sm:$0xf] }
 0x5c9   : > { %v3940_v19 = vpop.f32.mrf.mxu2 }
 0x5ca   : > { %v3941_v0 = vadd.f32 %v3940_v19, %v3852_v43  ;;  %v4029_v6 = vpop.f32.mrf.mxu3  ;;  %v8317_v43 = vor.u32 %v9173_v62, %v8316_v60  ;;  %v9237_v19 = vld [vmem:[#allocation8 + $0x3e4] sm:$0xf0]  ;;  %v9161_v60 = vld [vmem:[#allocation8 + $0x18c] sm:$0xf] }
 0x5cb   : > { %v3765_v14 = vpop.f32.mrf.mxu0  ;;  %v8286_v62 = vld [vmem:[#allocation8 + $0x1a8] sm:$0xf0] }
 0x5cc   : > { %v11607_v15 = vadd.f32 %v4029_v6, %v3941_v0  ;;  %v3854_v52 = vpop.f32.mrf.mxu1  ;;  %v9169_v0 = vld [vmem:[#allocation8 + $0x1cc] sm:$0xf]  ;;  %4969 = vmatpush.bf16.msrb.mxu0 %v8317_v43 }
 0x5cd   : > { %v3855_v13 = vadd.f32 %v3854_v52, %v3765_v14  ;;  %v8318_v6 = vld [vmem:[#allocation8 + $0x1e8] sm:$0xf0]  ;;  %v8573_v14 = vor.u32 %v9237_v19, %v8572_v18 }
 0x5ce   : > { %13382 = vst [vmem:[#allocation104_spill] sm:$0xff] %v11607_v15  ;;  %3804 = vmatmul.bf16.gmra.mxu0 %v11383_v27  ;;  %3982 = vmatmul.bf16.gmra.mxu2 %v11423_v54  ;;  %v13385_v27 = vld [vmem:[#allocation28_spill] sm:$0xff]  ;;  %v8321_v52 = vor.u32 %v9169_v0, %v8318_v6  ;;  %v8289_v6 = vor.u32 %v9161_v60, %v8286_v62  ;;  %v9225_v43 = vld [vmem:[#allocation8 + $0x38c] sm:$0xf]  ;;  %v8220_v62 = vld [vmem:[#allocation8 + $0x108] sm:$0xf] }
 0x5cf   : > { %3893 = vmatmul.bf16.gmra.mxu1 %v11387_v2  ;;  %4071 = vmatmul.bf16.gmra.mxu3 %v11427_v33  ;;  %v11617_v30 = vpack.c.bf16 %v13385_v27, %v13384_v50  ;;  %v13387_v33 = vld [vmem:[#allocation21_spill] sm:$0xff] }
 0x5d0   : > { %v11623_v37 = vpack.c.bf16 %v13388_v63, %v13387_v33  ;;  %4998 = vmatpush.bf16.msrb.mxu1 %v8573_v14  ;;  %5027 = vmatpush.bf16.msrb.mxu2 %v8321_v52  ;;  %v8252_v52 = vld [vmem:[#allocation8 + $0x148] sm:$0xf]  ;;  %v8398_v15 = vld [vmem:[#allocation8 + $0x278] sm:$0xf0] }
 0x5d1   : > { %v3943_v26 = vpop.f32.mrf.mxu2 }
 0x5d2   : > { %v3944_v8 = vadd.f32 %v3943_v26, %v3855_v13  ;;  %v4032_v7 = vpop.f32.mrf.mxu3  ;;  %v9233_v13 = vld [vmem:[#allocation8 + $0x3cc] sm:$0xf] }
 0x5d3   : > { %v3767_v59 = vpop.f32.mrf.mxu0  ;;  %v8574_v26 = vld [vmem:[#allocation8 + $0x3e8] sm:$0xf0] }
 0x5d4   : > { %v11613_v1 = vadd.f32 %v4032_v7, %v3944_v8  ;;  %v3856_v61 = vpop.f32.mrf.mxu1  ;;  %v8577_v7 = vor.u32 %v9233_v13, %v8574_v26  ;;  %v8542_v13 = vld [vmem:[#allocation8 + $0x3a8] sm:$0xf0]  ;;  %5028 = vmatpush.bf16.msrb.mxu2 %v8289_v6  ;;  %v9157_v26 = vld [vmem:[#allocation8 + $0x164] sm:$0xf0] }
 0x5d5   : > { %v3857_v11 = vadd.f32 %v3856_v61, %v3767_v59  ;;  %v8545_v14 = vor.u32 %v9225_v43, %v8542_v13  ;;  %v9213_v13 = vld [vmem:[#allocation8 + $0x324] sm:$0xf0] }
 0x5d6   : > { %13383 = vst [vmem:[#allocation110_spill] sm:$0xff] %v11613_v1  ;;  %5056 = vmatpush.bf16.msrb.mxu3 %v8577_v7  ;;  %v8253_v7 = vor.u32 %v9157_v26, %v8252_v52  ;;  %v8222_v52 = vld [vmem:[#allocation8 + $0x128] sm:$0xf0]  ;;  %v13390_v26 = vld [vmem:[#allocation36_spill] sm:$0xff]  ;;  %v8142_v1 = vld [vmem:[#allocation8 + $0x78] sm:$0xf0] }
 0x5d9   : > { %v3945_v46 = vpop.f32.mrf.mxu2 }
 0x5da   : > { %v3946_v9 = vadd.f32 %v3945_v46, %v3857_v11  ;;  %v4034_v40 = vpop.f32.mrf.mxu3  ;;  %v8284_v11 = vld [vmem:[#allocation8 + $0x188] sm:$0xf]  ;;  %5057 = vmatpush.bf16.msrb.mxu3 %v8545_v14  ;;  %v9145_v14 = vld [vmem:[#allocation8 + $0x10c] sm:$0xf] }
 0x5db   : > { %v3770_v31 = vpop.f32.mrf.mxu0  ;;  %v9165_v46 = vld [vmem:[#allocation8 + $0x1a4] sm:$0xf0] }
 0x5dc   : > { %v11619_v54 = vadd.f32 %v4034_v40, %v3946_v9  ;;  %v3859_v2 = vpop.f32.mrf.mxu1  ;;  %v8540_v9 = vld [vmem:[#allocation8 + $0x388] sm:$0xf] }
 0x5dd   : > { %v3860_v23 = vadd.f32 %v3859_v2, %v3770_v31  ;;  %v8285_v31 = vor.u32 %v9165_v46, %v8284_v11  ;;  %v9229_v2 = vld [vmem:[#allocation8 + $0x3a4] sm:$0xf0]  ;;  %v9153_v46 = vld [vmem:[#allocation8 + $0x14c] sm:$0xf] }
 0x5de   : > { %13386 = vst [vmem:[#allocation129_spill] sm:$0xff] %v11619_v54  ;;  %4861 = vmatmul.bf16.vlgmr.msra.gmra.mxu0 %v11617_v30  ;;  %4919 = vmatmul.bf16.vlgmr.msra.gmra.mxu2 %v11617_v30  ;;  %v8541_v0 = vor.u32 %v9229_v2, %v8540_v9  ;;  %v9221_v11 = vld [vmem:[#allocation8 + $0x364] sm:$0xf0]  ;;  %v8510_v9 = vld [vmem:[#allocation8 + $0x368] sm:$0xf0] }
 0x5df   : > { %4890 = vmatmul.bf16.vlgmr.msra.gmra.mxu1 %v11623_v37  ;;  %4948 = vmatmul.bf16.vlgmr.msra.gmra.mxu3 %v11623_v37  ;;  %v8513_v60 = vor.u32 %v9217_v55, %v8510_v9  ;;  %v13394_v9 = vld [vmem:[#allocation45_spill] sm:$0xff] }
 0x5e0   : > { %4970 = vmatpush.bf16.msrb.mxu0 %v8285_v31  ;;  %4999 = vmatpush.bf16.msrb.mxu1 %v8541_v0  ;;  %v8476_v0 = vld [vmem:[#allocation8 + $0x308] sm:$0xf]  ;;  %v9199_v54 = vld [vmem:[#allocation8 + $0x2b4] sm:$0xf0] }
 0x5e1   : > { %v3948_v8 = vpop.f32.mrf.mxu2  ;;  %5058 = vmatpush.bf16.msrb.mxu3 %v8513_v60 }
 0x5e2   : > { %v3949_v59 = vadd.f32 %v3948_v8, %v3860_v23  ;;  %v4037_v61 = vpop.f32.mrf.mxu3  ;;  %v8508_v8 = vld [vmem:[#allocation8 + $0x348] sm:$0xf] }
 0x5e3   : > { %v3772_v40 = vpop.f32.mrf.mxu0 }
 0x5e4   : > { %v11629_v18 = vadd.f32 %v4037_v61, %v3949_v59  ;;  %v3861_v19 = vpop.f32.mrf.mxu1  ;;  %v8509_v59 = vor.u32 %v9221_v11, %v8508_v8  ;;  %v8257_v61 = vor.u32 %v9153_v46, %v8254_v58  ;;  %4971 = vmatpush.bf16.msrb.mxu0 %v8253_v7  ;;  %v13391_v58 = vld [vmem:[#allocation44_spill] sm:$0xff]  ;;  %v8225_v7 = vor.u32 %v9145_v14, %v8222_v52  ;;  %v9209_v46 = vld [vmem:[#allocation8 + $0x30c] sm:$0xf] }
 0x5e5   : > { %v3862_v23 = vadd.f32 %v3861_v19, %v3772_v40  ;;  %v9149_v19 = vld [vmem:[#allocation8 + $0x124] sm:$0xf0]  ;;  %v11633_v8 = vpack.c.bf16 %v13391_v58, %v13390_v26  ;;  %v8190_v14 = vld [vmem:[#allocation8 + $0xe8] sm:$0xf0] }
 0x5e6   : > { %13389 = vst [vmem:[#allocation130_spill] sm:$0xff] %v11629_v18  ;;  %5000 = vmatpush.bf16.msrb.mxu1 %v8509_v59  ;;  %5029 = vmatpush.bf16.msrb.mxu2 %v8257_v61  ;;  %v8221_v43 = vor.u32 %v9149_v19, %v8220_v62  ;;  %v8478_v59 = vld [vmem:[#allocation8 + $0x328] sm:$0xf0]  ;;  %v13393_v61 = vld [vmem:[#allocation37_spill] sm:$0xff]  ;;  %v8188_v19 = vld [vmem:[#allocation8 + $0xc8] sm:$0xf] }
 0x5e7   : > { %v8481_v62 = vor.u32 %v9209_v46, %v8478_v59  ;;  %v9201_v52 = vld [vmem:[#allocation8 + $0x2cc] sm:$0xf]  ;;  %v8262_v18 = vld [vmem:[#allocation8 + $0x170] sm:$0xf0] }
 0x5e8   : > { %4972 = vmatpush.bf16.msrb.mxu0 %v8221_v43 }
 0x5e9   : > { %v3950_v2 = vpop.f32.mrf.mxu2  ;;  %5059 = vmatpush.bf16.msrb.mxu3 %v8481_v62  ;;  %v9193_v62 = vld [vmem:[#allocation8 + $0x28c] sm:$0xf] }
 0x5ea   : > { %v3951_v40 = vadd.f32 %v3950_v2, %v3862_v23  ;;  %v4039_v31 = vpop.f32.mrf.mxu3  ;;  %v8477_v23 = vor.u32 %v9213_v13, %v8476_v0  ;;  %v11639_v2 = vpack.c.bf16 %v13394_v9, %v13393_v61  ;;  %v9205_v0 = vld [vmem:[#allocation8 + $0x2e4] sm:$0xf0]  ;;  %v9137_v13 = vld [vmem:[#allocation8 + $0xcc] sm:$0xf]  ;;  %5030 = vmatpush.bf16.msrb.mxu2 %v8225_v7 }
 0x5eb   : > { %v3775_v6 = vpop.f32.mrf.mxu0  ;;  %v8193_v43 = vor.u32 %v9137_v13, %v8190_v14  ;;  %v8124_v14 = vld [vmem:[#allocation8 + $0x48] sm:$0xf] }
 0x5ec   : > { %v11635_v11 = vadd.f32 %v4039_v31, %v3951_v40  ;;  %v3864_v55 = vpop.f32.mrf.mxu1  ;;  %v8444_v40 = vld [vmem:[#allocation8 + $0x2c8] sm:$0xf]  ;;  %v8189_v31 = vor.u32 %v9141_v48, %v8188_v19  ;;  %5001 = vmatpush.bf16.msrb.mxu1 %v8477_v23  ;;  %v8157_v48 = vor.u32 %v9133_v10, %v8156_v12 }
 0x5ed   : > { %v3865_v60 = vadd.f32 %v3864_v55, %v3775_v6  ;;  %v8445_v6 = vor.u32 %v9205_v0, %v8444_v40  ;;  %v8446_v55 = vld [vmem:[#allocation8 + $0x2e8] sm:$0xf0]  ;;  %v9197_v19 = vld [vmem:[#allocation8 + $0x2a4] sm:$0xf0]  ;;  %v8161_v0 = vor.u32 %v9129_v21, %v8158_v24 }
 0x5ee   : > { %13392 = vst [vmem:[#allocation131_spill] sm:$0xff] %v11635_v11  ;;  %4866 = vmatmul.bf16.gmra.mxu0 %v11633_v8  ;;  %4924 = vmatmul.bf16.gmra.mxu2 %v11633_v8  ;;  %v8449_v59 = vor.u32 %v9201_v52, %v8446_v55  ;;  %v8413_v40 = vor.u32 %v9197_v19, %v8412_v42  ;;  %v9125_v52 = vld [vmem:[#allocation8 + $0x64] sm:$0xf0]  ;;  %v8382_v42 = vld [vmem:[#allocation8 + $0x268] sm:$0xf0] }
 0x5ef   : > { %4895 = vmatmul.bf16.gmra.mxu1 %v11639_v2  ;;  %4953 = vmatmul.bf16.gmra.mxu3 %v11639_v2  ;;  %v8380_v55 = vld [vmem:[#allocation8 + $0x248] sm:$0xf]  ;;  %v8125_v10 = vor.u32 %v9125_v52, %v8124_v14  ;;  %v9113_v52 = vld [vmem:[#allocation8 + $0xc] sm:$0xf]  ;;  %v9162_v11 = vld [vmem:[#allocation8 + $0x194] sm:$0xf] }
 0x5f0   : > { %4973 = vmatpush.bf16.msrb.mxu0 %v8189_v31  ;;  %5002 = vmatpush.bf16.msrb.mxu1 %v8445_v6  ;;  %v8414_v31 = vld [vmem:[#allocation8 + $0x2a8] sm:$0xf0]  ;;  %v9189_v12 = vld [vmem:[#allocation8 + $0x264] sm:$0xf0] }
 0x5f1   : > { %v3953_v46 = vpop.f32.mrf.mxu2  ;;  %5031 = vmatpush.bf16.msrb.mxu2 %v8193_v43  ;;  %5060 = vmatpush.bf16.msrb.mxu3 %v8449_v59  ;;  %v9185_v6 = vld [vmem:[#allocation8 + $0x24c] sm:$0xf]  ;;  %v8092_v59 = vld [vmem:[#allocation8 + $0x8] sm:$0xf] }
 0x5f2   : > { %v3954_v16 = vadd.f32 %v3953_v46, %v3865_v60  ;;  %v4042_v25 = vpop.f32.mrf.mxu3  ;;  %v8417_v60 = vor.u32 %v9193_v62, %v8414_v31  ;;  %v9121_v46 = vld [vmem:[#allocation8 + $0x4c] sm:$0xf]  ;;  %v8385_v21 = vor.u32 %v9185_v6, %v8382_v42  ;;  %v8348_v19 = vld [vmem:[#allocation8 + $0x208] sm:$0xf]  ;;  %v13397_v62 = vld [vmem:[#allocation66_spill] sm:$0xff] }
 0x5f3   : > { %v3777_v45 = vpop.f32.mrf.mxu0  ;;  %v13399_v6 = vld [vmem:[#allocation53_spill] sm:$0xff]  ;;  %v13400_v42 = vld [vmem:[#allocation67_spill] sm:$0xff] }
 0x5f4   : > { %v11645_v23 = vadd.f32 %v4042_v25, %v3954_v16  ;;  %v3866_v7 = vpop.f32.mrf.mxu1  ;;  %4974 = vmatpush.bf16.msrb.mxu0 %v8157_v48  ;;  %5003 = vmatpush.bf16.msrb.mxu1 %v8413_v40  ;;  %v8381_v25 = vor.u32 %v9189_v12, %v8380_v55  ;;  %v8129_v16 = vor.u32 %v9121_v46, %v8126_v53  ;;  %v9117_v48 = vld [vmem:[#allocation8 + $0x24] sm:$0xf0]  ;;  %v8094_v53 = vld [vmem:[#allocation8 + $0x28] sm:$0xf0] }
 0x5f5   : > { %v3867_v13 = vadd.f32 %v3866_v7, %v3777_v45  ;;  %5032 = vmatpush.bf16.msrb.mxu2 %v8161_v0  ;;  %5061 = vmatpush.bf16.msrb.mxu3 %v8417_v60  ;;  %v13396_v7 = vld [vmem:[#allocation52_spill] sm:$0xff]  ;;  %v8093_v40 = vor.u32 %v9117_v48, %v8092_v59  ;;  %v9181_v0 = vld [vmem:[#allocation8 + $0x224] sm:$0xf0]  ;;  %v8350_v46 = vld [vmem:[#allocation8 + $0x228] sm:$0xf0] }
 0x5f6   : > { %13395 = vst [vmem:[#allocation132_spill] sm:$0xff] %v11645_v23  ;;  %v11649_v31 = vpack.c.bf16 %v13397_v62, %v13396_v7  ;;  %v8349_v60 = vor.u32 %v9181_v0, %v8348_v19  ;;  %v8134_v7 = vld [vmem:[#allocation8 + $0x70] sm:$0xf0] }
 0x5f8   : > { %4975 = vmatpush.bf16.msrb.mxu0 %v8125_v10  ;;  %5004 = vmatpush.bf16.msrb.mxu1 %v8381_v25  ;;  %v9177_v10 = vld [vmem:[#allocation8 + $0x20c] sm:$0xf] }
 0x5f9   : > { %v3955_v24 = vpop.f32.mrf.mxu2  ;;  %5033 = vmatpush.bf16.msrb.mxu2 %v8129_v16  ;;  %5062 = vmatpush.bf16.msrb.mxu3 %v8385_v21  ;;  %v8353_v59 = vor.u32 %v9177_v10, %v8350_v46 }
 0x5fa   : > { %v3956_v45 = vadd.f32 %v3955_v24, %v3867_v13  ;;  %v4044_v43 = vpop.f32.mrf.mxu3  ;;  %v8097_v13 = vor.u32 %v9113_v52, %v8094_v53  ;;  %v11655_v24 = vpack.c.bf16 %v13400_v42, %v13399_v6  ;;  %v13402_v53 = vld [vmem:[#allocation82_spill] sm:$0xff]  ;;  %v9166_v42 = vld [vmem:[#allocation8 + $0x1ac] sm:$0xf0]  ;;  %v9130_v6 = vld [vmem:[#allocation8 + $0x94] sm:$0xf] }
 0x5fb   : > { %v3780_v14 = vpop.f32.mrf.mxu0 }
 0x5fc   : > { %v11651_v55 = vadd.f32 %v4044_v43, %v3956_v45  ;;  %v3869_v12 = vpop.f32.mrf.mxu1  ;;  %4976 = vmatpush.bf16.msrb.mxu0 %v8093_v40  ;;  %5005 = vmatpush.bf16.msrb.mxu1 %v8349_v60 }
 0x5fd   : > { %v3870_v62 = vadd.f32 %v3869_v12, %v3780_v14  ;;  %5034 = vmatpush.bf16.msrb.mxu2 %v8097_v13  ;;  %5063 = vmatpush.bf16.msrb.mxu3 %v8353_v59  ;;  %v13403_v12 = vld [vmem:[#allocation94_spill] sm:$0xff]  ;;  %v13405_v13 = vld [vmem:[#allocation83_spill] sm:$0xff] }
 0x5fe   : > { %13398 = vst [vmem:[#allocation133_spill] sm:$0xff] %v11651_v55  ;;  %4871 = vmatmul.bf16.gmra.mxu0 %v11649_v31  ;;  %4929 = vmatmul.bf16.gmra.mxu2 %v11649_v31  ;;  %v11665_v10 = vpack.c.bf16 %v13403_v12, %v13402_v53  ;;  %v13406_v59 = vld [vmem:[#allocation95_spill] sm:$0xff]  ;;  %v8548_v55 = vld [vmem:[#allocation8 + $0x390] sm:$0xf] }
 0x5ff   : > { %4900 = vmatmul.bf16.gmra.mxu1 %v11655_v24  ;;  %4958 = vmatmul.bf16.gmra.mxu3 %v11655_v24 }
 0x601   : > { %v3958_v25 = vpop.f32.mrf.mxu2 }
 0x602   : > { %v3959_v16 = vadd.f32 %v3958_v25, %v3870_v62  ;;  %v4047_v45 = vpop.f32.mrf.mxu3  ;;  %v11671_v62 = vpack.c.bf16 %v13406_v59, %v13405_v13 }
 0x603   : > { %v3782_v43 = vpop.f32.mrf.mxu0 }
 0x604   : > { %v11661_v48 = vadd.f32 %v4047_v45, %v3959_v16  ;;  %v3871_v21 = vpop.f32.mrf.mxu1 }
 0x605   : > { %v3872_v19 = vadd.f32 %v3871_v21, %v3782_v43 }
 0x606   : > { %13401 = vst [vmem:[#allocation134_spill] sm:$0xff] %v11661_v48  ;;  %v8292_v48 = vld [vmem:[#allocation8 + $0x190] sm:$0xf] }
 0x609   : > { %v3960_v14 = vpop.f32.mrf.mxu2 }
 0x60a   : > { %v3961_v40 = vadd.f32 %v3960_v14, %v3872_v19  ;;  %v4049_v0 = vpop.f32.mrf.mxu3 }
 0x60b   : > { %v3785_v52 = vpop.f32.mrf.mxu0 }
 0x60c   : > { %v11667_v46 = vadd.f32 %v4049_v0, %v3961_v40  ;;  %v3874_v60 = vpop.f32.mrf.mxu1 }
 0x60d   : > { %v3875_v25 = vadd.f32 %v3874_v60, %v3785_v52 }
 0x60e   : > { %13404 = vst [vmem:[#allocation135_spill] sm:$0xff] %v11667_v46  ;;  %4876 = vmatmul.bf16.gmra.mxu0 %v11665_v10  ;;  %4934 = vmatmul.bf16.gmra.mxu2 %v11665_v10  ;;  %v8324_v46 = vld [vmem:[#allocation8 + $0x1d0] sm:$0xf] }
 0x60f   : > { %4905 = vmatmul.bf16.gmra.mxu1 %v11671_v62  ;;  %4963 = vmatmul.bf16.gmra.mxu3 %v11671_v62 }
 0x611   : > { %v3963_v16 = vpop.f32.mrf.mxu2 }
 0x612   : > { %v3964_v45 = vadd.f32 %v3963_v16, %v3875_v25  ;;  %v4052_v43 = vpop.f32.mrf.mxu3  ;;  %v9174_v25 = vld [vmem:[#allocation8 + $0x1ec] sm:$0xf0] }
 0x613   : > { %v3787_v21 = vpop.f32.mrf.mxu0  ;;  %v8580_v16 = vld [vmem:[#allocation8 + $0x3d0] sm:$0xf] }
 0x614   : > { %v11677_v19 = vadd.f32 %v4052_v43, %v3964_v45  ;;  %v3876_v14 = vpop.f32.mrf.mxu1  ;;  %v8325_v45 = vor.u32 %v9174_v25, %v8324_v46  ;;  %v9238_v43 = vld [vmem:[#allocation8 + $0x3ec] sm:$0xf0]  ;;  %v8293_v46 = vor.u32 %v9166_v42, %v8292_v48 }
 0x615   : > { %v3877_v40 = vadd.f32 %v3876_v14, %v3787_v21  ;;  %v9170_v21 = vld [vmem:[#allocation8 + $0x1d4] sm:$0xf]  ;;  %v9230_v25 = vld [vmem:[#allocation8 + $0x3ac] sm:$0xf0] }
 0x616   : > { %13407 = vst [vmem:[#allocation136_spill] sm:$0xff] %v11677_v19  ;;  %v8326_v14 = vld [vmem:[#allocation8 + $0x1f0] sm:$0xf0]  ;;  %5085 = vmatpush.bf16.msra.mxu0 %v8325_v45  ;;  %v9222_v48 = vld [vmem:[#allocation8 + $0x36c] sm:$0xf0] }
 0x617   : > { %v9226_v45 = vld [vmem:[#allocation8 + $0x394] sm:$0xf] }
 0x619   : > { %v3965_v0 = vpop.f32.mrf.mxu2 }
 0x61a   : > { %v3966_v59 = vadd.f32 %v3965_v0, %v3877_v40  ;;  %v4054_v12 = vpop.f32.mrf.mxu3  ;;  %v8581_v40 = vor.u32 %v9238_v43, %v8580_v16  ;;  %v8582_v0 = vld [vmem:[#allocation8 + $0x3f0] sm:$0xf0]  ;;  %5086 = vmatpush.bf16.msra.mxu0 %v8293_v46 }
 0x61b   : > { %v3790_v52 = vpop.f32.mrf.mxu0 }
 0x61c   : > { %v11679_v60 = vadd.f32 %v4054_v12, %v3966_v59  ;;  %v3879_v13 = vpop.f32.mrf.mxu1  ;;  %v8329_v12 = vor.u32 %v9170_v21, %v8326_v14  ;;  %v9234_v59 = vld [vmem:[#allocation8 + $0x3d4] sm:$0xf]  ;;  %5114 = vmatpush.bf16.msra.mxu1 %v8581_v40  ;;  %v8549_v21 = vor.u32 %v9230_v25, %v8548_v55  ;;  %v8297_v14 = vor.u32 %v9162_v11, %v8294_v32  ;;  %v8228_v25 = vld [vmem:[#allocation8 + $0x110] sm:$0xf] }
 0x61d   : > { %v3880_v53 = vadd.f32 %v3879_v13, %v3790_v52  ;;  %v8585_v52 = vor.u32 %v9234_v59, %v8582_v0  ;;  %v8550_v59 = vld [vmem:[#allocation8 + $0x3b0] sm:$0xf0]  ;;  %v9158_v0 = vld [vmem:[#allocation8 + $0x16c] sm:$0xf0] }
 0x61e   : > { %13408 = vst [vmem:[#allocation137_spill] sm:$0xff] %v11679_v60  ;;  %4977 = vmatmul.bf16.vlgmr.msrb.gmra.mxu0 %v11617_v30  ;;  %5035 = vmatmul.bf16.vlgmr.msrb.gmra.mxu2 %v11617_v30  ;;  %v8553_v40 = vor.u32 %v9226_v45, %v8550_v59  ;;  %v8518_v55 = vld [vmem:[#allocation8 + $0x370] sm:$0xf0]  ;;  %v9214_v59 = vld [vmem:[#allocation8 + $0x32c] sm:$0xf0] }
 0x61f   : > { %5006 = vmatmul.bf16.vlgmr.msrb.gmra.mxu1 %v11623_v37  ;;  %5064 = vmatmul.bf16.vlgmr.msrb.gmra.mxu3 %v11623_v37 }
 0x620   : > { %5143 = vmatpush.bf16.msra.mxu2 %v8329_v12  ;;  %5172 = vmatpush.bf16.msra.mxu3 %v8585_v52  ;;  %v8260_v12 = vld [vmem:[#allocation8 + $0x150] sm:$0xf]  ;;  %v9154_v52 = vld [vmem:[#allocation8 + $0x154] sm:$0xf] }
 0x621   : > { %v3968_v13 = vpop.f32.mrf.mxu2  ;;  %5115 = vmatpush.bf16.msra.mxu1 %v8549_v21  ;;  %v8261_v42 = vor.u32 %v9158_v0, %v8260_v12  ;;  %v8484_v21 = vld [vmem:[#allocation8 + $0x310] sm:$0xf]  ;;  %v8230_v12 = vld [vmem:[#allocation8 + $0x130] sm:$0xf0] }
 0x622   : > { %v3969_v60 = vadd.f32 %v3968_v13, %v3880_v53  ;;  %v4057_v19 = vpop.f32.mrf.mxu3  ;;  %v8516_v13 = vld [vmem:[#allocation8 + $0x350] sm:$0xf] }
 0x623   : > { %v3792_v23 = vpop.f32.mrf.mxu0  ;;  %5087 = vmatpush.bf16.msra.mxu0 %v8261_v42  ;;  %v9210_v42 = vld [vmem:[#allocation8 + $0x314] sm:$0xf] }
 0x624   : > { %v11685_v16 = vadd.f32 %v4057_v19, %v3969_v60  ;;  %v3881_v43 = vpop.f32.mrf.mxu1  ;;  %5144 = vmatpush.bf16.msra.mxu2 %v8297_v14  ;;  %5173 = vmatpush.bf16.msra.mxu3 %v8553_v40  ;;  %v8517_v19 = vor.u32 %v9222_v48, %v8516_v13  ;;  %v8265_v60 = vor.u32 %v9154_v52, %v8262_v18  ;;  %v9146_v40 = vld [vmem:[#allocation8 + $0x114] sm:$0xf] }
 0x625   : > { %v3882_v53 = vadd.f32 %v3881_v43, %v3792_v23  ;;  %v9150_v43 = vld [vmem:[#allocation8 + $0x12c] sm:$0xf0]  ;;  %v8485_v13 = vor.u32 %v9214_v59, %v8484_v21  ;;  %v8233_v48 = vor.u32 %v9146_v40, %v8230_v12  ;;  %v9202_v21 = vld [vmem:[#allocation8 + $0x2d4] sm:$0xf] }
 0x626   : > { %13409 = vst [vmem:[#allocation138_spill] sm:$0xff] %v11685_v16  ;;  %v9218_v16 = vld [vmem:[#allocation8 + $0x354] sm:$0xf]  ;;  %5116 = vmatpush.bf16.msra.mxu1 %v8517_v19  ;;  %v8229_v45 = vor.u32 %v9150_v43, %v8228_v25  ;;  %v8196_v19 = vld [vmem:[#allocation8 + $0xd0] sm:$0xf] }
 0x627   : > { %v8521_v11 = vor.u32 %v9218_v16, %v8518_v55  ;;  %v8486_v16 = vld [vmem:[#allocation8 + $0x330] sm:$0xf0]  ;;  %v8452_v55 = vld [vmem:[#allocation8 + $0x2d0] sm:$0xf] }
 0x628   : > { %5145 = vmatpush.bf16.msra.mxu2 %v8265_v60  ;;  %5088 = vmatpush.bf16.msra.mxu0 %v8229_v45  ;;  %v8489_v52 = vor.u32 %v9210_v42, %v8486_v16  ;;  %v9142_v60 = vld [vmem:[#allocation8 + $0xec] sm:$0xf0] }
 0x629   : > { %v3970_v32 = vpop.f32.mrf.mxu2  ;;  %5174 = vmatpush.bf16.msra.mxu3 %v8521_v11  ;;  %v9206_v11 = vld [vmem:[#allocation8 + $0x2ec] sm:$0xf0] }
 0x62a   : > { %v3971_v23 = vadd.f32 %v3970_v32, %v3882_v53  ;;  %v4059_v46 = vpop.f32.mrf.mxu3  ;;  %v8197_v32 = vor.u32 %v9142_v60, %v8196_v19  ;;  %5117 = vmatpush.bf16.msra.mxu1 %v8485_v13  ;;  %v8453_v25 = vor.u32 %v9206_v11, %v8452_v55  ;;  %v9134_v42 = vld [vmem:[#allocation8 + $0xac] sm:$0xf0]  ;;  %v8169_v11 = vor.u32 %v9130_v6, %v8166_v41 }
 0x62b   : > { %v3795_v14 = vpop.f32.mrf.mxu0  ;;  %v8420_v16 = vld [vmem:[#allocation8 + $0x290] sm:$0xf] }
 0x62c   : > { %v11687_v0 = vadd.f32 %v4059_v46, %v3971_v23  ;;  %v3884_v18 = vpop.f32.mrf.mxu1  ;;  %v9138_v23 = vld [vmem:[#allocation8 + $0xd4] sm:$0xf]  ;;  %5146 = vmatpush.bf16.msra.mxu2 %v8233_v48  ;;  %5089 = vmatpush.bf16.msra.mxu0 %v8197_v32  ;;  %v9198_v60 = vld [vmem:[#allocation8 + $0x2ac] sm:$0xf0] }
 0x62d   : > { %v3885_v53 = vadd.f32 %v3884_v18, %v3795_v14  ;;  %v8198_v46 = vld [vmem:[#allocation8 + $0xf0] sm:$0xf0]  ;;  %5175 = vmatpush.bf16.msra.mxu3 %v8489_v52  ;;  %v8164_v18 = vld [vmem:[#allocation8 + $0x90] sm:$0xf]  ;;  %v8421_v55 = vor.u32 %v9198_v60, %v8420_v16 }
 0x62e   : > { %13410 = vst [vmem:[#allocation139_spill] sm:$0xff] %v11687_v0  ;;  %4982 = vmatmul.bf16.gmra.mxu0 %v11633_v8  ;;  %5040 = vmatmul.bf16.gmra.mxu2 %v11633_v8  ;;  %v8201_v43 = vor.u32 %v9138_v23, %v8198_v46  ;;  %v8454_v14 = vld [vmem:[#allocation8 + $0x2f0] sm:$0xf0]  ;;  %v8165_v19 = vor.u32 %v9134_v42, %v8164_v18  ;;  %v8132_v46 = vld [vmem:[#allocation8 + $0x50] sm:$0xf] }
 0x62f   : > { %5011 = vmatmul.bf16.gmra.mxu1 %v11639_v2  ;;  %5069 = vmatmul.bf16.gmra.mxu3 %v11639_v2  ;;  %v8457_v59 = vor.u32 %v9202_v21, %v8454_v14  ;;  %v9194_v52 = vld [vmem:[#allocation8 + $0x294] sm:$0xf]  ;;  %v9126_v21 = vld [vmem:[#allocation8 + $0x6c] sm:$0xf0] }
 0x630   : > { %5118 = vmatpush.bf16.msra.mxu1 %v8453_v25  ;;  %5147 = vmatpush.bf16.msra.mxu2 %v8201_v43  ;;  %v8422_v32 = vld [vmem:[#allocation8 + $0x2b0] sm:$0xf0]  ;;  %v8388_v14 = vld [vmem:[#allocation8 + $0x250] sm:$0xf] }
 0x631   : > { %v3973_v45 = vpop.f32.mrf.mxu2  ;;  %5176 = vmatpush.bf16.msra.mxu3 %v8457_v59  ;;  %5090 = vmatpush.bf16.msra.mxu0 %v8165_v19  ;;  %v9190_v18 = vld [vmem:[#allocation8 + $0x26c] sm:$0xf0]  ;;  %v9122_v42 = vld [vmem:[#allocation8 + $0x54] sm:$0xf] }
 0x632   : > { %v3974_v40 = vadd.f32 %v3973_v45, %v3885_v53  ;;  %v4062_v12 = vpop.f32.mrf.mxu3  ;;  %v8425_v53 = vor.u32 %v9194_v52, %v8422_v32  ;;  %v8133_v45 = vor.u32 %v9126_v21, %v8132_v46  ;;  %v8137_v25 = vor.u32 %v9122_v42, %v8134_v7  ;;  %v9186_v43 = vld [vmem:[#allocation8 + $0x254] sm:$0xf]  ;;  %v8100_v16 = vld [vmem:[#allocation8 + $0x10] sm:$0xf] }
 0x633   : > { %v3797_v0 = vpop.f32.mrf.mxu0  ;;  %v9118_v19 = vld [vmem:[#allocation8 + $0x2c] sm:$0xf0]  ;;  %v9114_v46 = vld [vmem:[#allocation8 + $0x14] sm:$0xf] }
 0x634   : > { %v11693_v13 = vadd.f32 %v4062_v12, %v3974_v40  ;;  %v3886_v48 = vpop.f32.mrf.mxu1  ;;  %5119 = vmatpush.bf16.msra.mxu1 %v8421_v55  ;;  %5148 = vmatpush.bf16.msra.mxu2 %v8169_v11  ;;  %v8389_v40 = vor.u32 %v9190_v18, %v8388_v14  ;;  %v8390_v12 = vld [vmem:[#allocation8 + $0x270] sm:$0xf0]  ;;  %v8356_v60 = vld [vmem:[#allocation8 + $0x210] sm:$0xf]  ;;  %v8101_v52 = vor.u32 %v9118_v19, %v8100_v16 }
 0x635   : > { %v3887_v23 = vadd.f32 %v3886_v48, %v3797_v0  ;;  %5177 = vmatpush.bf16.msra.mxu3 %v8425_v53  ;;  %5091 = vmatpush.bf16.msra.mxu0 %v8133_v45  ;;  %v8393_v6 = vor.u32 %v9186_v43, %v8390_v12  ;;  %v9182_v32 = vld [vmem:[#allocation8 + $0x22c] sm:$0xf0]  ;;  %v8102_v21 = vld [vmem:[#allocation8 + $0x30] sm:$0xf0] }
 0x636   : > { %13411 = vst [vmem:[#allocation140_spill] sm:$0xff] %v11693_v13  ;;  %v8357_v7 = vor.u32 %v9182_v32, %v8356_v60  ;;  %v8105_v14 = vor.u32 %v9114_v46, %v8102_v21  ;;  %v9178_v53 = vld [vmem:[#allocation8 + $0x214] sm:$0xf] }
 0x637   : > { %v8358_v45 = vld [vmem:[#allocation8 + $0x230] sm:$0xf0] }
 0x638   : > { %5120 = vmatpush.bf16.msra.mxu1 %v8389_v40  ;;  %5149 = vmatpush.bf16.msra.mxu2 %v8137_v25 }
 0x639   : > { %v3975_v41 = vpop.f32.mrf.mxu2  ;;  %5178 = vmatpush.bf16.msra.mxu3 %v8393_v6  ;;  %5092 = vmatpush.bf16.msra.mxu0 %v8101_v52 }
 0x63a   : > { %v3976_v0 = vadd.f32 %v3975_v41, %v3887_v23  ;;  %v4064_v59 = vpop.f32.mrf.mxu3  ;;  %v8361_v23 = vor.u32 %v9178_v53, %v8358_v45 }
 0x63b   : > { %v3800_v48 = vpop.f32.mrf.mxu0 }
 0x63c   : > { %v11695_v55 = vadd.f32 %v4064_v59, %v3976_v0  ;;  %v3889_v11 = vpop.f32.mrf.mxu1  ;;  %5121 = vmatpush.bf16.msra.mxu1 %v8357_v7  ;;  %5150 = vmatpush.bf16.msra.mxu2 %v8105_v14 }
 0x63d   : > { %v3890_v18 = vadd.f32 %v3889_v11, %v3800_v48  ;;  %5179 = vmatpush.bf16.msra.mxu3 %v8361_v23 }
 0x63e   : > { %13412 = vst [vmem:[#allocation141_spill] sm:$0xff] %v11695_v55  ;;  %4987 = vmatmul.bf16.gmra.mxu0 %v11649_v31  ;;  %5045 = vmatmul.bf16.gmra.mxu2 %v11649_v31  ;;  %v8428_v55 = vld [vmem:[#allocation8 + $0x298] sm:$0xf] }
 0x63f   : > { %5016 = vmatmul.bf16.gmra.mxu1 %v11655_v24  ;;  %5074 = vmatmul.bf16.gmra.mxu3 %v11655_v24 }
 0x641   : > { %v3978_v42 = vpop.f32.mrf.mxu2 }
 0x642   : > { %v3979_v40 = vadd.f32 %v3978_v42, %v3890_v18  ;;  %v4067_v25 = vpop.f32.mrf.mxu3 }
 0x643   : > { %v3802_v43 = vpop.f32.mrf.mxu0 }
 0x644   : > { %v11701_v12 = vadd.f32 %v4067_v25, %v3979_v40  ;;  %v3891_v41 = vpop.f32.mrf.mxu1 }
 0x645   : > { %v3892_v6 = vadd.f32 %v3891_v41, %v3802_v43  ;;  %v8332_v41 = vld [vmem:[#allocation8 + $0x1d8] sm:$0xf] }
 0x646   : > { %13413 = vst [vmem:[#allocation142_spill] sm:$0xff] %v11701_v12 }
 0x649   : > { %v3980_v0 = vpop.f32.mrf.mxu2 }
 0x64a   : > { %v3981_v59 = vadd.f32 %v3980_v0, %v3892_v6  ;;  %v4069_v16 = vpop.f32.mrf.mxu3  ;;  %v9175_v6 = vld [vmem:[#allocation8 + $0x1f4] sm:$0xf0] }
 0x64b   : > { %v3805_v19 = vpop.f32.mrf.mxu0  ;;  %v8588_v0 = vld [vmem:[#allocation8 + $0x3d8] sm:$0xf] }
 0x64c   : > { %v11703_v60 = vadd.f32 %v4069_v16, %v3981_v59  ;;  %v3894_v48 = vpop.f32.mrf.mxu1  ;;  %v8333_v59 = vor.u32 %v9175_v6, %v8332_v41  ;;  %v9239_v16 = vld [vmem:[#allocation8 + $0x3f4] sm:$0xf0] }
 0x64d   : > { %v3895_v52 = vadd.f32 %v3894_v48, %v3805_v19  ;;  %v9171_v19 = vld [vmem:[#allocation8 + $0x1dc] sm:$0xf]  ;;  %v9231_v6 = vld [vmem:[#allocation8 + $0x3b4] sm:$0xf0] }
 0x64e   : > { %13414 = vst [vmem:[#allocation143_spill] sm:$0xff] %v11703_v60  ;;  %4992 = vmatmul.bf16.gmra.mxu0 %v11665_v10  ;;  %5050 = vmatmul.bf16.gmra.mxu2 %v11665_v10  ;;  %v8334_v48 = vld [vmem:[#allocation8 + $0x1f8] sm:$0xf0]  ;;  %v8524_v60 = vld [vmem:[#allocation8 + $0x358] sm:$0xf] }
 0x64f   : > { %5021 = vmatmul.bf16.gmra.mxu1 %v11671_v62  ;;  %5079 = vmatmul.bf16.gmra.mxu3 %v11671_v62 }
 0x650   : > { %5201 = vmatpush.bf16.msrb.mxu0 %v8333_v59  ;;  %v8558_v59 = vld [vmem:[#allocation8 + $0x3b8] sm:$0xf0] }
 0x651   : > { %v3983_v32 = vpop.f32.mrf.mxu2 }
 0x652   : > { %v3984_v46 = vadd.f32 %v3983_v32, %v3895_v52  ;;  %v4072_v21 = vpop.f32.mrf.mxu3  ;;  %v8589_v52 = vor.u32 %v9239_v16, %v8588_v0  ;;  %v8337_v32 = vor.u32 %v9171_v19, %v8334_v48  ;;  %v8302_v0 = vld [vmem:[#allocation8 + $0x1b8] sm:$0xf0] }
 0x653   : > { %v3807_v11 = vpop.f32.mrf.mxu0 }
 0x654   : > { %v11709_v7 = vadd.f32 %v4072_v21, %v3984_v46  ;;  %v3896_v14 = vpop.f32.mrf.mxu1  ;;  %v9235_v46 = vld [vmem:[#allocation8 + $0x3dc] sm:$0xf]  ;;  %5230 = vmatpush.bf16.msrb.mxu1 %v8589_v52  ;;  %5259 = vmatpush.bf16.msrb.mxu2 %v8337_v32  ;;  %v8268_v32 = vld [vmem:[#allocation8 + $0x158] sm:$0xf] }
 0x655   : > { %v3897_v53 = vadd.f32 %v3896_v14, %v3807_v11  ;;  %v8590_v21 = vld [vmem:[#allocation8 + $0x3f8] sm:$0xf0] }
 0x656   : > { %13415 = vst [vmem:[#allocation144_spill] sm:$0xff] %v11709_v7  ;;  %v8593_v14 = vor.u32 %v9235_v46, %v8590_v21  ;;  %v9227_v7 = vld [vmem:[#allocation8 + $0x39c] sm:$0xf]  ;;  %v9159_v21 = vld [vmem:[#allocation8 + $0x174] sm:$0xf0] }
 0x657   : > { %v8561_v52 = vor.u32 %v9227_v7, %v8558_v59  ;;  %v8236_v7 = vld [vmem:[#allocation8 + $0x118] sm:$0xf] }
 0x658   : > { %5288 = vmatpush.bf16.msrb.mxu3 %v8593_v14  ;;  %v9223_v14 = vld [vmem:[#allocation8 + $0x374] sm:$0xf0] }
 0x659   : > { %v3985_v45 = vpop.f32.mrf.mxu2 }
 0x65a   : > { %v3986_v18 = vadd.f32 %v3985_v45, %v3897_v53  ;;  %v4074_v23 = vpop.f32.mrf.mxu3  ;;  %v8300_v45 = vld [vmem:[#allocation8 + $0x198] sm:$0xf] }
 0x65b   : > { %v4862_v42 = vpop.f32.mrf.mxu0 }
 0x65c   : > { %v11711_v40 = vadd.f32 %v4074_v23, %v3986_v18  ;;  %v4891_v25 = vpop.f32.mrf.mxu1  ;;  %v9167_v18 = vld [vmem:[#allocation8 + $0x1b4] sm:$0xf0]  ;;  %5289 = vmatpush.bf16.msrb.mxu3 %v8561_v52  ;;  %v9147_v52 = vld [vmem:[#allocation8 + $0x11c] sm:$0xf] }
 0x65d   : > { %v11713_v43 = vadd.f32 %v4891_v25, %v4862_v42  ;;  %v8556_v23 = vld [vmem:[#allocation8 + $0x398] sm:$0xf]  ;;  %v8301_v41 = vor.u32 %v9167_v18, %v8300_v45  ;;  %v8270_v45 = vld [vmem:[#allocation8 + $0x178] sm:$0xf0]  ;;  %v8525_v18 = vor.u32 %v9223_v14, %v8524_v60 }
 0x65e   : > { %13416 = vst [vmem:[#allocation145_spill] sm:$0xff] %v11711_v40  ;;  %5093 = vmatmul.bf16.vlgmr.msra.gmra.mxu0 %v11617_v30  ;;  %5151 = vmatmul.bf16.vlgmr.msra.gmra.mxu2 %v11617_v30  ;;  %v9163_v40 = vld [vmem:[#allocation8 + $0x19c] sm:$0xf]  ;;  %v8557_v19 = vor.u32 %v9231_v6, %v8556_v23 }
 0x65f   : > { %5122 = vmatmul.bf16.vlgmr.msra.gmra.mxu1 %v11623_v37  ;;  %5180 = vmatmul.bf16.vlgmr.msra.gmra.mxu3 %v11623_v37  ;;  %v8305_v48 = vor.u32 %v9163_v40, %v8302_v0  ;;  %v9219_v23 = vld [vmem:[#allocation8 + $0x35c] sm:$0xf] }
 0x660   : > { %5202 = vmatpush.bf16.msrb.mxu0 %v8301_v41  ;;  %5231 = vmatpush.bf16.msrb.mxu1 %v8557_v19  ;;  %v8526_v40 = vld [vmem:[#allocation8 + $0x378] sm:$0xf0]  ;;  %v9151_v41 = vld [vmem:[#allocation8 + $0x134] sm:$0xf0] }
 0x661   : > { %v4920_v11 = vpop.f32.mrf.mxu2  ;;  %5260 = vmatpush.bf16.msrb.mxu2 %v8305_v48  ;;  %v8529_v6 = vor.u32 %v9219_v23, %v8526_v40  ;;  %v8237_v59 = vor.u32 %v9151_v41, %v8236_v7  ;;  %v8238_v60 = vld [vmem:[#allocation8 + $0x138] sm:$0xf0]  ;;  %v9143_v40 = vld [vmem:[#allocation8 + $0xf4] sm:$0xf0] }
 0x662   : > { %v4949_v53 = vpop.f32.mrf.mxu3  ;;  %v8494_v23 = vld [vmem:[#allocation8 + $0x338] sm:$0xf0] }
 0x663   : > { %v11719_v42 = vadd.f32 %v4949_v53, %v4920_v11  ;;  %v4864_v25 = vpop.f32.mrf.mxu0  ;;  %v8269_v11 = vor.u32 %v9159_v21, %v8268_v32  ;;  %v9155_v53 = vld [vmem:[#allocation8 + $0x15c] sm:$0xf]  ;;  %5290 = vmatpush.bf16.msrb.mxu3 %v8529_v6  ;;  %v9215_v32 = vld [vmem:[#allocation8 + $0x334] sm:$0xf0] }
 0x664   : > { %v4893_v16 = vpop.f32.mrf.mxu1  ;;  %v8273_v12 = vor.u32 %v9155_v53, %v8270_v45  ;;  %5232 = vmatpush.bf16.msrb.mxu1 %v8525_v18  ;;  %v8241_v53 = vor.u32 %v9147_v52, %v8238_v60  ;;  %v9211_v45 = vld [vmem:[#allocation8 + $0x31c] sm:$0xf]  ;;  %v8204_v18 = vld [vmem:[#allocation8 + $0xd8] sm:$0xf] }
 0x665   : > { %v11721_v46 = vadd.f32 %v4893_v16, %v4864_v25  ;;  %5203 = vmatpush.bf16.msrb.mxu0 %v8269_v11  ;;  %v8492_v16 = vld [vmem:[#allocation8 + $0x318] sm:$0xf]  ;;  %v9139_v7 = vld [vmem:[#allocation8 + $0xdc] sm:$0xf] }
 0x666   : > { %5261 = vmatpush.bf16.msrb.mxu2 %v8273_v12  ;;  %v8493_v14 = vor.u32 %v9215_v32, %v8492_v16  ;;  %v8497_v12 = vor.u32 %v9211_v45, %v8494_v23  ;;  %v8460_v6 = vld [vmem:[#allocation8 + $0x2d8] sm:$0xf]  ;;  %v8206_v41 = vld [vmem:[#allocation8 + $0xf8] sm:$0xf0] }
 0x667   : > { %v8462_v32 = vld [vmem:[#allocation8 + $0x2f8] sm:$0xf0]  ;;  %v8172_v45 = vld [vmem:[#allocation8 + $0x98] sm:$0xf] }
 0x668   : > { %5233 = vmatpush.bf16.msrb.mxu1 %v8493_v14  ;;  %5291 = vmatpush.bf16.msrb.mxu3 %v8497_v12  ;;  %v9135_v23 = vld [vmem:[#allocation8 + $0xb4] sm:$0xf0]  ;;  %v8174_v14 = vld [vmem:[#allocation8 + $0xb8] sm:$0xf0] }
 0x669   : > { %v4922_v0 = vpop.f32.mrf.mxu2  ;;  %5204 = vmatpush.bf16.msrb.mxu0 %v8237_v59  ;;  %v9203_v59 = vld [vmem:[#allocation8 + $0x2dc] sm:$0xf] }
 0x66a   : > { %v4951_v25 = vpop.f32.mrf.mxu3  ;;  %5262 = vmatpush.bf16.msrb.mxu2 %v8241_v53  ;;  %v8465_v60 = vor.u32 %v9203_v59, %v8462_v32  ;;  %v8430_v12 = vld [vmem:[#allocation8 + $0x2b8] sm:$0xf0]  ;;  %v8140_v59 = vld [vmem:[#allocation8 + $0x58] sm:$0xf] }
 0x66b   : > { %v11723_v19 = vadd.f32 %v4951_v25, %v4922_v0  ;;  %v4867_v48 = vpop.f32.mrf.mxu0  ;;  %v8205_v0 = vor.u32 %v9143_v40, %v8204_v18  ;;  %v9207_v25 = vld [vmem:[#allocation8 + $0x2f4] sm:$0xf0]  ;;  %v8173_v40 = vor.u32 %v9135_v23, %v8172_v45  ;;  %v9123_v23 = vld [vmem:[#allocation8 + $0x5c] sm:$0xf] }
 0x66c   : > { %v4896_v21 = vpop.f32.mrf.mxu1  ;;  %v8461_v16 = vor.u32 %v9207_v25, %v8460_v6  ;;  %v8429_v6 = vor.u32 %v9199_v54, %v8428_v55  ;;  %v8177_v25 = vor.u32 %v9131_v44, %v8174_v14  ;;  %5292 = vmatpush.bf16.msrb.mxu3 %v8465_v60  ;;  %v9127_v32 = vld [vmem:[#allocation8 + $0x74] sm:$0xf0]  ;;  %v8145_v44 = vor.u32 %v9123_v23, %v8142_v1 }
 0x66d   : > { %v11725_v11 = vadd.f32 %v4896_v21, %v4867_v48  ;;  %v8209_v48 = vor.u32 %v9139_v7, %v8206_v41  ;;  %5205 = vmatpush.bf16.msrb.mxu0 %v8205_v0  ;;  %v9195_v7 = vld [vmem:[#allocation8 + $0x29c] sm:$0xf]  ;;  %v9191_v45 = vld [vmem:[#allocation8 + $0x274] sm:$0xf0] }
 0x66e   : > { %5098 = vmatmul.bf16.gmra.mxu0 %v11633_v8  ;;  %5156 = vmatmul.bf16.gmra.mxu2 %v11633_v8  ;;  %v8433_v41 = vor.u32 %v9195_v7, %v8430_v12  ;;  %v8108_v60 = vld [vmem:[#allocation8 + $0x18] sm:$0xf] }
 0x66f   : > { %5127 = vmatmul.bf16.gmra.mxu1 %v11639_v2  ;;  %5185 = vmatmul.bf16.gmra.mxu3 %v11639_v2  ;;  %v9183_v12 = vld [vmem:[#allocation8 + $0x234] sm:$0xf0] }
 0x670   : > { %5234 = vmatpush.bf16.msrb.mxu1 %v8461_v16  ;;  %5263 = vmatpush.bf16.msrb.mxu2 %v8209_v48  ;;  %v8401_v16 = vor.u32 %v9187_v34, %v8398_v15 }
 0x671   : > { %v4925_v52 = vpop.f32.mrf.mxu2  ;;  %5206 = vmatpush.bf16.msrb.mxu0 %v8173_v40  ;;  %5293 = vmatpush.bf16.msrb.mxu3 %v8433_v41  ;;  %v8364_v40 = vld [vmem:[#allocation8 + $0x218] sm:$0xf]  ;;  %v8366_v41 = vld [vmem:[#allocation8 + $0x238] sm:$0xf0] }
 0x672   : > { %v4954_v21 = vpop.f32.mrf.mxu3 }
 0x673   : > { %v11731_v13 = vadd.f32 %v4954_v21, %v4925_v52  ;;  %v4869_v18 = vpop.f32.mrf.mxu0  ;;  %v8396_v52 = vld [vmem:[#allocation8 + $0x258] sm:$0xf]  ;;  %v8141_v21 = vor.u32 %v9127_v32, %v8140_v59  ;;  %v9115_v59 = vld [vmem:[#allocation8 + $0x1c] sm:$0xf] }
 0x674   : > { %v4898_v53 = vpop.f32.mrf.mxu1  ;;  %5235 = vmatpush.bf16.msrb.mxu1 %v8429_v6  ;;  %5264 = vmatpush.bf16.msrb.mxu2 %v8177_v25  ;;  %v8397_v54 = vor.u32 %v9191_v45, %v8396_v52  ;;  %v8110_v32 = vld [vmem:[#allocation8 + $0x38] sm:$0xf0]  ;;  %v8365_v6 = vor.u32 %v9183_v12, %v8364_v40 }
 0x675   : > { %v11733_v0 = vadd.f32 %v4898_v53, %v4869_v18  ;;  %5207 = vmatpush.bf16.msrb.mxu0 %v8141_v21  ;;  %v9119_v18 = vld [vmem:[#allocation8 + $0x34] sm:$0xf0]  ;;  %v8113_v1 = vor.u32 %v9115_v59, %v8110_v32  ;;  %v9179_v25 = vld [vmem:[#allocation8 + $0x21c] sm:$0xf]  ;;  %5294 = vmatpush.bf16.msrb.mxu3 %v8401_v16 }
 0x676   : > { %v8109_v7 = vor.u32 %v9119_v18, %v8108_v60  ;;  %v8369_v34 = vor.u32 %v9179_v25, %v8366_v41 }
 0x678   : > { %5236 = vmatpush.bf16.msrb.mxu1 %v8397_v54  ;;  %5265 = vmatpush.bf16.msrb.mxu2 %v8145_v44 }
 0x679   : > { %v4927_v55 = vpop.f32.mrf.mxu2  ;;  %5208 = vmatpush.bf16.msrb.mxu0 %v8109_v7  ;;  %5295 = vmatpush.bf16.msrb.mxu3 %v8369_v34 }
 0x67a   : > { %v4956_v48 = vpop.f32.mrf.mxu3 }
 0x67b   : > { %v11735_v14 = vadd.f32 %v4956_v48, %v4927_v55  ;;  %v4872_v53 = vpop.f32.mrf.mxu0 }
 0x67c   : > { %v4901_v47 = vpop.f32.mrf.mxu1  ;;  %5237 = vmatpush.bf16.msrb.mxu1 %v8365_v6  ;;  %5266 = vmatpush.bf16.msrb.mxu2 %v8113_v1 }
 0x67d   : > { %v11737_v52 = vadd.f32 %v4901_v47, %v4872_v53 }
 0x67e   : > { %5103 = vmatmul.bf16.gmra.mxu0 %v11649_v31  ;;  %5161 = vmatmul.bf16.gmra.mxu2 %v11649_v31 }
 0x67f   : > { %5132 = vmatmul.bf16.gmra.mxu1 %v11655_v24  ;;  %5190 = vmatmul.bf16.gmra.mxu3 %v11655_v24 }
 0x681   : > { %v4930_v15 = vpop.f32.mrf.mxu2 }
 0x682   : > { %v4959_v21 = vpop.f32.mrf.mxu3 }
 0x683   : > { %v11743_v45 = vadd.f32 %v4959_v21, %v4930_v15  ;;  %v4874_v47 = vpop.f32.mrf.mxu0 }
 0x684   : > { %v4903_v23 = vpop.f32.mrf.mxu1 }
 0x685   : > { %v11745_v54 = vadd.f32 %v4903_v23, %v4874_v47 }
 0x687   : > { %13417 = vst [vmem:[#allocation146_spill] sm:$0xff] %v11745_v54 }
 0x689   : > { %v4932_v44 = vpop.f32.mrf.mxu2 }
 0x68a   : > { %v4961_v55 = vpop.f32.mrf.mxu3 }
 0x68b   : > { %v11747_v16 = vadd.f32 %v4961_v55, %v4932_v44  ;;  %v4877_v48 = vpop.f32.mrf.mxu0 }
 0x68c   : > { %v4906_v60 = vpop.f32.mrf.mxu1 }
 0x68d   : > { %v11749_v18 = vadd.f32 %v4906_v60, %v4877_v48 }
 0x68e   : > { %5108 = vmatmul.bf16.gmra.mxu0 %v11665_v10  ;;  %5166 = vmatmul.bf16.gmra.mxu2 %v11665_v10 }
 0x68f   : > { %13418 = vst [vmem:[#allocation147_spill] sm:$0xff] %v11749_v18  ;;  %5137 = vmatmul.bf16.gmra.mxu1 %v11671_v62  ;;  %5195 = vmatmul.bf16.gmra.mxu3 %v11671_v62 }
 0x691   : > { %v4935_v40 = vpop.f32.mrf.mxu2 }
 0x692   : > { %v4964_v53 = vpop.f32.mrf.mxu3 }
 0x693   : > { %v11755_v7 = vadd.f32 %v4964_v53, %v4935_v40  ;;  %v4879_v12 = vpop.f32.mrf.mxu0 }
 0x694   : > { %v4908_v59 = vpop.f32.mrf.mxu1 }
 0x695   : > { %13419 = vst [vmem:[#allocation148_spill] sm:$0xff] %v11755_v7  ;;  %v11757_v32 = vadd.f32 %v4908_v59, %v4879_v12 }
 0x697   : > { %13420 = vst [vmem:[#allocation149_spill] sm:$0xff] %v11757_v32 }
 0x699   : > { %v4937_v6 = vpop.f32.mrf.mxu2 }
 0x69a   : > { %v4966_v1 = vpop.f32.mrf.mxu3 }
 0x69b   : > { %v11759_v25 = vadd.f32 %v4966_v1, %v4937_v6  ;;  %v4978_v41 = vpop.f32.mrf.mxu0 }
 0x69c   : > { %v5007_v34 = vpop.f32.mrf.mxu1 }
 0x69d   : > { %13421 = vst [vmem:[#allocation150_spill] sm:$0xff] %v11759_v25  ;;  %v11761_v15 = vadd.f32 %v5007_v34, %v4978_v41 }
 0x69e   : > { %5209 = vmatmul.bf16.vlgmr.msrb.gmra.mxu0 %v11617_v30  ;;  %5267 = vmatmul.bf16.vlgmr.msrb.gmra.mxu2 %v11617_v30 }
 0x69f   : > { %5238 = vmatmul.bf16.vlgmr.msrb.gmra.mxu1 %v11623_v37  ;;  %5296 = vmatmul.bf16.vlgmr.msrb.gmra.mxu3 %v11623_v37 }
 0x6a1   : > { %v5036_v47 = vpop.f32.mrf.mxu2 }
 0x6a2   : > { %v5065_v23 = vpop.f32.mrf.mxu3 }
 0x6a3   : > { %v11769_v44 = vadd.f32 %v5065_v23, %v5036_v47  ;;  %v11771_v55 = vpop.f32.mrf.mxu0 }
 0x6a4   : > { %v11773_v48 = vpop.f32.mrf.mxu1 }
 0x6a9   : > { %v11777_v40 = vpop.f32.mrf.mxu2 }
 0x6aa   : > { %v11779_v30 = vpop.f32.mrf.mxu3 }
 0x6ab   : > { %v4983_v53 = vpop.f32.mrf.mxu0 }
 0x6ac   : > { %v5012_v12 = vpop.f32.mrf.mxu1 }
 0x6ad   : > { %v11781_v59 = vadd.f32 %v5012_v12, %v4983_v53 }
 0x6ae   : > { %5214 = vmatmul.bf16.gmra.mxu0 %v11633_v8  ;;  %5272 = vmatmul.bf16.gmra.mxu2 %v11633_v8 }
 0x6af   : > { %5243 = vmatmul.bf16.gmra.mxu1 %v11639_v2  ;;  %5301 = vmatmul.bf16.gmra.mxu3 %v11639_v2 }
 0x6b1   : > { %v5041_v6 = vpop.f32.mrf.mxu2 }
 0x6b2   : > { %v5070_v1 = vpop.f32.mrf.mxu3 }
 0x6b3   : > { %v11789_v41 = vadd.f32 %v5070_v1, %v5041_v6  ;;  %v11791_v34 = vpop.f32.mrf.mxu0 }
 0x6b4   : > { %v11793_v47 = vpop.f32.mrf.mxu1 }
 0x6b9   : > { %v11797_v53 = vpop.f32.mrf.mxu2 }
 0x6ba   : > { %v11799_v8 = vpop.f32.mrf.mxu3 }
 0x6bb   : > { %v4988_v12 = vpop.f32.mrf.mxu0 }
 0x6bc   : > { %v5017_v37 = vpop.f32.mrf.mxu1 }
 0x6bd   : > { %v11801_v21 = vadd.f32 %v5017_v37, %v4988_v12 }
 0x6be   : > { %5219 = vmatmul.bf16.gmra.mxu0 %v11649_v31  ;;  %5277 = vmatmul.bf16.gmra.mxu2 %v11649_v31 }
 0x6bf   : > { %5248 = vmatmul.bf16.gmra.mxu1 %v11655_v24  ;;  %5306 = vmatmul.bf16.gmra.mxu3 %v11655_v24 }
 0x6c1   : > { %v5046_v6 = vpop.f32.mrf.mxu2 }
 0x6c2   : > { %v5075_v1 = vpop.f32.mrf.mxu3 }
 0x6c3   : > { %v11809_v23 = vadd.f32 %v5075_v1, %v5046_v6  ;;  %v11811_v60 = vpop.f32.mrf.mxu0 }
 0x6c4   : > { %v11813_v35 = vpop.f32.mrf.mxu1 }
 0x6c5   : > { %13422 = vst [vmem:[#allocation151_spill] sm:$0xff] %v11813_v35 }
 0x6c9   : > { %v11817_v12 = vpop.f32.mrf.mxu2 }
 0x6ca   : > { %v11819_v31 = vpop.f32.mrf.mxu3 }
 0x6cb   : > { %v4993_v2 = vpop.f32.mrf.mxu0 }
 0x6cc   : > { %v5022_v9 = vpop.f32.mrf.mxu1 }
 0x6cd   : > { %v11821_v22 = vadd.f32 %v5022_v9, %v4993_v2 }
 0x6ce   : > { %5224 = vmatmul.bf16.gmra.mxu0 %v11665_v10  ;;  %5282 = vmatmul.bf16.gmra.mxu2 %v11665_v10 }
 0x6cf   : > { %13423 = vst [vmem:[#allocation152_spill] sm:$0xff] %v11821_v22  ;;  %5253 = vmatmul.bf16.gmra.mxu1 %v11671_v62  ;;  %5311 = vmatmul.bf16.gmra.mxu3 %v11671_v62 }
 0x6d1   : > { %v5051_v6 = vpop.f32.mrf.mxu2 }
 0x6d2   : > { %v5080_v1 = vpop.f32.mrf.mxu3 }
 0x6d3   : > { %v11829_v37 = vadd.f32 %v5080_v1, %v5051_v6  ;;  %v11831_v58 = vpop.f32.mrf.mxu0 }
 0x6d4   : > { %13425 = vst [vmem:[#allocation154_spill] sm:$0xff] %v11831_v58  ;;  %v11833_v36 = vpop.f32.mrf.mxu1 }
 0x6d5   : > { %13424 = vst [vmem:[#allocation153_spill] sm:$0xff] %v11829_v37 }
 0x6d6   : > { %13426 = vst [vmem:[#allocation155_spill] sm:$0xff] %v11833_v36 }
 0x6d9   : > { %v11837_v2 = vpop.f32.mrf.mxu2 }
 0x6da   : > { %13427 = vst [vmem:[#allocation156_spill] sm:$0xff] %v11837_v2  ;;  %v11839_v10 = vpop.f32.mrf.mxu3 }
 0x6db   : > { %13428 = vst [vmem:[#allocation157_spill] sm:$0xff] %v11839_v10  ;;  %v5094_v24 = vpop.f32.mrf.mxu0 }
 0x6dc   : > { %v5123_v56 = vpop.f32.mrf.mxu1 }
 0x6dd   : > { %v5124_v20 = vadd.f32 %v5123_v56, %v5094_v24 }
 0x6e1   : > { %v5152_v4 = vpop.f32.mrf.mxu2 }
 0x6e2   : > { %v5181_v62 = vpop.f32.mrf.mxu3 }
 0x6e3   : > { %v5182_v51 = vadd.f32 %v5181_v62, %v5152_v4  ;;  %v5096_v38 = vpop.f32.mrf.mxu0 }
 0x6e4   : > { %v5125_v6 = vpop.f32.mrf.mxu1 }
 0x6e9   : > { %v5154_v1 = vpop.f32.mrf.mxu2 }
 0x6ea   : > { %v5183_v61 = vpop.f32.mrf.mxu3 }
 0x6eb   : > { %v5099_v26 = vpop.f32.mrf.mxu0  ;;  %v5184_v54 = vadd.f32 %v5183_v61, %v5154_v1  ;;  %v11886_v61 = vld [vmem:[%s12884_s8] sm:$0xff] }
 0x6ec   : > { %v5128_v3 = vpop.f32.mrf.mxu1 }
 0x6ed   : > { %v11841_v28 = vadd.f32 %v5128_v3, %v5099_v26 }
 0x6f1   : > { %v5157_v29 = vpop.f32.mrf.mxu2 }
 0x6f2   : > { %v5186_v9 = vpop.f32.mrf.mxu3 }
 0x6f3   : > { %v11843_v17 = vadd.f32 %v5186_v9, %v5157_v29  ;;  %v11845_v63 = vpop.f32.mrf.mxu0 }
 0x6f4   : > { %v11847_v27 = vpop.f32.mrf.mxu1 }
 0x6f9   : > { %v11849_v56 = vpop.f32.mrf.mxu2 }
 0x6fa   : > { %v11851_v24 = vpop.f32.mrf.mxu3 }
 0x6fb   : > { %v5104_v4 = vpop.f32.mrf.mxu0 }
 0x6fc   : > { %v5133_v62 = vpop.f32.mrf.mxu1 }
 0x6fd   : > { %v11853_v5 = vadd.f32 %v5133_v62, %v5104_v4 }
 0x701   : > { %v5162_v49 = vpop.f32.mrf.mxu2 }
 0x702   : > { %v5191_v39 = vpop.f32.mrf.mxu3 }
 0x703   : > { %v11855_v3 = vadd.f32 %v5191_v39, %v5162_v49  ;;  %v11857_v26 = vpop.f32.mrf.mxu0 }
 0x704   : > { %v11859_v29 = vpop.f32.mrf.mxu1 }
 0x709   : > { %v11861_v9 = vpop.f32.mrf.mxu2 }
 0x70a   : > { %v11863_v57 = vpop.f32.mrf.mxu3 }
 0x70b   : > { %v5109_v33 = vpop.f32.mrf.mxu0 }
 0x70c   : > { %v5138_v50 = vpop.f32.mrf.mxu1 }
 0x70d   : > { %v11865_v32 = vadd.f32 %v5138_v50, %v5109_v33 }
 0x70f   : > { %13429 = vst [vmem:[#allocation158_spill] sm:$0xff] %v11865_v32 }
 0x711   : > { %v5167_v36 = vpop.f32.mrf.mxu2 }
 0x712   : > { %v5196_v58 = vpop.f32.mrf.mxu3 }
 0x713   : > { %v11867_v4 = vadd.f32 %v5196_v58, %v5167_v36  ;;  %v11869_v62 = vpop.f32.mrf.mxu0 }
 0x714   : > { %13431 = vst [vmem:[#allocation160_spill] sm:$0xff] %v11869_v62  ;;  %v11871_v39 = vpop.f32.mrf.mxu1 }
 0x715   : > { %13430 = vst [vmem:[#allocation159_spill] sm:$0xff] %v11867_v4  ;;  %v5068_v4 = vadd.f32 %v11779_v30, %v11777_v40 }
 0x716   : > { %13432 = vst [vmem:[#allocation161_spill] sm:$0xff] %v11871_v39  ;;  %v13435_v39 = vpack.c.bf16 %v11769_v44, %v11719_v42  ;;  %v5126_v42 = vadd.f32 %v5125_v6, %v5096_v38 }
 0x719   : > { %v11873_v49 = vpop.f32.mrf.mxu2 }
 0x71a   : > { %13433 = vst [vmem:[#allocation162_spill] sm:$0xff] %v11873_v49  ;;  %v11875_v18 = vpop.f32.mrf.mxu3 }
 0x71b   : > { %13434 = vst [vmem:[#allocation163_spill] sm:$0xff] %v11875_v18  ;;  %v5210_v22 = vpop.f32.mrf.mxu0 }
 0x71c   : > { %v5239_v25 = vpop.f32.mrf.mxu1 }
 0x71d   : > { %v5240_v32 = vadd.f32 %v5239_v25, %v5210_v22 }
 0x71f   : > { %v5318_v35 = vpack.c.bf16 %v5240_v32, %v5124_v20  ;;  %v5010_v20 = vadd.f32 %v11773_v48, %v11771_v55  ;;  %v5073_v55 = vadd.f32 %v11799_v8, %v11797_v53  ;;  %v13438_v53 = vpack.c.bf16 %v11781_v59, %v11725_v11 }
 0x721   : > { %v5268_v10 = vpop.f32.mrf.mxu2  ;;  %v5430_v38 = vpack.c.bf16 %v5010_v20, %v11721_v46  ;;  %v5514_v1 = vpack.c.bf16 %v5073_v55, %v11735_v14  ;;  %v5015_v14 = vadd.f32 %v11793_v47, %v11791_v34  ;;  %v5194_v34 = vadd.f32 %v11863_v57, %v11861_v9  ;;  %v13452_v55 = vld [vmem:[#allocation150_spill] sm:$0xff] }
 0x722   : > { %v5297_v2 = vpop.f32.mrf.mxu3 }
 0x723   : > { %v5298_v7 = vadd.f32 %v5297_v2, %v5268_v10  ;;  %v5212_v37 = vpop.f32.mrf.mxu0  ;;  %v13436_v10 = vpack.c.bf16 %v11761_v15, %v11713_v43  ;;  %v5189_v15 = vadd.f32 %v11851_v24, %v11849_v56 }
 0x724   : > { %v5241_v50 = vpop.f32.mrf.mxu1 }
 0x725   : > { %v5320_v33 = vpack.c.bf16 %v5298_v7, %v5182_v51  ;;  %v5432_v51 = vpack.c.bf16 %v5068_v4, %v11723_v19  ;;  %v5242_v22 = vadd.f32 %v5241_v50, %v5212_v37  ;;  %v5078_v50 = vadd.f32 %v11819_v31, %v11817_v12 }
 0x726   : > { %v13440_v31 = vpack.c.bf16 %v11801_v21, %v11737_v52 }
 0x727   : > { %5397 = vmatpush.bf16.msra.mxu0 %v5320_v33  ;;  %v5596_v57 = vpack.c.bf16 %v5078_v50, %v11747_v16  ;;  %v13441_v16 = vld [vmem:[#allocation151_spill] sm:$0xff]  ;;  %v8684_v50 = vld [vmem:[#allocation10 + $0x50] sm:$0xf] }
 0x729   : > { %v5270_v36 = vpop.f32.mrf.mxu2 }
 0x72a   : > { %v5299_v58 = vpop.f32.mrf.mxu3 }
 0x72b   : > { %v5300_v62 = vadd.f32 %v5299_v58, %v5270_v36  ;;  %5398 = vmatpush.bf16.msra.mxu0 %v13435_v39  ;;  %v5215_v49 = vpop.f32.mrf.mxu0 }
 0x72c   : > { %v5244_v18 = vpop.f32.mrf.mxu1 }
 0x72d   : > { %v5433_v2 = vpack.c.bf16 %v5300_v62, %v5184_v54  ;;  %v5245_v40 = vadd.f32 %v5244_v18, %v5215_v49 }
 0x72f   : > { %5399 = vmatpush.bf16.msra.mxu0 %v5318_v35  ;;  %5438 = vmatpush.bf16.msra.mxu1 %v5433_v2  ;;  %v5431_v35 = vpack.c.bf16 %v5242_v22, %v5126_v42  ;;  %v5472_v48 = vpack.c.bf16 %v5245_v40, %v11841_v28  ;;  %v5131_v28 = vadd.f32 %v11847_v27, %v11845_v63 }
 0x730   : > { %v5512_v27 = vpack.c.bf16 %v5015_v14, %v11733_v0 }
 0x731   : > { %v5273_v7 = vpop.f32.mrf.mxu2 }
 0x732   : > { %v5302_v25 = vpop.f32.mrf.mxu3 }
 0x733   : > { %v5303_v44 = vadd.f32 %v5302_v25, %v5273_v7  ;;  %5400 = vmatpush.bf16.msra.mxu0 %v13436_v10  ;;  %5439 = vmatpush.bf16.msra.mxu1 %v5432_v51  ;;  %v5217_v54 = vpop.f32.mrf.mxu0  ;;  %v5020_v51 = vadd.f32 %v13441_v16, %v11811_v60  ;;  %v13442_v7 = vld [vmem:[#allocation159_spill] sm:$0xff] }
 0x734   : > { %v5246_v32 = vpop.f32.mrf.mxu1  ;;  %v13445_v10 = vld [vmem:[#allocation163_spill] sm:$0xff] }
 0x735   : > { %v5474_v19 = vpack.c.bf16 %v5303_v44, %v11843_v17  ;;  %v13437_v17 = vpack.c.bf16 %v11789_v41, %v11731_v13  ;;  %v5247_v56 = vadd.f32 %v5246_v32, %v5217_v54  ;;  %v11911_v13 = vld [vmem:[%s12884_s8 + $0x8] sm:$0xff]  ;;  %v13444_v44 = vld [vmem:[#allocation162_spill] sm:$0xff]  ;;  %v13449_v32 = vld [vmem:[#allocation156_spill] sm:$0xff] }
 0x736   : > { %8610 = vmatmul.msk.bf16.vlgmr.msra.gmra.mxu0 %vm2256_vm1, %v11886_v61  ;;  %v5199_v20 = vadd.f32 %v13445_v10, %v13444_v44  ;;  %v8670_v44 = vld [vmem:[#allocation10 + $0x38] sm:$0xf0] }
 0x737   : > { %5440 = vmatpush.bf16.msra.mxu1 %v5431_v35  ;;  %5479 = vmatpush.bf16.msra.mxu2 %v5474_v19  ;;  %v5513_v8 = vpack.c.bf16 %v5247_v56, %v5131_v28  ;;  %v13446_v35 = vld [vmem:[#allocation153_spill] sm:$0xff]  ;;  %v13447_v19 = vld [vmem:[#allocation148_spill] sm:$0xff] }
 0x738   : > { %v13448_v54 = vpack.c.bf16 %v13446_v35, %v13447_v19  ;;  %v9244_v35 = vld [vmem:[#allocation10 + $0x24] sm:$0xf] }
 0x739   : > { %v5275_v30 = vpop.f32.mrf.mxu2 }
 0x73a   : > { %v5304_v43 = vpop.f32.mrf.mxu3 }
 0x73b   : > { %v5305_v37 = vadd.f32 %v5304_v43, %v5275_v30  ;;  %5441 = vmatpush.bf16.msra.mxu1 %v5430_v38  ;;  %5480 = vmatpush.bf16.msra.mxu2 %v13437_v17  ;;  %v5220_v46 = vpop.f32.mrf.mxu0  ;;  %v13450_v38 = vld [vmem:[#allocation157_spill] sm:$0xff]  ;;  %v13451_v30 = vld [vmem:[#allocation158_spill] sm:$0xff] }
 0x73c   : > { %v5249_v18 = vpop.f32.mrf.mxu1  ;;  %v5083_v40 = vadd.f32 %v13450_v38, %v13449_v32  ;;  %v8644_v38 = vld [vmem:[#allocation10] sm:$0xf] }
 0x73d   : > { %v5515_v6 = vpack.c.bf16 %v5305_v37, %v5189_v15  ;;  %v5250_v63 = vadd.f32 %v5249_v18, %v5220_v46  ;;  %v11973_v46 = vld [vmem:[%s12884_s8 + $0x18] sm:$0xff]  ;;  %v13453_v18 = vld [vmem:[#allocation160_spill] sm:$0xff] }
 0x73e   : > { %8614 = vmatmul.msk.bf16.vlgmr.msra.gmra.mxu1 %vm2256_vm1, %v11886_v61 }
 0x73f   : > { %5481 = vmatpush.bf16.msra.mxu2 %v5472_v48  ;;  %5520 = vmatpush.bf16.msra.mxu3 %v5515_v6  ;;  %v5554_v33 = vpack.c.bf16 %v5250_v63, %v11853_v5  ;;  %v5136_v5 = vadd.f32 %v11859_v29, %v11857_v26  ;;  %v13443_v26 = vld [vmem:[#allocation146_spill] sm:$0xff]  ;;  %v5678_v48 = vpack.c.bf16 %v5083_v40, %v13452_v55  ;;  %v8700_v63 = vld [vmem:[#allocation10 + $0x70] sm:$0xf]  ;;  %v9241_v40 = vld [vmem:[#allocation10 + $0x4] sm:$0xf0] }
 0x740   : > { %v5594_v52 = vpack.c.bf16 %v5020_v51, %v13443_v26  ;;  %v8668_v51 = vld [vmem:[#allocation10 + $0x30] sm:$0xf]  ;;  %v8678_v26 = vld [vmem:[#allocation10 + $0x48] sm:$0xf0]  ;;  %v9271_v55 = vld [vmem:[#allocation10 + $0xf4] sm:$0xf0] }
 0x741   : > { %v5278_v24 = vpop.f32.mrf.mxu2 }
 0x742   : > { %v5307_v4 = vpop.f32.mrf.mxu3 }
 0x743   : > { %v5308_v41 = vadd.f32 %v5307_v4, %v5278_v24  ;;  %5482 = vmatpush.bf16.msra.mxu2 %v13438_v53  ;;  %5521 = vmatpush.bf16.msra.mxu3 %v5514_v1  ;;  %v5222_v11 = vpop.f32.mrf.mxu0  ;;  %v13454_v1 = vld [vmem:[#allocation161_spill] sm:$0xff]  ;;  %v13455_v24 = vld [vmem:[#allocation152_spill] sm:$0xff]  ;;  %v13456_v4 = vld [vmem:[#allocation147_spill] sm:$0xff] }
 0x744   : > { %v5251_v39 = vpop.f32.mrf.mxu1  ;;  %v5141_v56 = vadd.f32 %v13454_v1, %v13453_v18  ;;  %v13457_v28 = vpack.c.bf16 %v13455_v24, %v13456_v4  ;;  %v13459_v53 = vld [vmem:[#allocation155_spill] sm:$0xff]  ;;  %v9270_v1 = vld [vmem:[#allocation10 + $0xf4] sm:$0xf] }
 0x745   : > { %v5556_v62 = vpack.c.bf16 %v5308_v41, %v11855_v3  ;;  %v13439_v3 = vpack.c.bf16 %v11809_v23, %v11743_v45  ;;  %v5252_v9 = vadd.f32 %v5251_v39, %v5222_v11  ;;  %v11942_v23 = vld [vmem:[%s12884_s8 + $0x10] sm:$0xff]  ;;  %v13458_v41 = vld [vmem:[#allocation154_spill] sm:$0xff]  ;;  %v9255_v11 = vld [vmem:[#allocation10 + $0x74] sm:$0xf0] }
 0x746   : > { %8611 = vmatmul.msk.bf16.gmra.mxu0 %vm2256_vm1, %v11911_v13  ;;  %8618 = vmatmul.msk.bf16.vlgmr.msra.gmra.mxu2 %vm2256_vm1, %v11886_v61  ;;  %v5025_v14 = vadd.f32 %v13459_v53, %v13458_v41  ;;  %v8692_v39 = vld [vmem:[#allocation10 + $0x60] sm:$0xf]  ;;  %v8646_v18 = vld [vmem:[#allocation10 + $0x8] sm:$0xf0]  ;;  %v9269_v41 = vld [vmem:[#allocation10 + $0xe4] sm:$0xf0] }
 0x747   : > { %5522 = vmatpush.bf16.msra.mxu3 %v5513_v8  ;;  %5561 = vmatpush.bf16.msrb.mxu0 %v5556_v62  ;;  %v5595_v22 = vpack.c.bf16 %v5252_v9, %v5136_v5  ;;  %v13460_v62 = vld [vmem:[#allocation149_spill] sm:$0xff]  ;;  %v8694_v9 = vld [vmem:[#allocation10 + $0x68] sm:$0xf0]  ;;  %v8676_v5 = vld [vmem:[#allocation10 + $0x40] sm:$0xf] }
 0x749   : > { %v5280_v59 = vpop.f32.mrf.mxu2 }
 0x74a   : > { %v5309_v49 = vpop.f32.mrf.mxu3 }
 0x74b   : > { %v5310_v47 = vadd.f32 %v5309_v49, %v5280_v59  ;;  %5523 = vmatpush.bf16.msra.mxu3 %v5512_v27  ;;  %5562 = vmatpush.bf16.msrb.mxu0 %v13439_v3  ;;  %v5225_v58 = vpop.f32.mrf.mxu0  ;;  %v5676_v27 = vpack.c.bf16 %v5025_v14, %v13460_v62  ;;  %v8701_v59 = vor.u32 %v9255_v11, %v8700_v63  ;;  %v9253_v49 = vld [vmem:[#allocation10 + $0x64] sm:$0xf0]  ;;  %v8702_v3 = vld [vmem:[#allocation10 + $0x78] sm:$0xf0]  ;;  %v8758_v14 = vld [vmem:[#allocation10 + $0xe8] sm:$0xf0] }
 0x74c   : > { %v5254_v2 = vpop.f32.mrf.mxu1  ;;  %v8748_v62 = vld [vmem:[#allocation10 + $0xd0] sm:$0xf]  ;;  %v9266_v63 = vld [vmem:[#allocation10 + $0xd4] sm:$0xf] }
 0x74d   : > { %v5597_v0 = vpack.c.bf16 %v5310_v47, %v5194_v34  ;;  %v5255_v21 = vadd.f32 %v5254_v2, %v5225_v58  ;;  %v9254_v34 = vld [vmem:[#allocation10 + $0x74] sm:$0xf]  ;;  %v8693_v47 = vor.u32 %v9253_v49, %v8692_v39  ;;  %v8686_v2 = vld [vmem:[#allocation10 + $0x58] sm:$0xf0]  ;;  %v8740_v49 = vld [vmem:[#allocation10 + $0xc0] sm:$0xf] }
 0x74e   : > { %8615 = vmatmul.msk.bf16.gmra.mxu1 %vm2256_vm1, %v11911_v13  ;;  %8622 = vmatmul.msk.bf16.vlgmr.msra.gmra.mxu3 %vm2256_vm1, %v11886_v61 }
 0x74f   : > { %5563 = vmatpush.bf16.msrb.mxu0 %v5554_v33  ;;  %5602 = vmatpush.bf16.msrb.mxu1 %v5597_v0  ;;  %v5636_v43 = vpack.c.bf16 %v5255_v21, %v13451_v30  ;;  %v9251_v33 = vld [vmem:[#allocation10 + $0x54] sm:$0xf0]  ;;  %v8705_v0 = vor.u32 %v9254_v34, %v8702_v3  ;;  %v8660_v21 = vld [vmem:[#allocation10 + $0x20] sm:$0xf]  ;;  %v9242_v30 = vld [vmem:[#allocation10 + $0x14] sm:$0xf] }
 0x750   : > { %v9265_v34 = vld [vmem:[#allocation10 + $0xc4] sm:$0xf0] }
 0x751   : > { %v5283_v36 = vpop.f32.mrf.mxu2  ;;  %v8741_v3 = vor.u32 %v9265_v34, %v8740_v49 }
 0x752   : > { %v5312_v45 = vpop.f32.mrf.mxu3 }
 0x753   : > { %v5313_v12 = vadd.f32 %v5312_v45, %v5283_v36  ;;  %5564 = vmatpush.bf16.msrb.mxu0 %v13440_v31  ;;  %5603 = vmatpush.bf16.msrb.mxu1 %v5596_v57  ;;  %v5227_v37 = vpop.f32.mrf.mxu0  ;;  %v9252_v57 = vld [vmem:[#allocation10 + $0x64] sm:$0xf]  ;;  %v8685_v36 = vor.u32 %v9251_v33, %v8684_v50  ;;  %v9250_v31 = vld [vmem:[#allocation10 + $0x54] sm:$0xf]  ;;  %v8742_v50 = vld [vmem:[#allocation10 + $0xc8] sm:$0xf0] }
 0x754   : > { %v5256_v17 = vpop.f32.mrf.mxu1  ;;  %v8697_v45 = vor.u32 %v9252_v57, %v8694_v9  ;;  %v8689_v16 = vor.u32 %v9250_v31, %v8686_v2  ;;  %v9263_v57 = vld [vmem:[#allocation10 + $0xb4] sm:$0xf0]  ;;  %v9262_v9 = vld [vmem:[#allocation10 + $0xb4] sm:$0xf]  ;;  %v8724_v31 = vld [vmem:[#allocation10 + $0xa0] sm:$0xf] }
 0x755   : > { %v5638_v25 = vpack.c.bf16 %v5313_v12, %v13442_v7  ;;  %v5257_v6 = vadd.f32 %v5256_v17, %v5227_v37  ;;  %v9249_v12 = vld [vmem:[#allocation10 + $0x44] sm:$0xf0]  ;;  %v9248_v7 = vld [vmem:[#allocation10 + $0x44] sm:$0xf]  ;;  %v8764_v17 = vld [vmem:[#allocation10 + $0xf0] sm:$0xf] }
 0x756   : > { %8612 = vmatmul.msk.bf16.gmra.mxu0 %vm2256_vm1, %v11942_v23  ;;  %8619 = vmatmul.msk.bf16.gmra.mxu2 %vm2256_vm1, %v11911_v13  ;;  %v8677_v58 = vor.u32 %v9249_v12, %v8676_v5  ;;  %v9260_v2 = vld [vmem:[#allocation10 + $0xa4] sm:$0xf] }
 0x757   : > { %5604 = vmatpush.bf16.msrb.mxu1 %v5595_v22  ;;  %5643 = vmatpush.bf16.msrb.mxu2 %v5638_v25  ;;  %v5677_v8 = vpack.c.bf16 %v5257_v6, %v5141_v56  ;;  %v9247_v22 = vld [vmem:[#allocation10 + $0x34] sm:$0xf0]  ;;  %v8765_v6 = vor.u32 %v9271_v55, %v8764_v17  ;;  %v8766_v56 = vld [vmem:[#allocation10 + $0xf8] sm:$0xf0] }
 0x758   : > { %5941 = vmatpush.bf16.msra.mxu0 %v8701_v59  ;;  %v8669_v25 = vor.u32 %v9247_v22, %v8668_v51  ;;  %v8769_v4 = vor.u32 %v9270_v1, %v8766_v56  ;;  %v8750_v59 = vld [vmem:[#allocation10 + $0xd8] sm:$0xf0]  ;;  %v12025_v22 = vpop.permute.xlu0 %5323 }
 0x759   : > { %v5285_v29 = vpop.f32.mrf.mxu2  ;;  %v8753_v39 = vor.u32 %v9266_v63, %v8750_v59 }
 0x75a   : > { %v5314_v42 = vpop.f32.mrf.mxu3 }
 0x75b   : > { %v5315_v60 = vadd.f32 %v5314_v42, %v5285_v29  ;;  %5605 = vmatpush.bf16.msrb.mxu1 %v5594_v52  ;;  %5644 = vmatpush.bf16.msrb.mxu2 %v13448_v54  ;;  %v8681_v52 = vor.u32 %v9248_v7, %v8678_v26  ;;  %v9245_v29 = vld [vmem:[#allocation10 + $0x24] sm:$0xf0]  ;;  %v9246_v42 = vld [vmem:[#allocation10 + $0x34] sm:$0xf]  ;;  %v8662_v54 = vld [vmem:[#allocation10 + $0x28] sm:$0xf0] }
 0x75c   : > { %5942 = vmatpush.bf16.msra.mxu0 %v8693_v47  ;;  %v8673_v10 = vor.u32 %v9246_v42, %v8670_v44  ;;  %v8665_v32 = vor.u32 %v9244_v35, %v8662_v54  ;;  %v9264_v47 = vld [vmem:[#allocation10 + $0xc4] sm:$0xf]  ;;  %v8716_v7 = vld [vmem:[#allocation10 + $0x90] sm:$0xf]  ;;  %v9258_v26 = vld [vmem:[#allocation10 + $0x94] sm:$0xf]  ;;  %v12028_v42 = vpop.permute.xlu1 %5328 }
 0x75d   : > { %v5679_v15 = vpack.c.bf16 %v5315_v60, %v5199_v20  ;;  %v8652_v20 = vld [vmem:[#allocation10 + $0x10] sm:$0xf]  ;;  %v9243_v60 = vld [vmem:[#allocation10 + $0x14] sm:$0xf0]  ;;  %v8745_v33 = vor.u32 %v9264_v47, %v8742_v50  ;;  %v9256_v35 = vld [vmem:[#allocation10 + $0x84] sm:$0xf] }
 0x75e   : > { %8616 = vmatmul.msk.bf16.gmra.mxu1 %vm2256_vm1, %v11942_v23  ;;  %8623 = vmatmul.msk.bf16.gmra.mxu3 %vm2256_vm1, %v11911_v13  ;;  %v8653_v19 = vor.u32 %v9243_v60, %v8652_v20  ;;  %v8708_v20 = vld [vmem:[#allocation10 + $0x80] sm:$0xf]  ;;  %v9257_v60 = vld [vmem:[#allocation10 + $0x84] sm:$0xf0] }
 0x75f   : > { %5645 = vmatpush.bf16.msrb.mxu2 %v5636_v43  ;;  %5684 = vmatpush.bf16.msrb.mxu3 %v5679_v15  ;;  %v8645_v43 = vor.u32 %v9241_v40, %v8644_v38  ;;  %v8654_v15 = vld [vmem:[#allocation10 + $0x18] sm:$0xf0]  ;;  %v8709_v38 = vor.u32 %v9257_v60, %v8708_v20  ;;  %v8710_v40 = vld [vmem:[#allocation10 + $0x88] sm:$0xf0] }
 0x760   : > { %5943 = vmatpush.bf16.msra.mxu0 %v8685_v36  ;;  %v8657_v37 = vor.u32 %v9242_v30, %v8654_v15  ;;  %6030 = vmatpush.bf16.msra.mxu1 %v8765_v6  ;;  %v8713_v30 = vor.u32 %v9256_v35, %v8710_v40  ;;  %v12033_v15 = vpop.permute.xlu2 %5343 }
 0x763   : > { %5646 = vmatpush.bf16.msrb.mxu2 %v13457_v28  ;;  %5685 = vmatpush.bf16.msrb.mxu3 %v5678_v48  ;;  %v9240_v48 = vld [vmem:[#allocation10 + $0x4] sm:$0xf]  ;;  %v8756_v28 = vld [vmem:[#allocation10 + $0xe0] sm:$0xf] }
 0x764   : > { %5944 = vmatpush.bf16.msra.mxu0 %v8677_v58  ;;  %v8649_v24 = vor.u32 %v9240_v48, %v8646_v18  ;;  %v8757_v53 = vor.u32 %v9269_v41, %v8756_v28  ;;  %v9261_v58 = vld [vmem:[#allocation10 + $0xa4] sm:$0xf0]  ;;  %v12035_v55 = vpop.permute.xlu1 %5333 }
 0x766   : > { %8613 = vmatmul.msk.bf16.gmra.mxu0 %vm2256_vm1, %v11973_v46  ;;  %8620 = vmatmul.msk.bf16.gmra.mxu2 %vm2256_vm1, %v11942_v23 }
 0x767   : > { %5686 = vmatpush.bf16.msrb.mxu3 %v5677_v8  ;;  %6119 = vmatpush.bf16.msra.mxu2 %v8705_v0  ;;  %v8732_v0 = vld [vmem:[#allocation10 + $0xb0] sm:$0xf] }
 0x768   : > { %5945 = vmatpush.bf16.msra.mxu0 %v8669_v25  ;;  %6031 = vmatpush.bf16.msra.mxu1 %v8757_v53  ;;  %v8733_v36 = vor.u32 %v9263_v57, %v8732_v0  ;;  %v9259_v25 = vld [vmem:[#allocation10 + $0x94] sm:$0xf0]  ;;  %v12040_v18 = vpop.permute.xlu2 %5338 }
 0x76b   : > { %5687 = vmatpush.bf16.msrb.mxu3 %v5676_v27  ;;  %6120 = vmatpush.bf16.msra.mxu2 %v8697_v45  ;;  %v9267_v27 = vld [vmem:[#allocation10 + $0xd4] sm:$0xf0]  ;;  %v8734_v45 = vld [vmem:[#allocation10 + $0xb8] sm:$0xf0] }
 0x76c   : > { %v8749_v11 = vor.u32 %v9267_v27, %v8748_v62  ;;  %v8737_v12 = vor.u32 %v9262_v9, %v8734_v45 }
 0x76e   : > { %8617 = vmatmul.msk.bf16.gmra.mxu1 %vm2256_vm1, %v11973_v46  ;;  %8624 = vmatmul.msk.bf16.gmra.mxu3 %vm2256_vm1, %v11942_v23 }
 0x76f   : > { %6121 = vmatpush.bf16.msra.mxu2 %v8689_v16  ;;  %6208 = vmatpush.bf16.msra.mxu3 %v8769_v4  ;;  %v8726_v16 = vld [vmem:[#allocation10 + $0xa8] sm:$0xf0] }
 0x770   : > { %6032 = vmatpush.bf16.msra.mxu1 %v8749_v11  ;;  %v8729_v51 = vor.u32 %v9260_v2, %v8726_v16  ;;  %v12052_v11 = vpop.permute.xlu0 %5348  ;;  %v12066_v16 = vpop.permute.xlu1 %5358 }
 0x773   : > { %6122 = vmatpush.bf16.msra.mxu2 %v8681_v52 }
 0x774   : > { %6033 = vmatpush.bf16.msra.mxu1 %v8741_v3 }
 0x776   : > { %8621 = vmatmul.msk.bf16.gmra.mxu2 %vm2256_vm1, %v11973_v46  ;;  %8626 = vmatmul.msk.bf16.vlgmr.msrb.gmra.mxu0 %vm2256_vm1, %v11886_v61 }
 0x777   : > { %6123 = vmatpush.bf16.msra.mxu2 %v8673_v10 }
 0x778   : > { %6034 = vmatpush.bf16.msra.mxu1 %v8733_v36 }
 0x77b   : > { %6124 = vmatpush.bf16.msra.mxu2 %v8665_v32 }
 0x77e   : > { %8625 = vmatmul.msk.bf16.gmra.mxu3 %vm2256_vm1, %v11973_v46  ;;  %8630 = vmatmul.msk.bf16.vlgmr.msrb.gmra.mxu1 %vm2256_vm1, %v11886_v61 }
 0x77f   : > { %6125 = vmatpush.bf16.msra.mxu2 %v8657_v37 }
 0x783   : > { %6126 = vmatpush.bf16.msra.mxu2 %v8649_v24 }
 0x786   : > { %8627 = vmatmul.msk.bf16.gmra.mxu0 %vm2256_vm1, %v11911_v13  ;;  %8634 = vmatmul.msk.bf16.vlgmr.msrb.gmra.mxu2 %vm2256_vm1, %v11886_v61 }
 0x78e   : > { %8631 = vmatmul.msk.bf16.gmra.mxu1 %vm2256_vm1, %v11911_v13  ;;  %8638 = vmatmul.msk.bf16.vlgmr.msrb.gmra.mxu3 %vm2256_vm1, %v11886_v61  ;;  %v8661_v61 = vor.u32 %v9245_v29, %v8660_v21  ;;  %v8717_v21 = vor.u32 %v9259_v25, %v8716_v7  ;;  %v8718_v29 = vld [vmem:[#allocation10 + $0x98] sm:$0xf0] }
 0x78f   : > { %v8721_v44 = vor.u32 %v9258_v26, %v8718_v29 }
 0x790   : > { %5946 = vmatpush.bf16.msra.mxu0 %v8661_v61 }
 0x794   : > { %5947 = vmatpush.bf16.msra.mxu0 %v8653_v19 }
 0x796   : > { %8628 = vmatmul.msk.bf16.gmra.mxu0 %vm2256_vm1, %v11942_v23  ;;  %8635 = vmatmul.msk.bf16.gmra.mxu2 %vm2256_vm1, %v11911_v13 }
 0x798   : > { %5948 = vmatpush.bf16.msra.mxu0 %v8645_v43 }
 0x79e   : > { %8632 = vmatmul.msk.bf16.gmra.mxu1 %vm2256_vm1, %v11942_v23  ;;  %8639 = vmatmul.msk.bf16.gmra.mxu3 %vm2256_vm1, %v11911_v13  ;;  %v9268_v13 = vld [vmem:[#allocation10 + $0xe4] sm:$0xf] }
 0x79f   : > { %v8761_v8 = vor.u32 %v9268_v13, %v8758_v14 }
 0x7a1   : > { %6209 = vmatpush.bf16.msra.mxu3 %v8761_v8 }
 0x7a5   : > { %6210 = vmatpush.bf16.msra.mxu3 %v8753_v39 }
 0x7a6   : > { %8629 = vmatmul.msk.bf16.gmra.mxu0 %vm2256_vm1, %v11973_v46  ;;  %8636 = vmatmul.msk.bf16.gmra.mxu2 %vm2256_vm1, %v11942_v23 }
 0x7a9   : > { %6211 = vmatpush.bf16.msra.mxu3 %v8745_v33 }
 0x7ad   : > { %6212 = vmatpush.bf16.msra.mxu3 %v8737_v12 }
 0x7ae   : > { %8633 = vmatmul.msk.bf16.gmra.mxu1 %vm2256_vm1, %v11973_v46  ;;  %8640 = vmatmul.msk.bf16.gmra.mxu3 %vm2256_vm1, %v11942_v23  ;;  %v8725_v23 = vor.u32 %v9261_v58, %v8724_v31 }
 0x7b0   : > { %6035 = vmatpush.bf16.msra.mxu1 %v8725_v23 }
 0x7b1   : > { %6213 = vmatpush.bf16.msra.mxu3 %v8729_v51 }
 0x7b3   : > { %v5402_v5 = vpop.f32.mrf.mxu0 }
 0x7b4   : > { %v5403_v52 = vadd.f32 %v5402_v5, %v12025_v22  ;;  %6036 = vmatpush.bf16.msra.mxu1 %v8717_v21  ;;  %v12057_v5 = vpop.permute.xlu0 %5353 }
 0x7b5   : > { %6214 = vmatpush.bf16.msra.mxu3 %v8721_v44 }
 0x7b6   : > { %8637 = vmatmul.msk.bf16.gmra.mxu2 %vm2256_vm1, %v11973_v46  ;;  %v5422_v19 = vmax.f32 %v5403_v52, 0.0 }
 0x7b8   : > { %6037 = vmatpush.bf16.msra.mxu1 %v8709_v38 }
 0x7b9   : > { %6215 = vmatpush.bf16.msra.mxu3 %v8713_v30 }
 0x7bb   : > { %v5404_v61 = vpop.f32.mrf.mxu0  ;;  %v5443_v32 = vpop.f32.mrf.mxu1 }
 0x7bc   : > { %v5405_v10 = vadd.f32 %v5404_v61, %v12028_v42  ;;  %v5444_v27 = vadd.f32 %v5443_v32, %v12025_v22 }
 0x7be   : > { %v5423_v54 = vmax.f32 %v5405_v10, 0.0  ;;  %8641 = vmatmul.msk.bf16.gmra.mxu3 %vm2256_vm1, %v11973_v46  ;;  %v5463_v47 = vmax.f32 %v5444_v27, 0.0 }
 0x7c0   : > { %v5717_v43 = vpack.c.bf16 %v5423_v54, %v5422_v19 }
 0x7c2   : > { %5949 = vmatmul.bf16.vlgmr.msra.gmra.mxu0 %v5717_v43 }
 0x7c3   : > { %v5407_v37 = vpop.f32.mrf.mxu0  ;;  %v5445_v17 = vpop.f32.mrf.mxu1 }
 0x7c4   : > { %v5408_v6 = vadd.f32 %v5407_v37, %v12035_v55  ;;  %v5446_v14 = vadd.f32 %v5445_v17, %v12028_v42 }
 0x7c6   : > { %6127 = vmatmul.bf16.vlgmr.msra.gmra.mxu2 %v5717_v43  ;;  %v5424_v56 = vmax.f32 %v5408_v6, 0.0  ;;  %v5464_v39 = vmax.f32 %v5446_v14, 0.0 }
 0x7c8   : > { %v5721_v0 = vpack.c.bf16 %v5464_v39, %v5463_v47 }
 0x7c9   : > { %v12037_v48 = vpop.f32.mrf.mxu2 }
 0x7ca   : > { %v5485_v32 = vadd.f32 %v12037_v48, %v12025_v22 }
 0x7cb   : > { %v5409_v46 = vpop.f32.mrf.mxu0  ;;  %v5448_v13 = vpop.f32.mrf.mxu1 }
 0x7cc   : > { %v5410_v1 = vadd.f32 %v5409_v46, %v12040_v18  ;;  %v5449_v2 = vadd.f32 %v5448_v13, %v12035_v55  ;;  %v5504_v6 = vmax.f32 %v5485_v32, 0.0 }
 0x7ce   : > { %v5425_v24 = vmax.f32 %v5410_v1, 0.0  ;;  %v5465_v26 = vmax.f32 %v5449_v2, 0.0 }
 0x7d0   : > { %v5719_v4 = vpack.c.bf16 %v5425_v24, %v5424_v56 }
 0x7d1   : > { %v5486_v28 = vpop.f32.mrf.mxu2  ;;  %v12043_v41 = vpop.f32.mrf.mxu3 }
 0x7d2   : > { %5954 = vmatmul.bf16.gmra.mxu0 %v5719_v4  ;;  %v5487_v35 = vadd.f32 %v5486_v28, %v12028_v42 }
 0x7d3   : > { %v5412_v53 = vpop.f32.mrf.mxu0  ;;  %v5450_v49 = vpop.f32.mrf.mxu1 }
 0x7d4   : > { %v5413_v63 = vadd.f32 %v5412_v53, %v12033_v15  ;;  %v5451_v12 = vadd.f32 %v5450_v49, %v12040_v18  ;;  %v5505_v37 = vmax.f32 %v5487_v35, 0.0 }
 0x7d6   : > { %6132 = vmatmul.bf16.gmra.mxu2 %v5719_v4  ;;  %v5426_v3 = vmax.f32 %v5413_v63, 0.0  ;;  %v5466_v7 = vmax.f32 %v5451_v12, 0.0  ;;  %v5725_v1 = vpack.c.bf16 %v5505_v37, %v5504_v6 }
 0x7d8   : > { %v5723_v61 = vpack.c.bf16 %v5466_v7, %v5465_v26 }
 0x7d9   : > { %v12046_v8 = vpop.f32.mrf.mxu2  ;;  %v12048_v62 = vpop.f32.mrf.mxu3 }
 0x7da   : > { %v5490_v27 = vadd.f32 %v12046_v8, %v12035_v55 }
 0x7db   : > { %v5414_v59 = vpop.f32.mrf.mxu0  ;;  %v5453_v45 = vpop.f32.mrf.mxu1 }
 0x7dc   : > { %v5415_v34 = vadd.f32 %v5414_v59, %v12052_v11  ;;  %v5454_v38 = vadd.f32 %v5453_v45, %v12033_v15  ;;  %v5506_v49 = vmax.f32 %v5490_v27, 0.0 }
 0x7de   : > { %v5427_v50 = vmax.f32 %v5415_v34, 0.0  ;;  %v5467_v46 = vmax.f32 %v5454_v38, 0.0 }
 0x7e0   : > { %v5718_v33 = vpack.c.bf16 %v5427_v50, %v5426_v3 }
 0x7e1   : > { %v5491_v57 = vpop.f32.mrf.mxu2  ;;  %v12055_v9 = vpop.f32.mrf.mxu3 }
 0x7e2   : > { %5959 = vmatmul.bf16.gmra.mxu0 %v5721_v0  ;;  %6038 = vmatmul.bf16.vlgmr.msra.gmra.mxu1 %v5718_v33  ;;  %v5492_v13 = vadd.f32 %v5491_v57, %v12040_v18 }
 0x7e3   : > { %6216 = vmatmul.bf16.vlgmr.msra.gmra.mxu3 %v5718_v33  ;;  %v5417_v36 = vpop.f32.mrf.mxu0  ;;  %v5455_v29 = vpop.f32.mrf.mxu1 }
 0x7e4   : > { %v5418_v23 = vadd.f32 %v5417_v36, %v12057_v5  ;;  %v5456_v19 = vadd.f32 %v5455_v29, %v12052_v11  ;;  %v5507_v59 = vmax.f32 %v5492_v13, 0.0  ;;  %v5531_v13 = vadd.f32 %v12055_v9, %v12035_v55 }
 0x7e6   : > { %6137 = vmatmul.bf16.gmra.mxu2 %v5721_v0  ;;  %v5428_v52 = vmax.f32 %v5418_v23, 0.0  ;;  %v5468_v17 = vmax.f32 %v5456_v19, 0.0  ;;  %v5727_v33 = vpack.c.bf16 %v5507_v59, %v5506_v49  ;;  %v5528_v23 = vadd.f32 %v12048_v62, %v12028_v42 }
 0x7e8   : > { %v5722_v56 = vpack.c.bf16 %v5468_v17, %v5467_v46 }
 0x7e9   : > { %v12060_v31 = vpop.f32.mrf.mxu2  ;;  %v12062_v58 = vpop.f32.mrf.mxu3 }
 0x7eb   : > { %v5419_v51 = vpop.f32.mrf.mxu0  ;;  %v5458_v30 = vpop.f32.mrf.mxu1 }
 0x7ec   : > { %v5420_v25 = vadd.f32 %v5419_v51, %v12066_v16  ;;  %v5459_v63 = vadd.f32 %v5458_v30, %v12057_v5 }
 0x7ee   : > { %v5429_v21 = vmax.f32 %v5420_v25, 0.0  ;;  %v5469_v34 = vmax.f32 %v5459_v63, 0.0 }
 0x7f0   : > { %v5720_v44 = vpack.c.bf16 %v5429_v21, %v5428_v52  ;;  %v5526_v52 = vadd.f32 %v12043_v41, %v12025_v22  ;;  %v5495_v21 = vadd.f32 %v12060_v31, %v12033_v15 }
 0x7f1   : > { %v5496_v10 = vpop.f32.mrf.mxu2  ;;  %v12069_v20 = vpop.f32.mrf.mxu3 }
 0x7f2   : > { %5964 = vmatmul.bf16.gmra.mxu0 %v5723_v61  ;;  %6043 = vmatmul.bf16.gmra.mxu1 %v5720_v44  ;;  %v5497_v51 = vadd.f32 %v5496_v10, %v12052_v11  ;;  %v5545_v35 = vmax.f32 %v5526_v52, 0.0  ;;  %v5508_v19 = vmax.f32 %v5495_v21, 0.0  ;;  %v5536_v52 = vadd.f32 %v12069_v20, %v12033_v15 }
 0x7f3   : > { %6221 = vmatmul.bf16.gmra.mxu3 %v5720_v44  ;;  %v12071_v60 = vpop.f32.mrf.mxu0  ;;  %v5460_v48 = vpop.f32.mrf.mxu1 }
 0x7f4   : > { %v5461_v53 = vadd.f32 %v5460_v48, %v12066_v16  ;;  %v5509_v44 = vmax.f32 %v5497_v51, 0.0  ;;  %v5567_v21 = vadd.f32 %v12071_v60, %v12025_v22 }
 0x7f6   : > { %6142 = vmatmul.bf16.gmra.mxu2 %v5723_v61  ;;  %v5470_v39 = vmax.f32 %v5461_v53, 0.0  ;;  %v5546_v61 = vmax.f32 %v5528_v23, 0.0  ;;  %v5726_v32 = vpack.c.bf16 %v5509_v44, %v5508_v19  ;;  %v5586_v19 = vmax.f32 %v5567_v21, 0.0 }
 0x7f8   : > { %v5724_v0 = vpack.c.bf16 %v5470_v39, %v5469_v34  ;;  %v5729_v10 = vpack.c.bf16 %v5546_v61, %v5545_v35  ;;  %v5547_v39 = vmax.f32 %v5531_v13, 0.0  ;;  %v5549_v35 = vmax.f32 %v5536_v52, 0.0 }
 0x7f9   : > { %v12075_v54 = vpop.f32.mrf.mxu2  ;;  %v12080_v40 = vpop.f32.mrf.mxu3 }
 0x7fa   : > { %v5500_v53 = vadd.f32 %v12075_v54, %v12057_v5 }
 0x7fb   : > { %v12082_v43 = vpop.f32.mrf.mxu0  ;;  %v12098_v57 = vpop.f32.mrf.mxu1 }
 0x7fc   : > { %v5510_v49 = vmax.f32 %v5500_v53, 0.0  ;;  %v5569_v23 = vadd.f32 %v12082_v43, %v12028_v42 }
 0x7fe   : > { %v5587_v44 = vmax.f32 %v5569_v23, 0.0 }
 0x801   : > { %v5501_v24 = vpop.f32.mrf.mxu2  ;;  %v12084_v4 = vpop.f32.mrf.mxu3 }
 0x802   : > { %5969 = vmatmul.bf16.gmra.mxu0 %v5725_v1  ;;  %6048 = vmatmul.bf16.gmra.mxu1 %v5722_v56  ;;  %v5541_v53 = vadd.f32 %v12084_v4, %v12057_v5 }
 0x803   : > { %6226 = vmatmul.bf16.gmra.mxu3 %v5722_v56  ;;  %v12086_v28 = vpop.f32.mrf.mxu0  ;;  %v12114_v29 = vpop.f32.mrf.mxu1  ;;  %v5502_v56 = vadd.f32 %v5501_v24, %v12066_v16 }
 0x805   : > { %v5511_v27 = vmax.f32 %v5502_v56, 0.0 }
 0x806   : > { %6147 = vmatmul.bf16.gmra.mxu2 %v5725_v1  ;;  %v5533_v1 = vadd.f32 %v12062_v58, %v12040_v18 }
 0x809   : > { %v5648_v14 = vpop.f32.mrf.mxu2  ;;  %v12093_v47 = vpop.f32.mrf.mxu3 }
 0x80a   : > { %v5649_v50 = vadd.f32 %v5648_v14, %v12025_v22  ;;  %v5548_v14 = vmax.f32 %v5533_v1, 0.0  ;;  %v5543_v56 = vadd.f32 %v12093_v47, %v12066_v16 }
 0x80b   : > { %v12095_v3 = vpop.f32.mrf.mxu0  ;;  %v12122_v6 = vpop.f32.mrf.mxu1 }
 0x80c   : > { %v5668_v8 = vmax.f32 %v5649_v50, 0.0  ;;  %v5731_v24 = vpack.c.bf16 %v5548_v14, %v5547_v39  ;;  %v5728_v50 = vpack.c.bf16 %v5511_v27, %v5510_v49  ;;  %v5572_v14 = vadd.f32 %v12086_v28, %v12035_v55 }
 0x80d   : > { %v5552_v39 = vmax.f32 %v5543_v56, 0.0  ;;  %v13463_v56 = vld [vmem:[#allocation21_spill] sm:$0xff] }
 0x811   : > { %v5650_v36 = vpop.f32.mrf.mxu2  ;;  %v12106_v7 = vpop.f32.mrf.mxu3 }
 0x812   : > { %v5651_v45 = vadd.f32 %v5650_v36, %v12028_v42  ;;  %5974 = vmatmul.bf16.gmra.mxu0 %v5727_v33  ;;  %6053 = vmatmul.bf16.gmra.mxu1 %v5724_v0 }
 0x813   : > { %6231 = vmatmul.bf16.gmra.mxu3 %v5724_v0  ;;  %v12108_v25 = vpop.f32.mrf.mxu0  ;;  %v12137_v34 = vpop.f32.mrf.mxu1 }
 0x814   : > { %v5669_v12 = vmax.f32 %v5651_v45, 0.0  ;;  %v5577_v52 = vadd.f32 %v12108_v25, %v12033_v15 }
 0x816   : > { %6152 = vmatmul.bf16.gmra.mxu2 %v5727_v33  ;;  %v12101_v2 = vpack.c.bf16 %v5669_v12, %v5668_v8  ;;  %v5538_v12 = vadd.f32 %v12080_v40, %v12052_v11 }
 0x818   : > { %v5550_v61 = vmax.f32 %v5538_v12, 0.0 }
 0x819   : > { %v5653_v26 = vpop.f32.mrf.mxu2  ;;  %v12117_v30 = vpop.f32.mrf.mxu3 }
 0x81a   : > { %v5654_v62 = vadd.f32 %v5653_v26, %v12035_v55  ;;  %v5730_v43 = vpack.c.bf16 %v5550_v61, %v5549_v35  ;;  %v5590_v35 = vmax.f32 %v5577_v52, 0.0 }
 0x81b   : > { %v12120_v41 = vpop.f32.mrf.mxu0  ;;  %v12151_v51 = vpop.f32.mrf.mxu1 }
 0x81c   : > { %v5670_v31 = vmax.f32 %v5654_v62, 0.0  ;;  %v5579_v12 = vadd.f32 %v12120_v41, %v12052_v11 }
 0x81e   : > { %v5591_v61 = vmax.f32 %v5579_v12, 0.0 }
 0x821   : > { %v5655_v38 = vpop.f32.mrf.mxu2  ;;  %v12133_v63 = vpop.f32.mrf.mxu3 }
 0x822   : > { %v5656_v37 = vadd.f32 %v5655_v38, %v12040_v18  ;;  %5979 = vmatmul.bf16.gmra.mxu0 %v5729_v10  ;;  %6058 = vmatmul.bf16.gmra.mxu1 %v5726_v32 }
 0x823   : > { %6236 = vmatmul.bf16.gmra.mxu3 %v5726_v32  ;;  %v12135_v59 = vpop.f32.mrf.mxu0  ;;  %v5733_v32 = vpack.c.bf16 %v5587_v44, %v5586_v19  ;;  %v12161_v20 = vpop.f32.mrf.mxu1 }
 0x824   : > { %v5671_v17 = vmax.f32 %v5656_v37, 0.0 }
 0x826   : > { %6157 = vmatmul.bf16.gmra.mxu2 %v5729_v10  ;;  %v12124_v46 = vpack.c.bf16 %v5671_v17, %v5670_v31 }
 0x829   : > { %v5658_v48 = vpop.f32.mrf.mxu2  ;;  %v12141_v36 = vpop.f32.mrf.mxu3 }
 0x82a   : > { %v5659_v58 = vadd.f32 %v5658_v48, %v12033_v15  ;;  %v5574_v48 = vadd.f32 %v12095_v3, %v12040_v18 }
 0x82b   : > { %v12145_v8 = vpop.f32.mrf.mxu0 }
 0x82c   : > { %v5672_v54 = vmax.f32 %v5659_v58, 0.0  ;;  %v5589_v49 = vmax.f32 %v5574_v48, 0.0  ;;  %v12175_v58 = vpop.f32.mrf.mxu1  ;;  %v13464_v48 = vld [vmem:[#allocation84_spill] sm:$0xff] }
 0x831   : > { %v5660_v33 = vpop.f32.mrf.mxu2  ;;  %v12157_v10 = vpop.f32.mrf.mxu3 }
 0x832   : > { %v5661_v9 = vadd.f32 %v5660_v33, %v12052_v11  ;;  %5984 = vmatmul.bf16.gmra.mxu0 %v5731_v24  ;;  %6063 = vmatmul.bf16.gmra.mxu1 %v5728_v50 }
 0x833   : > { %6241 = vmatmul.bf16.gmra.mxu3 %v5728_v50  ;;  %v5588_v50 = vmax.f32 %v5572_v14, 0.0 }
 0x834   : > { %v5673_v0 = vmax.f32 %v5661_v9, 0.0  ;;  %v12181_v28 = vpop.f32.mrf.mxu1 }
 0x835   : > { %v5735_v47 = vpack.c.bf16 %v5589_v49, %v5588_v50 }
 0x836   : > { %6162 = vmatmul.bf16.gmra.mxu2 %v5731_v24  ;;  %v12143_v45 = vpack.c.bf16 %v5673_v0, %v5672_v54  ;;  %v5551_v24 = vmax.f32 %v5541_v53, 0.0  ;;  %v5610_v0 = vadd.f32 %v12114_v29, %v12028_v42  ;;  %v13461_v29 = vld [vmem:[#allocation20_spill] sm:$0xff]  ;;  %v6298_v53 = vadd.f32 %v13464_v48, %v13463_v56 }
 0x838   : > { %v5732_v9 = vpack.c.bf16 %v5552_v39, %v5551_v24  ;;  %v5628_v21 = vmax.f32 %v5610_v0, 0.0  ;;  %v5584_v24 = vadd.f32 %v12145_v8, %v12066_v16  ;;  %v5582_v0 = vadd.f32 %v12135_v59, %v12057_v5 }
 0x839   : > { %v5663_v26 = vpop.f32.mrf.mxu2  ;;  %v12173_v27 = vpop.f32.mrf.mxu3 }
 0x83a   : > { %v5664_v40 = vadd.f32 %v5663_v26, %v12057_v5  ;;  %v5608_v26 = vadd.f32 %v12098_v57, %v12025_v22 }
 0x83c   : > { %v5674_v60 = vmax.f32 %v5664_v40, 0.0  ;;  %v5627_v44 = vmax.f32 %v5608_v26, 0.0  ;;  %v5593_v26 = vmax.f32 %v5584_v24, 0.0 }
 0x83f   : > { %v5950_v62 = vpop.f32.mrf.mxu0 }
 0x841   : > { %v5665_v38 = vpop.f32.mrf.mxu2  ;;  %v12179_v4 = vpop.f32.mrf.mxu3 }
 0x842   : > { %v5666_v37 = vadd.f32 %v5665_v38, %v12066_v16  ;;  %5989 = vmatmul.bf16.gmra.mxu0 %v5733_v32  ;;  %6068 = vmatmul.bf16.gmra.mxu1 %v5730_v43 }
 0x843   : > { %6246 = vmatmul.bf16.gmra.mxu3 %v5730_v43  ;;  %v13462_v43 = vld [vmem:[#allocation108_spill] sm:$0xff] }
 0x844   : > { %v5675_v31 = vmax.f32 %v5666_v37, 0.0  ;;  %v6297_v38 = vadd.f32 %v13462_v43, %v13461_v29  ;;  %v5737_v37 = vpack.c.bf16 %v5628_v21, %v5627_v44  ;;  %v13468_v29 = vld [vmem:[#allocation19_spill] sm:$0xff] }
 0x845   : > { %v13469_v43 = vmax.f32 %v13468_v29, 0.0 }
 0x846   : > { %6167 = vmatmul.bf16.gmra.mxu2 %v5733_v32  ;;  %v12163_v17 = vpack.c.bf16 %v5675_v31, %v5674_v60  ;;  %v5734_v60 = vpack.c.bf16 %v5591_v61, %v5590_v35  ;;  %v5592_v61 = vmax.f32 %v5582_v0, 0.0 }
 0x847   : > { %v5952_v1 = vpop.f32.mrf.mxu0 }
 0x849   : > { %v6128_v13 = vpop.f32.mrf.mxu2  ;;  %v12193_v19 = vpop.f32.mrf.mxu3 }
 0x84f   : > { %v12177_v33 = vpop.f32.mrf.mxu0 }
 0x851   : > { %v6130_v3 = vpop.f32.mrf.mxu2 }
 0x852   : > { %5994 = vmatmul.bf16.gmra.mxu0 %v5735_v47  ;;  %6073 = vmatmul.bf16.gmra.mxu1 %v5732_v9 }
 0x853   : > { %6251 = vmatmul.bf16.gmra.mxu3 %v5732_v9  ;;  %v5613_v9 = vadd.f32 %v12122_v6, %v12035_v55 }
 0x855   : > { %v5629_v21 = vmax.f32 %v5613_v9, 0.0  ;;  %v13473_v9 = vld [vmem:[#allocation113_spill] sm:$0xff] }
 0x856   : > { %6172 = vmatmul.bf16.gmra.mxu2 %v5735_v47 }
 0x857   : > { %v12183_v54 = vpop.f32.mrf.mxu0 }
 0x859   : > { %v6133_v23 = vpop.f32.mrf.mxu2 }
 0x85f   : > { %v12195_v40 = vpop.f32.mrf.mxu0  ;;  %v6039_v32 = vpop.f32.mrf.mxu1 }
 0x860   : > { %v6040_v41 = vadd.f32 %v6039_v32, %v5950_v62  ;;  %v5615_v62 = vadd.f32 %v12137_v34, %v12040_v18  ;;  %v13465_v34 = vld [vmem:[#allocation18_spill] sm:$0xff] }
 0x861   : > { %v12199_v31 = vpop.f32.mrf.mxu2  ;;  %v13466_v35 = vmax.f32 %v13465_v34, 0.0  ;;  %v13467_v32 = vld [vmem:[#allocation106_spill] sm:$0xff] }
 0x862   : > { %v6361_v57 = vadd.f32 %v6297_v38, %v6040_v41  ;;  %5999 = vmatmul.bf16.gmra.mxu0 %v5737_v37  ;;  %6078 = vmatmul.bf16.gmra.mxu1 %v5734_v60  ;;  %v13470_v38 = vld [vmem:[#allocation85_spill] sm:$0xff] }
 0x863   : > { %6256 = vmatmul.bf16.gmra.mxu3 %v5734_v60  ;;  %v6299_v8 = vadd.f32 %v13467_v32, %v13466_v35  ;;  %v6300_v41 = vadd.f32 %v13470_v38, %v13469_v43  ;;  %v5618_v38 = vadd.f32 %v12151_v51, %v12033_v15  ;;  %v13483_v51 = vld [vmem:[#allocation28_spill] sm:$0xff] }
 0x866   : > { %v6217_v25 = vpop.f32.mrf.mxu3  ;;  %6177 = vmatmul.bf16.gmra.mxu2 %v5737_v37 }
 0x867   : > { %v6218_v14 = vadd.f32 %v6217_v25, %v6128_v13  ;;  %v12203_v39 = vpop.f32.mrf.mxu0  ;;  %v6041_v49 = vpop.f32.mrf.mxu1  ;;  %v5630_v13 = vmax.f32 %v5615_v62, 0.0 }
 0x868   : > { %v6042_v52 = vadd.f32 %v6041_v49, %v5952_v1 }
 0x869   : > { %v6362_v50 = vadd.f32 %v6298_v53, %v6218_v14  ;;  %v12209_v47 = vpop.f32.mrf.mxu2  ;;  %v5739_v59 = vpack.c.bf16 %v5630_v13, %v5629_v21  ;;  %v13476_v21 = vld [vmem:[#allocation69_spill] sm:$0xff] }
 0x86a   : > { %v6363_v25 = vadd.f32 %v6299_v8, %v6042_v52 }
 0x86b   : > { %v6425_v12 = vpack.c.bf16 %v6362_v50, %v6361_v57  ;;  %v5736_v57 = vpack.c.bf16 %v5593_v26, %v5592_v61  ;;  %v13474_v26 = vld [vmem:[#allocation23_spill] sm:$0xff] }
 0x86c   : > { %v13475_v52 = vmax.f32 %v13474_v26, 0.0 }
 0x86d   : > { %v6481_v53 = vunpack.c.l.b16 %v6425_v12  ;;  %v6482_v62 = vunpack.c.h.b16 %v6425_v12 }
 0x86e   : > { %v6219_v44 = vpop.f32.mrf.mxu3  ;;  %v6302_v61 = vadd.f32 %v13476_v21, %v13475_v52 }
 0x86f   : > { %v6220_v37 = vadd.f32 %v6219_v44, %v6130_v3  ;;  %v12221_v6 = vpop.f32.mrf.mxu0  ;;  %v6044_v60 = vpop.f32.mrf.mxu1  ;;  %v13471_v3 = vld [vmem:[#allocation22_spill] sm:$0xff] }
 0x870   : > { %v6045_v14 = vadd.f32 %v6044_v60, %v12177_v33  ;;  %v13472_v50 = vmax.f32 %v13471_v3, 0.0  ;;  %v5620_v33 = vadd.f32 %v12161_v20, %v12052_v11  ;;  %v13482_v20 = vld [vmem:[#allocation91_spill] sm:$0xff] }
 0x871   : > { %v6364_v56 = vadd.f32 %v6300_v41, %v6220_v37  ;;  %v12223_v1 = vpop.f32.mrf.mxu2 }
 0x872   : > { %6004 = vmatmul.bf16.gmra.mxu0 %v5739_v59  ;;  %6083 = vmatmul.bf16.gmra.mxu1 %v5736_v57  ;;  %v6301_v0 = vadd.f32 %v13473_v9, %v13472_v50  ;;  %v5632_v37 = vmax.f32 %v5620_v33, 0.0  ;;  %v13484_v50 = vld [vmem:[#allocation109_spill] sm:$0xff] }
 0x873   : > { %v6426_v48 = vpack.c.bf16 %v6364_v56, %v6363_v25  ;;  %6261 = vmatmul.bf16.gmra.mxu3 %v5736_v57  ;;  %v13477_v57 = vld [vmem:[#allocation24_spill] sm:$0xff]  ;;  %v13479_v56 = vld [vmem:[#allocation111_spill] sm:$0xff]  ;;  %v6305_v9 = vadd.f32 %v13484_v50, %v13483_v51 }
 0x874   : > { %v6365_v12 = vadd.f32 %v6301_v0, %v6045_v14  ;;  %v13478_v25 = vmax.f32 %v13477_v57, 0.0  ;;  %v13490_v51 = vld [vmem:[#allocation27_spill] sm:$0xff] }
 0x875   : > { %v6483_v49 = vunpack.c.l.b16 %v6426_v48  ;;  %v6484_v24 = vunpack.c.h.b16 %v6426_v48  ;;  %v13491_v50 = vmax.f32 %v13490_v51, 0.0  ;;  %v13499_v51 = vld [vmem:[#allocation30_spill] sm:$0xff] }
 0x876   : > { %v6222_v13 = vpop.f32.mrf.mxu3  ;;  %6182 = vmatmul.bf16.gmra.mxu2 %v5739_v59  ;;  %v6303_v48 = vadd.f32 %v13479_v56, %v13478_v25  ;;  %v5625_v25 = vadd.f32 %v12181_v28, %v12066_v16 }
 0x877   : > { %v6223_v44 = vadd.f32 %v6222_v13, %v6133_v23  ;;  %v12232_v34 = vpop.f32.mrf.mxu0  ;;  %v6046_v35 = vpop.f32.mrf.mxu1  ;;  %v6489_v32 = vpack.c.b16 %v6483_v49, %v6481_v53  ;;  %v6490_v8 = vpack.c.b16 %v6484_v24, %v6482_v62  ;;  %v5631_v23 = vmax.f32 %v5618_v38, 0.0  ;;  %v13480_v53 = vld [vmem:[#allocation25_spill] sm:$0xff] }
 0x878   : > { %v6047_v60 = vadd.f32 %v6046_v35, %v12183_v54  ;;  %v13481_v49 = vmax.f32 %v13480_v53, 0.0  ;;  %v5634_v53 = vmax.f32 %v5625_v25, 0.0 }
 0x879   : > { %v6366_v29 = vadd.f32 %v6302_v61, %v6223_v44  ;;  %v12236_v43 = vpop.f32.mrf.mxu2  ;;  %v5738_v0 = vpack.c.bf16 %v5632_v37, %v5631_v23 }
 0x87a   : > { %v6304_v14 = vadd.f32 %v13482_v20, %v13481_v49  ;;  %v6367_v13 = vadd.f32 %v6303_v48, %v6047_v60 }
 0x87b   : > { %v6427_v41 = vpack.c.bf16 %v6366_v29, %v6365_v12  ;;  %v13485_v29 = vld [vmem:[#allocation29_spill] sm:$0xff] }
 0x87d   : > { %v6486_v44 = vunpack.c.h.b16 %v6427_v41 }
 0x87e   : > { %v6224_v59 = vpop.f32.mrf.mxu3 }
 0x87f   : > { %v6225_v62 = vadd.f32 %v6224_v59, %v12199_v31  ;;  %v12248_v24 = vpop.f32.mrf.mxu0  ;;  %v6049_v3 = vpop.f32.mrf.mxu1  ;;  %v6485_v31 = vunpack.c.l.b16 %v6427_v41 }
 0x880   : > { %v6050_v54 = vadd.f32 %v6049_v3, %v12195_v40  ;;  %v13486_v40 = vld [vmem:[#allocation86_spill] sm:$0xff]  ;;  %v13489_v3 = vld [vmem:[#allocation107_spill] sm:$0xff] }
 0x881   : > { %v6368_v26 = vadd.f32 %v6304_v14, %v6225_v62  ;;  %v12253_v52 = vpop.f32.mrf.mxu2  ;;  %v6306_v38 = vadd.f32 %v13486_v40, %v13485_v29  ;;  %v13487_v14 = vld [vmem:[#allocation26_spill] sm:$0xff]  ;;  %v13495_v29 = vld [vmem:[#allocation120_spill] sm:$0xff] }
 0x882   : > { %v6369_v21 = vadd.f32 %v6305_v9, %v6050_v54  ;;  %6009 = vmatmul.bf16.gmra.mxu0 %v12101_v2  ;;  %6088 = vmatmul.bf16.gmra.mxu1 %v5738_v0  ;;  %v13488_v62 = vmax.f32 %v13487_v14, 0.0  ;;  %v13492_v9 = vld [vmem:[#allocation78_spill] sm:$0xff] }
 0x883   : > { %v6428_v61 = vpack.c.bf16 %v6368_v26, %v6367_v13  ;;  %6266 = vmatmul.bf16.gmra.mxu3 %v5738_v0  ;;  %v6308_v54 = vadd.f32 %v13492_v9, %v13491_v50  ;;  %v13500_v50 = vmax.f32 %v13499_v51, 0.0  ;;  %v13501_v9 = vld [vmem:[#allocation118_spill] sm:$0xff] }
 0x884   : > { %v6307_v28 = vadd.f32 %v13489_v3, %v13488_v62 }
 0x885   : > { %v6487_v35 = vunpack.c.l.b16 %v6428_v61  ;;  %v6488_v33 = vunpack.c.h.b16 %v6428_v61 }
 0x886   : > { %v6227_v12 = vpop.f32.mrf.mxu3  ;;  %6187 = vmatmul.bf16.gmra.mxu2 %v12101_v2  ;;  %v5623_v2 = vadd.f32 %v12175_v58, %v12057_v5 }
 0x887   : > { %v6228_v37 = vadd.f32 %v6227_v12, %v12209_v47  ;;  %v12260_v60 = vpop.f32.mrf.mxu0  ;;  %v6051_v23 = vpop.f32.mrf.mxu1  ;;  %v6491_v59 = vpack.c.b16 %v6487_v35, %v6485_v31  ;;  %v6492_v57 = vpack.c.b16 %v6488_v33, %v6486_v44 }
 0x888   : > { %v6052_v47 = vadd.f32 %v6051_v23, %v12203_v39  ;;  %v5633_v49 = vmax.f32 %v5623_v2, 0.0 }
 0x889   : > { %v6370_v56 = vadd.f32 %v6306_v38, %v6228_v37  ;;  %6515 = vmatpush.bf16.msrb.mxu0 %v6491_v59  ;;  %6544 = vmatpush.bf16.msrb.mxu1 %v6492_v57  ;;  %v12264_v41 = vpop.f32.mrf.mxu2  ;;  %v13496_v37 = vld [vmem:[#allocation33_spill] sm:$0xff]  ;;  %v13498_v59 = vld [vmem:[#allocation102_spill] sm:$0xff] }
 0x88a   : > { %v5740_v26 = vpack.c.bf16 %v5634_v53, %v5633_v49  ;;  %v13497_v23 = vmax.f32 %v13496_v37, 0.0  ;;  %v13507_v37 = vld [vmem:[#allocation37_spill] sm:$0xff] }
 0x88b   : > { %v6429_v48 = vpack.c.bf16 %v6370_v56, %v6369_v21  ;;  %v6371_v21 = vadd.f32 %v6307_v28, %v6052_v47 }
 0x88c   : > { %v6310_v57 = vadd.f32 %v13498_v59, %v13497_v23 }
 0x88d   : > { %6516 = vmatpush.bf16.msrb.mxu0 %v6489_v32  ;;  %6545 = vmatpush.bf16.msrb.mxu1 %v6490_v8  ;;  %v6587_v61 = vunpack.c.l.b16 %v6429_v48  ;;  %v6588_v35 = vunpack.c.h.b16 %v6429_v48  ;;  %v5692_v48 = vadd.f32 %v12117_v30, %v12028_v42  ;;  %v13504_v42 = vld [vmem:[#allocation128_spill] sm:$0xff] }
 0x88e   : > { %v6229_v20 = vpop.f32.mrf.mxu3 }
 0x88f   : > { %v6230_v0 = vadd.f32 %v6229_v20, %v12223_v1  ;;  %v12276_v13 = vpop.f32.mrf.mxu0  ;;  %v6054_v58 = vpop.f32.mrf.mxu1  ;;  %v13493_v1 = vld [vmem:[#allocation32_spill] sm:$0xff]  ;;  %v5710_v62 = vmax.f32 %v5692_v48, 0.0 }
 0x890   : > { %v6055_v31 = vadd.f32 %v6054_v58, %v12221_v6  ;;  %v13494_v12 = vmax.f32 %v13493_v1, 0.0 }
 0x891   : > { %v6372_v39 = vadd.f32 %v6308_v54, %v6230_v0  ;;  %v12278_v32 = vpop.f32.mrf.mxu2  ;;  %v6311_v54 = vadd.f32 %v13501_v9, %v13500_v50  ;;  %v13502_v0 = vld [vmem:[#allocation31_spill] sm:$0xff]  ;;  %v13511_v50 = vld [vmem:[#allocation114_spill] sm:$0xff] }
 0x892   : > { %6014 = vmatmul.bf16.gmra.mxu0 %v12124_v46  ;;  %6093 = vmatmul.bf16.gmra.mxu1 %v5740_v26  ;;  %v6309_v40 = vadd.f32 %v13495_v29, %v13494_v12  ;;  %v13503_v58 = vmax.f32 %v13502_v0, 0.0 }
 0x893   : > { %v6430_v8 = vpack.c.bf16 %v6372_v39, %v6371_v21  ;;  %6271 = vmatmul.bf16.gmra.mxu3 %v5740_v26 }
 0x894   : > { %v6373_v47 = vadd.f32 %v6309_v40, %v6055_v31  ;;  %v6312_v30 = vadd.f32 %v13504_v42, %v13503_v58 }
 0x895   : > { %v6589_v44 = vunpack.c.l.b16 %v6430_v8  ;;  %v6590_v33 = vunpack.c.h.b16 %v6430_v8 }
 0x896   : > { %v6232_v38 = vpop.f32.mrf.mxu3  ;;  %6192 = vmatmul.bf16.gmra.mxu2 %v12124_v46  ;;  %v5690_v46 = vadd.f32 %v12106_v7, %v12025_v22  ;;  %v13505_v22 = vld [vmem:[#allocation36_spill] sm:$0xff] }
 0x897   : > { %v6233_v25 = vadd.f32 %v6232_v38, %v12236_v43  ;;  %v12290_v56 = vpop.f32.mrf.mxu0  ;;  %v6056_v2 = vpop.f32.mrf.mxu1  ;;  %v6595_v6 = vpack.c.b16 %v6589_v44, %v6587_v61  ;;  %v6596_v53 = vpack.c.b16 %v6590_v33, %v6588_v35  ;;  %v13506_v7 = vld [vmem:[#allocation116_spill] sm:$0xff] }
 0x898   : > { %v6057_v3 = vadd.f32 %v6056_v2, %v12232_v34  ;;  %v5709_v43 = vmax.f32 %v5690_v46, 0.0  ;;  %v6313_v8 = vadd.f32 %v13506_v7, %v13505_v22  ;;  %v5695_v46 = vadd.f32 %v12133_v63, %v12035_v55 }
 0x899   : > { %v6374_v49 = vadd.f32 %v6310_v57, %v6233_v25  ;;  %v12294_v20 = vpop.f32.mrf.mxu2 }
 0x89a   : > { %v5745_v61 = vpack.c.bf16 %v5710_v62, %v5709_v43  ;;  %v6375_v31 = vadd.f32 %v6311_v54, %v6057_v3  ;;  %v5711_v3 = vmax.f32 %v5695_v46, 0.0  ;;  %v13514_v54 = vld [vmem:[#allocation103_spill] sm:$0xff]  ;;  %v13521_v46 = vld [vmem:[#allocation38_spill] sm:$0xff] }
 0x89b   : > { %v6431_v14 = vpack.c.bf16 %v6374_v49, %v6373_v47  ;;  %v5697_v47 = vadd.f32 %v12141_v36, %v12040_v18  ;;  %v13512_v36 = vld [vmem:[#allocation35_spill] sm:$0xff] }
 0x89c   : > { %v13513_v9 = vmax.f32 %v13512_v36, 0.0 }
 0x89d   : > { %v6592_v12 = vunpack.c.h.b16 %v6431_v14  ;;  %v5712_v62 = vmax.f32 %v5697_v47, 0.0 }
 0x89e   : > { %v6234_v28 = vpop.f32.mrf.mxu3  ;;  %v6316_v0 = vadd.f32 %v13514_v54, %v13513_v9  ;;  %v12372_v9 = vld [vmem:[%s12887_s11] sm:$0xff] }
 0x89f   : > { %v6235_v26 = vadd.f32 %v6234_v28, %v12253_v52  ;;  %v12306_v21 = vpop.f32.mrf.mxu0  ;;  %v6059_v39 = vpop.f32.mrf.mxu1  ;;  %v6591_v52 = vunpack.c.l.b16 %v6431_v14  ;;  %v13509_v28 = vld [vmem:[#allocation34_spill] sm:$0xff]  ;;  %v5747_v63 = vpack.c.bf16 %v5712_v62, %v5711_v3  ;;  %v13523_v62 = vld [vmem:[#allocation119_spill] sm:$0xff] }
 0x8a0   : > { %v6060_v34 = vadd.f32 %v6059_v39, %v12248_v24  ;;  %v13508_v24 = vld [vmem:[#allocation100_spill] sm:$0xff]  ;;  %v13510_v51 = vmax.f32 %v13509_v28, 0.0  ;;  %v13524_v3 = vld [vmem:[#allocation39_spill] sm:$0xff] }
 0x8a1   : > { %v6376_v44 = vadd.f32 %v6312_v30, %v6235_v26  ;;  %v12311_v35 = vpop.f32.mrf.mxu2  ;;  %v6314_v23 = vadd.f32 %v13508_v24, %v13507_v37  ;;  %v5702_v37 = vadd.f32 %v12173_v27, %v12052_v11  ;;  %v13526_v11 = vld [vmem:[#allocation101_spill] sm:$0xff] }
 0x8a2   : > { %v6377_v33 = vadd.f32 %v6313_v8, %v6060_v34  ;;  %6019 = vmatmul.bf16.gmra.mxu0 %v5745_v61  ;;  %6098 = vmatmul.bf16.gmra.mxu1 %v12143_v45  ;;  %v6315_v18 = vadd.f32 %v13511_v50, %v13510_v51  ;;  %v13515_v8 = vld [vmem:[#allocation40_spill] sm:$0xff] }
 0x8a3   : > { %v6432_v1 = vpack.c.bf16 %v6376_v44, %v6375_v31  ;;  %6276 = vmatmul.bf16.gmra.mxu3 %v12143_v45  ;;  %v13516_v34 = vmax.f32 %v13515_v8, 0.0 }
 0x8a5   : > { %v6593_v29 = vunpack.c.l.b16 %v6432_v1  ;;  %v6594_v40 = vunpack.c.h.b16 %v6432_v1 }
 0x8a6   : > { %v6237_v38 = vpop.f32.mrf.mxu3  ;;  %6197 = vmatmul.bf16.gmra.mxu2 %v5745_v61  ;;  %v13517_v61 = vld [vmem:[#allocation121_spill] sm:$0xff] }
 0x8a7   : > { %v6238_v59 = vadd.f32 %v6237_v38, %v12264_v41  ;;  %v12318_v57 = vpop.f32.mrf.mxu0  ;;  %v6061_v25 = vpop.f32.mrf.mxu1  ;;  %v6597_v2 = vpack.c.b16 %v6593_v29, %v6591_v52  ;;  %v6598_v48 = vpack.c.b16 %v6594_v40, %v6592_v12  ;;  %v6317_v31 = vadd.f32 %v13517_v61, %v13516_v34  ;;  %v13520_v52 = vld [vmem:[#allocation105_spill] sm:$0xff] }
 0x8a8   : > { %v6062_v41 = vadd.f32 %v6061_v25, %v12260_v60  ;;  %v5700_v25 = vadd.f32 %v12157_v10, %v12033_v15  ;;  %v13527_v15 = vld [vmem:[#allocation44_spill] sm:$0xff]  ;;  %v13528_v10 = vld [vmem:[#allocation117_spill] sm:$0xff] }
 0x8a9   : > { %v6378_v45 = vadd.f32 %v6314_v23, %v6238_v59  ;;  %6609 = vmatpush.bf16.msrb.mxu2 %v6597_v2  ;;  %6638 = vmatpush.bf16.msrb.mxu3 %v6598_v48  ;;  %v12322_v49 = vpop.f32.mrf.mxu2  ;;  %v5714_v48 = vmax.f32 %v5702_v37, 0.0  ;;  %v13531_v37 = vld [vmem:[#allocation42_spill] sm:$0xff] }
 0x8aa   : > { %v6379_v30 = vadd.f32 %v6315_v18, %v6062_v41  ;;  %v6321_v18 = vadd.f32 %v13528_v10, %v13527_v15  ;;  %v13540_v15 = vld [vmem:[#allocation49_spill] sm:$0xff] }
 0x8ab   : > { %v6433_v14 = vpack.c.bf16 %v6378_v45, %v6377_v33  ;;  %v13518_v33 = vld [vmem:[#allocation41_spill] sm:$0xff]  ;;  %v13541_v10 = vmax.f32 %v13540_v15, 0.0 }
 0x8ac   : > { %v13519_v1 = vmax.f32 %v13518_v33, 0.0 }
 0x8ad   : > { %6610 = vmatpush.bf16.msrb.mxu2 %v6595_v6  ;;  %6639 = vmatpush.bf16.msrb.mxu3 %v6596_v53  ;;  %v6682_v26 = vunpack.c.l.b16 %v6433_v14  ;;  %v6683_v7 = vunpack.c.h.b16 %v6433_v14  ;;  %v13522_v14 = vmax.f32 %v13521_v46, 0.0 }
 0x8ae   : > { %v6239_v43 = vpop.f32.mrf.mxu3  ;;  %v6318_v12 = vadd.f32 %v13520_v52, %v13519_v1  ;;  %v5705_v1 = vadd.f32 %v12179_v4, %v12057_v5 }
 0x8af   : > { %v6240_v58 = vadd.f32 %v6239_v43, %v12278_v32  ;;  %v12334_v42 = vpop.f32.mrf.mxu0  ;;  %v6064_v55 = vpop.f32.mrf.mxu1  ;;  %v6319_v41 = vadd.f32 %v13523_v62, %v13522_v14  ;;  %v13525_v43 = vmax.f32 %v13524_v3, 0.0 }
 0x8b0   : > { %v6065_v39 = vadd.f32 %v6064_v55, %v12276_v13 }
 0x8b1   : > { %v6380_v60 = vadd.f32 %v6316_v0, %v6240_v58  ;;  %v12336_v6 = vpop.f32.mrf.mxu2  ;;  %v6320_v27 = vadd.f32 %v13526_v11, %v13525_v43  ;;  %v13537_v43 = vld [vmem:[#allocation48_spill] sm:$0xff] }
 0x8b2   : > { %6024 = vmatmul.bf16.gmra.mxu0 %v5747_v63  ;;  %6103 = vmatmul.bf16.gmra.mxu1 %v12163_v17  ;;  %v6381_v24 = vadd.f32 %v6317_v31, %v6065_v39  ;;  %v13530_v39 = vld [vmem:[#allocation112_spill] sm:$0xff]  ;;  %v5707_v31 = vadd.f32 %v12193_v19, %v12066_v16  ;;  %v13534_v19 = vld [vmem:[#allocation43_spill] sm:$0xff]  ;;  %v13538_v11 = vmax.f32 %v13537_v43, 0.0 }
 0x8b3   : > { %v6434_v53 = vpack.c.bf16 %v6380_v60, %v6379_v30  ;;  %6281 = vmatmul.bf16.gmra.mxu3 %v12163_v17 }
 0x8b5   : > { %v6684_v22 = vunpack.c.l.b16 %v6434_v53  ;;  %v6685_v32 = vunpack.c.h.b16 %v6434_v53 }
 0x8b6   : > { %v6242_v44 = vpop.f32.mrf.mxu3  ;;  %6202 = vmatmul.bf16.gmra.mxu2 %v5747_v63 }
 0x8b7   : > { %v6243_v29 = vadd.f32 %v6242_v44, %v12294_v20  ;;  %v12348_v40 = vpop.f32.mrf.mxu0  ;;  %v6066_v17 = vpop.f32.mrf.mxu1  ;;  %v6690_v38 = vpack.c.b16 %v6684_v22, %v6682_v26  ;;  %v6691_v13 = vpack.c.b16 %v6685_v32, %v6683_v7  ;;  %v5713_v20 = vmax.f32 %v5700_v25, 0.0  ;;  %v13529_v26 = vld [vmem:[#allocation45_spill] sm:$0xff] }
 0x8b8   : > { %v6067_v47 = vadd.f32 %v6066_v17, %v12290_v56  ;;  %v6322_v22 = vadd.f32 %v13530_v39, %v13529_v26  ;;  %v13535_v25 = vmax.f32 %v13534_v19, 0.0  ;;  %v13543_v26 = vld [vmem:[#allocation46_spill] sm:$0xff] }
 0x8b9   : > { %v6382_v23 = vadd.f32 %v6318_v12, %v6243_v29  ;;  %v12352_v59 = vpop.f32.mrf.mxu2  ;;  %v5746_v36 = vpack.c.bf16 %v5714_v48, %v5713_v20  ;;  %v5716_v12 = vmax.f32 %v5707_v31, 0.0  ;;  %v5715_v29 = vmax.f32 %v5705_v1, 0.0 }
 0x8ba   : > { %v6383_v54 = vadd.f32 %v6319_v41, %v6067_v47  ;;  %v13544_v39 = vmax.f32 %v13543_v26, 0.0 }
 0x8bb   : > { %v6435_v2 = vpack.c.bf16 %v6382_v23, %v6381_v24  ;;  %v13532_v24 = vmax.f32 %v13531_v37, 0.0  ;;  %v13533_v23 = vld [vmem:[#allocation115_spill] sm:$0xff]  ;;  %v5748_v4 = vpack.c.bf16 %v5716_v12, %v5715_v29  ;;  %v13550_v12 = vld [vmem:[#allocation124_spill] sm:$0xff] }
 0x8bd   : > { %v6686_v63 = vunpack.c.l.b16 %v6435_v2  ;;  %v6687_v30 = vunpack.c.h.b16 %v6435_v2  ;;  %v6323_v16 = vadd.f32 %v13533_v23, %v13532_v24  ;;  %v13536_v2 = vld [vmem:[#allocation104_spill] sm:$0xff] }
 0x8be   : > { %v6244_v45 = vpop.f32.mrf.mxu3  ;;  %v6324_v48 = vadd.f32 %v13536_v2, %v13535_v25 }
 0x8bf   : > { %v6245_v28 = vadd.f32 %v6244_v45, %v12311_v35  ;;  %v12364_v51 = vpop.f32.mrf.mxu0  ;;  %v6069_v50 = vpop.f32.mrf.mxu1 }
 0x8c0   : > { %v6070_v56 = vadd.f32 %v6069_v50, %v12306_v21 }
 0x8c1   : > { %v6384_v0 = vadd.f32 %v6320_v27, %v6245_v28  ;;  %v12374_v58 = vpop.f32.mrf.mxu2  ;;  %v13539_v27 = vld [vmem:[#allocation122_spill] sm:$0xff] }
 0x8c2   : > { %v6385_v55 = vadd.f32 %v6321_v18, %v6070_v56  ;;  %6108 = vmatmul.bf16.gmra.mxu1 %v5746_v36  ;;  %8786 = vmatmul.msk.bf16.vlgmr.msrb.gmra.mxu0 %vm594_vm0, %v12372_v9  ;;  %v6325_v28 = vadd.f32 %v13539_v27, %v13538_v11  ;;  %v13542_v18 = vld [vmem:[#allocation110_spill] sm:$0xff] }
 0x8c3   : > { %v6436_v35 = vpack.c.bf16 %v6384_v0, %v6383_v54  ;;  %6286 = vmatmul.bf16.gmra.mxu3 %v5746_v36  ;;  %v6326_v56 = vadd.f32 %v13542_v18, %v13541_v10  ;;  %v13553_v11 = vld [vmem:[#allocation50_spill] sm:$0xff]  ;;  %v13558_v10 = vld [vmem:[#allocation131_spill] sm:$0xff] }
 0x8c4   : > { %v13554_v27 = vmax.f32 %v13553_v11, 0.0 }
 0x8c5   : > { %v6688_v21 = vunpack.c.l.b16 %v6436_v35  ;;  %v6689_v60 = vunpack.c.h.b16 %v6436_v35 }
 0x8c6   : > { %v6247_v53 = vpop.f32.mrf.mxu3  ;;  %8794 = vmatmul.msk.bf16.vlgmr.msrb.gmra.mxu2 %vm594_vm0, %v12372_v9 }
 0x8c7   : > { %v6248_v7 = vadd.f32 %v6247_v53, %v12322_v49  ;;  %v12383_v32 = vpop.f32.mrf.mxu0  ;;  %v6071_v8 = vpop.f32.mrf.mxu1  ;;  %v6692_v34 = vpack.c.b16 %v6688_v21, %v6686_v63  ;;  %v6693_v61 = vpack.c.b16 %v6689_v60, %v6687_v30 }
 0x8c8   : > { %v6072_v49 = vadd.f32 %v6071_v8, %v12318_v57  ;;  %v12404_v57 = vld [vmem:[%s12887_s11 + $0x8] sm:$0xff] }
 0x8c9   : > { %v6386_v44 = vadd.f32 %v6322_v22, %v6248_v7  ;;  %6704 = vmatpush.bf16.msra.mxu0 %v6692_v34  ;;  %6733 = vmatpush.bf16.msra.mxu1 %v6693_v61  ;;  %v12387_v33 = vpop.f32.mrf.mxu2  ;;  %v13545_v22 = vld [vmem:[#allocation123_spill] sm:$0xff] }
 0x8ca   : > { %v6327_v7 = vadd.f32 %v13545_v22, %v13544_v39  ;;  %v13546_v8 = vld [vmem:[#allocation47_spill] sm:$0xff] }
 0x8cb   : > { %v6437_v52 = vpack.c.bf16 %v6386_v44, %v6385_v55  ;;  %v13547_v34 = vmax.f32 %v13546_v8, 0.0  ;;  %v13559_v39 = vld [vmem:[#allocation59_spill] sm:$0xff] }
 0x8cc   : > { %v13560_v22 = vmax.f32 %v13559_v39, 0.0 }
 0x8cd   : > { %6705 = vmatpush.bf16.msra.mxu0 %v6690_v38  ;;  %6734 = vmatpush.bf16.msra.mxu1 %v6691_v13  ;;  %v6387_v38 = vadd.f32 %v6323_v16, %v6072_v49  ;;  %v6778_v41 = vunpack.c.h.b16 %v6437_v52 }
 0x8ce   : > { %v6249_v17 = vpop.f32.mrf.mxu3 }
 0x8cf   : > { %v6250_v47 = vadd.f32 %v6249_v17, %v12336_v6  ;;  %v12399_v20 = vpop.f32.mrf.mxu0  ;;  %v6074_v5 = vpop.f32.mrf.mxu1  ;;  %v6777_v6 = vunpack.c.l.b16 %v6437_v52  ;;  %v13549_v52 = vld [vmem:[#allocation52_spill] sm:$0xff] }
 0x8d0   : > { %v6075_v14 = vadd.f32 %v6074_v5, %v12334_v42  ;;  %v6329_v49 = vadd.f32 %v13550_v12, %v13549_v52 }
 0x8d1   : > { %v6388_v13 = vadd.f32 %v6324_v48, %v6250_v47  ;;  %v12406_v45 = vpop.f32.mrf.mxu2  ;;  %v13551_v48 = vld [vmem:[#allocation53_spill] sm:$0xff]  ;;  %v13552_v47 = vld [vmem:[#allocation130_spill] sm:$0xff] }
 0x8d2   : > { %6113 = vmatmul.bf16.gmra.mxu1 %v5748_v4  ;;  %8787 = vmatmul.msk.bf16.gmra.mxu0 %vm594_vm0, %v12404_v57  ;;  %v6389_v35 = vadd.f32 %v6325_v28, %v6075_v14  ;;  %v6330_v5 = vadd.f32 %v13552_v47, %v13551_v48  ;;  %v13555_v28 = vld [vmem:[#allocation125_spill] sm:$0xff] }
 0x8d3   : > { %v6438_v46 = vpack.c.bf16 %v6388_v13, %v6387_v38  ;;  %6291 = vmatmul.bf16.gmra.mxu3 %v5748_v4  ;;  %v13568_v47 = vld [vmem:[#allocation57_spill] sm:$0xff] }
 0x8d5   : > { %v6779_v62 = vunpack.c.l.b16 %v6438_v46  ;;  %v6780_v3 = vunpack.c.h.b16 %v6438_v46 }
 0x8d6   : > { %v6252_v50 = vpop.f32.mrf.mxu3  ;;  %8795 = vmatmul.msk.bf16.gmra.mxu2 %vm594_vm0, %v12404_v57 }
 0x8d7   : > { %v6253_v36 = vadd.f32 %v6252_v50, %v12352_v59  ;;  %v12420_v54 = vpop.f32.mrf.mxu0  ;;  %v6076_v42 = vpop.f32.mrf.mxu1  ;;  %v6785_v0 = vpack.c.b16 %v6779_v62, %v6777_v6  ;;  %v6786_v55 = vpack.c.b16 %v6780_v3, %v6778_v41  ;;  %v13548_v59 = vld [vmem:[#allocation129_spill] sm:$0xff]  ;;  %v6331_v50 = vadd.f32 %v13555_v28, %v13554_v27 }
 0x8d8   : > { %v6077_v60 = vadd.f32 %v6076_v42, %v12348_v40  ;;  %v6328_v61 = vadd.f32 %v13548_v59, %v13547_v34  ;;  %v12440_v40 = vld [vmem:[%s12887_s11 + $0x10] sm:$0xff] }
 0x8d9   : > { %v6390_v63 = vadd.f32 %v6326_v56, %v6253_v36  ;;  %v12422_v30 = vpop.f32.mrf.mxu2  ;;  %v13562_v59 = vld [vmem:[#allocation60_spill] sm:$0xff] }
 0x8da   : > { %v6391_v17 = vadd.f32 %v6327_v7, %v6077_v60  ;;  %v13561_v7 = vld [vmem:[#allocation126_spill] sm:$0xff] }
 0x8db   : > { %v6439_v21 = vpack.c.bf16 %v6390_v63, %v6389_v35  ;;  %v6333_v8 = vadd.f32 %v13561_v7, %v13560_v22  ;;  %v13575_v7 = vld [vmem:[#allocation64_spill] sm:$0xff] }
 0x8dd   : > { %v6782_v16 = vunpack.c.h.b16 %v6439_v21 }
 0x8de   : > { %v6254_v53 = vpop.f32.mrf.mxu3 }
 0x8df   : > { %v6255_v31 = vadd.f32 %v6254_v53, %v12374_v58  ;;  %v12432_v44 = vpop.f32.mrf.mxu0  ;;  %v6079_v1 = vpop.f32.mrf.mxu1 }
 0x8e0   : > { %v6080_v29 = vadd.f32 %v6079_v1, %v12364_v51  ;;  %v6781_v51 = vunpack.c.l.b16 %v6439_v21 }
 0x8e1   : > { %v6392_v37 = vadd.f32 %v6328_v61, %v6255_v31  ;;  %v6175_v24 = vpop.f32.mrf.mxu2  ;;  %v13563_v61 = vmax.f32 %v13562_v59, 0.0  ;;  %v13564_v31 = vld [vmem:[#allocation132_spill] sm:$0xff] }
 0x8e2   : > { %v6393_v23 = vadd.f32 %v6329_v49, %v6080_v29  ;;  %8790 = vmatmul.msk.bf16.vlgmr.msrb.gmra.mxu1 %vm594_vm0, %v12372_v9  ;;  %8788 = vmatmul.msk.bf16.gmra.mxu0 %vm594_vm0, %v12440_v40 }
 0x8e3   : > { %v6440_v58 = vpack.c.bf16 %v6392_v37, %v6391_v17  ;;  %8798 = vmatmul.msk.bf16.vlgmr.msrb.gmra.mxu3 %vm594_vm0, %v12372_v9  ;;  %v6334_v1 = vadd.f32 %v13564_v31, %v13563_v61  ;;  %v13580_v31 = vld [vmem:[#allocation135_spill] sm:$0xff] }
 0x8e5   : > { %v6783_v19 = vunpack.c.l.b16 %v6440_v58  ;;  %v6784_v25 = vunpack.c.h.b16 %v6440_v58 }
 0x8e6   : > { %v6257_v2 = vpop.f32.mrf.mxu3  ;;  %8796 = vmatmul.msk.bf16.gmra.mxu2 %vm594_vm0, %v12440_v40 }
 0x8e7   : > { %v6258_v4 = vadd.f32 %v6257_v2, %v12387_v33  ;;  %v12453_v38 = vpop.f32.mrf.mxu0  ;;  %v6081_v13 = vpop.f32.mrf.mxu1  ;;  %v6787_v46 = vpack.c.b16 %v6783_v19, %v6781_v51  ;;  %v6788_v6 = vpack.c.b16 %v6784_v25, %v6782_v16  ;;  %v13556_v33 = vld [vmem:[#allocation51_spill] sm:$0xff]  ;;  %v13565_v19 = vld [vmem:[#allocation56_spill] sm:$0xff] }
 0x8e8   : > { %v6082_v3 = vadd.f32 %v6081_v13, %v12383_v32  ;;  %v13557_v15 = vmax.f32 %v13556_v33, 0.0  ;;  %v12468_v32 = vld [vmem:[%s12887_s11 + $0x18] sm:$0xff]  ;;  %v13566_v25 = vmax.f32 %v13565_v19, 0.0  ;;  %v13567_v2 = vld [vmem:[#allocation127_spill] sm:$0xff] }
 0x8e9   : > { %v6394_v14 = vadd.f32 %v6330_v5, %v6258_v4  ;;  %6799 = vmatpush.bf16.msra.mxu2 %v6787_v46  ;;  %6828 = vmatpush.bf16.msra.mxu3 %v6788_v6  ;;  %v6178_v62 = vpop.f32.mrf.mxu2  ;;  %v13569_v5 = vmax.f32 %v13568_v47, 0.0  ;;  %v13570_v4 = vld [vmem:[#allocation133_spill] sm:$0xff] }
 0x8ea   : > { %v6332_v18 = vadd.f32 %v13558_v10, %v13557_v15  ;;  %v6335_v48 = vadd.f32 %v13567_v2, %v13566_v25  ;;  %v13581_v25 = vld [vmem:[#allocation74_spill] sm:$0xff] }
 0x8eb   : > { %v6441_v41 = vpack.c.bf16 %v6394_v14, %v6393_v23  ;;  %v13571_v14 = vld [vmem:[#allocation66_spill] sm:$0xff]  ;;  %v13582_v2 = vmax.f32 %v13581_v25, 0.0 }
 0x8ed   : > { %6800 = vmatpush.bf16.msra.mxu2 %v6785_v0  ;;  %6829 = vmatpush.bf16.msra.mxu3 %v6786_v55  ;;  %v6395_v0 = vadd.f32 %v6331_v50, %v6082_v3  ;;  %v6873_v53 = vunpack.c.h.b16 %v6441_v41 }
 0x8ee   : > { %v6259_v43 = vpop.f32.mrf.mxu3 }
 0x8ef   : > { %v6260_v56 = vadd.f32 %v6259_v43, %v12406_v45  ;;  %v12463_v36 = vpop.f32.mrf.mxu0  ;;  %v6084_v42 = vpop.f32.mrf.mxu1  ;;  %v6872_v45 = vunpack.c.l.b16 %v6441_v41  ;;  %v13572_v41 = vld [vmem:[#allocation62_spill] sm:$0xff] }
 0x8f0   : > { %v6085_v21 = vadd.f32 %v6084_v42, %v12399_v20  ;;  %v6337_v3 = vadd.f32 %v13572_v41, %v13571_v14 }
 0x8f1   : > { %v6396_v55 = vadd.f32 %v6332_v18, %v6260_v56  ;;  %v12470_v35 = vpop.f32.mrf.mxu2  ;;  %v13574_v56 = vld [vmem:[#allocation134_spill] sm:$0xff] }
 0x8f2   : > { %8791 = vmatmul.msk.bf16.gmra.mxu1 %vm594_vm0, %v12404_v57  ;;  %8789 = vmatmul.msk.bf16.gmra.mxu0 %vm594_vm0, %v12468_v32  ;;  %v6397_v17 = vadd.f32 %v6333_v8, %v6085_v21  ;;  %v13576_v8 = vmax.f32 %v13575_v7, 0.0 }
 0x8f3   : > { %v6442_v63 = vpack.c.bf16 %v6396_v55, %v6395_v0  ;;  %8799 = vmatmul.msk.bf16.gmra.mxu3 %vm594_vm0, %v12404_v57 }
 0x8f5   : > { %v6874_v60 = vunpack.c.l.b16 %v6442_v63  ;;  %v6875_v26 = vunpack.c.h.b16 %v6442_v63 }
 0x8f6   : > { %v6262_v34 = vpop.f32.mrf.mxu3  ;;  %8797 = vmatmul.msk.bf16.gmra.mxu2 %vm594_vm0, %v12468_v32 }
 0x8f7   : > { %v6263_v52 = vadd.f32 %v6262_v34, %v12422_v30  ;;  %v12488_v12 = vpop.f32.mrf.mxu0  ;;  %v6086_v20 = vpop.f32.mrf.mxu1  ;;  %v6880_v49 = vpack.c.b16 %v6874_v60, %v6872_v45  ;;  %v6881_v29 = vpack.c.b16 %v6875_v26, %v6873_v53  ;;  %v6336_v30 = vadd.f32 %v13570_v4, %v13569_v5  ;;  %v13577_v34 = vld [vmem:[#allocation63_spill] sm:$0xff] }
 0x8f8   : > { %v6087_v51 = vadd.f32 %v6086_v20, %v12420_v54  ;;  %v6339_v59 = vadd.f32 %v13577_v34, %v13576_v8  ;;  %v13584_v4 = vld [vmem:[#allocation75_spill] sm:$0xff] }
 0x8f9   : > { %v6398_v37 = vadd.f32 %v6334_v1, %v6263_v52  ;;  %v6183_v23 = vpop.f32.mrf.mxu2 }
 0x8fa   : > { %v6399_v11 = vadd.f32 %v6335_v48, %v6087_v51  ;;  %v13583_v48 = vld [vmem:[#allocation58_spill] sm:$0xff] }
 0x8fb   : > { %v6443_v58 = vpack.c.bf16 %v6398_v37, %v6397_v17  ;;  %v6341_v47 = vadd.f32 %v13583_v48, %v13582_v2  ;;  %v13597_v48 = vld [vmem:[#allocation79_spill] sm:$0xff] }
 0x8fd   : > { %v6877_v33 = vunpack.c.h.b16 %v6443_v58 }
 0x8fe   : > { %v6264_v16 = vpop.f32.mrf.mxu3 }
 0x8ff   : > { %v6265_v13 = vadd.f32 %v6264_v16, %v6175_v24  ;;  %v12497_v46 = vpop.f32.mrf.mxu0  ;;  %v6089_v6 = vpop.f32.mrf.mxu1  ;;  %v6876_v24 = vunpack.c.l.b16 %v6443_v58 }
 0x900   : > { %v6090_v43 = vadd.f32 %v6089_v6, %v12432_v44  ;;  %v13573_v44 = vld [vmem:[#allocation67_spill] sm:$0xff] }
 0x901   : > { %v6400_v54 = vadd.f32 %v6336_v30, %v6265_v13  ;;  %v6185_v27 = vpop.f32.mrf.mxu2  ;;  %v6338_v42 = vadd.f32 %v13574_v56, %v13573_v44  ;;  %v13585_v30 = vmax.f32 %v13584_v4, 0.0  ;;  %v13586_v13 = vld [vmem:[#allocation136_spill] sm:$0xff] }
 0x902   : > { %v6401_v28 = vadd.f32 %v6337_v3, %v6090_v43  ;;  %8792 = vmatmul.msk.bf16.gmra.mxu1 %vm594_vm0, %v12440_v40  ;;  %8818 = vmatmul.msk.bf16.vlgmr.msra.gmra.mxu0 %vm594_vm0, %v12372_v9  ;;  %v13590_v56 = vld [vmem:[#allocation72_spill] sm:$0xff] }
 0x903   : > { %v6444_v50 = vpack.c.bf16 %v6400_v54, %v6399_v11  ;;  %8800 = vmatmul.msk.bf16.gmra.mxu3 %vm594_vm0, %v12440_v40  ;;  %v6342_v6 = vadd.f32 %v13586_v13, %v13585_v30  ;;  %v13600_v4 = vld [vmem:[#allocation80_spill] sm:$0xff]  ;;  %v13602_v13 = vld [vmem:[#allocation139_spill] sm:$0xff] }
 0x904   : > { %v13601_v30 = vmax.f32 %v13600_v4, 0.0 }
 0x905   : > { %v6878_v15 = vunpack.c.l.b16 %v6444_v50  ;;  %v6879_v10 = vunpack.c.h.b16 %v6444_v50 }
 0x906   : > { %v6267_v18 = vpop.f32.mrf.mxu3  ;;  %8842 = vmatmul.msk.bf16.vlgmr.msra.gmra.mxu2 %vm594_vm0, %v12372_v9 }
 0x907   : > { %v6268_v0 = vadd.f32 %v6267_v18, %v6178_v62  ;;  %v12512_v55 = vpop.f32.mrf.mxu0  ;;  %v6091_v63 = vpop.f32.mrf.mxu1  ;;  %v6882_v45 = vpack.c.b16 %v6878_v15, %v6876_v24  ;;  %v6883_v21 = vpack.c.b16 %v6879_v10, %v6877_v33  ;;  %v13578_v62 = vld [vmem:[#allocation65_spill] sm:$0xff]  ;;  %v13587_v15 = vld [vmem:[#allocation71_spill] sm:$0xff] }
 0x908   : > { %v6092_v39 = vadd.f32 %v6091_v63, %v12453_v38  ;;  %v13579_v61 = vmax.f32 %v13578_v62, 0.0  ;;  %v13588_v10 = vmax.f32 %v13587_v15, 0.0  ;;  %v13589_v18 = vld [vmem:[#allocation61_spill] sm:$0xff] }
 0x909   : > { %v6402_v60 = vadd.f32 %v6338_v42, %v6268_v0  ;;  %6894 = vmatpush.bf16.msrb.mxu0 %v6882_v45  ;;  %6923 = vmatpush.bf16.msrb.mxu1 %v6883_v21  ;;  %v6188_v53 = vpop.f32.mrf.mxu2  ;;  %v13591_v42 = vmax.f32 %v13590_v56, 0.0  ;;  %v13592_v0 = vld [vmem:[#allocation137_spill] sm:$0xff] }
 0x90a   : > { %v6340_v1 = vadd.f32 %v13580_v31, %v13579_v61  ;;  %v6403_v37 = vadd.f32 %v6339_v59, %v6092_v39  ;;  %v6343_v44 = vadd.f32 %v13589_v18, %v13588_v10  ;;  %v13603_v10 = vld [vmem:[#allocation87_spill] sm:$0xff] }
 0x90b   : > { %v6445_v26 = vpack.c.bf16 %v6402_v60, %v6401_v28  ;;  %v13593_v60 = vld [vmem:[#allocation82_spill] sm:$0xff]  ;;  %v13604_v18 = vmax.f32 %v13603_v10, 0.0 }
 0x90d   : > { %6895 = vmatpush.bf16.msrb.mxu0 %v6880_v49  ;;  %6924 = vmatpush.bf16.msrb.mxu1 %v6881_v29  ;;  %v6967_v49 = vunpack.c.l.b16 %v6445_v26  ;;  %v6968_v16 = vunpack.c.h.b16 %v6445_v26  ;;  %v13594_v26 = vld [vmem:[#allocation54_spill] sm:$0xff] }
 0x90e   : > { %v6269_v22 = vpop.f32.mrf.mxu3  ;;  %v6345_v39 = vadd.f32 %v13594_v26, %v13593_v60 }
 0x90f   : > { %v6270_v52 = vadd.f32 %v6269_v22, %v12470_v35  ;;  %v12522_v20 = vpop.f32.mrf.mxu0  ;;  %v6094_v17 = vpop.f32.mrf.mxu1 }
 0x910   : > { %v6095_v35 = vadd.f32 %v6094_v17, %v12463_v36 }
 0x911   : > { %v6404_v58 = vadd.f32 %v6340_v1, %v6270_v52  ;;  %v12524_v51 = vpop.f32.mrf.mxu2  ;;  %v13596_v52 = vld [vmem:[#allocation138_spill] sm:$0xff] }
 0x912   : > { %8793 = vmatmul.msk.bf16.gmra.mxu1 %vm594_vm0, %v12468_v32  ;;  %8819 = vmatmul.msk.bf16.gmra.mxu0 %vm594_vm0, %v12404_v57  ;;  %v6405_v11 = vadd.f32 %v6341_v47, %v6095_v35  ;;  %v13598_v47 = vmax.f32 %v13597_v48, 0.0 }
 0x913   : > { %v6446_v38 = vpack.c.bf16 %v6404_v58, %v6403_v37  ;;  %8801 = vmatmul.msk.bf16.gmra.mxu3 %vm594_vm0, %v12468_v32 }
 0x915   : > { %v6969_v29 = vunpack.c.l.b16 %v6446_v38  ;;  %v6970_v19 = vunpack.c.h.b16 %v6446_v38 }
 0x916   : > { %v6272_v5 = vpop.f32.mrf.mxu3  ;;  %8843 = vmatmul.msk.bf16.gmra.mxu2 %vm594_vm0, %v12404_v57 }
 0x917   : > { %v6273_v14 = vadd.f32 %v6272_v5, %v6183_v23  ;;  %v12541_v41 = vpop.f32.mrf.mxu0  ;;  %v6096_v3 = vpop.f32.mrf.mxu1  ;;  %v6975_v36 = vpack.c.b16 %v6969_v29, %v6967_v49  ;;  %v6976_v43 = vpack.c.b16 %v6970_v19, %v6968_v16  ;;  %v6344_v23 = vadd.f32 %v13592_v0, %v13591_v42  ;;  %v13599_v5 = vld [vmem:[#allocation55_spill] sm:$0xff]  ;;  %v13606_v0 = vld [vmem:[#allocation89_spill] sm:$0xff] }
 0x918   : > { %v6097_v24 = vadd.f32 %v6096_v3, %v12488_v12 }
 0x919   : > { %v6406_v54 = vadd.f32 %v6342_v6, %v6273_v14  ;;  %v6193_v28 = vpop.f32.mrf.mxu2  ;;  %v6348_v6 = vadd.f32 %v13602_v13, %v13601_v30 }
 0x91a   : > { %v6407_v7 = vadd.f32 %v6343_v44, %v6097_v24  ;;  %v13605_v44 = vld [vmem:[#allocation68_spill] sm:$0xff] }
 0x91b   : > { %v6447_v50 = vpack.c.bf16 %v6406_v54, %v6405_v11  ;;  %v6349_v56 = vadd.f32 %v13605_v44, %v13604_v18  ;;  %v13619_v44 = vld [vmem:[#allocation92_spill] sm:$0xff] }
 0x91d   : > { %v6972_v62 = vunpack.c.h.b16 %v6447_v50 }
 0x91e   : > { %v6274_v33 = vpop.f32.mrf.mxu3 }
 0x91f   : > { %v6275_v63 = vadd.f32 %v6274_v33, %v6185_v27  ;;  %v12550_v45 = vpop.f32.mrf.mxu0  ;;  %v6099_v21 = vpop.f32.mrf.mxu1  ;;  %v6971_v27 = vunpack.c.l.b16 %v6447_v50 }
 0x920   : > { %v6100_v22 = vadd.f32 %v6099_v21, %v12497_v46  ;;  %v13595_v46 = vld [vmem:[#allocation83_spill] sm:$0xff] }
 0x921   : > { %v6408_v12 = vadd.f32 %v6344_v23, %v6275_v63  ;;  %v6195_v8 = vpop.f32.mrf.mxu2  ;;  %v6346_v17 = vadd.f32 %v13596_v52, %v13595_v46  ;;  %v13607_v23 = vmax.f32 %v13606_v0, 0.0  ;;  %v13608_v63 = vld [vmem:[#allocation140_spill] sm:$0xff]  ;;  %v13612_v52 = vld [vmem:[#allocation90_spill] sm:$0xff]  ;;  %v13622_v0 = vld [vmem:[#allocation93_spill] sm:$0xff] }
 0x922   : > { %v6409_v34 = vadd.f32 %v6345_v39, %v6100_v22  ;;  %8822 = vmatmul.msk.bf16.vlgmr.msra.gmra.mxu1 %vm594_vm0, %v12372_v9  ;;  %8820 = vmatmul.msk.bf16.gmra.mxu0 %vm594_vm0, %v12440_v40 }
 0x923   : > { %v6448_v59 = vpack.c.bf16 %v6408_v12, %v6407_v7  ;;  %8846 = vmatmul.msk.bf16.vlgmr.msra.gmra.mxu3 %vm594_vm0, %v12372_v9  ;;  %v6350_v21 = vadd.f32 %v13608_v63, %v13607_v23  ;;  %v13623_v23 = vmax.f32 %v13622_v0, 0.0  ;;  %v13624_v63 = vld [vmem:[#allocation143_spill] sm:$0xff] }
 0x925   : > { %v6973_v61 = vunpack.c.l.b16 %v6448_v59  ;;  %v6974_v31 = vunpack.c.h.b16 %v6448_v59 }
 0x926   : > { %v6277_v1 = vpop.f32.mrf.mxu3  ;;  %8844 = vmatmul.msk.bf16.gmra.mxu2 %vm594_vm0, %v12440_v40 }
 0x927   : > { %v6278_v37 = vadd.f32 %v6277_v1, %v6188_v53  ;;  %v12565_v58 = vpop.f32.mrf.mxu0  ;;  %v6101_v38 = vpop.f32.mrf.mxu1  ;;  %v6977_v49 = vpack.c.b16 %v6973_v61, %v6971_v27  ;;  %v6978_v35 = vpack.c.b16 %v6974_v31, %v6972_v62  ;;  %v6347_v53 = vadd.f32 %v13599_v5, %v13598_v47  ;;  %v13609_v61 = vld [vmem:[#allocation88_spill] sm:$0xff]  ;;  %v13611_v1 = vld [vmem:[#allocation81_spill] sm:$0xff] }
 0x928   : > { %v6102_v25 = vadd.f32 %v6101_v38, %v12512_v55  ;;  %v13610_v31 = vmax.f32 %v13609_v61, 0.0 }
 0x929   : > { %v6410_v29 = vadd.f32 %v6346_v17, %v6278_v37  ;;  %6989 = vmatpush.bf16.msrb.mxu2 %v6977_v49  ;;  %7018 = vmatpush.bf16.msrb.mxu3 %v6978_v35  ;;  %v12567_v16 = vpop.f32.mrf.mxu2  ;;  %v13614_v17 = vld [vmem:[#allocation141_spill] sm:$0xff] }
 0x92a   : > { %v6411_v54 = vadd.f32 %v6347_v53, %v6102_v25  ;;  %v6351_v46 = vadd.f32 %v13611_v1, %v13610_v31  ;;  %v13625_v31 = vld [vmem:[#allocation98_spill] sm:$0xff] }
 0x92b   : > { %v6449_v19 = vpack.c.bf16 %v6410_v29, %v6409_v34  ;;  %v13615_v29 = vld [vmem:[#allocation94_spill] sm:$0xff]  ;;  %v13626_v1 = vmax.f32 %v13625_v31, 0.0 }
 0x92d   : > { %6990 = vmatpush.bf16.msrb.mxu2 %v6975_v36  ;;  %7019 = vmatpush.bf16.msrb.mxu3 %v6976_v43  ;;  %v7062_v36 = vunpack.c.l.b16 %v6449_v19  ;;  %v7063_v33 = vunpack.c.h.b16 %v6449_v19  ;;  %v13616_v19 = vld [vmem:[#allocation77_spill] sm:$0xff] }
 0x92e   : > { %v6279_v2 = vpop.f32.mrf.mxu3  ;;  %v6353_v25 = vadd.f32 %v13616_v19, %v13615_v29 }
 0x92f   : > { %v6280_v14 = vadd.f32 %v6279_v2, %v12524_v51  ;;  %v12577_v3 = vpop.f32.mrf.mxu0  ;;  %v6104_v11 = vpop.f32.mrf.mxu1 }
 0x930   : > { %v6105_v51 = vadd.f32 %v6104_v11, %v12522_v20 }
 0x931   : > { %v6412_v50 = vadd.f32 %v6348_v6, %v6280_v14  ;;  %v12579_v24 = vpop.f32.mrf.mxu2  ;;  %v13617_v6 = vld [vmem:[#allocation95_spill] sm:$0xff]  ;;  %v13618_v14 = vld [vmem:[#allocation142_spill] sm:$0xff] }
 0x932   : > { %8823 = vmatmul.msk.bf16.gmra.mxu1 %vm594_vm0, %v12404_v57  ;;  %8821 = vmatmul.msk.bf16.gmra.mxu0 %vm594_vm0, %v12468_v32  ;;  %v6413_v7 = vadd.f32 %v6349_v56, %v6105_v51  ;;  %v6354_v11 = vadd.f32 %v13618_v14, %v13617_v6  ;;  %v13621_v56 = vld [vmem:[#allocation76_spill] sm:$0xff]  ;;  %v13636_v14 = vld [vmem:[#allocation145_spill] sm:$0xff] }
 0x933   : > { %v6450_v55 = vpack.c.bf16 %v6412_v50, %v6411_v54  ;;  %8847 = vmatmul.msk.bf16.gmra.mxu3 %vm594_vm0, %v12404_v57 }
 0x935   : > { %v7064_v43 = vunpack.c.l.b16 %v6450_v55  ;;  %v7065_v15 = vunpack.c.h.b16 %v6450_v55 }
 0x936   : > { %v6282_v42 = vpop.f32.mrf.mxu3  ;;  %8845 = vmatmul.msk.bf16.gmra.mxu2 %vm594_vm0, %v12468_v32 }
 0x937   : > { %v6283_v60 = vadd.f32 %v6282_v42, %v6193_v28  ;;  %v12596_v26 = vpop.f32.mrf.mxu0  ;;  %v6106_v20 = vpop.f32.mrf.mxu1  ;;  %v7070_v39 = vpack.c.b16 %v7064_v43, %v7062_v36  ;;  %v7071_v22 = vpack.c.b16 %v7065_v15, %v7063_v33  ;;  %v13613_v28 = vmax.f32 %v13612_v52, 0.0 }
 0x938   : > { %v6107_v27 = vadd.f32 %v6106_v20, %v12541_v41 }
 0x939   : > { %v6414_v12 = vadd.f32 %v6350_v21, %v6283_v60  ;;  %v12598_v34 = vpop.f32.mrf.mxu2  ;;  %v6352_v37 = vadd.f32 %v13614_v17, %v13613_v28  ;;  %v6356_v21 = vadd.f32 %v13624_v63, %v13623_v23  ;;  %v13628_v17 = vld [vmem:[#allocation99_spill] sm:$0xff] }
 0x93a   : > { %v6415_v41 = vadd.f32 %v6351_v46, %v6107_v27  ;;  %v13627_v46 = vld [vmem:[#allocation73_spill] sm:$0xff] }
 0x93b   : > { %v6451_v59 = vpack.c.bf16 %v6414_v12, %v6413_v7  ;;  %v6357_v52 = vadd.f32 %v13627_v46, %v13626_v1 }
 0x93d   : > { %v7067_v53 = vunpack.c.h.b16 %v6451_v59 }
 0x93e   : > { %v6284_v62 = vpop.f32.mrf.mxu3 }
 0x93f   : > { %v6285_v38 = vadd.f32 %v6284_v62, %v6195_v8  ;;  %v6109_v49 = vpop.f32.mrf.mxu1  ;;  %v6518_v35 = vpop.f32.mrf.mxu0 }
 0x940   : > { %v6110_v2 = vadd.f32 %v6109_v49, %v12550_v45  ;;  %6567 = vst [vmem:[%s12611_s14] sm:$0xff] %v6518_v35  ;;  %v7066_v45 = vunpack.c.l.b16 %v6451_v59 }
 0x941   : > { %v6416_v48 = vadd.f32 %v6352_v37, %v6285_v38  ;;  %v12614_v47 = vpop.f32.mrf.mxu2  ;;  %v13629_v37 = vmax.f32 %v13628_v17, 0.0  ;;  %v13630_v38 = vld [vmem:[#allocation144_spill] sm:$0xff] }
 0x942   : > { %v6417_v5 = vadd.f32 %v6353_v25, %v6110_v2  ;;  %8824 = vmatmul.msk.bf16.gmra.mxu1 %vm594_vm0, %v12440_v40  ;;  %8866 = vmatmul.msk.bf16.vlgmr.msrb.gmra.mxu0 %vm594_vm0, %v12372_v9 }
 0x943   : > { %v6452_v8 = vpack.c.bf16 %v6416_v48, %v6415_v41  ;;  %8848 = vmatmul.msk.bf16.gmra.mxu3 %vm594_vm0, %v12440_v40  ;;  %v6358_v49 = vadd.f32 %v13630_v38, %v13629_v37 }
 0x945   : > { %v7068_v4 = vunpack.c.l.b16 %v6452_v8  ;;  %v7069_v30 = vunpack.c.h.b16 %v6452_v8 }
 0x946   : > { %v6287_v13 = vpop.f32.mrf.mxu3  ;;  %8890 = vmatmul.msk.bf16.vlgmr.msrb.gmra.mxu2 %vm594_vm0, %v12372_v9 }
 0x947   : > { %v6288_v54 = vadd.f32 %v6287_v13, %v12567_v16  ;;  %v6111_v50 = vpop.f32.mrf.mxu1  ;;  %v7072_v55 = vpack.c.b16 %v7068_v4, %v7066_v45  ;;  %v7073_v36 = vpack.c.b16 %v7069_v30, %v7067_v53  ;;  %v6520_v51 = vpop.f32.mrf.mxu0  ;;  %v13620_v16 = vmax.f32 %v13619_v44, 0.0  ;;  %v13631_v53 = vld [vmem:[#allocation96_spill] sm:$0xff]  ;;  %v13633_v30 = vld [vmem:[#allocation70_spill] sm:$0xff]  ;;  %v13634_v13 = vld [vmem:[#allocation97_spill] sm:$0xff] }
 0x948   : > { %6569 = vst [vmem:[%s12611_s14 + $0x10] sm:$0xff] %v6520_v51  ;;  %v6112_v10 = vadd.f32 %v6111_v50, %v12565_v58  ;;  %v13632_v4 = vmax.f32 %v13631_v53, 0.0  ;;  %v13635_v6 = vmax.f32 %v13634_v13, 0.0 }
 0x949   : > { %v6418_v43 = vadd.f32 %v6354_v11, %v6288_v54  ;;  %7084 = vmatpush.bf16.msra.mxu0 %v7072_v55  ;;  %7113 = vmatpush.bf16.msra.mxu1 %v7073_v36  ;;  %v6612_v33 = vpop.f32.mrf.mxu2  ;;  %v6355_v42 = vadd.f32 %v13621_v56, %v13620_v16 }
 0x94a   : > { %8802 = vst [vmem:[%s12611_s14 + $0x80] sm:$0xff] %v6612_v33  ;;  %v6360_v11 = vadd.f32 %v13636_v14, %v13635_v6 }
 0x94b   : > { %v6453_v15 = vpack.c.bf16 %v6418_v43, %v6417_v5  ;;  %v6419_v12 = vadd.f32 %v6355_v42, %v6112_v10 }
 0x94d   : > { %7085 = vmatpush.bf16.msra.mxu0 %v7070_v39  ;;  %7114 = vmatpush.bf16.msra.mxu1 %v7071_v22  ;;  %v7157_v39 = vunpack.c.l.b16 %v6453_v15  ;;  %v7158_v62 = vunpack.c.h.b16 %v6453_v15 }
 0x94e   : > { %v6289_v18 = vpop.f32.mrf.mxu3 }
 0x94f   : > { %v6290_v60 = vadd.f32 %v6289_v18, %v12579_v24  ;;  %v6114_v20 = vpop.f32.mrf.mxu1  ;;  %v6523_v7 = vpop.f32.mrf.mxu0 }
 0x950   : > { %6571 = vst [vmem:[%s12611_s14 + $0x20] sm:$0xff] %v6523_v7  ;;  %v6115_v24 = vadd.f32 %v6114_v20, %v12577_v3 }
 0x951   : > { %v6420_v59 = vadd.f32 %v6356_v21, %v6290_v60  ;;  %v6614_v27 = vpop.f32.mrf.mxu2 }
 0x952   : > { %8825 = vmatmul.msk.bf16.gmra.mxu1 %vm594_vm0, %v12468_v32  ;;  %8804 = vst [vmem:[%s12611_s14 + $0x90] sm:$0xff] %v6614_v27  ;;  %8867 = vmatmul.msk.bf16.gmra.mxu0 %vm594_vm0, %v12404_v57  ;;  %v6421_v2 = vadd.f32 %v6357_v52, %v6115_v24 }
 0x953   : > { %v6454_v58 = vpack.c.bf16 %v6420_v59, %v6419_v12  ;;  %8849 = vmatmul.msk.bf16.gmra.mxu3 %vm594_vm0, %v12468_v32 }
 0x955   : > { %v7159_v22 = vunpack.c.l.b16 %v6454_v58  ;;  %v7160_v61 = vunpack.c.h.b16 %v6454_v58 }
 0x956   : > { %v6292_v28 = vpop.f32.mrf.mxu3  ;;  %8891 = vmatmul.msk.bf16.gmra.mxu2 %vm594_vm0, %v12404_v57 }
 0x957   : > { %v6293_v35 = vadd.f32 %v6292_v28, %v12598_v34  ;;  %v6116_v29 = vpop.f32.mrf.mxu1  ;;  %v7165_v3 = vpack.c.b16 %v7159_v22, %v7157_v39  ;;  %v7166_v19 = vpack.c.b16 %v7160_v61, %v7158_v62  ;;  %v6525_v25 = vpop.f32.mrf.mxu0  ;;  %v6359_v34 = vadd.f32 %v13633_v30, %v13632_v4 }
 0x958   : > { %6573 = vst [vmem:[%s12611_s14 + $0x30] sm:$0xff] %v6525_v25  ;;  %v6117_v8 = vadd.f32 %v6116_v29, %v12596_v26 }
 0x959   : > { %v6422_v41 = vadd.f32 %v6358_v49, %v6293_v35  ;;  %v6617_v48 = vpop.f32.mrf.mxu2 }
 0x95a   : > { %8806 = vst [vmem:[%s12611_s14 + $0xa0] sm:$0xff] %v6617_v48  ;;  %v6423_v36 = vadd.f32 %v6359_v34, %v6117_v8 }
 0x95b   : > { %v6455_v5 = vpack.c.bf16 %v6422_v41, %v6421_v2 }
 0x95d   : > { %v7162_v33 = vunpack.c.h.b16 %v6455_v5 }
 0x95e   : > { %v6294_v45 = vpop.f32.mrf.mxu3 }
 0x95f   : > { %v6295_v54 = vadd.f32 %v6294_v45, %v12614_v47  ;;  %v6547_v50 = vpop.f32.mrf.mxu1  ;;  %v6528_v55 = vpop.f32.mrf.mxu0  ;;  %v7161_v47 = vunpack.c.l.b16 %v6455_v5 }
 0x960   : > { %6568 = vst [vmem:[%s12611_s14 + $0x8] sm:$0xff] %v6547_v50 }
 0x961   : > { %v6424_v51 = vadd.f32 %v6360_v11, %v6295_v54  ;;  %v6619_v43 = vpop.f32.mrf.mxu2  ;;  %6575 = vst [vmem:[%s12611_s14 + $0x40] sm:$0xff] %v6528_v55 }
 0x962   : > { %8870 = vmatmul.msk.bf16.vlgmr.msrb.gmra.mxu1 %vm594_vm0, %v12372_v9  ;;  %8808 = vst [vmem:[%s12611_s14 + $0xb0] sm:$0xff] %v6619_v43  ;;  %8868 = vmatmul.msk.bf16.gmra.mxu0 %vm594_vm0, %v12440_v40 }
 0x963   : > { %v6456_v26 = vpack.c.bf16 %v6424_v51, %v6423_v36  ;;  %8894 = vmatmul.msk.bf16.vlgmr.msrb.gmra.mxu3 %vm594_vm0, %v12372_v9 }
 0x965   : > { %v7163_v15 = vunpack.c.l.b16 %v6456_v26  ;;  %v7164_v10 = vunpack.c.h.b16 %v6456_v26 }
 0x966   : > { %v6641_v18 = vpop.f32.mrf.mxu3  ;;  %8892 = vmatmul.msk.bf16.gmra.mxu2 %vm594_vm0, %v12440_v40 }
 0x967   : > { %v7167_v44 = vpack.c.b16 %v7163_v15, %v7161_v47  ;;  %v7168_v16 = vpack.c.b16 %v7164_v10, %v7162_v33  ;;  %8803 = vst [vmem:[%s12611_s14 + $0x88] sm:$0xff] %v6641_v18  ;;  %v6549_v56 = vpop.f32.mrf.mxu1  ;;  %v6530_v42 = vpop.f32.mrf.mxu0 }
 0x968   : > { %6570 = vst [vmem:[%s12611_s14 + $0x18] sm:$0xff] %v6549_v56 }
 0x969   : > { %7179 = vmatpush.bf16.msra.mxu2 %v7167_v44  ;;  %7208 = vmatpush.bf16.msra.mxu3 %v7168_v16  ;;  %v6622_v0 = vpop.f32.mrf.mxu2  ;;  %6577 = vst [vmem:[%s12611_s14 + $0x50] sm:$0xff] %v6530_v42 }
 0x96a   : > { %8810 = vst [vmem:[%s12611_s14 + $0xc0] sm:$0xff] %v6622_v0 }
 0x96d   : > { %7180 = vmatpush.bf16.msra.mxu2 %v7165_v3  ;;  %7209 = vmatpush.bf16.msra.mxu3 %v7166_v19 }
 0x96e   : > { %v6643_v23 = vpop.f32.mrf.mxu3 }
 0x96f   : > { %8805 = vst [vmem:[%s12611_s14 + $0x98] sm:$0xff] %v6643_v23  ;;  %v6552_v63 = vpop.f32.mrf.mxu1  ;;  %v6533_v21 = vpop.f32.mrf.mxu0 }
 0x970   : > { %6572 = vst [vmem:[%s12611_s14 + $0x28] sm:$0xff] %v6552_v63 }
 0x971   : > { %v6624_v60 = vpop.f32.mrf.mxu2  ;;  %6579 = vst [vmem:[%s12611_s14 + $0x60] sm:$0xff] %v6533_v21 }
 0x972   : > { %8871 = vmatmul.msk.bf16.gmra.mxu1 %vm594_vm0, %v12404_v57  ;;  %8812 = vst [vmem:[%s12611_s14 + $0xd0] sm:$0xff] %v6624_v60  ;;  %8869 = vmatmul.msk.bf16.gmra.mxu0 %vm594_vm0, %v12468_v32 }
 0x973   : > { %8895 = vmatmul.msk.bf16.gmra.mxu3 %vm594_vm0, %v12404_v57 }
 0x976   : > { %v6646_v20 = vpop.f32.mrf.mxu3  ;;  %8893 = vmatmul.msk.bf16.gmra.mxu2 %vm594_vm0, %v12468_v32 }
 0x977   : > { %8807 = vst [vmem:[%s12611_s14 + $0xa8] sm:$0xff] %v6646_v20  ;;  %v6554_v7 = vpop.f32.mrf.mxu1  ;;  %v6535_v12 = vpop.f32.mrf.mxu0 }
 0x978   : > { %6574 = vst [vmem:[%s12611_s14 + $0x38] sm:$0xff] %v6554_v7 }
 0x979   : > { %v6627_v59 = vpop.f32.mrf.mxu2  ;;  %6581 = vst [vmem:[%s12611_s14 + $0x70] sm:$0xff] %v6535_v12 }
 0x97a   : > { %8814 = vst [vmem:[%s12611_s14 + $0xe0] sm:$0xff] %v6627_v59 }
 0x97e   : > { %v6648_v27 = vpop.f32.mrf.mxu3 }
 0x97f   : > { %8809 = vst [vmem:[%s12611_s14 + $0xb8] sm:$0xff] %v6648_v27  ;;  %v6557_v58 = vpop.f32.mrf.mxu1  ;;  %v6707_v39 = vpop.f32.mrf.mxu0 }
 0x980   : > { %6576 = vst [vmem:[%s12611_s14 + $0x48] sm:$0xff] %v6557_v58 }
 0x981   : > { %v6629_v24 = vpop.f32.mrf.mxu2  ;;  %8826 = vst [vmem:[%s12611_s14 + $0x100] sm:$0xff] %v6707_v39 }
 0x982   : > { %8872 = vmatmul.msk.bf16.gmra.mxu1 %vm594_vm0, %v12440_v40  ;;  %8816 = vst [vmem:[%s12611_s14 + $0xf0] sm:$0xff] %v6629_v24  ;;  %8914 = vmatmul.msk.bf16.vlgmr.msra.gmra.mxu0 %vm594_vm0, %v12372_v9 }
 0x983   : > { %8896 = vmatmul.msk.bf16.gmra.mxu3 %vm594_vm0, %v12440_v40 }
 0x986   : > { %v6651_v22 = vpop.f32.mrf.mxu3  ;;  %8938 = vmatmul.msk.bf16.vlgmr.msra.gmra.mxu2 %vm594_vm0, %v12372_v9 }
 0x987   : > { %8811 = vst [vmem:[%s12611_s14 + $0xc8] sm:$0xff] %v6651_v22  ;;  %v6559_v62 = vpop.f32.mrf.mxu1  ;;  %v6709_v61 = vpop.f32.mrf.mxu0 }
 0x988   : > { %6578 = vst [vmem:[%s12611_s14 + $0x58] sm:$0xff] %v6559_v62 }
 0x989   : > { %v6802_v31 = vpop.f32.mrf.mxu2  ;;  %8828 = vst [vmem:[%s12611_s14 + $0x110] sm:$0xff] %v6709_v61 }
 0x98a   : > { %8850 = vst [vmem:[%s12611_s14 + $0x180] sm:$0xff] %v6802_v31 }
 0x98e   : > { %v6653_v1 = vpop.f32.mrf.mxu3 }
 0x98f   : > { %8813 = vst [vmem:[%s12611_s14 + $0xd8] sm:$0xff] %v6653_v1  ;;  %v6562_v46 = vpop.f32.mrf.mxu1  ;;  %v6712_v52 = vpop.f32.mrf.mxu0 }
 0x990   : > { %6580 = vst [vmem:[%s12611_s14 + $0x68] sm:$0xff] %v6562_v46 }
 0x991   : > { %v6804_v28 = vpop.f32.mrf.mxu2  ;;  %8830 = vst [vmem:[%s12611_s14 + $0x120] sm:$0xff] %v6712_v52 }
 0x992   : > { %8873 = vmatmul.msk.bf16.gmra.mxu1 %vm594_vm0, %v12468_v32  ;;  %8852 = vst [vmem:[%s12611_s14 + $0x190] sm:$0xff] %v6804_v28  ;;  %8915 = vmatmul.msk.bf16.gmra.mxu0 %vm594_vm0, %v12404_v57 }
 0x993   : > { %8897 = vmatmul.msk.bf16.gmra.mxu3 %vm594_vm0, %v12468_v32 }
 0x996   : > { %v6656_v17 = vpop.f32.mrf.mxu3  ;;  %8939 = vmatmul.msk.bf16.gmra.mxu2 %vm594_vm0, %v12404_v57 }
 0x997   : > { %8815 = vst [vmem:[%s12611_s14 + $0xe8] sm:$0xff] %v6656_v17  ;;  %v6564_v37 = vpop.f32.mrf.mxu1  ;;  %v6714_v38 = vpop.f32.mrf.mxu0 }
 0x998   : > { %6582 = vst [vmem:[%s12611_s14 + $0x78] sm:$0xff] %v6564_v37 }
 0x999   : > { %v6807_v49 = vpop.f32.mrf.mxu2  ;;  %8832 = vst [vmem:[%s12611_s14 + $0x130] sm:$0xff] %v6714_v38 }
 0x99a   : > { %8854 = vst [vmem:[%s12611_s14 + $0x1a0] sm:$0xff] %v6807_v49 }
 0x99e   : > { %v6658_v35 = vpop.f32.mrf.mxu3 }
 0x99f   : > { %8817 = vst [vmem:[%s12611_s14 + $0xf8] sm:$0xff] %v6658_v35  ;;  %v6736_v29 = vpop.f32.mrf.mxu1  ;;  %v6717_v3 = vpop.f32.mrf.mxu0 }
 0x9a0   : > { %8827 = vst [vmem:[%s12611_s14 + $0x108] sm:$0xff] %v6736_v29 }
 0x9a1   : > { %v6809_v19 = vpop.f32.mrf.mxu2  ;;  %8834 = vst [vmem:[%s12611_s14 + $0x140] sm:$0xff] %v6717_v3 }
 0x9a2   : > { %8918 = vmatmul.msk.bf16.vlgmr.msra.gmra.mxu1 %vm594_vm0, %v12372_v9  ;;  %8856 = vst [vmem:[%s12611_s14 + $0x1b0] sm:$0xff] %v6809_v19  ;;  %8916 = vmatmul.msk.bf16.gmra.mxu0 %vm594_vm0, %v12440_v40 }
 0x9a3   : > { %8942 = vmatmul.msk.bf16.vlgmr.msra.gmra.mxu3 %vm594_vm0, %v12372_v9 }
 0x9a6   : > { %v6831_v25 = vpop.f32.mrf.mxu3  ;;  %8940 = vmatmul.msk.bf16.gmra.mxu2 %vm594_vm0, %v12440_v40 }
 0x9a7   : > { %8851 = vst [vmem:[%s12611_s14 + $0x188] sm:$0xff] %v6831_v25  ;;  %v6738_v2 = vpop.f32.mrf.mxu1  ;;  %v6719_v41 = vpop.f32.mrf.mxu0 }
 0x9a8   : > { %8829 = vst [vmem:[%s12611_s14 + $0x118] sm:$0xff] %v6738_v2 }
 0x9a9   : > { %v6812_v48 = vpop.f32.mrf.mxu2  ;;  %8836 = vst [vmem:[%s12611_s14 + $0x150] sm:$0xff] %v6719_v41 }
 0x9aa   : > { %8858 = vst [vmem:[%s12611_s14 + $0x1c0] sm:$0xff] %v6812_v48 }
 0x9ae   : > { %v6833_v5 = vpop.f32.mrf.mxu3 }
 0x9af   : > { %8853 = vst [vmem:[%s12611_s14 + $0x198] sm:$0xff] %v6833_v5  ;;  %v6741_v8 = vpop.f32.mrf.mxu1  ;;  %v6722_v9 = vpop.f32.mrf.mxu0 }
 0x9b0   : > { %8831 = vst [vmem:[%s12611_s14 + $0x128] sm:$0xff] %v6741_v8 }
 0x9b1   : > { %v6814_v45 = vpop.f32.mrf.mxu2  ;;  %8838 = vst [vmem:[%s12611_s14 + $0x160] sm:$0xff] %v6722_v9 }
 0x9b2   : > { %8919 = vmatmul.msk.bf16.gmra.mxu1 %vm594_vm0, %v12404_v57  ;;  %8860 = vst [vmem:[%s12611_s14 + $0x1d0] sm:$0xff] %v6814_v45  ;;  %8917 = vmatmul.msk.bf16.gmra.mxu0 %vm594_vm0, %v12468_v32 }
 0x9b3   : > { %8943 = vmatmul.msk.bf16.gmra.mxu3 %vm594_vm0, %v12404_v57 }
 0x9b6   : > { %v6836_v53 = vpop.f32.mrf.mxu3  ;;  %8941 = vmatmul.msk.bf16.gmra.mxu2 %vm594_vm0, %v12468_v32 }
 0x9b7   : > { %8855 = vst [vmem:[%s12611_s14 + $0x1a8] sm:$0xff] %v6836_v53  ;;  %v6743_v4 = vpop.f32.mrf.mxu1  ;;  %v6724_v30 = vpop.f32.mrf.mxu0 }
 0x9b8   : > { %8833 = vst [vmem:[%s12611_s14 + $0x138] sm:$0xff] %v6743_v4 }
 0x9b9   : > { %v6817_v34 = vpop.f32.mrf.mxu2  ;;  %8840 = vst [vmem:[%s12611_s14 + $0x170] sm:$0xff] %v6724_v30 }
 0x9ba   : > { %8862 = vst [vmem:[%s12611_s14 + $0x1e0] sm:$0xff] %v6817_v34 }
 0x9be   : > { %v6838_v13 = vpop.f32.mrf.mxu3 }
 0x9bf   : > { %8857 = vst [vmem:[%s12611_s14 + $0x1b8] sm:$0xff] %v6838_v13  ;;  %v6746_v57 = vpop.f32.mrf.mxu1  ;;  %v6897_v6 = vpop.f32.mrf.mxu0 }
 0x9c0   : > { %8835 = vst [vmem:[%s12611_s14 + $0x148] sm:$0xff] %v6746_v57 }
 0x9c1   : > { %v6819_v14 = vpop.f32.mrf.mxu2  ;;  %8874 = vst [vmem:[%s12611_s14 + $0x200] sm:$0xff] %v6897_v6 }
 0x9c2   : > { %8920 = vmatmul.msk.bf16.gmra.mxu1 %vm594_vm0, %v12440_v40  ;;  %8864 = vst [vmem:[%s12611_s14 + $0x1f0] sm:$0xff] %v6819_v14 }
 0x9c3   : > { %8944 = vmatmul.msk.bf16.gmra.mxu3 %vm594_vm0, %v12440_v40 }
 0x9c6   : > { %v6841_v11 = vpop.f32.mrf.mxu3 }
 0x9c7   : > { %8859 = vst [vmem:[%s12611_s14 + $0x1c8] sm:$0xff] %v6841_v11  ;;  %v6748_v54 = vpop.f32.mrf.mxu1  ;;  %v6899_v50 = vpop.f32.mrf.mxu0 }
 0x9c8   : > { %8837 = vst [vmem:[%s12611_s14 + $0x158] sm:$0xff] %v6748_v54 }
 0x9c9   : > { %v6992_v55 = vpop.f32.mrf.mxu2  ;;  %8876 = vst [vmem:[%s12611_s14 + $0x210] sm:$0xff] %v6899_v50 }
 0x9ca   : > { %8898 = vst [vmem:[%s12611_s14 + $0x280] sm:$0xff] %v6992_v55 }
 0x9ce   : > { %v6843_v36 = vpop.f32.mrf.mxu3 }
 0x9cf   : > { %8861 = vst [vmem:[%s12611_s14 + $0x1d8] sm:$0xff] %v6843_v36  ;;  %v6751_v51 = vpop.f32.mrf.mxu1  ;;  %v6902_v43 = vpop.f32.mrf.mxu0 }
 0x9d0   : > { %8839 = vst [vmem:[%s12611_s14 + $0x168] sm:$0xff] %v6751_v51 }
 0x9d1   : > { %v6994_v40 = vpop.f32.mrf.mxu2  ;;  %8878 = vst [vmem:[%s12611_s14 + $0x220] sm:$0xff] %v6902_v43 }
 0x9d2   : > { %8921 = vmatmul.msk.bf16.gmra.mxu1 %vm594_vm0, %v12468_v32  ;;  %8900 = vst [vmem:[%s12611_s14 + $0x290] sm:$0xff] %v6994_v40 }
 0x9d3   : > { %8945 = vmatmul.msk.bf16.gmra.mxu3 %vm594_vm0, %v12468_v32 }
 0x9d6   : > { %v6846_v26 = vpop.f32.mrf.mxu3 }
 0x9d7   : > { %8863 = vst [vmem:[%s12611_s14 + $0x1e8] sm:$0xff] %v6846_v26  ;;  %v6753_v47 = vpop.f32.mrf.mxu1  ;;  %v6904_v33 = vpop.f32.mrf.mxu0 }
 0x9d8   : > { %8841 = vst [vmem:[%s12611_s14 + $0x178] sm:$0xff] %v6753_v47 }
 0x9d9   : > { %v6997_v15 = vpop.f32.mrf.mxu2  ;;  %8880 = vst [vmem:[%s12611_s14 + $0x230] sm:$0xff] %v6904_v33 }
 0x9da   : > { %8902 = vst [vmem:[%s12611_s14 + $0x2a0] sm:$0xff] %v6997_v15 }
 0x9de   : > { %v6848_v10 = vpop.f32.mrf.mxu3 }
 0x9df   : > { %8865 = vst [vmem:[%s12611_s14 + $0x1f8] sm:$0xff] %v6848_v10  ;;  %v6926_v18 = vpop.f32.mrf.mxu1  ;;  %v6907_v44 = vpop.f32.mrf.mxu0 }
 0x9e0   : > { %8875 = vst [vmem:[%s12611_s14 + $0x208] sm:$0xff] %v6926_v18 }
 0x9e1   : > { %v6999_v32 = vpop.f32.mrf.mxu2  ;;  %8882 = vst [vmem:[%s12611_s14 + $0x240] sm:$0xff] %v6907_v44 }
 0x9e2   : > { %8904 = vst [vmem:[%s12611_s14 + $0x2b0] sm:$0xff] %v6999_v32 }
 0x9e6   : > { %v7021_v16 = vpop.f32.mrf.mxu3 }
 0x9e7   : > { %8899 = vst [vmem:[%s12611_s14 + $0x288] sm:$0xff] %v7021_v16  ;;  %v6928_v56 = vpop.f32.mrf.mxu1  ;;  %v6909_v42 = vpop.f32.mrf.mxu0 }
 0x9e8   : > { %8877 = vst [vmem:[%s12611_s14 + $0x218] sm:$0xff] %v6928_v56 }
 0x9e9   : > { %v7002_v0 = vpop.f32.mrf.mxu2  ;;  %8884 = vst [vmem:[%s12611_s14 + $0x250] sm:$0xff] %v6909_v42 }
 0x9ea   : > { %8906 = vst [vmem:[%s12611_s14 + $0x2c0] sm:$0xff] %v7002_v0 }
 0x9ee   : > { %v7023_v23 = vpop.f32.mrf.mxu3 }
 0x9ef   : > { %8901 = vst [vmem:[%s12611_s14 + $0x298] sm:$0xff] %v7023_v23  ;;  %v6931_v63 = vpop.f32.mrf.mxu1  ;;  %v6912_v21 = vpop.f32.mrf.mxu0 }
 0x9f0   : > { %8879 = vst [vmem:[%s12611_s14 + $0x228] sm:$0xff] %v6931_v63 }
 0x9f1   : > { %v7004_v60 = vpop.f32.mrf.mxu2  ;;  %8886 = vst [vmem:[%s12611_s14 + $0x260] sm:$0xff] %v6912_v21 }
 0x9f2   : > { %8908 = vst [vmem:[%s12611_s14 + $0x2d0] sm:$0xff] %v7004_v60 }
 0x9f6   : > { %v7026_v20 = vpop.f32.mrf.mxu3 }
 0x9f7   : > { %8903 = vst [vmem:[%s12611_s14 + $0x2a8] sm:$0xff] %v7026_v20  ;;  %v6933_v7 = vpop.f32.mrf.mxu1  ;;  %v6914_v12 = vpop.f32.mrf.mxu0 }
 0x9f8   : > { %8881 = vst [vmem:[%s12611_s14 + $0x238] sm:$0xff] %v6933_v7 }
 0x9f9   : > { %v7007_v59 = vpop.f32.mrf.mxu2  ;;  %8888 = vst [vmem:[%s12611_s14 + $0x270] sm:$0xff] %v6914_v12 }
 0x9fa   : > { %8910 = vst [vmem:[%s12611_s14 + $0x2e0] sm:$0xff] %v7007_v59 }
 0x9fe   : > { %v7028_v27 = vpop.f32.mrf.mxu3 }
 0x9ff   : > { %8905 = vst [vmem:[%s12611_s14 + $0x2b8] sm:$0xff] %v7028_v27  ;;  %v6936_v58 = vpop.f32.mrf.mxu1  ;;  %v7087_v39 = vpop.f32.mrf.mxu0 }
 0xa00   : > { %8883 = vst [vmem:[%s12611_s14 + $0x248] sm:$0xff] %v6936_v58 }
 0xa01   : > { %v7009_v24 = vpop.f32.mrf.mxu2  ;;  %8922 = vst [vmem:[%s12611_s14 + $0x300] sm:$0xff] %v7087_v39 }
 0xa02   : > { %8912 = vst [vmem:[%s12611_s14 + $0x2f0] sm:$0xff] %v7009_v24 }
 0xa06   : > { %v7031_v22 = vpop.f32.mrf.mxu3 }
 0xa07   : > { %8907 = vst [vmem:[%s12611_s14 + $0x2c8] sm:$0xff] %v7031_v22  ;;  %v6938_v62 = vpop.f32.mrf.mxu1  ;;  %v7089_v61 = vpop.f32.mrf.mxu0 }
 0xa08   : > { %8885 = vst [vmem:[%s12611_s14 + $0x258] sm:$0xff] %v6938_v62 }
 0xa09   : > { %v7182_v31 = vpop.f32.mrf.mxu2  ;;  %8924 = vst [vmem:[%s12611_s14 + $0x310] sm:$0xff] %v7089_v61 }
 0xa0a   : > { %8946 = vst [vmem:[%s12611_s14 + $0x380] sm:$0xff] %v7182_v31 }
 0xa0e   : > { %v7033_v1 = vpop.f32.mrf.mxu3 }
 0xa0f   : > { %8909 = vst [vmem:[%s12611_s14 + $0x2d8] sm:$0xff] %v7033_v1  ;;  %v6941_v46 = vpop.f32.mrf.mxu1  ;;  %v7092_v52 = vpop.f32.mrf.mxu0 }
 0xa10   : > { %8887 = vst [vmem:[%s12611_s14 + $0x268] sm:$0xff] %v6941_v46 }
 0xa11   : > { %v7184_v28 = vpop.f32.mrf.mxu2  ;;  %8926 = vst [vmem:[%s12611_s14 + $0x320] sm:$0xff] %v7092_v52 }
 0xa12   : > { %8948 = vst [vmem:[%s12611_s14 + $0x390] sm:$0xff] %v7184_v28 }
 0xa16   : > { %v7036_v17 = vpop.f32.mrf.mxu3 }
 0xa17   : > { %8911 = vst [vmem:[%s12611_s14 + $0x2e8] sm:$0xff] %v7036_v17  ;;  %v6943_v37 = vpop.f32.mrf.mxu1  ;;  %v7094_v38 = vpop.f32.mrf.mxu0 }
 0xa18   : > { %8889 = vst [vmem:[%s12611_s14 + $0x278] sm:$0xff] %v6943_v37 }
 0xa19   : > { %v7187_v49 = vpop.f32.mrf.mxu2  ;;  %8928 = vst [vmem:[%s12611_s14 + $0x330] sm:$0xff] %v7094_v38 }
 0xa1a   : > { %8950 = vst [vmem:[%s12611_s14 + $0x3a0] sm:$0xff] %v7187_v49 }
 0xa1e   : > { %v7038_v35 = vpop.f32.mrf.mxu3 }
 0xa1f   : > { %8913 = vst [vmem:[%s12611_s14 + $0x2f8] sm:$0xff] %v7038_v35  ;;  %v7116_v29 = vpop.f32.mrf.mxu1  ;;  %v7097_v3 = vpop.f32.mrf.mxu0 }
 0xa20   : > { %8923 = vst [vmem:[%s12611_s14 + $0x308] sm:$0xff] %v7116_v29 }
 0xa21   : > { %v7189_v19 = vpop.f32.mrf.mxu2  ;;  %8930 = vst [vmem:[%s12611_s14 + $0x340] sm:$0xff] %v7097_v3 }
 0xa22   : > { %8952 = vst [vmem:[%s12611_s14 + $0x3b0] sm:$0xff] %v7189_v19 }
 0xa26   : > { %v7211_v25 = vpop.f32.mrf.mxu3 }
 0xa27   : > { %8947 = vst [vmem:[%s12611_s14 + $0x388] sm:$0xff] %v7211_v25  ;;  %v7118_v2 = vpop.f32.mrf.mxu1  ;;  %v7099_v41 = vpop.f32.mrf.mxu0 }
 0xa28   : > { %8925 = vst [vmem:[%s12611_s14 + $0x318] sm:$0xff] %v7118_v2 }
 0xa29   : > { %v7192_v48 = vpop.f32.mrf.mxu2  ;;  %8932 = vst [vmem:[%s12611_s14 + $0x350] sm:$0xff] %v7099_v41 }
 0xa2a   : > { %8954 = vst [vmem:[%s12611_s14 + $0x3c0] sm:$0xff] %v7192_v48 }
 0xa2e   : > { %v7213_v5 = vpop.f32.mrf.mxu3 }
 0xa2f   : > { %8949 = vst [vmem:[%s12611_s14 + $0x398] sm:$0xff] %v7213_v5  ;;  %v7121_v8 = vpop.f32.mrf.mxu1  ;;  %v7102_v9 = vpop.f32.mrf.mxu0 }
 0xa30   : > { %8927 = vst [vmem:[%s12611_s14 + $0x328] sm:$0xff] %v7121_v8 }
 0xa31   : > { %v7194_v45 = vpop.f32.mrf.mxu2  ;;  %8934 = vst [vmem:[%s12611_s14 + $0x360] sm:$0xff] %v7102_v9 }
 0xa32   : > { %8956 = vst [vmem:[%s12611_s14 + $0x3d0] sm:$0xff] %v7194_v45 }
 0xa36   : > { %v7216_v53 = vpop.f32.mrf.mxu3 }
 0xa37   : > { %8951 = vst [vmem:[%s12611_s14 + $0x3a8] sm:$0xff] %v7216_v53  ;;  %v7123_v4 = vpop.f32.mrf.mxu1  ;;  %v7104_v30 = vpop.f32.mrf.mxu0 }
 0xa38   : > { %8929 = vst [vmem:[%s12611_s14 + $0x338] sm:$0xff] %v7123_v4 }
 0xa39   : > { %v7197_v34 = vpop.f32.mrf.mxu2  ;;  %8936 = vst [vmem:[%s12611_s14 + $0x370] sm:$0xff] %v7104_v30 }
 0xa3a   : > { %8958 = vst [vmem:[%s12611_s14 + $0x3e0] sm:$0xff] %v7197_v34 }
 0xa3e   : > { %v7218_v13 = vpop.f32.mrf.mxu3 }
 0xa3f   : > { %8953 = vst [vmem:[%s12611_s14 + $0x3b8] sm:$0xff] %v7218_v13  ;;  %v7126_v57 = vpop.f32.mrf.mxu1 }
 0xa40   : > { %8931 = vst [vmem:[%s12611_s14 + $0x348] sm:$0xff] %v7126_v57 }
 0xa41   : > { %v7199_v6 = vpop.f32.mrf.mxu2 }
 0xa42   : > { %8960 = vst [vmem:[%s12611_s14 + $0x3f0] sm:$0xff] %v7199_v6 }
 0xa46   : > { %v7221_v14 = vpop.f32.mrf.mxu3 }
 0xa47   : > { %8955 = vst [vmem:[%s12611_s14 + $0x3c8] sm:$0xff] %v7221_v14  ;;  %v7128_v11 = vpop.f32.mrf.mxu1 }
 0xa48   : > { %8933 = vst [vmem:[%s12611_s14 + $0x358] sm:$0xff] %v7128_v11 }
 0xa4e   : > { %v7223_v54 = vpop.f32.mrf.mxu3 }
 0xa4f   : > { %8957 = vst [vmem:[%s12611_s14 + $0x3d8] sm:$0xff] %v7223_v54  ;;  %v7131_v50 = vpop.f32.mrf.mxu1 }
 0xa50   : > { %8935 = vst [vmem:[%s12611_s14 + $0x368] sm:$0xff] %v7131_v50 }
 0xa56   : > { %v7226_v55 = vpop.f32.mrf.mxu3 }
 0xa57   : > { %8959 = vst [vmem:[%s12611_s14 + $0x3e8] sm:$0xff] %v7226_v55  ;;  %v7133_v36 = vpop.f32.mrf.mxu1 }
 0xa58   : > { %8937 = vst [vmem:[%s12611_s14 + $0x378] sm:$0xff] %v7133_v36 }
 0xa5e   : > { %v7228_v51 = vpop.f32.mrf.mxu3 }
 0xa5f   : > { %8961 = vst [vmem:[%s12611_s14 + $0x3f8] sm:$0xff] %v7228_v51 }
 0xa60   : > { %9550 = shalt.err (!%p9547_p10)
}
 0xa61   : > { %s9610_s26 = smov 256   ;;  %s9611_s14 = smov 16  }
 0xa62   : > { %9292 = dma.vmem_to_hbm [thread:$0]  (%p9764_p3), %s7263_s17, 16384, %s7265_s30, %s7249_s3, %s9610_s26, %s9610_s26, %s9611_s14  }
 0xa63 PF: > { %s13637_s29 = sld [smem:[#allocation16_spill]]  ;;  %p13639_p12 = scmp.ge.s32.totalorder %s9597_s24, 2 }
 0xa65   : > { %p9312_p13 = pnand %p13639_p12, %p9712_p6 }
 0xa67   : > { %p9313_p0 = pneg %p9312_p13 }
 0xa69   : > { %s7279_s19 = sand.u32 1, %s13637_s29  }
 0xa6a   : > { %s7280_s18 = scalar_lea.sflag [#allocation4], %s7279_s19 }
 0xa6b   : > { %9580 = dma.done.wait (%p9313_p0), %s7280_s18, 16384  }
 0xa6c   : > { %9582 = vsyncadd (%p9313_p0), %s7280_s18, 4294950912  ;;  %s13640_s28 = smov %s9754_s21  ;;  %p27_p5 = scmp.ge.s32.totalorder %s9754_s21, 4  }
 0xa6d   : > { %s13641_s21 = smov %s9589_s22  ;;  %s13642_s22 = smov %s9593_s23 }
 0xa6e   : > { %s13643_s23 = smov %s9770_s7  ;;  %s13644_s24 = smov %s13640_s28 }
 0xa6f   :  { %29 = sbr.rel (!%p27_p5) target bundleno = 12 (0xc), region = 143 }
 0xa74   :  { %7286 = vsyncpa [#allocation3], 1 }
 0xa75   :  { %7288 = vsyncpa [#allocation3 + $0x1], 1 }
 0xa76   :  { %7289 = vsyncpa [#allocation6], 1 }
 0xa77   :  { %7290 = vsyncpa [#allocation9], 1 }
 0xa78   :  { %7291 = vsyncpa [#allocation4], 1 }
 0xa79   :  { %7293 = vsyncpa [#allocation4 + $0x1], 1 }

</bundles_post_ra>
